<compile_context>
chip_gen: v6e
topology: v6e:2x2x1
jax: 0.10.0
libtpu: 0.0.40
codegen_flags: <defaults>
</compile_context>

<pallas_src>
import functools

import jax
import jax.numpy as jnp
import numpy as np
from jax.experimental import pallas as pl
from jax.experimental.pallas import tpu as pltpu

# ----------------------------- configuration -------------------------------
FREQ_BINS   = 16   # configs.InputsConfig.FREQ_BINS (input='cqt')
N_FRAMES    = 16   # configs.InputsConfig.N_FRAMES
GRU_UNITS   = 32   # configs.ParamsConfig.GRU_UNITS
LATENT_DIMS = 8    # configs.ParamsConfig.LATENT_DIMS

_H, _F, _T, _L = GRU_UNITS, FREQ_BINS, N_FRAMES, LATENT_DIMS
_H2, _H6 = 2 * _H, 6 * _H

# ---- weight slab WG (GRU weights, 6H = 192 columns, gate-interleaved) ----
ROW_WIH_E  = 0                     # (2F, 6H) encoder fused fwd|bwd input projection
ROW_WHH_E  = ROW_WIH_E + 2 * _F    # (2H, 6H) encoder block-diagonal recurrent weights
ROW_WHH_D  = ROW_WHH_E + _H2       # (2H, 6H) decoder block-diagonal recurrent weights
ROW_B_IH_E = ROW_WHH_D + _H2       # interleaved biases / selection rows below
ROW_B_HH_E = ROW_B_IH_E + 1
ROW_B_IH_D = ROW_B_HH_E + 1
ROW_B_HH_D = ROW_B_IH_D + 1
ROW_WF_SEL = ROW_B_HH_D + 1        # decoder fwd input weights spread to fwd gate cols
ROW_WR_SEL = ROW_WF_SEL + 1        # decoder bwd input weights spread to bwd gate cols
WG_ROWS = ((ROW_WR_SEL + 1 + 7) // 8) * 8
WG_COLS = _H6

# ---- weight slab WS (small dense weights, 128 columns) ----
ROW_HEAD  = 0                      # (2L, T) packed fc_mu|fc_logvar; col T holds bias col
ROW_DMU   = ROW_HEAD + 2 * _L      # (2T, L) decoder fc_mu stacked fwd|time-reversed; col L bias
ROW_WFC_D = ROW_DMU + 2 * _T       # (2H, F -> padded 128) decoder output fc
ROW_MISC  = ROW_WFC_D + _H2        # +0 enc fc weight row (2H); +1 enc fc bias@col0; +2 dec fc bias row
WS_ROWS = ((ROW_MISC + 3 + 7) // 8) * 8
WS_COLS = 128


# ------------------------------ fused kernel --------------------------------
def _timbre_vae_kernel(xb_ref, wg_ref, ws_ref, recon_ref, muvar_ref,
                       gx_scr, h_scr, *, n_seq):
    f32, bf16 = jnp.float32, jnp.bfloat16
    N = n_seq
    H, T, F, L, H2, H6 = _H, _T, _F, _L, _H2, _H6

    def sig(v):  # logistic via EUP tanh (no divide on the gate path)
        return 0.5 * jnp.tanh(0.5 * v) + 0.5

    def bigru(whh_bf, bhh, out_scr):
        """Fused fwd|bwd GRU: one block-diag (N,2H)@(2H,6H) bf16 MXU op per step.

        Gate-interleaved columns: [r_f r_b | z_f z_b | n_f n_b]; h = [h_f | h_b].
        Per-step input gates are read from gx_scr (precomputed, time-major rows).
        """
        h = jnp.zeros((N, H2), f32)
        for s in range(T):                                   # unrolled, static slices
            gx = gx_scr[s * N:(s + 1) * N, :]                              # (N, 6H)
            gh = jnp.dot(h.astype(bf16), whh_bf,
                         preferred_element_type=f32) + bhh                 # (N, 6H)
            r = sig(gx[:, 0:H2] + gh[:, 0:H2])
            z = sig(gx[:, H2:2 * H2] + gh[:, H2:2 * H2])
            n = jnp.tanh(gx[:, 2 * H2:] + r * gh[:, 2 * H2:])
            h = (1.0 - z) * n + z * h
            out_scr[s * N:(s + 1) * N, 0:H] = h[:, 0:H]                    # fwd @ time s
            out_scr[(T - 1 - s) * N:(T - s) * N, H:H2] = h[:, H:H2]        # bwd @ time T-1-s

    # ---------------- encoder: fused fwd|bwd input-gate projection -------------
    xb = xb_ref[...].astype(bf16)                                          # (T*N, 2F)
    w_ih_e = wg_ref[ROW_WIH_E:ROW_WIH_E + 2 * F, :].astype(bf16)           # (2F, 6H)
    gx_scr[...] = (jnp.dot(xb, w_ih_e, preferred_element_type=f32)
                   + wg_ref[ROW_B_IH_E:ROW_B_IH_E + 1, :])

    # ---------------- encoder bi-GRU recurrence --------------------------------
    whh_e = wg_ref[ROW_WHH_E:ROW_WHH_E + H2, :].astype(bf16)
    bhh_e = wg_ref[ROW_B_HH_E:ROW_B_HH_E + 1, :]
    bigru(whh_e, bhh_e, h_scr)

    # -------- encoder tail: relu -> fc(2H->1) -> relu -> packed mu|logvar ------
    eh = jnp.maximum(h_scr[...], 0.0).reshape(T, N, H2)                    # (T, N, 2H)
    wfc = ws_ref[ROW_MISC:ROW_MISC + 1, 0:H2].reshape(1, 1, H2)
    bfc = ws_ref[ROW_MISC + 1:ROW_MISC + 2, 0:1]                           # (1, 1)
    x_tm = jnp.maximum(jnp.sum(eh * wfc, axis=-1) + bfc, 0.0)              # (T, N)

    w_head = ws_ref[ROW_HEAD:ROW_HEAD + 2 * L, 0:T]                        # (2L, T)
    b_head = ws_ref[ROW_HEAD:ROW_HEAD + 2 * L, T:T + 1]                    # (2L, 1)
    muvar_t = jnp.maximum(
        jnp.dot(w_head, x_tm, preferred_element_type=f32) + b_head, 0.0)   # (2L, N)
    muvar_ref[...] = muvar_t

    # ------------- decoder (eval: latent = mu), fc_mu to time-major ------------
    w_dmu = ws_ref[ROW_DMU:ROW_DMU + 2 * T, 0:L]                           # (2T, L)
    b_dmu = ws_ref[ROW_DMU:ROW_DMU + 2 * T, L:L + 1]                       # (2T, 1)
    d_t = jnp.maximum(
        jnp.dot(w_dmu, muvar_t[0:L, :], preferred_element_type=f32)
        + b_dmu, 0.0)                                                      # (2T, N): d | d reversed

    # hoisted decoder input gates (built once, staged in the reused gx scratch)
    wf_sel = wg_ref[ROW_WF_SEL:ROW_WF_SEL + 1, :].reshape(1, 1, H6)
    wr_sel = wg_ref[ROW_WR_SEL:ROW_WR_SEL + 1, :].reshape(1, 1, H6)
    b_ih_d = wg_ref[ROW_B_IH_D:ROW_B_IH_D + 1, :].reshape(1, 1, H6)
    gxd = d_t[0:T, :, None] * wf_sel + d_t[T:, :, None] * wr_sel + b_ih_d  # (T, N, 6H)
    gx_scr[...] = gxd.reshape(T * N, H6)

    # ---------------- decoder bi-GRU recurrence --------------------------------
    whh_d = wg_ref[ROW_WHH_D:ROW_WHH_D + H2, :].astype(bf16)
    bhh_d = wg_ref[ROW_B_HH_D:ROW_B_HH_D + 1, :]
    bigru(whh_d, bhh_d, h_scr)

    # ------- decoder tail: relu -> fc(2H->F padded to 128 lanes) -> sigmoid ----
    hd = jnp.maximum(h_scr[...], 0.0).astype(bf16)                         # (T*N, 2H)
    w_fc_d = ws_ref[ROW_WFC_D:ROW_WFC_D + H2, :].astype(bf16)              # (2H, 128)
    b_fc_d = ws_ref[ROW_MISC + 2:ROW_MISC + 3, :]                          # (1, 128)
    pre = jnp.dot(hd, w_fc_d, preferred_element_type=f32) + b_fc_d         # (T*N, 128)
    recon_ref[...] = sig(pre)                                              # lane-dense store


# ------------------------------ JAX wrapper ---------------------------------
def timbre_vae_forward(x, wg, ws):
    """x: (B, C, FREQ_BINS, N_FRAMES) f32 -> (x_recon, mu, logvar)."""
    B, C, F, T = x.shape
    N = B * C
    # time-major rows; per row s*N+n: [x(t=s) | x(t=T-1-s)] feeding fwd|bwd directions
    x_tm = jnp.transpose(x, (3, 0, 1, 2)).reshape(T, N, F)
    x_big = jnp.concatenate([x_tm, x_tm[::-1]], axis=-1).reshape(T * N, 2 * F)

    kernel = functools.partial(_timbre_vae_kernel, n_seq=N)
    recon_pad, muvar_t = pl.pallas_call(
        kernel,
        out_shape=(jax.ShapeDtypeStruct((T * N, 128), jnp.float32),
                   jax.ShapeDtypeStruct((2 * _L, N), jnp.float32)),
        scratch_shapes=[pltpu.VMEM((T * N, _H6), jnp.float32),   # input gates (enc then dec)
                        pltpu.VMEM((T * N, _H2), jnp.float32)],  # hidden history (enc then dec)
    )(x_big, wg, ws)

    mu = muvar_t[:_L, :].T
    logvar = muvar_t[_L:, :].T
    # wrapper-side layout plumbing; matches PyTorch's contiguous view(-1, 1, F, T)
    recon = (recon_pad[:, :F].reshape(T, N, F).transpose(1, 0, 2)
             .reshape(N, 1, F, T))
    return recon, mu, logvar


# --------------------------- parameter handling ------------------------------
def init_params(key):
    """PyTorch-layout parameters for TimbreVAE (single bidirectional GRU layer)."""
    H, F, T, L = GRU_UNITS, FREQ_BINS, N_FRAMES, LATENT_DIMS
    ks = iter(jax.random.split(key, 40))

    def u(shape, scale):
        return jax.random.uniform(next(ks), shape, jnp.float32, -scale, scale)

    s = 1.0 / np.sqrt(H)
    p = {}
    for d in ("f", "r"):                       # encoder GRU (input_size = F)
        p[f"enc_w_ih_{d}"] = u((3 * H, F), s)
        p[f"enc_w_hh_{d}"] = u((3 * H, H), s)
        p[f"enc_b_ih_{d}"] = u((3 * H,), s)
        p[f"enc_b_hh_{d}"] = u((3 * H,), s)
    p["enc_fc_w"] = u((1, 2 * H), 1.0 / np.sqrt(2 * H))
    p["enc_fc_b"] = u((1,), 1.0 / np.sqrt(2 * H))
    p["fc_mu_w"] = u((L, T), 1.0 / np.sqrt(T))
    p["fc_mu_b"] = u((L,), 1.0 / np.sqrt(T))
    p["fc_lv_w"] = u((L, T), 1.0 / np.sqrt(T))
    p["fc_lv_b"] = u((L,), 1.0 / np.sqrt(T))
    p["dec_fcmu_w"] = u((T, L), 1.0 / np.sqrt(L))
    p["dec_fcmu_b"] = u((T,), 1.0 / np.sqrt(L))
    for d in ("f", "r"):                       # decoder GRU (input_size = 1)
        p[f"dec_w_ih_{d}"] = u((3 * H, 1), s)
        p[f"dec_w_hh_{d}"] = u((3 * H, H), s)
        p[f"dec_b_ih_{d}"] = u((3 * H,), s)
        p[f"dec_b_hh_{d}"] = u((3 * H,), s)
    p["dec_fc_w"] = u((F, 2 * H), 1.0 / np.sqrt(2 * H))
    p["dec_fc_b"] = u((F,), 1.0 / np.sqrt(2 * H))
    return p


def prepare_kernel_params(p):
    """PyTorch layout -> two packed f32 slabs (gate-interleaved / block-diag layout)."""
    H, F, T, L = _H, _F, _T, _L
    pt = lambda a: np.asarray(a, np.float32)

    def spread(w, fwd):
        """(rows, 3H) [r|z|n] -> (rows, 6H) placed at interleaved fwd/bwd gate columns."""
        w = pt(w)
        out = np.zeros((w.shape[0], 6 * H), np.float32)
        for g in range(3):
            col = (2 * g + (0 if fwd else 1)) * H
            out[:, col:col + H] = w[:, g * H:(g + 1) * H]
        return out

    def inter(vf, vb):
        return (spread(pt(vf).reshape(1, 3 * H), True)
                + spread(pt(vb).reshape(1, 3 * H), False))[0]

    wg = np.zeros((WG_ROWS, WG_COLS), np.float32)
    wg[ROW_WIH_E:ROW_WIH_E + F]         = spread(pt(p["enc_w_ih_f"]).T, True)
    wg[ROW_WIH_E + F:ROW_WIH_E + 2 * F] = spread(pt(p["enc_w_ih_r"]).T, False)
    wg[ROW_WHH_E:ROW_WHH_E + H]         = spread(pt(p["enc_w_hh_f"]).T, True)
    wg[ROW_WHH_E + H:ROW_WHH_E + 2 * H] = spread(pt(p["enc_w_hh_r"]).T, False)
    wg[ROW_WHH_D:ROW_WHH_D + H]         = spread(pt(p["dec_w_hh_f"]).T, True)
    wg[ROW_WHH_D + H:ROW_WHH_D + 2 * H] = spread(pt(p["dec_w_hh_r"]).T, False)
    wg[ROW_B_IH_E] = inter(p["enc_b_ih_f"], p["enc_b_ih_r"])
    wg[ROW_B_HH_E] = inter(p["enc_b_hh_f"], p["enc_b_hh_r"])
    wg[ROW_B_IH_D] = inter(p["dec_b_ih_f"], p["dec_b_ih_r"])
    wg[ROW_B_HH_D] = inter(p["dec_b_hh_f"], p["dec_b_hh_r"])
    wg[ROW_WF_SEL] = spread(pt(p["dec_w_ih_f"]).reshape(1, 3 * H), True)[0]
    wg[ROW_WR_SEL] = spread(pt(p["dec_w_ih_r"]).reshape(1, 3 * H), False)[0]

    ws = np.zeros((WS_ROWS, WS_COLS), np.float32)
    ws[ROW_HEAD:ROW_HEAD + 2 * L, 0:T] = np.concatenate([pt(p["fc_mu_w"]), pt(p["fc_lv_w"])], 0)
    ws[ROW_HEAD:ROW_HEAD + 2 * L, T]   = np.concatenate([pt(p["fc_mu_b"]), pt(p["fc_lv_b"])], 0)
    wdm, bdm = pt(p["dec_fcmu_w"]), pt(p["dec_fcmu_b"])
    ws[ROW_DMU:ROW_DMU + 2 * T, 0:L] = np.concatenate([wdm, wdm[::-1]], 0)
    ws[ROW_DMU:ROW_DMU + 2 * T, L]   = np.concatenate([bdm, bdm[::-1]], 0)
    ws[ROW_WFC_D:ROW_WFC_D + 2 * H, 0:F] = pt(p["dec_fc_w"]).T
    ws[ROW_MISC, 0:2 * H] = pt(p["enc_fc_w"])[0]
    ws[ROW_MISC + 1, 0]   = pt(p["enc_fc_b"])[0]
    ws[ROW_MISC + 2, 0:F] = pt(p["dec_fc_b"])
    return jnp.asarray(wg), jnp.asarray(ws)


# --------------------------- pure-JAX reference ------------------------------
def reference_forward(x, p):
    B, C, F, T = x.shape
    N, H = B * C, GRU_UNITS
    relu = jax.nn.relu

    def bigru(xs, prefix):
        def run(direction, reverse):
            w_ih = p[f"{prefix}_w_ih_{direction}"]
            w_hh = p[f"{prefix}_w_hh_{direction}"]
            b_ih = p[f"{prefix}_b_ih_{direction}"]
            b_hh = p[f"{prefix}_b_hh_{direction}"]
            h = jnp.zeros((N, H), jnp.float32)
            outs = [None] * T
            order = range(T - 1, -1, -1) if reverse else range(T)
            for t in order:
                gx = xs[:, t, :] @ w_ih.T + b_ih
                gh = h @ w_hh.T + b_hh
                r = jax.nn.sigmoid(gx[:, :H] + gh[:, :H])
                z = jax.nn.sigmoid(gx[:, H:2 * H] + gh[:, H:2 * H])
                n = jnp.tanh(gx[:, 2 * H:] + r * gh[:, 2 * H:])
                h = (1.0 - z) * n + z * h
                outs[t] = h
            return jnp.stack(outs, axis=1)                      # (N, T, H)
        return jnp.concatenate([run("f", False), run("r", True)], axis=-1)

    xp = jnp.transpose(x, (0, 1, 3, 2)).reshape(N, T, F)
    g = relu(bigru(xp, "enc"))
    fcv = relu(jnp.einsum("nth,kh->ntk", g, p["enc_fc_w"]) + p["enc_fc_b"])
    x_flat = fcv.reshape(N, T)
    mu = relu(x_flat @ p["fc_mu_w"].T + p["fc_mu_b"])
    logvar = relu(x_flat @ p["fc_lv_w"].T + p["fc_lv_b"])
    d = relu(mu @ p["dec_fcmu_w"].T + p["dec_fcmu_b"]).reshape(N, T, 1)
    gd = relu(bigru(d, "dec"))
    out = jax.nn.sigmoid(jnp.einsum("nth,fh->ntf", gd, p["dec_fc_w"]) + p["dec_fc_b"])
    recon = out.reshape(N, 1, F, T)
    return recon, mu, logvar


# ---------------------------------- main -------------------------------------
if __name__ == "__main__":
    key = jax.random.PRNGKey(0)
    pkey, xkey = jax.random.split(key)
    params = init_params(pkey)

    B, C = 2, 4
    x = jax.random.normal(xkey, (B, C, FREQ_BINS, N_FRAMES), jnp.float32)

    wg, ws = prepare_kernel_params(params)
    fwd = jax.jit(timbre_vae_forward)
    recon, mu, logvar = fwd(x, wg, ws)
    jax.block_until_ready((recon, mu, logvar))

    recon_ref, mu_ref, lv_ref = jax.jit(reference_forward)(x, params)
    # bf16 MXU operands (f32 accumulate) across the 16-step recurrences -> 2e-2 tol.
    np.testing.assert_allclose(np.asarray(mu), np.asarray(mu_ref), rtol=2e-2, atol=2e-2)
    np.testing.assert_allclose(np.asarray(logvar), np.asarray(lv_ref), rtol=2e-2, atol=2e-2)
    np.testing.assert_allclose(np.asarray(recon), np.asarray(recon_ref), rtol=2e-2, atol=2e-2)

    assert recon.shape == (B * C, 1, FREQ_BINS, N_FRAMES)
    assert mu.shape == (B * C, LATENT_DIMS) and logvar.shape == (B * C, LATENT_DIMS)
    print("KERNEL_OK")
</pallas_src>

<mosaic_0001>
module attributes {stable_mosaic.version = 11 : i64} {
  func.func @_timbre_vae_kernel(%arg0: memref<128x32xf32, #tpu.memory_space<vmem>>, %arg1: memref<168x192xf32, #tpu.memory_space<vmem>>, %arg2: memref<120x128xf32, #tpu.memory_space<vmem>>, %arg3: memref<128x128xf32, #tpu.memory_space<vmem>>, %arg4: memref<16x8xf32, #tpu.memory_space<vmem>>, %arg5: memref<128x192xf32, #tpu.memory_space<vmem>>, %arg6: memref<128x64xf32, #tpu.memory_space<vmem>>) attributes {dimension_semantics = [], scalar_prefetch = 0 : i64, scratch_operands = 2 : i64, tpu.core_type = #tpu.core_type<tc>} {
    %c0 = arith.constant 0 : index
    %c0_0 = arith.constant 0 : index
    %0 = vector.load %arg0[%c0, %c0_0] : memref<128x32xf32, #tpu.memory_space<vmem>>, vector<128x32xf32>
    %1 = arith.truncf %0 : vector<128x32xf32> to vector<128x32xbf16>
    %c0_1 = arith.constant 0 : index
    %c0_2 = arith.constant 0 : index
    %2 = vector.load %arg1[%c0_1, %c0_2] : memref<168x192xf32, #tpu.memory_space<vmem>>, vector<32x192xf32>
    %3 = arith.truncf %2 : vector<32x192xf32> to vector<32x192xbf16>
    %cst = arith.constant dense<0.000000e+00> : vector<128x192xf32>
    %4 = tpu.matmul %1, %3, %cst {dimension_numbers = #tpu.dot_dimension_numbers<[1], [0], [0], [1], [0, 0, 1, 1], [], []>} : vector<128x32xbf16>, vector<32x192xbf16>, vector<128x192xf32> -> vector<128x192xf32>
    %c160 = arith.constant 160 : index
    %c0_3 = arith.constant 0 : index
    %5 = vector.load %arg1[%c160, %c0_3] : memref<168x192xf32, #tpu.memory_space<vmem>>, vector<1x192xf32>
    %6 = vector.broadcast %5 : vector<1x192xf32> to vector<128x192xf32>
    %7 = arith.addf %4, %6 : vector<128x192xf32>
    %c0_4 = arith.constant 0 : index
    %c0_5 = arith.constant 0 : index
    %8 = vector.load %arg5[%c0_4, %c0_5] : memref<128x192xf32, #tpu.memory_space<vmem>>, vector<128x192xf32>
    tpu.vector_store %arg5[%c0_4, %c0_5], %7 {strides = array<i32>} : memref<128x192xf32, #tpu.memory_space<vmem>>, vector<128x192xf32>,
    %c32 = arith.constant 32 : index
    %c0_6 = arith.constant 0 : index
    %9 = vector.load %arg1[%c32, %c0_6] : memref<168x192xf32, #tpu.memory_space<vmem>>, vector<64x192xf32>
    %10 = arith.truncf %9 : vector<64x192xf32> to vector<64x192xbf16>
    %c161 = arith.constant 161 : index
    %c0_7 = arith.constant 0 : index
    %11 = vector.load %arg1[%c161, %c0_7] : memref<168x192xf32, #tpu.memory_space<vmem>>, vector<1x192xf32>
    %cst_8 = arith.constant 0.000000e+00 : f32
    %12 = vector.broadcast %cst_8 : f32 to vector<8x64xf32>
    %c0_9 = arith.constant 0 : index
    %c0_10 = arith.constant 0 : index
    %13 = vector.load %arg5[%c0_9, %c0_10] : memref<128x192xf32, #tpu.memory_space<vmem>>, vector<8x192xf32>
    %14 = arith.truncf %12 : vector<8x64xf32> to vector<8x64xbf16>
    %cst_11 = arith.constant dense<0.000000e+00> : vector<8x192xf32>
    %15 = tpu.matmul %14, %10, %cst_11 {dimension_numbers = #tpu.dot_dimension_numbers<[1], [0], [0], [1], [0, 0, 1, 1], [], []>} : vector<8x64xbf16>, vector<64x192xbf16>, vector<8x192xf32> -> vector<8x192xf32>
    %16 = vector.broadcast %11 : vector<1x192xf32> to vector<8x192xf32>
    %17 = arith.addf %15, %16 : vector<8x192xf32>
    %18 = vector.extract_strided_slice %13 {offsets = [0, 0], sizes = [8, 64], strides = [1, 1]} : vector<8x192xf32> to vector<8x64xf32>
    %19 = vector.extract_strided_slice %17 {offsets = [0, 0], sizes = [8, 64], strides = [1, 1]} : vector<8x192xf32> to vector<8x64xf32>
    %20 = arith.addf %18, %19 : vector<8x64xf32>
    %cst_12 = arith.constant 5.000000e-01 : f32
    %21 = vector.broadcast %cst_12 : f32 to vector<8x64xf32>
    %22 = arith.mulf %21, %20 : vector<8x64xf32>
    %23 = math.tanh %22 : vector<8x64xf32>
    %cst_13 = arith.constant 5.000000e-01 : f32
    %24 = vector.broadcast %cst_13 : f32 to vector<8x64xf32>
    %25 = arith.mulf %24, %23 : vector<8x64xf32>
    %cst_14 = arith.constant 5.000000e-01 : f32
    %26 = vector.broadcast %cst_14 : f32 to vector<8x64xf32>
    %27 = arith.addf %25, %26 : vector<8x64xf32>
    %28 = vector.extract_strided_slice %13 {offsets = [0, 64], sizes = [8, 64], strides = [1, 1]} : vector<8x192xf32> to vector<8x64xf32>
    %29 = vector.extract_strided_slice %17 {offsets = [0, 64], sizes = [8, 64], strides = [1, 1]} : vector<8x192xf32> to vector<8x64xf32>
    %30 = arith.addf %28, %29 : vector<8x64xf32>
    %cst_15 = arith.constant 5.000000e-01 : f32
    %31 = vector.broadcast %cst_15 : f32 to vector<8x64xf32>
    %32 = arith.mulf %31, %30 : vector<8x64xf32>
    %33 = math.tanh %32 : vector<8x64xf32>
    %cst_16 = arith.constant 5.000000e-01 : f32
    %34 = vector.broadcast %cst_16 : f32 to vector<8x64xf32>
    %35 = arith.mulf %34, %33 : vector<8x64xf32>
    %cst_17 = arith.constant 5.000000e-01 : f32
    %36 = vector.broadcast %cst_17 : f32 to vector<8x64xf32>
    %37 = arith.addf %35, %36 : vector<8x64xf32>
    %38 = vector.extract_strided_slice %13 {offsets = [0, 128], sizes = [8, 64], strides = [1, 1]} : vector<8x192xf32> to vector<8x64xf32>
    %39 = vector.extract_strided_slice %17 {offsets = [0, 128], sizes = [8, 64], strides = [1, 1]} : vector<8x192xf32> to vector<8x64xf32>
    %40 = arith.mulf %27, %39 : vector<8x64xf32>
    %41 = arith.addf %38, %40 : vector<8x64xf32>
    %42 = math.tanh %41 : vector<8x64xf32>
    %cst_18 = arith.constant 1.000000e+00 : f32
    %43 = vector.broadcast %cst_18 : f32 to vector<8x64xf32>
    %44 = arith.subf %43, %37 : vector<8x64xf32>
    %45 = arith.mulf %44, %42 : vector<8x64xf32>
    %46 = arith.mulf %37, %12 : vector<8x64xf32>
    %47 = arith.addf %45, %46 : vector<8x64xf32>
    %48 = vector.extract_strided_slice %47 {offsets = [0, 0], sizes = [8, 32], strides = [1, 1]} : vector<8x64xf32> to vector<8x32xf32>
    %c0_19 = arith.constant 0 : index
    %c0_20 = arith.constant 0 : index
    %49 = vector.load %arg6[%c0_19, %c0_20] : memref<128x64xf32, #tpu.memory_space<vmem>>, vector<8x32xf32>
    tpu.vector_store %arg6[%c0_19, %c0_20], %48 {strides = array<i32>} : memref<128x64xf32, #tpu.memory_space<vmem>>, vector<8x32xf32>,
    %50 = vector.extract_strided_slice %47 {offsets = [0, 32], sizes = [8, 32], strides = [1, 1]} : vector<8x64xf32> to vector<8x32xf32>
    %c120 = arith.constant 120 : index
    %c32_21 = arith.constant 32 : index
    %51 = vector.load %arg6[%c120, %c32_21] : memref<128x64xf32, #tpu.memory_space<vmem>>, vector<8x32xf32>
    tpu.vector_store %arg6[%c120, %c32_21], %50 {strides = array<i32>} : memref<128x64xf32, #tpu.memory_space<vmem>>, vector<8x32xf32>,
    %c8 = arith.constant 8 : index
    %c0_22 = arith.constant 0 : index
    %52 = vector.load %arg5[%c8, %c0_22] : memref<128x192xf32, #tpu.memory_space<vmem>>, vector<8x192xf32>
    %53 = arith.truncf %47 : vector<8x64xf32> to vector<8x64xbf16>
    %cst_23 = arith.constant dense<0.000000e+00> : vector<8x192xf32>
    %54 = tpu.matmul %53, %10, %cst_23 {dimension_numbers = #tpu.dot_dimension_numbers<[1], [0], [0], [1], [0, 0, 1, 1], [], []>} : vector<8x64xbf16>, vector<64x192xbf16>, vector<8x192xf32> -> vector<8x192xf32>
    %55 = vector.broadcast %11 : vector<1x192xf32> to vector<8x192xf32>
    %56 = arith.addf %54, %55 : vector<8x192xf32>
    %57 = vector.extract_strided_slice %52 {offsets = [0, 0], sizes = [8, 64], strides = [1, 1]} : vector<8x192xf32> to vector<8x64xf32>
    %58 = vector.extract_strided_slice %56 {offsets = [0, 0], sizes = [8, 64], strides = [1, 1]} : vector<8x192xf32> to vector<8x64xf32>
    %59 = arith.addf %57, %58 : vector<8x64xf32>
    %cst_24 = arith.constant 5.000000e-01 : f32
    %60 = vector.broadcast %cst_24 : f32 to vector<8x64xf32>
    %61 = arith.mulf %60, %59 : vector<8x64xf32>
    %62 = math.tanh %61 : vector<8x64xf32>
    %cst_25 = arith.constant 5.000000e-01 : f32
    %63 = vector.broadcast %cst_25 : f32 to vector<8x64xf32>
    %64 = arith.mulf %63, %62 : vector<8x64xf32>
    %cst_26 = arith.constant 5.000000e-01 : f32
    %65 = vector.broadcast %cst_26 : f32 to vector<8x64xf32>
    %66 = arith.addf %64, %65 : vector<8x64xf32>
    %67 = vector.extract_strided_slice %52 {offsets = [0, 64], sizes = [8, 64], strides = [1, 1]} : vector<8x192xf32> to vector<8x64xf32>
    %68 = vector.extract_strided_slice %56 {offsets = [0, 64], sizes = [8, 64], strides = [1, 1]} : vector<8x192xf32> to vector<8x64xf32>
    %69 = arith.addf %67, %68 : vector<8x64xf32>
    %cst_27 = arith.constant 5.000000e-01 : f32
    %70 = vector.broadcast %cst_27 : f32 to vector<8x64xf32>
    %71 = arith.mulf %70, %69 : vector<8x64xf32>
    %72 = math.tanh %71 : vector<8x64xf32>
    %cst_28 = arith.constant 5.000000e-01 : f32
    %73 = vector.broadcast %cst_28 : f32 to vector<8x64xf32>
    %74 = arith.mulf %73, %72 : vector<8x64xf32>
    %cst_29 = arith.constant 5.000000e-01 : f32
    %75 = vector.broadcast %cst_29 : f32 to vector<8x64xf32>
    %76 = arith.addf %74, %75 : vector<8x64xf32>
    %77 = vector.extract_strided_slice %52 {offsets = [0, 128], sizes = [8, 64], strides = [1, 1]} : vector<8x192xf32> to vector<8x64xf32>
    %78 = vector.extract_strided_slice %56 {offsets = [0, 128], sizes = [8, 64], strides = [1, 1]} : vector<8x192xf32> to vector<8x64xf32>
    %79 = arith.mulf %66, %78 : vector<8x64xf32>
    %80 = arith.addf %77, %79 : vector<8x64xf32>
    %81 = math.tanh %80 : vector<8x64xf32>
    %cst_30 = arith.constant 1.000000e+00 : f32
    %82 = vector.broadcast %cst_30 : f32 to vector<8x64xf32>
    %83 = arith.subf %82, %76 : vector<8x64xf32>
    %84 = arith.mulf %83, %81 : vector<8x64xf32>
    %85 = arith.mulf %76, %47 : vector<8x64xf32>
    %86 = arith.addf %84, %85 : vector<8x64xf32>
    %87 = vector.extract_strided_slice %86 {offsets = [0, 0], sizes = [8, 32], strides = [1, 1]} : vector<8x64xf32> to vector<8x32xf32>
    %c8_31 = arith.constant 8 : index
    %c0_32 = arith.constant 0 : index
    %88 = vector.load %arg6[%c8_31, %c0_32] : memref<128x64xf32, #tpu.memory_space<vmem>>, vector<8x32xf32>
    tpu.vector_store %arg6[%c8_31, %c0_32], %87 {strides = array<i32>} : memref<128x64xf32, #tpu.memory_space<vmem>>, vector<8x32xf32>,
    %89 = vector.extract_strided_slice %86 {offsets = [0, 32], sizes = [8, 32], strides = [1, 1]} : vector<8x64xf32> to vector<8x32xf32>
    %c112 = arith.constant 112 : index
    %c32_33 = arith.constant 32 : index
    %90 = vector.load %arg6[%c112, %c32_33] : memref<128x64xf32, #tpu.memory_space<vmem>>, vector<8x32xf32>
    tpu.vector_store %arg6[%c112, %c32_33], %89 {strides = array<i32>} : memref<128x64xf32, #tpu.memory_space<vmem>>, vector<8x32xf32>,
    %c16 = arith.constant 16 : index
    %c0_34 = arith.constant 0 : index
    %91 = vector.load %arg5[%c16, %c0_34] : memref<128x192xf32, #tpu.memory_space<vmem>>, vector<8x192xf32>
    %92 = arith.truncf %86 : vector<8x64xf32> to vector<8x64xbf16>
    %cst_35 = arith.constant dense<0.000000e+00> : vector<8x192xf32>
    %93 = tpu.matmul %92, %10, %cst_35 {dimension_numbers = #tpu.dot_dimension_numbers<[1], [0], [0], [1], [0, 0, 1, 1], [], []>} : vector<8x64xbf16>, vector<64x192xbf16>, vector<8x192xf32> -> vector<8x192xf32>
    %94 = vector.broadcast %11 : vector<1x192xf32> to vector<8x192xf32>
    %95 = arith.addf %93, %94 : vector<8x192xf32>
    %96 = vector.extract_strided_slice %91 {offsets = [0, 0], sizes = [8, 64], strides = [1, 1]} : vector<8x192xf32> to vector<8x64xf32>
    %97 = vector.extract_strided_slice %95 {offsets = [0, 0], sizes = [8, 64], strides = [1, 1]} : vector<8x192xf32> to vector<8x64xf32>
    %98 = arith.addf %96, %97 : vector<8x64xf32>
    %cst_36 = arith.constant 5.000000e-01 : f32
    %99 = vector.broadcast %cst_36 : f32 to vector<8x64xf32>
    %100 = arith.mulf %99, %98 : vector<8x64xf32>
    %101 = math.tanh %100 : vector<8x64xf32>
    %cst_37 = arith.constant 5.000000e-01 : f32
    %102 = vector.broadcast %cst_37 : f32 to vector<8x64xf32>
    %103 = arith.mulf %102, %101 : vector<8x64xf32>
    %cst_38 = arith.constant 5.000000e-01 : f32
    %104 = vector.broadcast %cst_38 : f32 to vector<8x64xf32>
    %105 = arith.addf %103, %104 : vector<8x64xf32>
    %106 = vector.extract_strided_slice %91 {offsets = [0, 64], sizes = [8, 64], strides = [1, 1]} : vector<8x192xf32> to vector<8x64xf32>
    %107 = vector.extract_strided_slice %95 {offsets = [0, 64], sizes = [8, 64], strides = [1, 1]} : vector<8x192xf32> to vector<8x64xf32>
    %108 = arith.addf %106, %107 : vector<8x64xf32>
    %cst_39 = arith.constant 5.000000e-01 : f32
    %109 = vector.broadcast %cst_39 : f32 to vector<8x64xf32>
    %110 = arith.mulf %109, %108 : vector<8x64xf32>
    %111 = math.tanh %110 : vector<8x64xf32>
    %cst_40 = arith.constant 5.000000e-01 : f32
    %112 = vector.broadcast %cst_40 : f32 to vector<8x64xf32>
    %113 = arith.mulf %112, %111 : vector<8x64xf32>
    %cst_41 = arith.constant 5.000000e-01 : f32
    %114 = vector.broadcast %cst_41 : f32 to vector<8x64xf32>
    %115 = arith.addf %113, %114 : vector<8x64xf32>
    %116 = vector.extract_strided_slice %91 {offsets = [0, 128], sizes = [8, 64], strides = [1, 1]} : vector<8x192xf32> to vector<8x64xf32>
    %117 = vector.extract_strided_slice %95 {offsets = [0, 128], sizes = [8, 64], strides = [1, 1]} : vector<8x192xf32> to vector<8x64xf32>
    %118 = arith.mulf %105, %117 : vector<8x64xf32>
    %119 = arith.addf %116, %118 : vector<8x64xf32>
    %120 = math.tanh %119 : vector<8x64xf32>
    %cst_42 = arith.constant 1.000000e+00 : f32
    %121 = vector.broadcast %cst_42 : f32 to vector<8x64xf32>
    %122 = arith.subf %121, %115 : vector<8x64xf32>
    %123 = arith.mulf %122, %120 : vector<8x64xf32>
    %124 = arith.mulf %115, %86 : vector<8x64xf32>
    %125 = arith.addf %123, %124 : vector<8x64xf32>
    %126 = vector.extract_strided_slice %125 {offsets = [0, 0], sizes = [8, 32], strides = [1, 1]} : vector<8x64xf32> to vector<8x32xf32>
    %c16_43 = arith.constant 16 : index
    %c0_44 = arith.constant 0 : index
    %127 = vector.load %arg6[%c16_43, %c0_44] : memref<128x64xf32, #tpu.memory_space<vmem>>, vector<8x32xf32>
    tpu.vector_store %arg6[%c16_43, %c0_44], %126 {strides = array<i32>} : memref<128x64xf32, #tpu.memory_space<vmem>>, vector<8x32xf32>,
    %128 = vector.extract_strided_slice %125 {offsets = [0, 32], sizes = [8, 32], strides = [1, 1]} : vector<8x64xf32> to vector<8x32xf32>
    %c104 = arith.constant 104 : index
    %c32_45 = arith.constant 32 : index
    %129 = vector.load %arg6[%c104, %c32_45] : memref<128x64xf32, #tpu.memory_space<vmem>>, vector<8x32xf32>
    tpu.vector_store %arg6[%c104, %c32_45], %128 {strides = array<i32>} : memref<128x64xf32, #tpu.memory_space<vmem>>, vector<8x32xf32>,
    %c24 = arith.constant 24 : index
    %c0_46 = arith.constant 0 : index
    %130 = vector.load %arg5[%c24, %c0_46] : memref<128x192xf32, #tpu.memory_space<vmem>>, vector<8x192xf32>
    %131 = arith.truncf %125 : vector<8x64xf32> to vector<8x64xbf16>
    %cst_47 = arith.constant dense<0.000000e+00> : vector<8x192xf32>
    %132 = tpu.matmul %131, %10, %cst_47 {dimension_numbers = #tpu.dot_dimension_numbers<[1], [0], [0], [1], [0, 0, 1, 1], [], []>} : vector<8x64xbf16>, vector<64x192xbf16>, vector<8x192xf32> -> vector<8x192xf32>
    %133 = vector.broadcast %11 : vector<1x192xf32> to vector<8x192xf32>
    %134 = arith.addf %132, %133 : vector<8x192xf32>
    %135 = vector.extract_strided_slice %130 {offsets = [0, 0], sizes = [8, 64], strides = [1, 1]} : vector<8x192xf32> to vector<8x64xf32>
    %136 = vector.extract_strided_slice %134 {offsets = [0, 0], sizes = [8, 64], strides = [1, 1]} : vector<8x192xf32> to vector<8x64xf32>
    %137 = arith.addf %135, %136 : vector<8x64xf32>
    %cst_48 = arith.constant 5.000000e-01 : f32
    %138 = vector.broadcast %cst_48 : f32 to vector<8x64xf32>
    %139 = arith.mulf %138, %137 : vector<8x64xf32>
    %140 = math.tanh %139 : vector<8x64xf32>
    %cst_49 = arith.constant 5.000000e-01 : f32
    %141 = vector.broadcast %cst_49 : f32 to vector<8x64xf32>
    %142 = arith.mulf %141, %140 : vector<8x64xf32>
    %cst_50 = arith.constant 5.000000e-01 : f32
    %143 = vector.broadcast %cst_50 : f32 to vector<8x64xf32>
    %144 = arith.addf %142, %143 : vector<8x64xf32>
    %145 = vector.extract_strided_slice %130 {offsets = [0, 64], sizes = [8, 64], strides = [1, 1]} : vector<8x192xf32> to vector<8x64xf32>
    %146 = vector.extract_strided_slice %134 {offsets = [0, 64], sizes = [8, 64], strides = [1, 1]} : vector<8x192xf32> to vector<8x64xf32>
    %147 = arith.addf %145, %146 : vector<8x64xf32>
    %cst_51 = arith.constant 5.000000e-01 : f32
    %148 = vector.broadcast %cst_51 : f32 to vector<8x64xf32>
    %149 = arith.mulf %148, %147 : vector<8x64xf32>
    %150 = math.tanh %149 : vector<8x64xf32>
    %cst_52 = arith.constant 5.000000e-01 : f32
    %151 = vector.broadcast %cst_52 : f32 to vector<8x64xf32>
    %152 = arith.mulf %151, %150 : vector<8x64xf32>
    %cst_53 = arith.constant 5.000000e-01 : f32
    %153 = vector.broadcast %cst_53 : f32 to vector<8x64xf32>
    %154 = arith.addf %152, %153 : vector<8x64xf32>
    %155 = vector.extract_strided_slice %130 {offsets = [0, 128], sizes = [8, 64], strides = [1, 1]} : vector<8x192xf32> to vector<8x64xf32>
    %156 = vector.extract_strided_slice %134 {offsets = [0, 128], sizes = [8, 64], strides = [1, 1]} : vector<8x192xf32> to vector<8x64xf32>
    %157 = arith.mulf %144, %156 : vector<8x64xf32>
    %158 = arith.addf %155, %157 : vector<8x64xf32>
    %159 = math.tanh %158 : vector<8x64xf32>
    %cst_54 = arith.constant 1.000000e+00 : f32
    %160 = vector.broadcast %cst_54 : f32 to vector<8x64xf32>
    %161 = arith.subf %160, %154 : vector<8x64xf32>
    %162 = arith.mulf %161, %159 : vector<8x64xf32>
    %163 = arith.mulf %154, %125 : vector<8x64xf32>
    %164 = arith.addf %162, %163 : vector<8x64xf32>
    %165 = vector.extract_strided_slice %164 {offsets = [0, 0], sizes = [8, 32], strides = [1, 1]} : vector<8x64xf32> to vector<8x32xf32>
    %c24_55 = arith.constant 24 : index
    %c0_56 = arith.constant 0 : index
    %166 = vector.load %arg6[%c24_55, %c0_56] : memref<128x64xf32, #tpu.memory_space<vmem>>, vector<8x32xf32>
    tpu.vector_store %arg6[%c24_55, %c0_56], %165 {strides = array<i32>} : memref<128x64xf32, #tpu.memory_space<vmem>>, vector<8x32xf32>,
    %167 = vector.extract_strided_slice %164 {offsets = [0, 32], sizes = [8, 32], strides = [1, 1]} : vector<8x64xf32> to vector<8x32xf32>
    %c96 = arith.constant 96 : index
    %c32_57 = arith.constant 32 : index
    %168 = vector.load %arg6[%c96, %c32_57] : memref<128x64xf32, #tpu.memory_space<vmem>>, vector<8x32xf32>
    tpu.vector_store %arg6[%c96, %c32_57], %167 {strides = array<i32>} : memref<128x64xf32, #tpu.memory_space<vmem>>, vector<8x32xf32>,
    %c32_58 = arith.constant 32 : index
    %c0_59 = arith.constant 0 : index
    %169 = vector.load %arg5[%c32_58, %c0_59] : memref<128x192xf32, #tpu.memory_space<vmem>>, vector<8x192xf32>
    %170 = arith.truncf %164 : vector<8x64xf32> to vector<8x64xbf16>
    %cst_60 = arith.constant dense<0.000000e+00> : vector<8x192xf32>
    %171 = tpu.matmul %170, %10, %cst_60 {dimension_numbers = #tpu.dot_dimension_numbers<[1], [0], [0], [1], [0, 0, 1, 1], [], []>} : vector<8x64xbf16>, vector<64x192xbf16>, vector<8x192xf32> -> vector<8x192xf32>
    %172 = vector.broadcast %11 : vector<1x192xf32> to vector<8x192xf32>
    %173 = arith.addf %171, %172 : vector<8x192xf32>
    %174 = vector.extract_strided_slice %169 {offsets = [0, 0], sizes = [8, 64], strides = [1, 1]} : vector<8x192xf32> to vector<8x64xf32>
    %175 = vector.extract_strided_slice %173 {offsets = [0, 0], sizes = [8, 64], strides = [1, 1]} : vector<8x192xf32> to vector<8x64xf32>
    %176 = arith.addf %174, %175 : vector<8x64xf32>
    %cst_61 = arith.constant 5.000000e-01 : f32
    %177 = vector.broadcast %cst_61 : f32 to vector<8x64xf32>
    %178 = arith.mulf %177, %176 : vector<8x64xf32>
    %179 = math.tanh %178 : vector<8x64xf32>
    %cst_62 = arith.constant 5.000000e-01 : f32
    %180 = vector.broadcast %cst_62 : f32 to vector<8x64xf32>
    %181 = arith.mulf %180, %179 : vector<8x64xf32>
    %cst_63 = arith.constant 5.000000e-01 : f32
    %182 = vector.broadcast %cst_63 : f32 to vector<8x64xf32>
    %183 = arith.addf %181, %182 : vector<8x64xf32>
    %184 = vector.extract_strided_slice %169 {offsets = [0, 64], sizes = [8, 64], strides = [1, 1]} : vector<8x192xf32> to vector<8x64xf32>
    %185 = vector.extract_strided_slice %173 {offsets = [0, 64], sizes = [8, 64], strides = [1, 1]} : vector<8x192xf32> to vector<8x64xf32>
    %186 = arith.addf %184, %185 : vector<8x64xf32>
    %cst_64 = arith.constant 5.000000e-01 : f32
    %187 = vector.broadcast %cst_64 : f32 to vector<8x64xf32>
    %188 = arith.mulf %187, %186 : vector<8x64xf32>
    %189 = math.tanh %188 : vector<8x64xf32>
    %cst_65 = arith.constant 5.000000e-01 : f32
    %190 = vector.broadcast %cst_65 : f32 to vector<8x64xf32>
    %191 = arith.mulf %190, %189 : vector<8x64xf32>
    %cst_66 = arith.constant 5.000000e-01 : f32
    %192 = vector.broadcast %cst_66 : f32 to vector<8x64xf32>
    %193 = arith.addf %191, %192 : vector<8x64xf32>
    %194 = vector.extract_strided_slice %169 {offsets = [0, 128], sizes = [8, 64], strides = [1, 1]} : vector<8x192xf32> to vector<8x64xf32>
    %195 = vector.extract_strided_slice %173 {offsets = [0, 128], sizes = [8, 64], strides = [1, 1]} : vector<8x192xf32> to vector<8x64xf32>
    %196 = arith.mulf %183, %195 : vector<8x64xf32>
    %197 = arith.addf %194, %196 : vector<8x64xf32>
    %198 = math.tanh %197 : vector<8x64xf32>
    %cst_67 = arith.constant 1.000000e+00 : f32
    %199 = vector.broadcast %cst_67 : f32 to vector<8x64xf32>
    %200 = arith.subf %199, %193 : vector<8x64xf32>
    %201 = arith.mulf %200, %198 : vector<8x64xf32>
    %202 = arith.mulf %193, %164 : vector<8x64xf32>
    %203 = arith.addf %201, %202 : vector<8x64xf32>
    %204 = vector.extract_strided_slice %203 {offsets = [0, 0], sizes = [8, 32], strides = [1, 1]} : vector<8x64xf32> to vector<8x32xf32>
    %c32_68 = arith.constant 32 : index
    %c0_69 = arith.constant 0 : index
    %205 = vector.load %arg6[%c32_68, %c0_69] : memref<128x64xf32, #tpu.memory_space<vmem>>, vector<8x32xf32>
    tpu.vector_store %arg6[%c32_68, %c0_69], %204 {strides = array<i32>} : memref<128x64xf32, #tpu.memory_space<vmem>>, vector<8x32xf32>,
    %206 = vector.extract_strided_slice %203 {offsets = [0, 32], sizes = [8, 32], strides = [1, 1]} : vector<8x64xf32> to vector<8x32xf32>
    %c88 = arith.constant 88 : index
    %c32_70 = arith.constant 32 : index
    %207 = vector.load %arg6[%c88, %c32_70] : memref<128x64xf32, #tpu.memory_space<vmem>>, vector<8x32xf32>
    tpu.vector_store %arg6[%c88, %c32_70], %206 {strides = array<i32>} : memref<128x64xf32, #tpu.memory_space<vmem>>, vector<8x32xf32>,
    %c40 = arith.constant 40 : index
    %c0_71 = arith.constant 0 : index
    %208 = vector.load %arg5[%c40, %c0_71] : memref<128x192xf32, #tpu.memory_space<vmem>>, vector<8x192xf32>
    %209 = arith.truncf %203 : vector<8x64xf32> to vector<8x64xbf16>
    %cst_72 = arith.constant dense<0.000000e+00> : vector<8x192xf32>
    %210 = tpu.matmul %209, %10, %cst_72 {dimension_numbers = #tpu.dot_dimension_numbers<[1], [0], [0], [1], [0, 0, 1, 1], [], []>} : vector<8x64xbf16>, vector<64x192xbf16>, vector<8x192xf32> -> vector<8x192xf32>
    %211 = vector.broadcast %11 : vector<1x192xf32> to vector<8x192xf32>
    %212 = arith.addf %210, %211 : vector<8x192xf32>
    %213 = vector.extract_strided_slice %208 {offsets = [0, 0], sizes = [8, 64], strides = [1, 1]} : vector<8x192xf32> to vector<8x64xf32>
    %214 = vector.extract_strided_slice %212 {offsets = [0, 0], sizes = [8, 64], strides = [1, 1]} : vector<8x192xf32> to vector<8x64xf32>
    %215 = arith.addf %213, %214 : vector<8x64xf32>
    %cst_73 = arith.constant 5.000000e-01 : f32
    %216 = vector.broadcast %cst_73 : f32 to vector<8x64xf32>
    %217 = arith.mulf %216, %215 : vector<8x64xf32>
    %218 = math.tanh %217 : vector<8x64xf32>
    %cst_74 = arith.constant 5.000000e-01 : f32
    %219 = vector.broadcast %cst_74 : f32 to vector<8x64xf32>
    %220 = arith.mulf %219, %218 : vector<8x64xf32>
    %cst_75 = arith.constant 5.000000e-01 : f32
    %221 = vector.broadcast %cst_75 : f32 to vector<8x64xf32>
    %222 = arith.addf %220, %221 : vector<8x64xf32>
    %223 = vector.extract_strided_slice %208 {offsets = [0, 64], sizes = [8, 64], strides = [1, 1]} : vector<8x192xf32> to vector<8x64xf32>
    %224 = vector.extract_strided_slice %212 {offsets = [0, 64], sizes = [8, 64], strides = [1, 1]} : vector<8x192xf32> to vector<8x64xf32>
    %225 = arith.addf %223, %224 : vector<8x64xf32>
    %cst_76 = arith.constant 5.000000e-01 : f32
    %226 = vector.broadcast %cst_76 : f32 to vector<8x64xf32>
    %227 = arith.mulf %226, %225 : vector<8x64xf32>
    %228 = math.tanh %227 : vector<8x64xf32>
    %cst_77 = arith.constant 5.000000e-01 : f32
    %229 = vector.broadcast %cst_77 : f32 to vector<8x64xf32>
    %230 = arith.mulf %229, %228 : vector<8x64xf32>
    %cst_78 = arith.constant 5.000000e-01 : f32
    %231 = vector.broadcast %cst_78 : f32 to vector<8x64xf32>
    %232 = arith.addf %230, %231 : vector<8x64xf32>
    %233 = vector.extract_strided_slice %208 {offsets = [0, 128], sizes = [8, 64], strides = [1, 1]} : vector<8x192xf32> to vector<8x64xf32>
    %234 = vector.extract_strided_slice %212 {offsets = [0, 128], sizes = [8, 64], strides = [1, 1]} : vector<8x192xf32> to vector<8x64xf32>
    %235 = arith.mulf %222, %234 : vector<8x64xf32>
    %236 = arith.addf %233, %235 : vector<8x64xf32>
    %237 = math.tanh %236 : vector<8x64xf32>
    %cst_79 = arith.constant 1.000000e+00 : f32
    %238 = vector.broadcast %cst_79 : f32 to vector<8x64xf32>
    %239 = arith.subf %238, %232 : vector<8x64xf32>
    %240 = arith.mulf %239, %237 : vector<8x64xf32>
    %241 = arith.mulf %232, %203 : vector<8x64xf32>
    %242 = arith.addf %240, %241 : vector<8x64xf32>
    %243 = vector.extract_strided_slice %242 {offsets = [0, 0], sizes = [8, 32], strides = [1, 1]} : vector<8x64xf32> to vector<8x32xf32>
    %c40_80 = arith.constant 40 : index
    %c0_81 = arith.constant 0 : index
    %244 = vector.load %arg6[%c40_80, %c0_81] : memref<128x64xf32, #tpu.memory_space<vmem>>, vector<8x32xf32>
    tpu.vector_store %arg6[%c40_80, %c0_81], %243 {strides = array<i32>} : memref<128x64xf32, #tpu.memory_space<vmem>>, vector<8x32xf32>,
    %245 = vector.extract_strided_slice %242 {offsets = [0, 32], sizes = [8, 32], strides = [1, 1]} : vector<8x64xf32> to vector<8x32xf32>
    %c80 = arith.constant 80 : index
    %c32_82 = arith.constant 32 : index
    %246 = vector.load %arg6[%c80, %c32_82] : memref<128x64xf32, #tpu.memory_space<vmem>>, vector<8x32xf32>
    tpu.vector_store %arg6[%c80, %c32_82], %245 {strides = array<i32>} : memref<128x64xf32, #tpu.memory_space<vmem>>, vector<8x32xf32>,
    %c48 = arith.constant 48 : index
    %c0_83 = arith.constant 0 : index
    %247 = vector.load %arg5[%c48, %c0_83] : memref<128x192xf32, #tpu.memory_space<vmem>>, vector<8x192xf32>
    %248 = arith.truncf %242 : vector<8x64xf32> to vector<8x64xbf16>
    %cst_84 = arith.constant dense<0.000000e+00> : vector<8x192xf32>
    %249 = tpu.matmul %248, %10, %cst_84 {dimension_numbers = #tpu.dot_dimension_numbers<[1], [0], [0], [1], [0, 0, 1, 1], [], []>} : vector<8x64xbf16>, vector<64x192xbf16>, vector<8x192xf32> -> vector<8x192xf32>
    %250 = vector.broadcast %11 : vector<1x192xf32> to vector<8x192xf32>
    %251 = arith.addf %249, %250 : vector<8x192xf32>
    %252 = vector.extract_strided_slice %247 {offsets = [0, 0], sizes = [8, 64], strides = [1, 1]} : vector<8x192xf32> to vector<8x64xf32>
    %253 = vector.extract_strided_slice %251 {offsets = [0, 0], sizes = [8, 64], strides = [1, 1]} : vector<8x192xf32> to vector<8x64xf32>
    %254 = arith.addf %252, %253 : vector<8x64xf32>
    %cst_85 = arith.constant 5.000000e-01 : f32
    %255 = vector.broadcast %cst_85 : f32 to vector<8x64xf32>
    %256 = arith.mulf %255, %254 : vector<8x64xf32>
    %257 = math.tanh %256 : vector<8x64xf32>
    %cst_86 = arith.constant 5.000000e-01 : f32
    %258 = vector.broadcast %cst_86 : f32 to vector<8x64xf32>
    %259 = arith.mulf %258, %257 : vector<8x64xf32>
    %cst_87 = arith.constant 5.000000e-01 : f32
    %260 = vector.broadcast %cst_87 : f32 to vector<8x64xf32>
    %261 = arith.addf %259, %260 : vector<8x64xf32>
    %262 = vector.extract_strided_slice %247 {offsets = [0, 64], sizes = [8, 64], strides = [1, 1]} : vector<8x192xf32> to vector<8x64xf32>
    %263 = vector.extract_strided_slice %251 {offsets = [0, 64], sizes = [8, 64], strides = [1, 1]} : vector<8x192xf32> to vector<8x64xf32>
    %264 = arith.addf %262, %263 : vector<8x64xf32>
    %cst_88 = arith.constant 5.000000e-01 : f32
    %265 = vector.broadcast %cst_88 : f32 to vector<8x64xf32>
    %266 = arith.mulf %265, %264 : vector<8x64xf32>
    %267 = math.tanh %266 : vector<8x64xf32>
    %cst_89 = arith.constant 5.000000e-01 : f32
    %268 = vector.broadcast %cst_89 : f32 to vector<8x64xf32>
    %269 = arith.mulf %268, %267 : vector<8x64xf32>
    %cst_90 = arith.constant 5.000000e-01 : f32
    %270 = vector.broadcast %cst_90 : f32 to vector<8x64xf32>
    %271 = arith.addf %269, %270 : vector<8x64xf32>
    %272 = vector.extract_strided_slice %247 {offsets = [0, 128], sizes = [8, 64], strides = [1, 1]} : vector<8x192xf32> to vector<8x64xf32>
    %273 = vector.extract_strided_slice %251 {offsets = [0, 128], sizes = [8, 64], strides = [1, 1]} : vector<8x192xf32> to vector<8x64xf32>
    %274 = arith.mulf %261, %273 : vector<8x64xf32>
    %275 = arith.addf %272, %274 : vector<8x64xf32>
    %276 = math.tanh %275 : vector<8x64xf32>
    %cst_91 = arith.constant 1.000000e+00 : f32
    %277 = vector.broadcast %cst_91 : f32 to vector<8x64xf32>
    %278 = arith.subf %277, %271 : vector<8x64xf32>
    %279 = arith.mulf %278, %276 : vector<8x64xf32>
    %280 = arith.mulf %271, %242 : vector<8x64xf32>
    %281 = arith.addf %279, %280 : vector<8x64xf32>
    %282 = vector.extract_strided_slice %281 {offsets = [0, 0], sizes = [8, 32], strides = [1, 1]} : vector<8x64xf32> to vector<8x32xf32>
    %c48_92 = arith.constant 48 : index
    %c0_93 = arith.constant 0 : index
    %283 = vector.load %arg6[%c48_92, %c0_93] : memref<128x64xf32, #tpu.memory_space<vmem>>, vector<8x32xf32>
    tpu.vector_store %arg6[%c48_92, %c0_93], %282 {strides = array<i32>} : memref<128x64xf32, #tpu.memory_space<vmem>>, vector<8x32xf32>,
    %284 = vector.extract_strided_slice %281 {offsets = [0, 32], sizes = [8, 32], strides = [1, 1]} : vector<8x64xf32> to vector<8x32xf32>
    %c72 = arith.constant 72 : index
    %c32_94 = arith.constant 32 : index
    %285 = vector.load %arg6[%c72, %c32_94] : memref<128x64xf32, #tpu.memory_space<vmem>>, vector<8x32xf32>
    tpu.vector_store %arg6[%c72, %c32_94], %284 {strides = array<i32>} : memref<128x64xf32, #tpu.memory_space<vmem>>, vector<8x32xf32>,
    %c56 = arith.constant 56 : index
    %c0_95 = arith.constant 0 : index
    %286 = vector.load %arg5[%c56, %c0_95] : memref<128x192xf32, #tpu.memory_space<vmem>>, vector<8x192xf32>
    %287 = arith.truncf %281 : vector<8x64xf32> to vector<8x64xbf16>
    %cst_96 = arith.constant dense<0.000000e+00> : vector<8x192xf32>
    %288 = tpu.matmul %287, %10, %cst_96 {dimension_numbers = #tpu.dot_dimension_numbers<[1], [0], [0], [1], [0, 0, 1, 1], [], []>} : vector<8x64xbf16>, vector<64x192xbf16>, vector<8x192xf32> -> vector<8x192xf32>
    %289 = vector.broadcast %11 : vector<1x192xf32> to vector<8x192xf32>
    %290 = arith.addf %288, %289 : vector<8x192xf32>
    %291 = vector.extract_strided_slice %286 {offsets = [0, 0], sizes = [8, 64], strides = [1, 1]} : vector<8x192xf32> to vector<8x64xf32>
    %292 = vector.extract_strided_slice %290 {offsets = [0, 0], sizes = [8, 64], strides = [1, 1]} : vector<8x192xf32> to vector<8x64xf32>
    %293 = arith.addf %291, %292 : vector<8x64xf32>
    %cst_97 = arith.constant 5.000000e-01 : f32
    %294 = vector.broadcast %cst_97 : f32 to vector<8x64xf32>
    %295 = arith.mulf %294, %293 : vector<8x64xf32>
    %296 = math.tanh %295 : vector<8x64xf32>
    %cst_98 = arith.constant 5.000000e-01 : f32
    %297 = vector.broadcast %cst_98 : f32 to vector<8x64xf32>
    %298 = arith.mulf %297, %296 : vector<8x64xf32>
    %cst_99 = arith.constant 5.000000e-01 : f32
    %299 = vector.broadcast %cst_99 : f32 to vector<8x64xf32>
    %300 = arith.addf %298, %299 : vector<8x64xf32>
    %301 = vector.extract_strided_slice %286 {offsets = [0, 64], sizes = [8, 64], strides = [1, 1]} : vector<8x192xf32> to vector<8x64xf32>
    %302 = vector.extract_strided_slice %290 {offsets = [0, 64], sizes = [8, 64], strides = [1, 1]} : vector<8x192xf32> to vector<8x64xf32>
    %303 = arith.addf %301, %302 : vector<8x64xf32>
    %cst_100 = arith.constant 5.000000e-01 : f32
    %304 = vector.broadcast %cst_100 : f32 to vector<8x64xf32>
    %305 = arith.mulf %304, %303 : vector<8x64xf32>
    %306 = math.tanh %305 : vector<8x64xf32>
    %cst_101 = arith.constant 5.000000e-01 : f32
    %307 = vector.broadcast %cst_101 : f32 to vector<8x64xf32>
    %308 = arith.mulf %307, %306 : vector<8x64xf32>
    %cst_102 = arith.constant 5.000000e-01 : f32
    %309 = vector.broadcast %cst_102 : f32 to vector<8x64xf32>
    %310 = arith.addf %308, %309 : vector<8x64xf32>
    %311 = vector.extract_strided_slice %286 {offsets = [0, 128], sizes = [8, 64], strides = [1, 1]} : vector<8x192xf32> to vector<8x64xf32>
    %312 = vector.extract_strided_slice %290 {offsets = [0, 128], sizes = [8, 64], strides = [1, 1]} : vector<8x192xf32> to vector<8x64xf32>
    %313 = arith.mulf %300, %312 : vector<8x64xf32>
    %314 = arith.addf %311, %313 : vector<8x64xf32>
    %315 = math.tanh %314 : vector<8x64xf32>
    %cst_103 = arith.constant 1.000000e+00 : f32
    %316 = vector.broadcast %cst_103 : f32 to vector<8x64xf32>
    %317 = arith.subf %316, %310 : vector<8x64xf32>
    %318 = arith.mulf %317, %315 : vector<8x64xf32>
    %319 = arith.mulf %310, %281 : vector<8x64xf32>
    %320 = arith.addf %318, %319 : vector<8x64xf32>
    %321 = vector.extract_strided_slice %320 {offsets = [0, 0], sizes = [8, 32], strides = [1, 1]} : vector<8x64xf32> to vector<8x32xf32>
    %c56_104 = arith.constant 56 : index
    %c0_105 = arith.constant 0 : index
    %322 = vector.load %arg6[%c56_104, %c0_105] : memref<128x64xf32, #tpu.memory_space<vmem>>, vector<8x32xf32>
    tpu.vector_store %arg6[%c56_104, %c0_105], %321 {strides = array<i32>} : memref<128x64xf32, #tpu.memory_space<vmem>>, vector<8x32xf32>,
    %323 = vector.extract_strided_slice %320 {offsets = [0, 32], sizes = [8, 32], strides = [1, 1]} : vector<8x64xf32> to vector<8x32xf32>
    %c64 = arith.constant 64 : index
    %c32_106 = arith.constant 32 : index
    %324 = vector.load %arg6[%c64, %c32_106] : memref<128x64xf32, #tpu.memory_space<vmem>>, vector<8x32xf32>
    tpu.vector_store %arg6[%c64, %c32_106], %323 {strides = array<i32>} : memref<128x64xf32, #tpu.memory_space<vmem>>, vector<8x32xf32>,
    %c64_107 = arith.constant 64 : index
    %c0_108 = arith.constant 0 : index
    %325 = vector.load %arg5[%c64_107, %c0_108] : memref<128x192xf32, #tpu.memory_space<vmem>>, vector<8x192xf32>
    %326 = arith.truncf %320 : vector<8x64xf32> to vector<8x64xbf16>
    %cst_109 = arith.constant dense<0.000000e+00> : vector<8x192xf32>
    %327 = tpu.matmul %326, %10, %cst_109 {dimension_numbers = #tpu.dot_dimension_numbers<[1], [0], [0], [1], [0, 0, 1, 1], [], []>} : vector<8x64xbf16>, vector<64x192xbf16>, vector<8x192xf32> -> vector<8x192xf32>
    %328 = vector.broadcast %11 : vector<1x192xf32> to vector<8x192xf32>
    %329 = arith.addf %327, %328 : vector<8x192xf32>
    %330 = vector.extract_strided_slice %325 {offsets = [0, 0], sizes = [8, 64], strides = [1, 1]} : vector<8x192xf32> to vector<8x64xf32>
    %331 = vector.extract_strided_slice %329 {offsets = [0, 0], sizes = [8, 64], strides = [1, 1]} : vector<8x192xf32> to vector<8x64xf32>
    %332 = arith.addf %330, %331 : vector<8x64xf32>
    %cst_110 = arith.constant 5.000000e-01 : f32
    %333 = vector.broadcast %cst_110 : f32 to vector<8x64xf32>
    %334 = arith.mulf %333, %332 : vector<8x64xf32>
    %335 = math.tanh %334 : vector<8x64xf32>
    %cst_111 = arith.constant 5.000000e-01 : f32
    %336 = vector.broadcast %cst_111 : f32 to vector<8x64xf32>
    %337 = arith.mulf %336, %335 : vector<8x64xf32>
    %cst_112 = arith.constant 5.000000e-01 : f32
    %338 = vector.broadcast %cst_112 : f32 to vector<8x64xf32>
    %339 = arith.addf %337, %338 : vector<8x64xf32>
    %340 = vector.extract_strided_slice %325 {offsets = [0, 64], sizes = [8, 64], strides = [1, 1]} : vector<8x192xf32> to vector<8x64xf32>
    %341 = vector.extract_strided_slice %329 {offsets = [0, 64], sizes = [8, 64], strides = [1, 1]} : vector<8x192xf32> to vector<8x64xf32>
    %342 = arith.addf %340, %341 : vector<8x64xf32>
    %cst_113 = arith.constant 5.000000e-01 : f32
    %343 = vector.broadcast %cst_113 : f32 to vector<8x64xf32>
    %344 = arith.mulf %343, %342 : vector<8x64xf32>
    %345 = math.tanh %344 : vector<8x64xf32>
    %cst_114 = arith.constant 5.000000e-01 : f32
    %346 = vector.broadcast %cst_114 : f32 to vector<8x64xf32>
    %347 = arith.mulf %346, %345 : vector<8x64xf32>
    %cst_115 = arith.constant 5.000000e-01 : f32
    %348 = vector.broadcast %cst_115 : f32 to vector<8x64xf32>
    %349 = arith.addf %347, %348 : vector<8x64xf32>
    %350 = vector.extract_strided_slice %325 {offsets = [0, 128], sizes = [8, 64], strides = [1, 1]} : vector<8x192xf32> to vector<8x64xf32>
    %351 = vector.extract_strided_slice %329 {offsets = [0, 128], sizes = [8, 64], strides = [1, 1]} : vector<8x192xf32> to vector<8x64xf32>
    %352 = arith.mulf %339, %351 : vector<8x64xf32>
    %353 = arith.addf %350, %352 : vector<8x64xf32>
    %354 = math.tanh %353 : vector<8x64xf32>
    %cst_116 = arith.constant 1.000000e+00 : f32
    %355 = vector.broadcast %cst_116 : f32 to vector<8x64xf32>
    %356 = arith.subf %355, %349 : vector<8x64xf32>
    %357 = arith.mulf %356, %354 : vector<8x64xf32>
    %358 = arith.mulf %349, %320 : vector<8x64xf32>
    %359 = arith.addf %357, %358 : vector<8x64xf32>
    %360 = vector.extract_strided_slice %359 {offsets = [0, 0], sizes = [8, 32], strides = [1, 1]} : vector<8x64xf32> to vector<8x32xf32>
    %c64_117 = arith.constant 64 : index
    %c0_118 = arith.constant 0 : index
    %361 = vector.load %arg6[%c64_117, %c0_118] : memref<128x64xf32, #tpu.memory_space<vmem>>, vector<8x32xf32>
    tpu.vector_store %arg6[%c64_117, %c0_118], %360 {strides = array<i32>} : memref<128x64xf32, #tpu.memory_space<vmem>>, vector<8x32xf32>,
    %362 = vector.extract_strided_slice %359 {offsets = [0, 32], sizes = [8, 32], strides = [1, 1]} : vector<8x64xf32> to vector<8x32xf32>
    %c56_119 = arith.constant 56 : index
    %c32_120 = arith.constant 32 : index
    %363 = vector.load %arg6[%c56_119, %c32_120] : memref<128x64xf32, #tpu.memory_space<vmem>>, vector<8x32xf32>
    tpu.vector_store %arg6[%c56_119, %c32_120], %362 {strides = array<i32>} : memref<128x64xf32, #tpu.memory_space<vmem>>, vector<8x32xf32>,
    %c72_121 = arith.constant 72 : index
    %c0_122 = arith.constant 0 : index
    %364 = vector.load %arg5[%c72_121, %c0_122] : memref<128x192xf32, #tpu.memory_space<vmem>>, vector<8x192xf32>
    %365 = arith.truncf %359 : vector<8x64xf32> to vector<8x64xbf16>
    %cst_123 = arith.constant dense<0.000000e+00> : vector<8x192xf32>
    %366 = tpu.matmul %365, %10, %cst_123 {dimension_numbers = #tpu.dot_dimension_numbers<[1], [0], [0], [1], [0, 0, 1, 1], [], []>} : vector<8x64xbf16>, vector<64x192xbf16>, vector<8x192xf32> -> vector<8x192xf32>
    %367 = vector.broadcast %11 : vector<1x192xf32> to vector<8x192xf32>
    %368 = arith.addf %366, %367 : vector<8x192xf32>
    %369 = vector.extract_strided_slice %364 {offsets = [0, 0], sizes = [8, 64], strides = [1, 1]} : vector<8x192xf32> to vector<8x64xf32>
    %370 = vector.extract_strided_slice %368 {offsets = [0, 0], sizes = [8, 64], strides = [1, 1]} : vector<8x192xf32> to vector<8x64xf32>
    %371 = arith.addf %369, %370 : vector<8x64xf32>
    %cst_124 = arith.constant 5.000000e-01 : f32
    %372 = vector.broadcast %cst_124 : f32 to vector<8x64xf32>
    %373 = arith.mulf %372, %371 : vector<8x64xf32>
    %374 = math.tanh %373 : vector<8x64xf32>
    %cst_125 = arith.constant 5.000000e-01 : f32
    %375 = vector.broadcast %cst_125 : f32 to vector<8x64xf32>
    %376 = arith.mulf %375, %374 : vector<8x64xf32>
    %cst_126 = arith.constant 5.000000e-01 : f32
    %377 = vector.broadcast %cst_126 : f32 to vector<8x64xf32>
    %378 = arith.addf %376, %377 : vector<8x64xf32>
    %379 = vector.extract_strided_slice %364 {offsets = [0, 64], sizes = [8, 64], strides = [1, 1]} : vector<8x192xf32> to vector<8x64xf32>
    %380 = vector.extract_strided_slice %368 {offsets = [0, 64], sizes = [8, 64], strides = [1, 1]} : vector<8x192xf32> to vector<8x64xf32>
    %381 = arith.addf %379, %380 : vector<8x64xf32>
    %cst_127 = arith.constant 5.000000e-01 : f32
    %382 = vector.broadcast %cst_127 : f32 to vector<8x64xf32>
    %383 = arith.mulf %382, %381 : vector<8x64xf32>
    %384 = math.tanh %383 : vector<8x64xf32>
    %cst_128 = arith.constant 5.000000e-01 : f32
    %385 = vector.broadcast %cst_128 : f32 to vector<8x64xf32>
    %386 = arith.mulf %385, %384 : vector<8x64xf32>
    %cst_129 = arith.constant 5.000000e-01 : f32
    %387 = vector.broadcast %cst_129 : f32 to vector<8x64xf32>
    %388 = arith.addf %386, %387 : vector<8x64xf32>
    %389 = vector.extract_strided_slice %364 {offsets = [0, 128], sizes = [8, 64], strides = [1, 1]} : vector<8x192xf32> to vector<8x64xf32>
    %390 = vector.extract_strided_slice %368 {offsets = [0, 128], sizes = [8, 64], strides = [1, 1]} : vector<8x192xf32> to vector<8x64xf32>
    %391 = arith.mulf %378, %390 : vector<8x64xf32>
    %392 = arith.addf %389, %391 : vector<8x64xf32>
    %393 = math.tanh %392 : vector<8x64xf32>
    %cst_130 = arith.constant 1.000000e+00 : f32
    %394 = vector.broadcast %cst_130 : f32 to vector<8x64xf32>
    %395 = arith.subf %394, %388 : vector<8x64xf32>
    %396 = arith.mulf %395, %393 : vector<8x64xf32>
    %397 = arith.mulf %388, %359 : vector<8x64xf32>
    %398 = arith.addf %396, %397 : vector<8x64xf32>
    %399 = vector.extract_strided_slice %398 {offsets = [0, 0], sizes = [8, 32], strides = [1, 1]} : vector<8x64xf32> to vector<8x32xf32>
    %c72_131 = arith.constant 72 : index
    %c0_132 = arith.constant 0 : index
    %400 = vector.load %arg6[%c72_131, %c0_132] : memref<128x64xf32, #tpu.memory_space<vmem>>, vector<8x32xf32>
    tpu.vector_store %arg6[%c72_131, %c0_132], %399 {strides = array<i32>} : memref<128x64xf32, #tpu.memory_space<vmem>>, vector<8x32xf32>,
    %401 = vector.extract_strided_slice %398 {offsets = [0, 32], sizes = [8, 32], strides = [1, 1]} : vector<8x64xf32> to vector<8x32xf32>
    %c48_133 = arith.constant 48 : index
    %c32_134 = arith.constant 32 : index
    %402 = vector.load %arg6[%c48_133, %c32_134] : memref<128x64xf32, #tpu.memory_space<vmem>>, vector<8x32xf32>
    tpu.vector_store %arg6[%c48_133, %c32_134], %401 {strides = array<i32>} : memref<128x64xf32, #tpu.memory_space<vmem>>, vector<8x32xf32>,
    %c80_135 = arith.constant 80 : index
    %c0_136 = arith.constant 0 : index
    %403 = vector.load %arg5[%c80_135, %c0_136] : memref<128x192xf32, #tpu.memory_space<vmem>>, vector<8x192xf32>
    %404 = arith.truncf %398 : vector<8x64xf32> to vector<8x64xbf16>
    %cst_137 = arith.constant dense<0.000000e+00> : vector<8x192xf32>
    %405 = tpu.matmul %404, %10, %cst_137 {dimension_numbers = #tpu.dot_dimension_numbers<[1], [0], [0], [1], [0, 0, 1, 1], [], []>} : vector<8x64xbf16>, vector<64x192xbf16>, vector<8x192xf32> -> vector<8x192xf32>
    %406 = vector.broadcast %11 : vector<1x192xf32> to vector<8x192xf32>
    %407 = arith.addf %405, %406 : vector<8x192xf32>
    %408 = vector.extract_strided_slice %403 {offsets = [0, 0], sizes = [8, 64], strides = [1, 1]} : vector<8x192xf32> to vector<8x64xf32>
    %409 = vector.extract_strided_slice %407 {offsets = [0, 0], sizes = [8, 64], strides = [1, 1]} : vector<8x192xf32> to vector<8x64xf32>
    %410 = arith.addf %408, %409 : vector<8x64xf32>
    %cst_138 = arith.constant 5.000000e-01 : f32
    %411 = vector.broadcast %cst_138 : f32 to vector<8x64xf32>
    %412 = arith.mulf %411, %410 : vector<8x64xf32>
    %413 = math.tanh %412 : vector<8x64xf32>
    %cst_139 = arith.constant 5.000000e-01 : f32
    %414 = vector.broadcast %cst_139 : f32 to vector<8x64xf32>
    %415 = arith.mulf %414, %413 : vector<8x64xf32>
    %cst_140 = arith.constant 5.000000e-01 : f32
    %416 = vector.broadcast %cst_140 : f32 to vector<8x64xf32>
    %417 = arith.addf %415, %416 : vector<8x64xf32>
    %418 = vector.extract_strided_slice %403 {offsets = [0, 64], sizes = [8, 64], strides = [1, 1]} : vector<8x192xf32> to vector<8x64xf32>
    %419 = vector.extract_strided_slice %407 {offsets = [0, 64], sizes = [8, 64], strides = [1, 1]} : vector<8x192xf32> to vector<8x64xf32>
    %420 = arith.addf %418, %419 : vector<8x64xf32>
    %cst_141 = arith.constant 5.000000e-01 : f32
    %421 = vector.broadcast %cst_141 : f32 to vector<8x64xf32>
    %422 = arith.mulf %421, %420 : vector<8x64xf32>
    %423 = math.tanh %422 : vector<8x64xf32>
    %cst_142 = arith.constant 5.000000e-01 : f32
    %424 = vector.broadcast %cst_142 : f32 to vector<8x64xf32>
    %425 = arith.mulf %424, %423 : vector<8x64xf32>
    %cst_143 = arith.constant 5.000000e-01 : f32
    %426 = vector.broadcast %cst_143 : f32 to vector<8x64xf32>
    %427 = arith.addf %425, %426 : vector<8x64xf32>
    %428 = vector.extract_strided_slice %403 {offsets = [0, 128], sizes = [8, 64], strides = [1, 1]} : vector<8x192xf32> to vector<8x64xf32>
    %429 = vector.extract_strided_slice %407 {offsets = [0, 128], sizes = [8, 64], strides = [1, 1]} : vector<8x192xf32> to vector<8x64xf32>
    %430 = arith.mulf %417, %429 : vector<8x64xf32>
    %431 = arith.addf %428, %430 : vector<8x64xf32>
    %432 = math.tanh %431 : vector<8x64xf32>
    %cst_144 = arith.constant 1.000000e+00 : f32
    %433 = vector.broadcast %cst_144 : f32 to vector<8x64xf32>
    %434 = arith.subf %433, %427 : vector<8x64xf32>
    %435 = arith.mulf %434, %432 : vector<8x64xf32>
    %436 = arith.mulf %427, %398 : vector<8x64xf32>
    %437 = arith.addf %435, %436 : vector<8x64xf32>
    %438 = vector.extract_strided_slice %437 {offsets = [0, 0], sizes = [8, 32], strides = [1, 1]} : vector<8x64xf32> to vector<8x32xf32>
    %c80_145 = arith.constant 80 : index
    %c0_146 = arith.constant 0 : index
    %439 = vector.load %arg6[%c80_145, %c0_146] : memref<128x64xf32, #tpu.memory_space<vmem>>, vector<8x32xf32>
    tpu.vector_store %arg6[%c80_145, %c0_146], %438 {strides = array<i32>} : memref<128x64xf32, #tpu.memory_space<vmem>>, vector<8x32xf32>,
    %440 = vector.extract_strided_slice %437 {offsets = [0, 32], sizes = [8, 32], strides = [1, 1]} : vector<8x64xf32> to vector<8x32xf32>
    %c40_147 = arith.constant 40 : index
    %c32_148 = arith.constant 32 : index
    %441 = vector.load %arg6[%c40_147, %c32_148] : memref<128x64xf32, #tpu.memory_space<vmem>>, vector<8x32xf32>
    tpu.vector_store %arg6[%c40_147, %c32_148], %440 {strides = array<i32>} : memref<128x64xf32, #tpu.memory_space<vmem>>, vector<8x32xf32>,
    %c88_149 = arith.constant 88 : index
    %c0_150 = arith.constant 0 : index
    %442 = vector.load %arg5[%c88_149, %c0_150] : memref<128x192xf32, #tpu.memory_space<vmem>>, vector<8x192xf32>
    %443 = arith.truncf %437 : vector<8x64xf32> to vector<8x64xbf16>
    %cst_151 = arith.constant dense<0.000000e+00> : vector<8x192xf32>
    %444 = tpu.matmul %443, %10, %cst_151 {dimension_numbers = #tpu.dot_dimension_numbers<[1], [0], [0], [1], [0, 0, 1, 1], [], []>} : vector<8x64xbf16>, vector<64x192xbf16>, vector<8x192xf32> -> vector<8x192xf32>
    %445 = vector.broadcast %11 : vector<1x192xf32> to vector<8x192xf32>
    %446 = arith.addf %444, %445 : vector<8x192xf32>
    %447 = vector.extract_strided_slice %442 {offsets = [0, 0], sizes = [8, 64], strides = [1, 1]} : vector<8x192xf32> to vector<8x64xf32>
    %448 = vector.extract_strided_slice %446 {offsets = [0, 0], sizes = [8, 64], strides = [1, 1]} : vector<8x192xf32> to vector<8x64xf32>
    %449 = arith.addf %447, %448 : vector<8x64xf32>
    %cst_152 = arith.constant 5.000000e-01 : f32
    %450 = vector.broadcast %cst_152 : f32 to vector<8x64xf32>
    %451 = arith.mulf %450, %449 : vector<8x64xf32>
    %452 = math.tanh %451 : vector<8x64xf32>
    %cst_153 = arith.constant 5.000000e-01 : f32
    %453 = vector.broadcast %cst_153 : f32 to vector<8x64xf32>
    %454 = arith.mulf %453, %452 : vector<8x64xf32>
    %cst_154 = arith.constant 5.000000e-01 : f32
    %455 = vector.broadcast %cst_154 : f32 to vector<8x64xf32>
    %456 = arith.addf %454, %455 : vector<8x64xf32>
    %457 = vector.extract_strided_slice %442 {offsets = [0, 64], sizes = [8, 64], strides = [1, 1]} : vector<8x192xf32> to vector<8x64xf32>
    %458 = vector.extract_strided_slice %446 {offsets = [0, 64], sizes = [8, 64], strides = [1, 1]} : vector<8x192xf32> to vector<8x64xf32>
    %459 = arith.addf %457, %458 : vector<8x64xf32>
    %cst_155 = arith.constant 5.000000e-01 : f32
    %460 = vector.broadcast %cst_155 : f32 to vector<8x64xf32>
    %461 = arith.mulf %460, %459 : vector<8x64xf32>
    %462 = math.tanh %461 : vector<8x64xf32>
    %cst_156 = arith.constant 5.000000e-01 : f32
    %463 = vector.broadcast %cst_156 : f32 to vector<8x64xf32>
    %464 = arith.mulf %463, %462 : vector<8x64xf32>
    %cst_157 = arith.constant 5.000000e-01 : f32
    %465 = vector.broadcast %cst_157 : f32 to vector<8x64xf32>
    %466 = arith.addf %464, %465 : vector<8x64xf32>
    %467 = vector.extract_strided_slice %442 {offsets = [0, 128], sizes = [8, 64], strides = [1, 1]} : vector<8x192xf32> to vector<8x64xf32>
    %468 = vector.extract_strided_slice %446 {offsets = [0, 128], sizes = [8, 64], strides = [1, 1]} : vector<8x192xf32> to vector<8x64xf32>
    %469 = arith.mulf %456, %468 : vector<8x64xf32>
    %470 = arith.addf %467, %469 : vector<8x64xf32>
    %471 = math.tanh %470 : vector<8x64xf32>
    %cst_158 = arith.constant 1.000000e+00 : f32
    %472 = vector.broadcast %cst_158 : f32 to vector<8x64xf32>
    %473 = arith.subf %472, %466 : vector<8x64xf32>
    %474 = arith.mulf %473, %471 : vector<8x64xf32>
    %475 = arith.mulf %466, %437 : vector<8x64xf32>
    %476 = arith.addf %474, %475 : vector<8x64xf32>
    %477 = vector.extract_strided_slice %476 {offsets = [0, 0], sizes = [8, 32], strides = [1, 1]} : vector<8x64xf32> to vector<8x32xf32>
    %c88_159 = arith.constant 88 : index
    %c0_160 = arith.constant 0 : index
    %478 = vector.load %arg6[%c88_159, %c0_160] : memref<128x64xf32, #tpu.memory_space<vmem>>, vector<8x32xf32>
    tpu.vector_store %arg6[%c88_159, %c0_160], %477 {strides = array<i32>} : memref<128x64xf32, #tpu.memory_space<vmem>>, vector<8x32xf32>,
    %479 = vector.extract_strided_slice %476 {offsets = [0, 32], sizes = [8, 32], strides = [1, 1]} : vector<8x64xf32> to vector<8x32xf32>
    %c32_161 = arith.constant 32 : index
    %c32_162 = arith.constant 32 : index
    %480 = vector.load %arg6[%c32_161, %c32_162] : memref<128x64xf32, #tpu.memory_space<vmem>>, vector<8x32xf32>
    tpu.vector_store %arg6[%c32_161, %c32_162], %479 {strides = array<i32>} : memref<128x64xf32, #tpu.memory_space<vmem>>, vector<8x32xf32>,
    %c96_163 = arith.constant 96 : index
    %c0_164 = arith.constant 0 : index
    %481 = vector.load %arg5[%c96_163, %c0_164] : memref<128x192xf32, #tpu.memory_space<vmem>>, vector<8x192xf32>
    %482 = arith.truncf %476 : vector<8x64xf32> to vector<8x64xbf16>
    %cst_165 = arith.constant dense<0.000000e+00> : vector<8x192xf32>
    %483 = tpu.matmul %482, %10, %cst_165 {dimension_numbers = #tpu.dot_dimension_numbers<[1], [0], [0], [1], [0, 0, 1, 1], [], []>} : vector<8x64xbf16>, vector<64x192xbf16>, vector<8x192xf32> -> vector<8x192xf32>
    %484 = vector.broadcast %11 : vector<1x192xf32> to vector<8x192xf32>
    %485 = arith.addf %483, %484 : vector<8x192xf32>
    %486 = vector.extract_strided_slice %481 {offsets = [0, 0], sizes = [8, 64], strides = [1, 1]} : vector<8x192xf32> to vector<8x64xf32>
    %487 = vector.extract_strided_slice %485 {offsets = [0, 0], sizes = [8, 64], strides = [1, 1]} : vector<8x192xf32> to vector<8x64xf32>
    %488 = arith.addf %486, %487 : vector<8x64xf32>
    %cst_166 = arith.constant 5.000000e-01 : f32
    %489 = vector.broadcast %cst_166 : f32 to vector<8x64xf32>
    %490 = arith.mulf %489, %488 : vector<8x64xf32>
    %491 = math.tanh %490 : vector<8x64xf32>
    %cst_167 = arith.constant 5.000000e-01 : f32
    %492 = vector.broadcast %cst_167 : f32 to vector<8x64xf32>
    %493 = arith.mulf %492, %491 : vector<8x64xf32>
    %cst_168 = arith.constant 5.000000e-01 : f32
    %494 = vector.broadcast %cst_168 : f32 to vector<8x64xf32>
    %495 = arith.addf %493, %494 : vector<8x64xf32>
    %496 = vector.extract_strided_slice %481 {offsets = [0, 64], sizes = [8, 64], strides = [1, 1]} : vector<8x192xf32> to vector<8x64xf32>
    %497 = vector.extract_strided_slice %485 {offsets = [0, 64], sizes = [8, 64], strides = [1, 1]} : vector<8x192xf32> to vector<8x64xf32>
    %498 = arith.addf %496, %497 : vector<8x64xf32>
    %cst_169 = arith.constant 5.000000e-01 : f32
    %499 = vector.broadcast %cst_169 : f32 to vector<8x64xf32>
    %500 = arith.mulf %499, %498 : vector<8x64xf32>
    %501 = math.tanh %500 : vector<8x64xf32>
    %cst_170 = arith.constant 5.000000e-01 : f32
    %502 = vector.broadcast %cst_170 : f32 to vector<8x64xf32>
    %503 = arith.mulf %502, %501 : vector<8x64xf32>
    %cst_171 = arith.constant 5.000000e-01 : f32
    %504 = vector.broadcast %cst_171 : f32 to vector<8x64xf32>
    %505 = arith.addf %503, %504 : vector<8x64xf32>
    %506 = vector.extract_strided_slice %481 {offsets = [0, 128], sizes = [8, 64], strides = [1, 1]} : vector<8x192xf32> to vector<8x64xf32>
    %507 = vector.extract_strided_slice %485 {offsets = [0, 128], sizes = [8, 64], strides = [1, 1]} : vector<8x192xf32> to vector<8x64xf32>
    %508 = arith.mulf %495, %507 : vector<8x64xf32>
    %509 = arith.addf %506, %508 : vector<8x64xf32>
    %510 = math.tanh %509 : vector<8x64xf32>
    %cst_172 = arith.constant 1.000000e+00 : f32
    %511 = vector.broadcast %cst_172 : f32 to vector<8x64xf32>
    %512 = arith.subf %511, %505 : vector<8x64xf32>
    %513 = arith.mulf %512, %510 : vector<8x64xf32>
    %514 = arith.mulf %505, %476 : vector<8x64xf32>
    %515 = arith.addf %513, %514 : vector<8x64xf32>
    %516 = vector.extract_strided_slice %515 {offsets = [0, 0], sizes = [8, 32], strides = [1, 1]} : vector<8x64xf32> to vector<8x32xf32>
    %c96_173 = arith.constant 96 : index
    %c0_174 = arith.constant 0 : index
    %517 = vector.load %arg6[%c96_173, %c0_174] : memref<128x64xf32, #tpu.memory_space<vmem>>, vector<8x32xf32>
    tpu.vector_store %arg6[%c96_173, %c0_174], %516 {strides = array<i32>} : memref<128x64xf32, #tpu.memory_space<vmem>>, vector<8x32xf32>,
    %518 = vector.extract_strided_slice %515 {offsets = [0, 32], sizes = [8, 32], strides = [1, 1]} : vector<8x64xf32> to vector<8x32xf32>
    %c24_175 = arith.constant 24 : index
    %c32_176 = arith.constant 32 : index
    %519 = vector.load %arg6[%c24_175, %c32_176] : memref<128x64xf32, #tpu.memory_space<vmem>>, vector<8x32xf32>
    tpu.vector_store %arg6[%c24_175, %c32_176], %518 {strides = array<i32>} : memref<128x64xf32, #tpu.memory_space<vmem>>, vector<8x32xf32>,
    %c104_177 = arith.constant 104 : index
    %c0_178 = arith.constant 0 : index
    %520 = vector.load %arg5[%c104_177, %c0_178] : memref<128x192xf32, #tpu.memory_space<vmem>>, vector<8x192xf32>
    %521 = arith.truncf %515 : vector<8x64xf32> to vector<8x64xbf16>
    %cst_179 = arith.constant dense<0.000000e+00> : vector<8x192xf32>
    %522 = tpu.matmul %521, %10, %cst_179 {dimension_numbers = #tpu.dot_dimension_numbers<[1], [0], [0], [1], [0, 0, 1, 1], [], []>} : vector<8x64xbf16>, vector<64x192xbf16>, vector<8x192xf32> -> vector<8x192xf32>
    %523 = vector.broadcast %11 : vector<1x192xf32> to vector<8x192xf32>
    %524 = arith.addf %522, %523 : vector<8x192xf32>
    %525 = vector.extract_strided_slice %520 {offsets = [0, 0], sizes = [8, 64], strides = [1, 1]} : vector<8x192xf32> to vector<8x64xf32>
    %526 = vector.extract_strided_slice %524 {offsets = [0, 0], sizes = [8, 64], strides = [1, 1]} : vector<8x192xf32> to vector<8x64xf32>
    %527 = arith.addf %525, %526 : vector<8x64xf32>
    %cst_180 = arith.constant 5.000000e-01 : f32
    %528 = vector.broadcast %cst_180 : f32 to vector<8x64xf32>
    %529 = arith.mulf %528, %527 : vector<8x64xf32>
    %530 = math.tanh %529 : vector<8x64xf32>
    %cst_181 = arith.constant 5.000000e-01 : f32
    %531 = vector.broadcast %cst_181 : f32 to vector<8x64xf32>
    %532 = arith.mulf %531, %530 : vector<8x64xf32>
    %cst_182 = arith.constant 5.000000e-01 : f32
    %533 = vector.broadcast %cst_182 : f32 to vector<8x64xf32>
    %534 = arith.addf %532, %533 : vector<8x64xf32>
    %535 = vector.extract_strided_slice %520 {offsets = [0, 64], sizes = [8, 64], strides = [1, 1]} : vector<8x192xf32> to vector<8x64xf32>
    %536 = vector.extract_strided_slice %524 {offsets = [0, 64], sizes = [8, 64], strides = [1, 1]} : vector<8x192xf32> to vector<8x64xf32>
    %537 = arith.addf %535, %536 : vector<8x64xf32>
    %cst_183 = arith.constant 5.000000e-01 : f32
    %538 = vector.broadcast %cst_183 : f32 to vector<8x64xf32>
    %539 = arith.mulf %538, %537 : vector<8x64xf32>
    %540 = math.tanh %539 : vector<8x64xf32>
    %cst_184 = arith.constant 5.000000e-01 : f32
    %541 = vector.broadcast %cst_184 : f32 to vector<8x64xf32>
    %542 = arith.mulf %541, %540 : vector<8x64xf32>
    %cst_185 = arith.constant 5.000000e-01 : f32
    %543 = vector.broadcast %cst_185 : f32 to vector<8x64xf32>
    %544 = arith.addf %542, %543 : vector<8x64xf32>
    %545 = vector.extract_strided_slice %520 {offsets = [0, 128], sizes = [8, 64], strides = [1, 1]} : vector<8x192xf32> to vector<8x64xf32>
    %546 = vector.extract_strided_slice %524 {offsets = [0, 128], sizes = [8, 64], strides = [1, 1]} : vector<8x192xf32> to vector<8x64xf32>
    %547 = arith.mulf %534, %546 : vector<8x64xf32>
    %548 = arith.addf %545, %547 : vector<8x64xf32>
    %549 = math.tanh %548 : vector<8x64xf32>
    %cst_186 = arith.constant 1.000000e+00 : f32
    %550 = vector.broadcast %cst_186 : f32 to vector<8x64xf32>
    %551 = arith.subf %550, %544 : vector<8x64xf32>
    %552 = arith.mulf %551, %549 : vector<8x64xf32>
    %553 = arith.mulf %544, %515 : vector<8x64xf32>
    %554 = arith.addf %552, %553 : vector<8x64xf32>
    %555 = vector.extract_strided_slice %554 {offsets = [0, 0], sizes = [8, 32], strides = [1, 1]} : vector<8x64xf32> to vector<8x32xf32>
    %c104_187 = arith.constant 104 : index
    %c0_188 = arith.constant 0 : index
    %556 = vector.load %arg6[%c104_187, %c0_188] : memref<128x64xf32, #tpu.memory_space<vmem>>, vector<8x32xf32>
    tpu.vector_store %arg6[%c104_187, %c0_188], %555 {strides = array<i32>} : memref<128x64xf32, #tpu.memory_space<vmem>>, vector<8x32xf32>,
    %557 = vector.extract_strided_slice %554 {offsets = [0, 32], sizes = [8, 32], strides = [1, 1]} : vector<8x64xf32> to vector<8x32xf32>
    %c16_189 = arith.constant 16 : index
    %c32_190 = arith.constant 32 : index
    %558 = vector.load %arg6[%c16_189, %c32_190] : memref<128x64xf32, #tpu.memory_space<vmem>>, vector<8x32xf32>
    tpu.vector_store %arg6[%c16_189, %c32_190], %557 {strides = array<i32>} : memref<128x64xf32, #tpu.memory_space<vmem>>, vector<8x32xf32>,
    %c112_191 = arith.constant 112 : index
    %c0_192 = arith.constant 0 : index
    %559 = vector.load %arg5[%c112_191, %c0_192] : memref<128x192xf32, #tpu.memory_space<vmem>>, vector<8x192xf32>
    %560 = arith.truncf %554 : vector<8x64xf32> to vector<8x64xbf16>
    %cst_193 = arith.constant dense<0.000000e+00> : vector<8x192xf32>
    %561 = tpu.matmul %560, %10, %cst_193 {dimension_numbers = #tpu.dot_dimension_numbers<[1], [0], [0], [1], [0, 0, 1, 1], [], []>} : vector<8x64xbf16>, vector<64x192xbf16>, vector<8x192xf32> -> vector<8x192xf32>
    %562 = vector.broadcast %11 : vector<1x192xf32> to vector<8x192xf32>
    %563 = arith.addf %561, %562 : vector<8x192xf32>
    %564 = vector.extract_strided_slice %559 {offsets = [0, 0], sizes = [8, 64], strides = [1, 1]} : vector<8x192xf32> to vector<8x64xf32>
    %565 = vector.extract_strided_slice %563 {offsets = [0, 0], sizes = [8, 64], strides = [1, 1]} : vector<8x192xf32> to vector<8x64xf32>
    %566 = arith.addf %564, %565 : vector<8x64xf32>
    %cst_194 = arith.constant 5.000000e-01 : f32
    %567 = vector.broadcast %cst_194 : f32 to vector<8x64xf32>
    %568 = arith.mulf %567, %566 : vector<8x64xf32>
    %569 = math.tanh %568 : vector<8x64xf32>
    %cst_195 = arith.constant 5.000000e-01 : f32
    %570 = vector.broadcast %cst_195 : f32 to vector<8x64xf32>
    %571 = arith.mulf %570, %569 : vector<8x64xf32>
    %cst_196 = arith.constant 5.000000e-01 : f32
    %572 = vector.broadcast %cst_196 : f32 to vector<8x64xf32>
    %573 = arith.addf %571, %572 : vector<8x64xf32>
    %574 = vector.extract_strided_slice %559 {offsets = [0, 64], sizes = [8, 64], strides = [1, 1]} : vector<8x192xf32> to vector<8x64xf32>
    %575 = vector.extract_strided_slice %563 {offsets = [0, 64], sizes = [8, 64], strides = [1, 1]} : vector<8x192xf32> to vector<8x64xf32>
    %576 = arith.addf %574, %575 : vector<8x64xf32>
    %cst_197 = arith.constant 5.000000e-01 : f32
    %577 = vector.broadcast %cst_197 : f32 to vector<8x64xf32>
    %578 = arith.mulf %577, %576 : vector<8x64xf32>
    %579 = math.tanh %578 : vector<8x64xf32>
    %cst_198 = arith.constant 5.000000e-01 : f32
    %580 = vector.broadcast %cst_198 : f32 to vector<8x64xf32>
    %581 = arith.mulf %580, %579 : vector<8x64xf32>
    %cst_199 = arith.constant 5.000000e-01 : f32
    %582 = vector.broadcast %cst_199 : f32 to vector<8x64xf32>
    %583 = arith.addf %581, %582 : vector<8x64xf32>
    %584 = vector.extract_strided_slice %559 {offsets = [0, 128], sizes = [8, 64], strides = [1, 1]} : vector<8x192xf32> to vector<8x64xf32>
    %585 = vector.extract_strided_slice %563 {offsets = [0, 128], sizes = [8, 64], strides = [1, 1]} : vector<8x192xf32> to vector<8x64xf32>
    %586 = arith.mulf %573, %585 : vector<8x64xf32>
    %587 = arith.addf %584, %586 : vector<8x64xf32>
    %588 = math.tanh %587 : vector<8x64xf32>
    %cst_200 = arith.constant 1.000000e+00 : f32
    %589 = vector.broadcast %cst_200 : f32 to vector<8x64xf32>
    %590 = arith.subf %589, %583 : vector<8x64xf32>
    %591 = arith.mulf %590, %588 : vector<8x64xf32>
    %592 = arith.mulf %583, %554 : vector<8x64xf32>
    %593 = arith.addf %591, %592 : vector<8x64xf32>
    %594 = vector.extract_strided_slice %593 {offsets = [0, 0], sizes = [8, 32], strides = [1, 1]} : vector<8x64xf32> to vector<8x32xf32>
    %c112_201 = arith.constant 112 : index
    %c0_202 = arith.constant 0 : index
    %595 = vector.load %arg6[%c112_201, %c0_202] : memref<128x64xf32, #tpu.memory_space<vmem>>, vector<8x32xf32>
    tpu.vector_store %arg6[%c112_201, %c0_202], %594 {strides = array<i32>} : memref<128x64xf32, #tpu.memory_space<vmem>>, vector<8x32xf32>,
    %596 = vector.extract_strided_slice %593 {offsets = [0, 32], sizes = [8, 32], strides = [1, 1]} : vector<8x64xf32> to vector<8x32xf32>
    %c8_203 = arith.constant 8 : index
    %c32_204 = arith.constant 32 : index
    %597 = vector.load %arg6[%c8_203, %c32_204] : memref<128x64xf32, #tpu.memory_space<vmem>>, vector<8x32xf32>
    tpu.vector_store %arg6[%c8_203, %c32_204], %596 {strides = array<i32>} : memref<128x64xf32, #tpu.memory_space<vmem>>, vector<8x32xf32>,
    %c120_205 = arith.constant 120 : index
    %c0_206 = arith.constant 0 : index
    %598 = vector.load %arg5[%c120_205, %c0_206] : memref<128x192xf32, #tpu.memory_space<vmem>>, vector<8x192xf32>
    %599 = arith.truncf %593 : vector<8x64xf32> to vector<8x64xbf16>
    %cst_207 = arith.constant dense<0.000000e+00> : vector<8x192xf32>
    %600 = tpu.matmul %599, %10, %cst_207 {dimension_numbers = #tpu.dot_dimension_numbers<[1], [0], [0], [1], [0, 0, 1, 1], [], []>} : vector<8x64xbf16>, vector<64x192xbf16>, vector<8x192xf32> -> vector<8x192xf32>
    %601 = vector.broadcast %11 : vector<1x192xf32> to vector<8x192xf32>
    %602 = arith.addf %600, %601 : vector<8x192xf32>
    %603 = vector.extract_strided_slice %598 {offsets = [0, 0], sizes = [8, 64], strides = [1, 1]} : vector<8x192xf32> to vector<8x64xf32>
    %604 = vector.extract_strided_slice %602 {offsets = [0, 0], sizes = [8, 64], strides = [1, 1]} : vector<8x192xf32> to vector<8x64xf32>
    %605 = arith.addf %603, %604 : vector<8x64xf32>
    %cst_208 = arith.constant 5.000000e-01 : f32
    %606 = vector.broadcast %cst_208 : f32 to vector<8x64xf32>
    %607 = arith.mulf %606, %605 : vector<8x64xf32>
    %608 = math.tanh %607 : vector<8x64xf32>
    %cst_209 = arith.constant 5.000000e-01 : f32
    %609 = vector.broadcast %cst_209 : f32 to vector<8x64xf32>
    %610 = arith.mulf %609, %608 : vector<8x64xf32>
    %cst_210 = arith.constant 5.000000e-01 : f32
    %611 = vector.broadcast %cst_210 : f32 to vector<8x64xf32>
    %612 = arith.addf %610, %611 : vector<8x64xf32>
    %613 = vector.extract_strided_slice %598 {offsets = [0, 64], sizes = [8, 64], strides = [1, 1]} : vector<8x192xf32> to vector<8x64xf32>
    %614 = vector.extract_strided_slice %602 {offsets = [0, 64], sizes = [8, 64], strides = [1, 1]} : vector<8x192xf32> to vector<8x64xf32>
    %615 = arith.addf %613, %614 : vector<8x64xf32>
    %cst_211 = arith.constant 5.000000e-01 : f32
    %616 = vector.broadcast %cst_211 : f32 to vector<8x64xf32>
    %617 = arith.mulf %616, %615 : vector<8x64xf32>
    %618 = math.tanh %617 : vector<8x64xf32>
    %cst_212 = arith.constant 5.000000e-01 : f32
    %619 = vector.broadcast %cst_212 : f32 to vector<8x64xf32>
    %620 = arith.mulf %619, %618 : vector<8x64xf32>
    %cst_213 = arith.constant 5.000000e-01 : f32
    %621 = vector.broadcast %cst_213 : f32 to vector<8x64xf32>
    %622 = arith.addf %620, %621 : vector<8x64xf32>
    %623 = vector.extract_strided_slice %598 {offsets = [0, 128], sizes = [8, 64], strides = [1, 1]} : vector<8x192xf32> to vector<8x64xf32>
    %624 = vector.extract_strided_slice %602 {offsets = [0, 128], sizes = [8, 64], strides = [1, 1]} : vector<8x192xf32> to vector<8x64xf32>
    %625 = arith.mulf %612, %624 : vector<8x64xf32>
    %626 = arith.addf %623, %625 : vector<8x64xf32>
    %627 = math.tanh %626 : vector<8x64xf32>
    %cst_214 = arith.constant 1.000000e+00 : f32
    %628 = vector.broadcast %cst_214 : f32 to vector<8x64xf32>
    %629 = arith.subf %628, %622 : vector<8x64xf32>
    %630 = arith.mulf %629, %627 : vector<8x64xf32>
    %631 = arith.mulf %622, %593 : vector<8x64xf32>
    %632 = arith.addf %630, %631 : vector<8x64xf32>
    %633 = vector.extract_strided_slice %632 {offsets = [0, 0], sizes = [8, 32], strides = [1, 1]} : vector<8x64xf32> to vector<8x32xf32>
    %c120_215 = arith.constant 120 : index
    %c0_216 = arith.constant 0 : index
    %634 = vector.load %arg6[%c120_215, %c0_216] : memref<128x64xf32, #tpu.memory_space<vmem>>, vector<8x32xf32>
    tpu.vector_store %arg6[%c120_215, %c0_216], %633 {strides = array<i32>} : memref<128x64xf32, #tpu.memory_space<vmem>>, vector<8x32xf32>,
    %635 = vector.extract_strided_slice %632 {offsets = [0, 32], sizes = [8, 32], strides = [1, 1]} : vector<8x64xf32> to vector<8x32xf32>
    %c0_217 = arith.constant 0 : index
    %c32_218 = arith.constant 32 : index
    %636 = vector.load %arg6[%c0_217, %c32_218] : memref<128x64xf32, #tpu.memory_space<vmem>>, vector<8x32xf32>
    tpu.vector_store %arg6[%c0_217, %c32_218], %635 {strides = array<i32>} : memref<128x64xf32, #tpu.memory_space<vmem>>, vector<8x32xf32>,
    %c0_219 = arith.constant 0 : index
    %c0_220 = arith.constant 0 : index
    %637 = vector.load %arg6[%c0_219, %c0_220] : memref<128x64xf32, #tpu.memory_space<vmem>>, vector<128x64xf32>
    %cst_221 = arith.constant 0.000000e+00 : f32
    %638 = vector.broadcast %cst_221 : f32 to vector<128x64xf32>
    %639 = arith.maximumf %637, %638 : vector<128x64xf32>
    %640 = vector.shape_cast %639 : vector<128x64xf32> to vector<16x8x64xf32>
    %c112_222 = arith.constant 112 : index
    %c0_223 = arith.constant 0 : index
    %641 = vector.load %arg2[%c112_222, %c0_223] : memref<120x128xf32, #tpu.memory_space<vmem>>, vector<1x64xf32>
    %642 = vector.shape_cast %641 : vector<1x64xf32> to vector<1x1x64xf32>
    %c113 = arith.constant 113 : index
    %c0_224 = arith.constant 0 : index
    %643 = vector.load %arg2[%c113, %c0_224] : memref<120x128xf32, #tpu.memory_space<vmem>>, vector<1x1xf32>
    %644 = vector.broadcast %642 : vector<1x1x64xf32> to vector<16x8x64xf32>
    %645 = arith.mulf %640, %644 : vector<16x8x64xf32>
    %cst_225 = arith.constant dense<0.000000e+00> : vector<16x8xf32>
    %646 = vector.multi_reduction <add>, %645, %cst_225 [2] : vector<16x8x64xf32> to vector<16x8xf32>
    %647 = vector.broadcast %643 : vector<1x1xf32> to vector<16x8xf32>
    %648 = arith.addf %646, %647 : vector<16x8xf32>
    %cst_226 = arith.constant 0.000000e+00 : f32
    %649 = vector.broadcast %cst_226 : f32 to vector<16x8xf32>
    %650 = arith.maximumf %648, %649 : vector<16x8xf32>
    %c0_227 = arith.constant 0 : index
    %c0_228 = arith.constant 0 : index
    %651 = vector.load %arg2[%c0_227, %c0_228] : memref<120x128xf32, #tpu.memory_space<vmem>>, vector<16x16xf32>
    %c0_229 = arith.constant 0 : index
    %c16_230 = arith.constant 16 : index
    %652 = vector.load %arg2[%c0_229, %c16_230] : memref<120x128xf32, #tpu.memory_space<vmem>>, vector<16x1xf32>
    %cst_231 = arith.constant dense<0.000000e+00> : vector<16x8xf32>
    %653 = tpu.matmul %651, %650, %cst_231 {dimension_numbers = #tpu.dot_dimension_numbers<[1], [0], [0], [1], [0, 0, 1, 1], [], []>} : vector<16x16xf32>, vector<16x8xf32>, vector<16x8xf32> -> vector<16x8xf32>
    %654 = vector.broadcast %652 : vector<16x1xf32> to vector<16x8xf32>
    %655 = arith.addf %653, %654 : vector<16x8xf32>
    %cst_232 = arith.constant 0.000000e+00 : f32
    %656 = vector.broadcast %cst_232 : f32 to vector<16x8xf32>
    %657 = arith.maximumf %655, %656 : vector<16x8xf32>
    %c0_233 = arith.constant 0 : index
    %c0_234 = arith.constant 0 : index
    %658 = vector.load %arg4[%c0_233, %c0_234] : memref<16x8xf32, #tpu.memory_space<vmem>>, vector<16x8xf32>
    tpu.vector_store %arg4[%c0_233, %c0_234], %657 {strides = array<i32>} : memref<16x8xf32, #tpu.memory_space<vmem>>, vector<16x8xf32>,
    %c16_235 = arith.constant 16 : index
    %c0_236 = arith.constant 0 : index
    %659 = vector.load %arg2[%c16_235, %c0_236] : memref<120x128xf32, #tpu.memory_space<vmem>>, vector<32x8xf32>
    %c16_237 = arith.constant 16 : index
    %c8_238 = arith.constant 8 : index
    %660 = vector.load %arg2[%c16_237, %c8_238] : memref<120x128xf32, #tpu.memory_space<vmem>>, vector<32x1xf32>
    %661 = vector.extract_strided_slice %657 {offsets = [0, 0], sizes = [8, 8], strides = [1, 1]} : vector<16x8xf32> to vector<8x8xf32>
    %cst_239 = arith.constant dense<0.000000e+00> : vector<32x8xf32>
    %662 = tpu.matmul %659, %661, %cst_239 {dimension_numbers = #tpu.dot_dimension_numbers<[1], [0], [0], [1], [0, 0, 1, 1], [], []>} : vector<32x8xf32>, vector<8x8xf32>, vector<32x8xf32> -> vector<32x8xf32>
    %663 = vector.broadcast %660 : vector<32x1xf32> to vector<32x8xf32>
    %664 = arith.addf %662, %663 : vector<32x8xf32>
    %cst_240 = arith.constant 0.000000e+00 : f32
    %665 = vector.broadcast %cst_240 : f32 to vector<32x8xf32>
    %666 = arith.maximumf %664, %665 : vector<32x8xf32>
    %c164 = arith.constant 164 : index
    %c0_241 = arith.constant 0 : index
    %667 = vector.load %arg1[%c164, %c0_241] : memref<168x192xf32, #tpu.memory_space<vmem>>, vector<1x192xf32>
    %668 = vector.shape_cast %667 : vector<1x192xf32> to vector<1x1x192xf32>
    %c165 = arith.constant 165 : index
    %c0_242 = arith.constant 0 : index
    %669 = vector.load %arg1[%c165, %c0_242] : memref<168x192xf32, #tpu.memory_space<vmem>>, vector<1x192xf32>
    %670 = vector.shape_cast %669 : vector<1x192xf32> to vector<1x1x192xf32>
    %c162 = arith.constant 162 : index
    %c0_243 = arith.constant 0 : index
    %671 = vector.load %arg1[%c162, %c0_243] : memref<168x192xf32, #tpu.memory_space<vmem>>, vector<1x192xf32>
    %672 = vector.shape_cast %671 : vector<1x192xf32> to vector<1x1x192xf32>
    %673 = vector.extract_strided_slice %666 {offsets = [0, 0], sizes = [16, 8], strides = [1, 1]} : vector<32x8xf32> to vector<16x8xf32>
    %674 = vector.shape_cast %673 : vector<16x8xf32> to vector<16x8x1xf32>
    %675 = vector.broadcast %674 : vector<16x8x1xf32> to vector<16x8x192xf32>
    %676 = vector.broadcast %668 : vector<1x1x192xf32> to vector<16x8x192xf32>
    %677 = arith.mulf %675, %676 : vector<16x8x192xf32>
    %678 = vector.extract_strided_slice %666 {offsets = [16, 0], sizes = [16, 8], strides = [1, 1]} : vector<32x8xf32> to vector<16x8xf32>
    %679 = vector.shape_cast %678 : vector<16x8xf32> to vector<16x8x1xf32>
    %680 = vector.broadcast %679 : vector<16x8x1xf32> to vector<16x8x192xf32>
    %681 = vector.broadcast %670 : vector<1x1x192xf32> to vector<16x8x192xf32>
    %682 = arith.mulf %680, %681 : vector<16x8x192xf32>
    %683 = arith.addf %677, %682 : vector<16x8x192xf32>
    %684 = vector.broadcast %672 : vector<1x1x192xf32> to vector<16x8x192xf32>
    %685 = arith.addf %683, %684 : vector<16x8x192xf32>
    %686 = vector.shape_cast %685 : vector<16x8x192xf32> to vector<128x192xf32>
    %c0_244 = arith.constant 0 : index
    %c0_245 = arith.constant 0 : index
    %687 = vector.load %arg5[%c0_244, %c0_245] : memref<128x192xf32, #tpu.memory_space<vmem>>, vector<128x192xf32>
    tpu.vector_store %arg5[%c0_244, %c0_245], %686 {strides = array<i32>} : memref<128x192xf32, #tpu.memory_space<vmem>>, vector<128x192xf32>,
    %c96_246 = arith.constant 96 : index
    %c0_247 = arith.constant 0 : index
    %688 = vector.load %arg1[%c96_246, %c0_247] : memref<168x192xf32, #tpu.memory_space<vmem>>, vector<64x192xf32>
    %689 = arith.truncf %688 : vector<64x192xf32> to vector<64x192xbf16>
    %c163 = arith.constant 163 : index
    %c0_248 = arith.constant 0 : index
    %690 = vector.load %arg1[%c163, %c0_248] : memref<168x192xf32, #tpu.memory_space<vmem>>, vector<1x192xf32>
    %cst_249 = arith.constant 0.000000e+00 : f32
    %691 = vector.broadcast %cst_249 : f32 to vector<8x64xf32>
    %c0_250 = arith.constant 0 : index
    %c0_251 = arith.constant 0 : index
    %692 = vector.load %arg5[%c0_250, %c0_251] : memref<128x192xf32, #tpu.memory_space<vmem>>, vector<8x192xf32>
    %693 = arith.truncf %691 : vector<8x64xf32> to vector<8x64xbf16>
    %cst_252 = arith.constant dense<0.000000e+00> : vector<8x192xf32>
    %694 = tpu.matmul %693, %689, %cst_252 {dimension_numbers = #tpu.dot_dimension_numbers<[1], [0], [0], [1], [0, 0, 1, 1], [], []>} : vector<8x64xbf16>, vector<64x192xbf16>, vector<8x192xf32> -> vector<8x192xf32>
    %695 = vector.broadcast %690 : vector<1x192xf32> to vector<8x192xf32>
    %696 = arith.addf %694, %695 : vector<8x192xf32>
    %697 = vector.extract_strided_slice %692 {offsets = [0, 0], sizes = [8, 64], strides = [1, 1]} : vector<8x192xf32> to vector<8x64xf32>
    %698 = vector.extract_strided_slice %696 {offsets = [0, 0], sizes = [8, 64], strides = [1, 1]} : vector<8x192xf32> to vector<8x64xf32>
    %699 = arith.addf %697, %698 : vector<8x64xf32>
    %cst_253 = arith.constant 5.000000e-01 : f32
    %700 = vector.broadcast %cst_253 : f32 to vector<8x64xf32>
    %701 = arith.mulf %700, %699 : vector<8x64xf32>
    %702 = math.tanh %701 : vector<8x64xf32>
    %cst_254 = arith.constant 5.000000e-01 : f32
    %703 = vector.broadcast %cst_254 : f32 to vector<8x64xf32>
    %704 = arith.mulf %703, %702 : vector<8x64xf32>
    %cst_255 = arith.constant 5.000000e-01 : f32
    %705 = vector.broadcast %cst_255 : f32 to vector<8x64xf32>
    %706 = arith.addf %704, %705 : vector<8x64xf32>
    %707 = vector.extract_strided_slice %692 {offsets = [0, 64], sizes = [8, 64], strides = [1, 1]} : vector<8x192xf32> to vector<8x64xf32>
    %708 = vector.extract_strided_slice %696 {offsets = [0, 64], sizes = [8, 64], strides = [1, 1]} : vector<8x192xf32> to vector<8x64xf32>
    %709 = arith.addf %707, %708 : vector<8x64xf32>
    %cst_256 = arith.constant 5.000000e-01 : f32
    %710 = vector.broadcast %cst_256 : f32 to vector<8x64xf32>
    %711 = arith.mulf %710, %709 : vector<8x64xf32>
    %712 = math.tanh %711 : vector<8x64xf32>
    %cst_257 = arith.constant 5.000000e-01 : f32
    %713 = vector.broadcast %cst_257 : f32 to vector<8x64xf32>
    %714 = arith.mulf %713, %712 : vector<8x64xf32>
    %cst_258 = arith.constant 5.000000e-01 : f32
    %715 = vector.broadcast %cst_258 : f32 to vector<8x64xf32>
    %716 = arith.addf %714, %715 : vector<8x64xf32>
    %717 = vector.extract_strided_slice %692 {offsets = [0, 128], sizes = [8, 64], strides = [1, 1]} : vector<8x192xf32> to vector<8x64xf32>
    %718 = vector.extract_strided_slice %696 {offsets = [0, 128], sizes = [8, 64], strides = [1, 1]} : vector<8x192xf32> to vector<8x64xf32>
    %719 = arith.mulf %706, %718 : vector<8x64xf32>
    %720 = arith.addf %717, %719 : vector<8x64xf32>
    %721 = math.tanh %720 : vector<8x64xf32>
    %cst_259 = arith.constant 1.000000e+00 : f32
    %722 = vector.broadcast %cst_259 : f32 to vector<8x64xf32>
    %723 = arith.subf %722, %716 : vector<8x64xf32>
    %724 = arith.mulf %723, %721 : vector<8x64xf32>
    %725 = arith.mulf %716, %691 : vector<8x64xf32>
    %726 = arith.addf %724, %725 : vector<8x64xf32>
    %727 = vector.extract_strided_slice %726 {offsets = [0, 0], sizes = [8, 32], strides = [1, 1]} : vector<8x64xf32> to vector<8x32xf32>
    %c0_260 = arith.constant 0 : index
    %c0_261 = arith.constant 0 : index
    %728 = vector.load %arg6[%c0_260, %c0_261] : memref<128x64xf32, #tpu.memory_space<vmem>>, vector<8x32xf32>
    tpu.vector_store %arg6[%c0_260, %c0_261], %727 {strides = array<i32>} : memref<128x64xf32, #tpu.memory_space<vmem>>, vector<8x32xf32>,
    %729 = vector.extract_strided_slice %726 {offsets = [0, 32], sizes = [8, 32], strides = [1, 1]} : vector<8x64xf32> to vector<8x32xf32>
    %c120_262 = arith.constant 120 : index
    %c32_263 = arith.constant 32 : index
    %730 = vector.load %arg6[%c120_262, %c32_263] : memref<128x64xf32, #tpu.memory_space<vmem>>, vector<8x32xf32>
    tpu.vector_store %arg6[%c120_262, %c32_263], %729 {strides = array<i32>} : memref<128x64xf32, #tpu.memory_space<vmem>>, vector<8x32xf32>,
    %c8_264 = arith.constant 8 : index
    %c0_265 = arith.constant 0 : index
    %731 = vector.load %arg5[%c8_264, %c0_265] : memref<128x192xf32, #tpu.memory_space<vmem>>, vector<8x192xf32>
    %732 = arith.truncf %726 : vector<8x64xf32> to vector<8x64xbf16>
    %cst_266 = arith.constant dense<0.000000e+00> : vector<8x192xf32>
    %733 = tpu.matmul %732, %689, %cst_266 {dimension_numbers = #tpu.dot_dimension_numbers<[1], [0], [0], [1], [0, 0, 1, 1], [], []>} : vector<8x64xbf16>, vector<64x192xbf16>, vector<8x192xf32> -> vector<8x192xf32>
    %734 = vector.broadcast %690 : vector<1x192xf32> to vector<8x192xf32>
    %735 = arith.addf %733, %734 : vector<8x192xf32>
    %736 = vector.extract_strided_slice %731 {offsets = [0, 0], sizes = [8, 64], strides = [1, 1]} : vector<8x192xf32> to vector<8x64xf32>
    %737 = vector.extract_strided_slice %735 {offsets = [0, 0], sizes = [8, 64], strides = [1, 1]} : vector<8x192xf32> to vector<8x64xf32>
    %738 = arith.addf %736, %737 : vector<8x64xf32>
    %cst_267 = arith.constant 5.000000e-01 : f32
    %739 = vector.broadcast %cst_267 : f32 to vector<8x64xf32>
    %740 = arith.mulf %739, %738 : vector<8x64xf32>
    %741 = math.tanh %740 : vector<8x64xf32>
    %cst_268 = arith.constant 5.000000e-01 : f32
    %742 = vector.broadcast %cst_268 : f32 to vector<8x64xf32>
    %743 = arith.mulf %742, %741 : vector<8x64xf32>
    %cst_269 = arith.constant 5.000000e-01 : f32
    %744 = vector.broadcast %cst_269 : f32 to vector<8x64xf32>
    %745 = arith.addf %743, %744 : vector<8x64xf32>
    %746 = vector.extract_strided_slice %731 {offsets = [0, 64], sizes = [8, 64], strides = [1, 1]} : vector<8x192xf32> to vector<8x64xf32>
    %747 = vector.extract_strided_slice %735 {offsets = [0, 64], sizes = [8, 64], strides = [1, 1]} : vector<8x192xf32> to vector<8x64xf32>
    %748 = arith.addf %746, %747 : vector<8x64xf32>
    %cst_270 = arith.constant 5.000000e-01 : f32
    %749 = vector.broadcast %cst_270 : f32 to vector<8x64xf32>
    %750 = arith.mulf %749, %748 : vector<8x64xf32>
    %751 = math.tanh %750 : vector<8x64xf32>
    %cst_271 = arith.constant 5.000000e-01 : f32
    %752 = vector.broadcast %cst_271 : f32 to vector<8x64xf32>
    %753 = arith.mulf %752, %751 : vector<8x64xf32>
    %cst_272 = arith.constant 5.000000e-01 : f32
    %754 = vector.broadcast %cst_272 : f32 to vector<8x64xf32>
    %755 = arith.addf %753, %754 : vector<8x64xf32>
    %756 = vector.extract_strided_slice %731 {offsets = [0, 128], sizes = [8, 64], strides = [1, 1]} : vector<8x192xf32> to vector<8x64xf32>
    %757 = vector.extract_strided_slice %735 {offsets = [0, 128], sizes = [8, 64], strides = [1, 1]} : vector<8x192xf32> to vector<8x64xf32>
    %758 = arith.mulf %745, %757 : vector<8x64xf32>
    %759 = arith.addf %756, %758 : vector<8x64xf32>
    %760 = math.tanh %759 : vector<8x64xf32>
    %cst_273 = arith.constant 1.000000e+00 : f32
    %761 = vector.broadcast %cst_273 : f32 to vector<8x64xf32>
    %762 = arith.subf %761, %755 : vector<8x64xf32>
    %763 = arith.mulf %762, %760 : vector<8x64xf32>
    %764 = arith.mulf %755, %726 : vector<8x64xf32>
    %765 = arith.addf %763, %764 : vector<8x64xf32>
    %766 = vector.extract_strided_slice %765 {offsets = [0, 0], sizes = [8, 32], strides = [1, 1]} : vector<8x64xf32> to vector<8x32xf32>
    %c8_274 = arith.constant 8 : index
    %c0_275 = arith.constant 0 : index
    %767 = vector.load %arg6[%c8_274, %c0_275] : memref<128x64xf32, #tpu.memory_space<vmem>>, vector<8x32xf32>
    tpu.vector_store %arg6[%c8_274, %c0_275], %766 {strides = array<i32>} : memref<128x64xf32, #tpu.memory_space<vmem>>, vector<8x32xf32>,
    %768 = vector.extract_strided_slice %765 {offsets = [0, 32], sizes = [8, 32], strides = [1, 1]} : vector<8x64xf32> to vector<8x32xf32>
    %c112_276 = arith.constant 112 : index
    %c32_277 = arith.constant 32 : index
    %769 = vector.load %arg6[%c112_276, %c32_277] : memref<128x64xf32, #tpu.memory_space<vmem>>, vector<8x32xf32>
    tpu.vector_store %arg6[%c112_276, %c32_277], %768 {strides = array<i32>} : memref<128x64xf32, #tpu.memory_space<vmem>>, vector<8x32xf32>,
    %c16_278 = arith.constant 16 : index
    %c0_279 = arith.constant 0 : index
    %770 = vector.load %arg5[%c16_278, %c0_279] : memref<128x192xf32, #tpu.memory_space<vmem>>, vector<8x192xf32>
    %771 = arith.truncf %765 : vector<8x64xf32> to vector<8x64xbf16>
    %cst_280 = arith.constant dense<0.000000e+00> : vector<8x192xf32>
    %772 = tpu.matmul %771, %689, %cst_280 {dimension_numbers = #tpu.dot_dimension_numbers<[1], [0], [0], [1], [0, 0, 1, 1], [], []>} : vector<8x64xbf16>, vector<64x192xbf16>, vector<8x192xf32> -> vector<8x192xf32>
    %773 = vector.broadcast %690 : vector<1x192xf32> to vector<8x192xf32>
    %774 = arith.addf %772, %773 : vector<8x192xf32>
    %775 = vector.extract_strided_slice %770 {offsets = [0, 0], sizes = [8, 64], strides = [1, 1]} : vector<8x192xf32> to vector<8x64xf32>
    %776 = vector.extract_strided_slice %774 {offsets = [0, 0], sizes = [8, 64], strides = [1, 1]} : vector<8x192xf32> to vector<8x64xf32>
    %777 = arith.addf %775, %776 : vector<8x64xf32>
    %cst_281 = arith.constant 5.000000e-01 : f32
    %778 = vector.broadcast %cst_281 : f32 to vector<8x64xf32>
    %779 = arith.mulf %778, %777 : vector<8x64xf32>
    %780 = math.tanh %779 : vector<8x64xf32>
    %cst_282 = arith.constant 5.000000e-01 : f32
    %781 = vector.broadcast %cst_282 : f32 to vector<8x64xf32>
    %782 = arith.mulf %781, %780 : vector<8x64xf32>
    %cst_283 = arith.constant 5.000000e-01 : f32
    %783 = vector.broadcast %cst_283 : f32 to vector<8x64xf32>
    %784 = arith.addf %782, %783 : vector<8x64xf32>
    %785 = vector.extract_strided_slice %770 {offsets = [0, 64], sizes = [8, 64], strides = [1, 1]} : vector<8x192xf32> to vector<8x64xf32>
    %786 = vector.extract_strided_slice %774 {offsets = [0, 64], sizes = [8, 64], strides = [1, 1]} : vector<8x192xf32> to vector<8x64xf32>
    %787 = arith.addf %785, %786 : vector<8x64xf32>
    %cst_284 = arith.constant 5.000000e-01 : f32
    %788 = vector.broadcast %cst_284 : f32 to vector<8x64xf32>
    %789 = arith.mulf %788, %787 : vector<8x64xf32>
    %790 = math.tanh %789 : vector<8x64xf32>
    %cst_285 = arith.constant 5.000000e-01 : f32
    %791 = vector.broadcast %cst_285 : f32 to vector<8x64xf32>
    %792 = arith.mulf %791, %790 : vector<8x64xf32>
    %cst_286 = arith.constant 5.000000e-01 : f32
    %793 = vector.broadcast %cst_286 : f32 to vector<8x64xf32>
    %794 = arith.addf %792, %793 : vector<8x64xf32>
    %795 = vector.extract_strided_slice %770 {offsets = [0, 128], sizes = [8, 64], strides = [1, 1]} : vector<8x192xf32> to vector<8x64xf32>
    %796 = vector.extract_strided_slice %774 {offsets = [0, 128], sizes = [8, 64], strides = [1, 1]} : vector<8x192xf32> to vector<8x64xf32>
    %797 = arith.mulf %784, %796 : vector<8x64xf32>
    %798 = arith.addf %795, %797 : vector<8x64xf32>
    %799 = math.tanh %798 : vector<8x64xf32>
    %cst_287 = arith.constant 1.000000e+00 : f32
    %800 = vector.broadcast %cst_287 : f32 to vector<8x64xf32>
    %801 = arith.subf %800, %794 : vector<8x64xf32>
    %802 = arith.mulf %801, %799 : vector<8x64xf32>
    %803 = arith.mulf %794, %765 : vector<8x64xf32>
    %804 = arith.addf %802, %803 : vector<8x64xf32>
    %805 = vector.extract_strided_slice %804 {offsets = [0, 0], sizes = [8, 32], strides = [1, 1]} : vector<8x64xf32> to vector<8x32xf32>
    %c16_288 = arith.constant 16 : index
    %c0_289 = arith.constant 0 : index
    %806 = vector.load %arg6[%c16_288, %c0_289] : memref<128x64xf32, #tpu.memory_space<vmem>>, vector<8x32xf32>
    tpu.vector_store %arg6[%c16_288, %c0_289], %805 {strides = array<i32>} : memref<128x64xf32, #tpu.memory_space<vmem>>, vector<8x32xf32>,
    %807 = vector.extract_strided_slice %804 {offsets = [0, 32], sizes = [8, 32], strides = [1, 1]} : vector<8x64xf32> to vector<8x32xf32>
    %c104_290 = arith.constant 104 : index
    %c32_291 = arith.constant 32 : index
    %808 = vector.load %arg6[%c104_290, %c32_291] : memref<128x64xf32, #tpu.memory_space<vmem>>, vector<8x32xf32>
    tpu.vector_store %arg6[%c104_290, %c32_291], %807 {strides = array<i32>} : memref<128x64xf32, #tpu.memory_space<vmem>>, vector<8x32xf32>,
    %c24_292 = arith.constant 24 : index
    %c0_293 = arith.constant 0 : index
    %809 = vector.load %arg5[%c24_292, %c0_293] : memref<128x192xf32, #tpu.memory_space<vmem>>, vector<8x192xf32>
    %810 = arith.truncf %804 : vector<8x64xf32> to vector<8x64xbf16>
    %cst_294 = arith.constant dense<0.000000e+00> : vector<8x192xf32>
    %811 = tpu.matmul %810, %689, %cst_294 {dimension_numbers = #tpu.dot_dimension_numbers<[1], [0], [0], [1], [0, 0, 1, 1], [], []>} : vector<8x64xbf16>, vector<64x192xbf16>, vector<8x192xf32> -> vector<8x192xf32>
    %812 = vector.broadcast %690 : vector<1x192xf32> to vector<8x192xf32>
    %813 = arith.addf %811, %812 : vector<8x192xf32>
    %814 = vector.extract_strided_slice %809 {offsets = [0, 0], sizes = [8, 64], strides = [1, 1]} : vector<8x192xf32> to vector<8x64xf32>
    %815 = vector.extract_strided_slice %813 {offsets = [0, 0], sizes = [8, 64], strides = [1, 1]} : vector<8x192xf32> to vector<8x64xf32>
    %816 = arith.addf %814, %815 : vector<8x64xf32>
    %cst_295 = arith.constant 5.000000e-01 : f32
    %817 = vector.broadcast %cst_295 : f32 to vector<8x64xf32>
    %818 = arith.mulf %817, %816 : vector<8x64xf32>
    %819 = math.tanh %818 : vector<8x64xf32>
    %cst_296 = arith.constant 5.000000e-01 : f32
    %820 = vector.broadcast %cst_296 : f32 to vector<8x64xf32>
    %821 = arith.mulf %820, %819 : vector<8x64xf32>
    %cst_297 = arith.constant 5.000000e-01 : f32
    %822 = vector.broadcast %cst_297 : f32 to vector<8x64xf32>
    %823 = arith.addf %821, %822 : vector<8x64xf32>
    %824 = vector.extract_strided_slice %809 {offsets = [0, 64], sizes = [8, 64], strides = [1, 1]} : vector<8x192xf32> to vector<8x64xf32>
    %825 = vector.extract_strided_slice %813 {offsets = [0, 64], sizes = [8, 64], strides = [1, 1]} : vector<8x192xf32> to vector<8x64xf32>
    %826 = arith.addf %824, %825 : vector<8x64xf32>
    %cst_298 = arith.constant 5.000000e-01 : f32
    %827 = vector.broadcast %cst_298 : f32 to vector<8x64xf32>
    %828 = arith.mulf %827, %826 : vector<8x64xf32>
    %829 = math.tanh %828 : vector<8x64xf32>
    %cst_299 = arith.constant 5.000000e-01 : f32
    %830 = vector.broadcast %cst_299 : f32 to vector<8x64xf32>
    %831 = arith.mulf %830, %829 : vector<8x64xf32>
    %cst_300 = arith.constant 5.000000e-01 : f32
    %832 = vector.broadcast %cst_300 : f32 to vector<8x64xf32>
    %833 = arith.addf %831, %832 : vector<8x64xf32>
    %834 = vector.extract_strided_slice %809 {offsets = [0, 128], sizes = [8, 64], strides = [1, 1]} : vector<8x192xf32> to vector<8x64xf32>
    %835 = vector.extract_strided_slice %813 {offsets = [0, 128], sizes = [8, 64], strides = [1, 1]} : vector<8x192xf32> to vector<8x64xf32>
    %836 = arith.mulf %823, %835 : vector<8x64xf32>
    %837 = arith.addf %834, %836 : vector<8x64xf32>
    %838 = math.tanh %837 : vector<8x64xf32>
    %cst_301 = arith.constant 1.000000e+00 : f32
    %839 = vector.broadcast %cst_301 : f32 to vector<8x64xf32>
    %840 = arith.subf %839, %833 : vector<8x64xf32>
    %841 = arith.mulf %840, %838 : vector<8x64xf32>
    %842 = arith.mulf %833, %804 : vector<8x64xf32>
    %843 = arith.addf %841, %842 : vector<8x64xf32>
    %844 = vector.extract_strided_slice %843 {offsets = [0, 0], sizes = [8, 32], strides = [1, 1]} : vector<8x64xf32> to vector<8x32xf32>
    %c24_302 = arith.constant 24 : index
    %c0_303 = arith.constant 0 : index
    %845 = vector.load %arg6[%c24_302, %c0_303] : memref<128x64xf32, #tpu.memory_space<vmem>>, vector<8x32xf32>
    tpu.vector_store %arg6[%c24_302, %c0_303], %844 {strides = array<i32>} : memref<128x64xf32, #tpu.memory_space<vmem>>, vector<8x32xf32>,
    %846 = vector.extract_strided_slice %843 {offsets = [0, 32], sizes = [8, 32], strides = [1, 1]} : vector<8x64xf32> to vector<8x32xf32>
    %c96_304 = arith.constant 96 : index
    %c32_305 = arith.constant 32 : index
    %847 = vector.load %arg6[%c96_304, %c32_305] : memref<128x64xf32, #tpu.memory_space<vmem>>, vector<8x32xf32>
    tpu.vector_store %arg6[%c96_304, %c32_305], %846 {strides = array<i32>} : memref<128x64xf32, #tpu.memory_space<vmem>>, vector<8x32xf32>,
    %c32_306 = arith.constant 32 : index
    %c0_307 = arith.constant 0 : index
    %848 = vector.load %arg5[%c32_306, %c0_307] : memref<128x192xf32, #tpu.memory_space<vmem>>, vector<8x192xf32>
    %849 = arith.truncf %843 : vector<8x64xf32> to vector<8x64xbf16>
    %cst_308 = arith.constant dense<0.000000e+00> : vector<8x192xf32>
    %850 = tpu.matmul %849, %689, %cst_308 {dimension_numbers = #tpu.dot_dimension_numbers<[1], [0], [0], [1], [0, 0, 1, 1], [], []>} : vector<8x64xbf16>, vector<64x192xbf16>, vector<8x192xf32> -> vector<8x192xf32>
    %851 = vector.broadcast %690 : vector<1x192xf32> to vector<8x192xf32>
    %852 = arith.addf %850, %851 : vector<8x192xf32>
    %853 = vector.extract_strided_slice %848 {offsets = [0, 0], sizes = [8, 64], strides = [1, 1]} : vector<8x192xf32> to vector<8x64xf32>
    %854 = vector.extract_strided_slice %852 {offsets = [0, 0], sizes = [8, 64], strides = [1, 1]} : vector<8x192xf32> to vector<8x64xf32>
    %855 = arith.addf %853, %854 : vector<8x64xf32>
    %cst_309 = arith.constant 5.000000e-01 : f32
    %856 = vector.broadcast %cst_309 : f32 to vector<8x64xf32>
    %857 = arith.mulf %856, %855 : vector<8x64xf32>
    %858 = math.tanh %857 : vector<8x64xf32>
    %cst_310 = arith.constant 5.000000e-01 : f32
    %859 = vector.broadcast %cst_310 : f32 to vector<8x64xf32>
    %860 = arith.mulf %859, %858 : vector<8x64xf32>
    %cst_311 = arith.constant 5.000000e-01 : f32
    %861 = vector.broadcast %cst_311 : f32 to vector<8x64xf32>
    %862 = arith.addf %860, %861 : vector<8x64xf32>
    %863 = vector.extract_strided_slice %848 {offsets = [0, 64], sizes = [8, 64], strides = [1, 1]} : vector<8x192xf32> to vector<8x64xf32>
    %864 = vector.extract_strided_slice %852 {offsets = [0, 64], sizes = [8, 64], strides = [1, 1]} : vector<8x192xf32> to vector<8x64xf32>
    %865 = arith.addf %863, %864 : vector<8x64xf32>
    %cst_312 = arith.constant 5.000000e-01 : f32
    %866 = vector.broadcast %cst_312 : f32 to vector<8x64xf32>
    %867 = arith.mulf %866, %865 : vector<8x64xf32>
    %868 = math.tanh %867 : vector<8x64xf32>
    %cst_313 = arith.constant 5.000000e-01 : f32
    %869 = vector.broadcast %cst_313 : f32 to vector<8x64xf32>
    %870 = arith.mulf %869, %868 : vector<8x64xf32>
    %cst_314 = arith.constant 5.000000e-01 : f32
    %871 = vector.broadcast %cst_314 : f32 to vector<8x64xf32>
    %872 = arith.addf %870, %871 : vector<8x64xf32>
    %873 = vector.extract_strided_slice %848 {offsets = [0, 128], sizes = [8, 64], strides = [1, 1]} : vector<8x192xf32> to vector<8x64xf32>
    %874 = vector.extract_strided_slice %852 {offsets = [0, 128], sizes = [8, 64], strides = [1, 1]} : vector<8x192xf32> to vector<8x64xf32>
    %875 = arith.mulf %862, %874 : vector<8x64xf32>
    %876 = arith.addf %873, %875 : vector<8x64xf32>
    %877 = math.tanh %876 : vector<8x64xf32>
    %cst_315 = arith.constant 1.000000e+00 : f32
    %878 = vector.broadcast %cst_315 : f32 to vector<8x64xf32>
    %879 = arith.subf %878, %872 : vector<8x64xf32>
    %880 = arith.mulf %879, %877 : vector<8x64xf32>
    %881 = arith.mulf %872, %843 : vector<8x64xf32>
    %882 = arith.addf %880, %881 : vector<8x64xf32>
    %883 = vector.extract_strided_slice %882 {offsets = [0, 0], sizes = [8, 32], strides = [1, 1]} : vector<8x64xf32> to vector<8x32xf32>
    %c32_316 = arith.constant 32 : index
    %c0_317 = arith.constant 0 : index
    %884 = vector.load %arg6[%c32_316, %c0_317] : memref<128x64xf32, #tpu.memory_space<vmem>>, vector<8x32xf32>
    tpu.vector_store %arg6[%c32_316, %c0_317], %883 {strides = array<i32>} : memref<128x64xf32, #tpu.memory_space<vmem>>, vector<8x32xf32>,
    %885 = vector.extract_strided_slice %882 {offsets = [0, 32], sizes = [8, 32], strides = [1, 1]} : vector<8x64xf32> to vector<8x32xf32>
    %c88_318 = arith.constant 88 : index
    %c32_319 = arith.constant 32 : index
    %886 = vector.load %arg6[%c88_318, %c32_319] : memref<128x64xf32, #tpu.memory_space<vmem>>, vector<8x32xf32>
    tpu.vector_store %arg6[%c88_318, %c32_319], %885 {strides = array<i32>} : memref<128x64xf32, #tpu.memory_space<vmem>>, vector<8x32xf32>,
    %c40_320 = arith.constant 40 : index
    %c0_321 = arith.constant 0 : index
    %887 = vector.load %arg5[%c40_320, %c0_321] : memref<128x192xf32, #tpu.memory_space<vmem>>, vector<8x192xf32>
    %888 = arith.truncf %882 : vector<8x64xf32> to vector<8x64xbf16>
    %cst_322 = arith.constant dense<0.000000e+00> : vector<8x192xf32>
    %889 = tpu.matmul %888, %689, %cst_322 {dimension_numbers = #tpu.dot_dimension_numbers<[1], [0], [0], [1], [0, 0, 1, 1], [], []>} : vector<8x64xbf16>, vector<64x192xbf16>, vector<8x192xf32> -> vector<8x192xf32>
    %890 = vector.broadcast %690 : vector<1x192xf32> to vector<8x192xf32>
    %891 = arith.addf %889, %890 : vector<8x192xf32>
    %892 = vector.extract_strided_slice %887 {offsets = [0, 0], sizes = [8, 64], strides = [1, 1]} : vector<8x192xf32> to vector<8x64xf32>
    %893 = vector.extract_strided_slice %891 {offsets = [0, 0], sizes = [8, 64], strides = [1, 1]} : vector<8x192xf32> to vector<8x64xf32>
    %894 = arith.addf %892, %893 : vector<8x64xf32>
    %cst_323 = arith.constant 5.000000e-01 : f32
    %895 = vector.broadcast %cst_323 : f32 to vector<8x64xf32>
    %896 = arith.mulf %895, %894 : vector<8x64xf32>
    %897 = math.tanh %896 : vector<8x64xf32>
    %cst_324 = arith.constant 5.000000e-01 : f32
    %898 = vector.broadcast %cst_324 : f32 to vector<8x64xf32>
    %899 = arith.mulf %898, %897 : vector<8x64xf32>
    %cst_325 = arith.constant 5.000000e-01 : f32
    %900 = vector.broadcast %cst_325 : f32 to vector<8x64xf32>
    %901 = arith.addf %899, %900 : vector<8x64xf32>
    %902 = vector.extract_strided_slice %887 {offsets = [0, 64], sizes = [8, 64], strides = [1, 1]} : vector<8x192xf32> to vector<8x64xf32>
    %903 = vector.extract_strided_slice %891 {offsets = [0, 64], sizes = [8, 64], strides = [1, 1]} : vector<8x192xf32> to vector<8x64xf32>
    %904 = arith.addf %902, %903 : vector<8x64xf32>
    %cst_326 = arith.constant 5.000000e-01 : f32
    %905 = vector.broadcast %cst_326 : f32 to vector<8x64xf32>
    %906 = arith.mulf %905, %904 : vector<8x64xf32>
    %907 = math.tanh %906 : vector<8x64xf32>
    %cst_327 = arith.constant 5.000000e-01 : f32
    %908 = vector.broadcast %cst_327 : f32 to vector<8x64xf32>
    %909 = arith.mulf %908, %907 : vector<8x64xf32>
    %cst_328 = arith.constant 5.000000e-01 : f32
    %910 = vector.broadcast %cst_328 : f32 to vector<8x64xf32>
    %911 = arith.addf %909, %910 : vector<8x64xf32>
    %912 = vector.extract_strided_slice %887 {offsets = [0, 128], sizes = [8, 64], strides = [1, 1]} : vector<8x192xf32> to vector<8x64xf32>
    %913 = vector.extract_strided_slice %891 {offsets = [0, 128], sizes = [8, 64], strides = [1, 1]} : vector<8x192xf32> to vector<8x64xf32>
    %914 = arith.mulf %901, %913 : vector<8x64xf32>
    %915 = arith.addf %912, %914 : vector<8x64xf32>
    %916 = math.tanh %915 : vector<8x64xf32>
    %cst_329 = arith.constant 1.000000e+00 : f32
    %917 = vector.broadcast %cst_329 : f32 to vector<8x64xf32>
    %918 = arith.subf %917, %911 : vector<8x64xf32>
    %919 = arith.mulf %918, %916 : vector<8x64xf32>
    %920 = arith.mulf %911, %882 : vector<8x64xf32>
    %921 = arith.addf %919, %920 : vector<8x64xf32>
    %922 = vector.extract_strided_slice %921 {offsets = [0, 0], sizes = [8, 32], strides = [1, 1]} : vector<8x64xf32> to vector<8x32xf32>
    %c40_330 = arith.constant 40 : index
    %c0_331 = arith.constant 0 : index
    %923 = vector.load %arg6[%c40_330, %c0_331] : memref<128x64xf32, #tpu.memory_space<vmem>>, vector<8x32xf32>
    tpu.vector_store %arg6[%c40_330, %c0_331], %922 {strides = array<i32>} : memref<128x64xf32, #tpu.memory_space<vmem>>, vector<8x32xf32>,
    %924 = vector.extract_strided_slice %921 {offsets = [0, 32], sizes = [8, 32], strides = [1, 1]} : vector<8x64xf32> to vector<8x32xf32>
    %c80_332 = arith.constant 80 : index
    %c32_333 = arith.constant 32 : index
    %925 = vector.load %arg6[%c80_332, %c32_333] : memref<128x64xf32, #tpu.memory_space<vmem>>, vector<8x32xf32>
    tpu.vector_store %arg6[%c80_332, %c32_333], %924 {strides = array<i32>} : memref<128x64xf32, #tpu.memory_space<vmem>>, vector<8x32xf32>,
    %c48_334 = arith.constant 48 : index
    %c0_335 = arith.constant 0 : index
    %926 = vector.load %arg5[%c48_334, %c0_335] : memref<128x192xf32, #tpu.memory_space<vmem>>, vector<8x192xf32>
    %927 = arith.truncf %921 : vector<8x64xf32> to vector<8x64xbf16>
    %cst_336 = arith.constant dense<0.000000e+00> : vector<8x192xf32>
    %928 = tpu.matmul %927, %689, %cst_336 {dimension_numbers = #tpu.dot_dimension_numbers<[1], [0], [0], [1], [0, 0, 1, 1], [], []>} : vector<8x64xbf16>, vector<64x192xbf16>, vector<8x192xf32> -> vector<8x192xf32>
    %929 = vector.broadcast %690 : vector<1x192xf32> to vector<8x192xf32>
    %930 = arith.addf %928, %929 : vector<8x192xf32>
    %931 = vector.extract_strided_slice %926 {offsets = [0, 0], sizes = [8, 64], strides = [1, 1]} : vector<8x192xf32> to vector<8x64xf32>
    %932 = vector.extract_strided_slice %930 {offsets = [0, 0], sizes = [8, 64], strides = [1, 1]} : vector<8x192xf32> to vector<8x64xf32>
    %933 = arith.addf %931, %932 : vector<8x64xf32>
    %cst_337 = arith.constant 5.000000e-01 : f32
    %934 = vector.broadcast %cst_337 : f32 to vector<8x64xf32>
    %935 = arith.mulf %934, %933 : vector<8x64xf32>
    %936 = math.tanh %935 : vector<8x64xf32>
    %cst_338 = arith.constant 5.000000e-01 : f32
    %937 = vector.broadcast %cst_338 : f32 to vector<8x64xf32>
    %938 = arith.mulf %937, %936 : vector<8x64xf32>
    %cst_339 = arith.constant 5.000000e-01 : f32
    %939 = vector.broadcast %cst_339 : f32 to vector<8x64xf32>
    %940 = arith.addf %938, %939 : vector<8x64xf32>
    %941 = vector.extract_strided_slice %926 {offsets = [0, 64], sizes = [8, 64], strides = [1, 1]} : vector<8x192xf32> to vector<8x64xf32>
    %942 = vector.extract_strided_slice %930 {offsets = [0, 64], sizes = [8, 64], strides = [1, 1]} : vector<8x192xf32> to vector<8x64xf32>
    %943 = arith.addf %941, %942 : vector<8x64xf32>
    %cst_340 = arith.constant 5.000000e-01 : f32
    %944 = vector.broadcast %cst_340 : f32 to vector<8x64xf32>
    %945 = arith.mulf %944, %943 : vector<8x64xf32>
    %946 = math.tanh %945 : vector<8x64xf32>
    %cst_341 = arith.constant 5.000000e-01 : f32
    %947 = vector.broadcast %cst_341 : f32 to vector<8x64xf32>
    %948 = arith.mulf %947, %946 : vector<8x64xf32>
    %cst_342 = arith.constant 5.000000e-01 : f32
    %949 = vector.broadcast %cst_342 : f32 to vector<8x64xf32>
    %950 = arith.addf %948, %949 : vector<8x64xf32>
    %951 = vector.extract_strided_slice %926 {offsets = [0, 128], sizes = [8, 64], strides = [1, 1]} : vector<8x192xf32> to vector<8x64xf32>
    %952 = vector.extract_strided_slice %930 {offsets = [0, 128], sizes = [8, 64], strides = [1, 1]} : vector<8x192xf32> to vector<8x64xf32>
    %953 = arith.mulf %940, %952 : vector<8x64xf32>
    %954 = arith.addf %951, %953 : vector<8x64xf32>
    %955 = math.tanh %954 : vector<8x64xf32>
    %cst_343 = arith.constant 1.000000e+00 : f32
    %956 = vector.broadcast %cst_343 : f32 to vector<8x64xf32>
    %957 = arith.subf %956, %950 : vector<8x64xf32>
    %958 = arith.mulf %957, %955 : vector<8x64xf32>
    %959 = arith.mulf %950, %921 : vector<8x64xf32>
    %960 = arith.addf %958, %959 : vector<8x64xf32>
    %961 = vector.extract_strided_slice %960 {offsets = [0, 0], sizes = [8, 32], strides = [1, 1]} : vector<8x64xf32> to vector<8x32xf32>
    %c48_344 = arith.constant 48 : index
    %c0_345 = arith.constant 0 : index
    %962 = vector.load %arg6[%c48_344, %c0_345] : memref<128x64xf32, #tpu.memory_space<vmem>>, vector<8x32xf32>
    tpu.vector_store %arg6[%c48_344, %c0_345], %961 {strides = array<i32>} : memref<128x64xf32, #tpu.memory_space<vmem>>, vector<8x32xf32>,
    %963 = vector.extract_strided_slice %960 {offsets = [0, 32], sizes = [8, 32], strides = [1, 1]} : vector<8x64xf32> to vector<8x32xf32>
    %c72_346 = arith.constant 72 : index
    %c32_347 = arith.constant 32 : index
    %964 = vector.load %arg6[%c72_346, %c32_347] : memref<128x64xf32, #tpu.memory_space<vmem>>, vector<8x32xf32>
    tpu.vector_store %arg6[%c72_346, %c32_347], %963 {strides = array<i32>} : memref<128x64xf32, #tpu.memory_space<vmem>>, vector<8x32xf32>,
    %c56_348 = arith.constant 56 : index
    %c0_349 = arith.constant 0 : index
    %965 = vector.load %arg5[%c56_348, %c0_349] : memref<128x192xf32, #tpu.memory_space<vmem>>, vector<8x192xf32>
    %966 = arith.truncf %960 : vector<8x64xf32> to vector<8x64xbf16>
    %cst_350 = arith.constant dense<0.000000e+00> : vector<8x192xf32>
    %967 = tpu.matmul %966, %689, %cst_350 {dimension_numbers = #tpu.dot_dimension_numbers<[1], [0], [0], [1], [0, 0, 1, 1], [], []>} : vector<8x64xbf16>, vector<64x192xbf16>, vector<8x192xf32> -> vector<8x192xf32>
    %968 = vector.broadcast %690 : vector<1x192xf32> to vector<8x192xf32>
    %969 = arith.addf %967, %968 : vector<8x192xf32>
    %970 = vector.extract_strided_slice %965 {offsets = [0, 0], sizes = [8, 64], strides = [1, 1]} : vector<8x192xf32> to vector<8x64xf32>
    %971 = vector.extract_strided_slice %969 {offsets = [0, 0], sizes = [8, 64], strides = [1, 1]} : vector<8x192xf32> to vector<8x64xf32>
    %972 = arith.addf %970, %971 : vector<8x64xf32>
    %cst_351 = arith.constant 5.000000e-01 : f32
    %973 = vector.broadcast %cst_351 : f32 to vector<8x64xf32>
    %974 = arith.mulf %973, %972 : vector<8x64xf32>
    %975 = math.tanh %974 : vector<8x64xf32>
    %cst_352 = arith.constant 5.000000e-01 : f32
    %976 = vector.broadcast %cst_352 : f32 to vector<8x64xf32>
    %977 = arith.mulf %976, %975 : vector<8x64xf32>
    %cst_353 = arith.constant 5.000000e-01 : f32
    %978 = vector.broadcast %cst_353 : f32 to vector<8x64xf32>
    %979 = arith.addf %977, %978 : vector<8x64xf32>
    %980 = vector.extract_strided_slice %965 {offsets = [0, 64], sizes = [8, 64], strides = [1, 1]} : vector<8x192xf32> to vector<8x64xf32>
    %981 = vector.extract_strided_slice %969 {offsets = [0, 64], sizes = [8, 64], strides = [1, 1]} : vector<8x192xf32> to vector<8x64xf32>
    %982 = arith.addf %980, %981 : vector<8x64xf32>
    %cst_354 = arith.constant 5.000000e-01 : f32
    %983 = vector.broadcast %cst_354 : f32 to vector<8x64xf32>
    %984 = arith.mulf %983, %982 : vector<8x64xf32>
    %985 = math.tanh %984 : vector<8x64xf32>
    %cst_355 = arith.constant 5.000000e-01 : f32
    %986 = vector.broadcast %cst_355 : f32 to vector<8x64xf32>
    %987 = arith.mulf %986, %985 : vector<8x64xf32>
    %cst_356 = arith.constant 5.000000e-01 : f32
    %988 = vector.broadcast %cst_356 : f32 to vector<8x64xf32>
    %989 = arith.addf %987, %988 : vector<8x64xf32>
    %990 = vector.extract_strided_slice %965 {offsets = [0, 128], sizes = [8, 64], strides = [1, 1]} : vector<8x192xf32> to vector<8x64xf32>
    %991 = vector.extract_strided_slice %969 {offsets = [0, 128], sizes = [8, 64], strides = [1, 1]} : vector<8x192xf32> to vector<8x64xf32>
    %992 = arith.mulf %979, %991 : vector<8x64xf32>
    %993 = arith.addf %990, %992 : vector<8x64xf32>
    %994 = math.tanh %993 : vector<8x64xf32>
    %cst_357 = arith.constant 1.000000e+00 : f32
    %995 = vector.broadcast %cst_357 : f32 to vector<8x64xf32>
    %996 = arith.subf %995, %989 : vector<8x64xf32>
    %997 = arith.mulf %996, %994 : vector<8x64xf32>
    %998 = arith.mulf %989, %960 : vector<8x64xf32>
    %999 = arith.addf %997, %998 : vector<8x64xf32>
    %1000 = vector.extract_strided_slice %999 {offsets = [0, 0], sizes = [8, 32], strides = [1, 1]} : vector<8x64xf32> to vector<8x32xf32>
    %c56_358 = arith.constant 56 : index
    %c0_359 = arith.constant 0 : index
    %1001 = vector.load %arg6[%c56_358, %c0_359] : memref<128x64xf32, #tpu.memory_space<vmem>>, vector<8x32xf32>
    tpu.vector_store %arg6[%c56_358, %c0_359], %1000 {strides = array<i32>} : memref<128x64xf32, #tpu.memory_space<vmem>>, vector<8x32xf32>,
    %1002 = vector.extract_strided_slice %999 {offsets = [0, 32], sizes = [8, 32], strides = [1, 1]} : vector<8x64xf32> to vector<8x32xf32>
    %c64_360 = arith.constant 64 : index
    %c32_361 = arith.constant 32 : index
    %1003 = vector.load %arg6[%c64_360, %c32_361] : memref<128x64xf32, #tpu.memory_space<vmem>>, vector<8x32xf32>
    tpu.vector_store %arg6[%c64_360, %c32_361], %1002 {strides = array<i32>} : memref<128x64xf32, #tpu.memory_space<vmem>>, vector<8x32xf32>,
    %c64_362 = arith.constant 64 : index
    %c0_363 = arith.constant 0 : index
    %1004 = vector.load %arg5[%c64_362, %c0_363] : memref<128x192xf32, #tpu.memory_space<vmem>>, vector<8x192xf32>
    %1005 = arith.truncf %999 : vector<8x64xf32> to vector<8x64xbf16>
    %cst_364 = arith.constant dense<0.000000e+00> : vector<8x192xf32>
    %1006 = tpu.matmul %1005, %689, %cst_364 {dimension_numbers = #tpu.dot_dimension_numbers<[1], [0], [0], [1], [0, 0, 1, 1], [], []>} : vector<8x64xbf16>, vector<64x192xbf16>, vector<8x192xf32> -> vector<8x192xf32>
    %1007 = vector.broadcast %690 : vector<1x192xf32> to vector<8x192xf32>
    %1008 = arith.addf %1006, %1007 : vector<8x192xf32>
    %1009 = vector.extract_strided_slice %1004 {offsets = [0, 0], sizes = [8, 64], strides = [1, 1]} : vector<8x192xf32> to vector<8x64xf32>
    %1010 = vector.extract_strided_slice %1008 {offsets = [0, 0], sizes = [8, 64], strides = [1, 1]} : vector<8x192xf32> to vector<8x64xf32>
    %1011 = arith.addf %1009, %1010 : vector<8x64xf32>
    %cst_365 = arith.constant 5.000000e-01 : f32
    %1012 = vector.broadcast %cst_365 : f32 to vector<8x64xf32>
    %1013 = arith.mulf %1012, %1011 : vector<8x64xf32>
    %1014 = math.tanh %1013 : vector<8x64xf32>
    %cst_366 = arith.constant 5.000000e-01 : f32
    %1015 = vector.broadcast %cst_366 : f32 to vector<8x64xf32>
    %1016 = arith.mulf %1015, %1014 : vector<8x64xf32>
    %cst_367 = arith.constant 5.000000e-01 : f32
    %1017 = vector.broadcast %cst_367 : f32 to vector<8x64xf32>
    %1018 = arith.addf %1016, %1017 : vector<8x64xf32>
    %1019 = vector.extract_strided_slice %1004 {offsets = [0, 64], sizes = [8, 64], strides = [1, 1]} : vector<8x192xf32> to vector<8x64xf32>
    %1020 = vector.extract_strided_slice %1008 {offsets = [0, 64], sizes = [8, 64], strides = [1, 1]} : vector<8x192xf32> to vector<8x64xf32>
    %1021 = arith.addf %1019, %1020 : vector<8x64xf32>
    %cst_368 = arith.constant 5.000000e-01 : f32
    %1022 = vector.broadcast %cst_368 : f32 to vector<8x64xf32>
    %1023 = arith.mulf %1022, %1021 : vector<8x64xf32>
    %1024 = math.tanh %1023 : vector<8x64xf32>
    %cst_369 = arith.constant 5.000000e-01 : f32
    %1025 = vector.broadcast %cst_369 : f32 to vector<8x64xf32>
    %1026 = arith.mulf %1025, %1024 : vector<8x64xf32>
    %cst_370 = arith.constant 5.000000e-01 : f32
    %1027 = vector.broadcast %cst_370 : f32 to vector<8x64xf32>
    %1028 = arith.addf %1026, %1027 : vector<8x64xf32>
    %1029 = vector.extract_strided_slice %1004 {offsets = [0, 128], sizes = [8, 64], strides = [1, 1]} : vector<8x192xf32> to vector<8x64xf32>
    %1030 = vector.extract_strided_slice %1008 {offsets = [0, 128], sizes = [8, 64], strides = [1, 1]} : vector<8x192xf32> to vector<8x64xf32>
    %1031 = arith.mulf %1018, %1030 : vector<8x64xf32>
    %1032 = arith.addf %1029, %1031 : vector<8x64xf32>
    %1033 = math.tanh %1032 : vector<8x64xf32>
    %cst_371 = arith.constant 1.000000e+00 : f32
    %1034 = vector.broadcast %cst_371 : f32 to vector<8x64xf32>
    %1035 = arith.subf %1034, %1028 : vector<8x64xf32>
    %1036 = arith.mulf %1035, %1033 : vector<8x64xf32>
    %1037 = arith.mulf %1028, %999 : vector<8x64xf32>
    %1038 = arith.addf %1036, %1037 : vector<8x64xf32>
    %1039 = vector.extract_strided_slice %1038 {offsets = [0, 0], sizes = [8, 32], strides = [1, 1]} : vector<8x64xf32> to vector<8x32xf32>
    %c64_372 = arith.constant 64 : index
    %c0_373 = arith.constant 0 : index
    %1040 = vector.load %arg6[%c64_372, %c0_373] : memref<128x64xf32, #tpu.memory_space<vmem>>, vector<8x32xf32>
    tpu.vector_store %arg6[%c64_372, %c0_373], %1039 {strides = array<i32>} : memref<128x64xf32, #tpu.memory_space<vmem>>, vector<8x32xf32>,
    %1041 = vector.extract_strided_slice %1038 {offsets = [0, 32], sizes = [8, 32], strides = [1, 1]} : vector<8x64xf32> to vector<8x32xf32>
    %c56_374 = arith.constant 56 : index
    %c32_375 = arith.constant 32 : index
    %1042 = vector.load %arg6[%c56_374, %c32_375] : memref<128x64xf32, #tpu.memory_space<vmem>>, vector<8x32xf32>
    tpu.vector_store %arg6[%c56_374, %c32_375], %1041 {strides = array<i32>} : memref<128x64xf32, #tpu.memory_space<vmem>>, vector<8x32xf32>,
    %c72_376 = arith.constant 72 : index
    %c0_377 = arith.constant 0 : index
    %1043 = vector.load %arg5[%c72_376, %c0_377] : memref<128x192xf32, #tpu.memory_space<vmem>>, vector<8x192xf32>
    %1044 = arith.truncf %1038 : vector<8x64xf32> to vector<8x64xbf16>
    %cst_378 = arith.constant dense<0.000000e+00> : vector<8x192xf32>
    %1045 = tpu.matmul %1044, %689, %cst_378 {dimension_numbers = #tpu.dot_dimension_numbers<[1], [0], [0], [1], [0, 0, 1, 1], [], []>} : vector<8x64xbf16>, vector<64x192xbf16>, vector<8x192xf32> -> vector<8x192xf32>
    %1046 = vector.broadcast %690 : vector<1x192xf32> to vector<8x192xf32>
    %1047 = arith.addf %1045, %1046 : vector<8x192xf32>
    %1048 = vector.extract_strided_slice %1043 {offsets = [0, 0], sizes = [8, 64], strides = [1, 1]} : vector<8x192xf32> to vector<8x64xf32>
    %1049 = vector.extract_strided_slice %1047 {offsets = [0, 0], sizes = [8, 64], strides = [1, 1]} : vector<8x192xf32> to vector<8x64xf32>
    %1050 = arith.addf %1048, %1049 : vector<8x64xf32>
    %cst_379 = arith.constant 5.000000e-01 : f32
    %1051 = vector.broadcast %cst_379 : f32 to vector<8x64xf32>
    %1052 = arith.mulf %1051, %1050 : vector<8x64xf32>
    %1053 = math.tanh %1052 : vector<8x64xf32>
    %cst_380 = arith.constant 5.000000e-01 : f32
    %1054 = vector.broadcast %cst_380 : f32 to vector<8x64xf32>
    %1055 = arith.mulf %1054, %1053 : vector<8x64xf32>
    %cst_381 = arith.constant 5.000000e-01 : f32
    %1056 = vector.broadcast %cst_381 : f32 to vector<8x64xf32>
    %1057 = arith.addf %1055, %1056 : vector<8x64xf32>
    %1058 = vector.extract_strided_slice %1043 {offsets = [0, 64], sizes = [8, 64], strides = [1, 1]} : vector<8x192xf32> to vector<8x64xf32>
    %1059 = vector.extract_strided_slice %1047 {offsets = [0, 64], sizes = [8, 64], strides = [1, 1]} : vector<8x192xf32> to vector<8x64xf32>
    %1060 = arith.addf %1058, %1059 : vector<8x64xf32>
    %cst_382 = arith.constant 5.000000e-01 : f32
    %1061 = vector.broadcast %cst_382 : f32 to vector<8x64xf32>
    %1062 = arith.mulf %1061, %1060 : vector<8x64xf32>
    %1063 = math.tanh %1062 : vector<8x64xf32>
    %cst_383 = arith.constant 5.000000e-01 : f32
    %1064 = vector.broadcast %cst_383 : f32 to vector<8x64xf32>
    %1065 = arith.mulf %1064, %1063 : vector<8x64xf32>
    %cst_384 = arith.constant 5.000000e-01 : f32
    %1066 = vector.broadcast %cst_384 : f32 to vector<8x64xf32>
    %1067 = arith.addf %1065, %1066 : vector<8x64xf32>
    %1068 = vector.extract_strided_slice %1043 {offsets = [0, 128], sizes = [8, 64], strides = [1, 1]} : vector<8x192xf32> to vector<8x64xf32>
    %1069 = vector.extract_strided_slice %1047 {offsets = [0, 128], sizes = [8, 64], strides = [1, 1]} : vector<8x192xf32> to vector<8x64xf32>
    %1070 = arith.mulf %1057, %1069 : vector<8x64xf32>
    %1071 = arith.addf %1068, %1070 : vector<8x64xf32>
    %1072 = math.tanh %1071 : vector<8x64xf32>
    %cst_385 = arith.constant 1.000000e+00 : f32
    %1073 = vector.broadcast %cst_385 : f32 to vector<8x64xf32>
    %1074 = arith.subf %1073, %1067 : vector<8x64xf32>
    %1075 = arith.mulf %1074, %1072 : vector<8x64xf32>
    %1076 = arith.mulf %1067, %1038 : vector<8x64xf32>
    %1077 = arith.addf %1075, %1076 : vector<8x64xf32>
    %1078 = vector.extract_strided_slice %1077 {offsets = [0, 0], sizes = [8, 32], strides = [1, 1]} : vector<8x64xf32> to vector<8x32xf32>
    %c72_386 = arith.constant 72 : index
    %c0_387 = arith.constant 0 : index
    %1079 = vector.load %arg6[%c72_386, %c0_387] : memref<128x64xf32, #tpu.memory_space<vmem>>, vector<8x32xf32>
    tpu.vector_store %arg6[%c72_386, %c0_387], %1078 {strides = array<i32>} : memref<128x64xf32, #tpu.memory_space<vmem>>, vector<8x32xf32>,
    %1080 = vector.extract_strided_slice %1077 {offsets = [0, 32], sizes = [8, 32], strides = [1, 1]} : vector<8x64xf32> to vector<8x32xf32>
    %c48_388 = arith.constant 48 : index
    %c32_389 = arith.constant 32 : index
    %1081 = vector.load %arg6[%c48_388, %c32_389] : memref<128x64xf32, #tpu.memory_space<vmem>>, vector<8x32xf32>
    tpu.vector_store %arg6[%c48_388, %c32_389], %1080 {strides = array<i32>} : memref<128x64xf32, #tpu.memory_space<vmem>>, vector<8x32xf32>,
    %c80_390 = arith.constant 80 : index
    %c0_391 = arith.constant 0 : index
    %1082 = vector.load %arg5[%c80_390, %c0_391] : memref<128x192xf32, #tpu.memory_space<vmem>>, vector<8x192xf32>
    %1083 = arith.truncf %1077 : vector<8x64xf32> to vector<8x64xbf16>
    %cst_392 = arith.constant dense<0.000000e+00> : vector<8x192xf32>
    %1084 = tpu.matmul %1083, %689, %cst_392 {dimension_numbers = #tpu.dot_dimension_numbers<[1], [0], [0], [1], [0, 0, 1, 1], [], []>} : vector<8x64xbf16>, vector<64x192xbf16>, vector<8x192xf32> -> vector<8x192xf32>
    %1085 = vector.broadcast %690 : vector<1x192xf32> to vector<8x192xf32>
    %1086 = arith.addf %1084, %1085 : vector<8x192xf32>
    %1087 = vector.extract_strided_slice %1082 {offsets = [0, 0], sizes = [8, 64], strides = [1, 1]} : vector<8x192xf32> to vector<8x64xf32>
    %1088 = vector.extract_strided_slice %1086 {offsets = [0, 0], sizes = [8, 64], strides = [1, 1]} : vector<8x192xf32> to vector<8x64xf32>
    %1089 = arith.addf %1087, %1088 : vector<8x64xf32>
    %cst_393 = arith.constant 5.000000e-01 : f32
    %1090 = vector.broadcast %cst_393 : f32 to vector<8x64xf32>
    %1091 = arith.mulf %1090, %1089 : vector<8x64xf32>
    %1092 = math.tanh %1091 : vector<8x64xf32>
    %cst_394 = arith.constant 5.000000e-01 : f32
    %1093 = vector.broadcast %cst_394 : f32 to vector<8x64xf32>
    %1094 = arith.mulf %1093, %1092 : vector<8x64xf32>
    %cst_395 = arith.constant 5.000000e-01 : f32
    %1095 = vector.broadcast %cst_395 : f32 to vector<8x64xf32>
    %1096 = arith.addf %1094, %1095 : vector<8x64xf32>
    %1097 = vector.extract_strided_slice %1082 {offsets = [0, 64], sizes = [8, 64], strides = [1, 1]} : vector<8x192xf32> to vector<8x64xf32>
    %1098 = vector.extract_strided_slice %1086 {offsets = [0, 64], sizes = [8, 64], strides = [1, 1]} : vector<8x192xf32> to vector<8x64xf32>
    %1099 = arith.addf %1097, %1098 : vector<8x64xf32>
    %cst_396 = arith.constant 5.000000e-01 : f32
    %1100 = vector.broadcast %cst_396 : f32 to vector<8x64xf32>
    %1101 = arith.mulf %1100, %1099 : vector<8x64xf32>
    %1102 = math.tanh %1101 : vector<8x64xf32>
    %cst_397 = arith.constant 5.000000e-01 : f32
    %1103 = vector.broadcast %cst_397 : f32 to vector<8x64xf32>
    %1104 = arith.mulf %1103, %1102 : vector<8x64xf32>
    %cst_398 = arith.constant 5.000000e-01 : f32
    %1105 = vector.broadcast %cst_398 : f32 to vector<8x64xf32>
    %1106 = arith.addf %1104, %1105 : vector<8x64xf32>
    %1107 = vector.extract_strided_slice %1082 {offsets = [0, 128], sizes = [8, 64], strides = [1, 1]} : vector<8x192xf32> to vector<8x64xf32>
    %1108 = vector.extract_strided_slice %1086 {offsets = [0, 128], sizes = [8, 64], strides = [1, 1]} : vector<8x192xf32> to vector<8x64xf32>
    %1109 = arith.mulf %1096, %1108 : vector<8x64xf32>
    %1110 = arith.addf %1107, %1109 : vector<8x64xf32>
    %1111 = math.tanh %1110 : vector<8x64xf32>
    %cst_399 = arith.constant 1.000000e+00 : f32
    %1112 = vector.broadcast %cst_399 : f32 to vector<8x64xf32>
    %1113 = arith.subf %1112, %1106 : vector<8x64xf32>
    %1114 = arith.mulf %1113, %1111 : vector<8x64xf32>
    %1115 = arith.mulf %1106, %1077 : vector<8x64xf32>
    %1116 = arith.addf %1114, %1115 : vector<8x64xf32>
    %1117 = vector.extract_strided_slice %1116 {offsets = [0, 0], sizes = [8, 32], strides = [1, 1]} : vector<8x64xf32> to vector<8x32xf32>
    %c80_400 = arith.constant 80 : index
    %c0_401 = arith.constant 0 : index
    %1118 = vector.load %arg6[%c80_400, %c0_401] : memref<128x64xf32, #tpu.memory_space<vmem>>, vector<8x32xf32>
    tpu.vector_store %arg6[%c80_400, %c0_401], %1117 {strides = array<i32>} : memref<128x64xf32, #tpu.memory_space<vmem>>, vector<8x32xf32>,
    %1119 = vector.extract_strided_slice %1116 {offsets = [0, 32], sizes = [8, 32], strides = [1, 1]} : vector<8x64xf32> to vector<8x32xf32>
    %c40_402 = arith.constant 40 : index
    %c32_403 = arith.constant 32 : index
    %1120 = vector.load %arg6[%c40_402, %c32_403] : memref<128x64xf32, #tpu.memory_space<vmem>>, vector<8x32xf32>
    tpu.vector_store %arg6[%c40_402, %c32_403], %1119 {strides = array<i32>} : memref<128x64xf32, #tpu.memory_space<vmem>>, vector<8x32xf32>,
    %c88_404 = arith.constant 88 : index
    %c0_405 = arith.constant 0 : index
    %1121 = vector.load %arg5[%c88_404, %c0_405] : memref<128x192xf32, #tpu.memory_space<vmem>>, vector<8x192xf32>
    %1122 = arith.truncf %1116 : vector<8x64xf32> to vector<8x64xbf16>
    %cst_406 = arith.constant dense<0.000000e+00> : vector<8x192xf32>
    %1123 = tpu.matmul %1122, %689, %cst_406 {dimension_numbers = #tpu.dot_dimension_numbers<[1], [0], [0], [1], [0, 0, 1, 1], [], []>} : vector<8x64xbf16>, vector<64x192xbf16>, vector<8x192xf32> -> vector<8x192xf32>
    %1124 = vector.broadcast %690 : vector<1x192xf32> to vector<8x192xf32>
    %1125 = arith.addf %1123, %1124 : vector<8x192xf32>
    %1126 = vector.extract_strided_slice %1121 {offsets = [0, 0], sizes = [8, 64], strides = [1, 1]} : vector<8x192xf32> to vector<8x64xf32>
    %1127 = vector.extract_strided_slice %1125 {offsets = [0, 0], sizes = [8, 64], strides = [1, 1]} : vector<8x192xf32> to vector<8x64xf32>
    %1128 = arith.addf %1126, %1127 : vector<8x64xf32>
    %cst_407 = arith.constant 5.000000e-01 : f32
    %1129 = vector.broadcast %cst_407 : f32 to vector<8x64xf32>
    %1130 = arith.mulf %1129, %1128 : vector<8x64xf32>
    %1131 = math.tanh %1130 : vector<8x64xf32>
    %cst_408 = arith.constant 5.000000e-01 : f32
    %1132 = vector.broadcast %cst_408 : f32 to vector<8x64xf32>
    %1133 = arith.mulf %1132, %1131 : vector<8x64xf32>
    %cst_409 = arith.constant 5.000000e-01 : f32
    %1134 = vector.broadcast %cst_409 : f32 to vector<8x64xf32>
    %1135 = arith.addf %1133, %1134 : vector<8x64xf32>
    %1136 = vector.extract_strided_slice %1121 {offsets = [0, 64], sizes = [8, 64], strides = [1, 1]} : vector<8x192xf32> to vector<8x64xf32>
    %1137 = vector.extract_strided_slice %1125 {offsets = [0, 64], sizes = [8, 64], strides = [1, 1]} : vector<8x192xf32> to vector<8x64xf32>
    %1138 = arith.addf %1136, %1137 : vector<8x64xf32>
    %cst_410 = arith.constant 5.000000e-01 : f32
    %1139 = vector.broadcast %cst_410 : f32 to vector<8x64xf32>
    %1140 = arith.mulf %1139, %1138 : vector<8x64xf32>
    %1141 = math.tanh %1140 : vector<8x64xf32>
    %cst_411 = arith.constant 5.000000e-01 : f32
    %1142 = vector.broadcast %cst_411 : f32 to vector<8x64xf32>
    %1143 = arith.mulf %1142, %1141 : vector<8x64xf32>
    %cst_412 = arith.constant 5.000000e-01 : f32
    %1144 = vector.broadcast %cst_412 : f32 to vector<8x64xf32>
    %1145 = arith.addf %1143, %1144 : vector<8x64xf32>
    %1146 = vector.extract_strided_slice %1121 {offsets = [0, 128], sizes = [8, 64], strides = [1, 1]} : vector<8x192xf32> to vector<8x64xf32>
    %1147 = vector.extract_strided_slice %1125 {offsets = [0, 128], sizes = [8, 64], strides = [1, 1]} : vector<8x192xf32> to vector<8x64xf32>
    %1148 = arith.mulf %1135, %1147 : vector<8x64xf32>
    %1149 = arith.addf %1146, %1148 : vector<8x64xf32>
    %1150 = math.tanh %1149 : vector<8x64xf32>
    %cst_413 = arith.constant 1.000000e+00 : f32
    %1151 = vector.broadcast %cst_413 : f32 to vector<8x64xf32>
    %1152 = arith.subf %1151, %1145 : vector<8x64xf32>
    %1153 = arith.mulf %1152, %1150 : vector<8x64xf32>
    %1154 = arith.mulf %1145, %1116 : vector<8x64xf32>
    %1155 = arith.addf %1153, %1154 : vector<8x64xf32>
    %1156 = vector.extract_strided_slice %1155 {offsets = [0, 0], sizes = [8, 32], strides = [1, 1]} : vector<8x64xf32> to vector<8x32xf32>
    %c88_414 = arith.constant 88 : index
    %c0_415 = arith.constant 0 : index
    %1157 = vector.load %arg6[%c88_414, %c0_415] : memref<128x64xf32, #tpu.memory_space<vmem>>, vector<8x32xf32>
    tpu.vector_store %arg6[%c88_414, %c0_415], %1156 {strides = array<i32>} : memref<128x64xf32, #tpu.memory_space<vmem>>, vector<8x32xf32>,
    %1158 = vector.extract_strided_slice %1155 {offsets = [0, 32], sizes = [8, 32], strides = [1, 1]} : vector<8x64xf32> to vector<8x32xf32>
    %c32_416 = arith.constant 32 : index
    %c32_417 = arith.constant 32 : index
    %1159 = vector.load %arg6[%c32_416, %c32_417] : memref<128x64xf32, #tpu.memory_space<vmem>>, vector<8x32xf32>
    tpu.vector_store %arg6[%c32_416, %c32_417], %1158 {strides = array<i32>} : memref<128x64xf32, #tpu.memory_space<vmem>>, vector<8x32xf32>,
    %c96_418 = arith.constant 96 : index
    %c0_419 = arith.constant 0 : index
    %1160 = vector.load %arg5[%c96_418, %c0_419] : memref<128x192xf32, #tpu.memory_space<vmem>>, vector<8x192xf32>
    %1161 = arith.truncf %1155 : vector<8x64xf32> to vector<8x64xbf16>
    %cst_420 = arith.constant dense<0.000000e+00> : vector<8x192xf32>
    %1162 = tpu.matmul %1161, %689, %cst_420 {dimension_numbers = #tpu.dot_dimension_numbers<[1], [0], [0], [1], [0, 0, 1, 1], [], []>} : vector<8x64xbf16>, vector<64x192xbf16>, vector<8x192xf32> -> vector<8x192xf32>
    %1163 = vector.broadcast %690 : vector<1x192xf32> to vector<8x192xf32>
    %1164 = arith.addf %1162, %1163 : vector<8x192xf32>
    %1165 = vector.extract_strided_slice %1160 {offsets = [0, 0], sizes = [8, 64], strides = [1, 1]} : vector<8x192xf32> to vector<8x64xf32>
    %1166 = vector.extract_strided_slice %1164 {offsets = [0, 0], sizes = [8, 64], strides = [1, 1]} : vector<8x192xf32> to vector<8x64xf32>
    %1167 = arith.addf %1165, %1166 : vector<8x64xf32>
    %cst_421 = arith.constant 5.000000e-01 : f32
    %1168 = vector.broadcast %cst_421 : f32 to vector<8x64xf32>
    %1169 = arith.mulf %1168, %1167 : vector<8x64xf32>
    %1170 = math.tanh %1169 : vector<8x64xf32>
    %cst_422 = arith.constant 5.000000e-01 : f32
    %1171 = vector.broadcast %cst_422 : f32 to vector<8x64xf32>
    %1172 = arith.mulf %1171, %1170 : vector<8x64xf32>
    %cst_423 = arith.constant 5.000000e-01 : f32
    %1173 = vector.broadcast %cst_423 : f32 to vector<8x64xf32>
    %1174 = arith.addf %1172, %1173 : vector<8x64xf32>
    %1175 = vector.extract_strided_slice %1160 {offsets = [0, 64], sizes = [8, 64], strides = [1, 1]} : vector<8x192xf32> to vector<8x64xf32>
    %1176 = vector.extract_strided_slice %1164 {offsets = [0, 64], sizes = [8, 64], strides = [1, 1]} : vector<8x192xf32> to vector<8x64xf32>
    %1177 = arith.addf %1175, %1176 : vector<8x64xf32>
    %cst_424 = arith.constant 5.000000e-01 : f32
    %1178 = vector.broadcast %cst_424 : f32 to vector<8x64xf32>
    %1179 = arith.mulf %1178, %1177 : vector<8x64xf32>
    %1180 = math.tanh %1179 : vector<8x64xf32>
    %cst_425 = arith.constant 5.000000e-01 : f32
    %1181 = vector.broadcast %cst_425 : f32 to vector<8x64xf32>
    %1182 = arith.mulf %1181, %1180 : vector<8x64xf32>
    %cst_426 = arith.constant 5.000000e-01 : f32
    %1183 = vector.broadcast %cst_426 : f32 to vector<8x64xf32>
    %1184 = arith.addf %1182, %1183 : vector<8x64xf32>
    %1185 = vector.extract_strided_slice %1160 {offsets = [0, 128], sizes = [8, 64], strides = [1, 1]} : vector<8x192xf32> to vector<8x64xf32>
    %1186 = vector.extract_strided_slice %1164 {offsets = [0, 128], sizes = [8, 64], strides = [1, 1]} : vector<8x192xf32> to vector<8x64xf32>
    %1187 = arith.mulf %1174, %1186 : vector<8x64xf32>
    %1188 = arith.addf %1185, %1187 : vector<8x64xf32>
    %1189 = math.tanh %1188 : vector<8x64xf32>
    %cst_427 = arith.constant 1.000000e+00 : f32
    %1190 = vector.broadcast %cst_427 : f32 to vector<8x64xf32>
    %1191 = arith.subf %1190, %1184 : vector<8x64xf32>
    %1192 = arith.mulf %1191, %1189 : vector<8x64xf32>
    %1193 = arith.mulf %1184, %1155 : vector<8x64xf32>
    %1194 = arith.addf %1192, %1193 : vector<8x64xf32>
    %1195 = vector.extract_strided_slice %1194 {offsets = [0, 0], sizes = [8, 32], strides = [1, 1]} : vector<8x64xf32> to vector<8x32xf32>
    %c96_428 = arith.constant 96 : index
    %c0_429 = arith.constant 0 : index
    %1196 = vector.load %arg6[%c96_428, %c0_429] : memref<128x64xf32, #tpu.memory_space<vmem>>, vector<8x32xf32>
    tpu.vector_store %arg6[%c96_428, %c0_429], %1195 {strides = array<i32>} : memref<128x64xf32, #tpu.memory_space<vmem>>, vector<8x32xf32>,
    %1197 = vector.extract_strided_slice %1194 {offsets = [0, 32], sizes = [8, 32], strides = [1, 1]} : vector<8x64xf32> to vector<8x32xf32>
    %c24_430 = arith.constant 24 : index
    %c32_431 = arith.constant 32 : index
    %1198 = vector.load %arg6[%c24_430, %c32_431] : memref<128x64xf32, #tpu.memory_space<vmem>>, vector<8x32xf32>
    tpu.vector_store %arg6[%c24_430, %c32_431], %1197 {strides = array<i32>} : memref<128x64xf32, #tpu.memory_space<vmem>>, vector<8x32xf32>,
    %c104_432 = arith.constant 104 : index
    %c0_433 = arith.constant 0 : index
    %1199 = vector.load %arg5[%c104_432, %c0_433] : memref<128x192xf32, #tpu.memory_space<vmem>>, vector<8x192xf32>
    %1200 = arith.truncf %1194 : vector<8x64xf32> to vector<8x64xbf16>
    %cst_434 = arith.constant dense<0.000000e+00> : vector<8x192xf32>
    %1201 = tpu.matmul %1200, %689, %cst_434 {dimension_numbers = #tpu.dot_dimension_numbers<[1], [0], [0], [1], [0, 0, 1, 1], [], []>} : vector<8x64xbf16>, vector<64x192xbf16>, vector<8x192xf32> -> vector<8x192xf32>
    %1202 = vector.broadcast %690 : vector<1x192xf32> to vector<8x192xf32>
    %1203 = arith.addf %1201, %1202 : vector<8x192xf32>
    %1204 = vector.extract_strided_slice %1199 {offsets = [0, 0], sizes = [8, 64], strides = [1, 1]} : vector<8x192xf32> to vector<8x64xf32>
    %1205 = vector.extract_strided_slice %1203 {offsets = [0, 0], sizes = [8, 64], strides = [1, 1]} : vector<8x192xf32> to vector<8x64xf32>
    %1206 = arith.addf %1204, %1205 : vector<8x64xf32>
    %cst_435 = arith.constant 5.000000e-01 : f32
    %1207 = vector.broadcast %cst_435 : f32 to vector<8x64xf32>
    %1208 = arith.mulf %1207, %1206 : vector<8x64xf32>
    %1209 = math.tanh %1208 : vector<8x64xf32>
    %cst_436 = arith.constant 5.000000e-01 : f32
    %1210 = vector.broadcast %cst_436 : f32 to vector<8x64xf32>
    %1211 = arith.mulf %1210, %1209 : vector<8x64xf32>
    %cst_437 = arith.constant 5.000000e-01 : f32
    %1212 = vector.broadcast %cst_437 : f32 to vector<8x64xf32>
    %1213 = arith.addf %1211, %1212 : vector<8x64xf32>
    %1214 = vector.extract_strided_slice %1199 {offsets = [0, 64], sizes = [8, 64], strides = [1, 1]} : vector<8x192xf32> to vector<8x64xf32>
    %1215 = vector.extract_strided_slice %1203 {offsets = [0, 64], sizes = [8, 64], strides = [1, 1]} : vector<8x192xf32> to vector<8x64xf32>
    %1216 = arith.addf %1214, %1215 : vector<8x64xf32>
    %cst_438 = arith.constant 5.000000e-01 : f32
    %1217 = vector.broadcast %cst_438 : f32 to vector<8x64xf32>
    %1218 = arith.mulf %1217, %1216 : vector<8x64xf32>
    %1219 = math.tanh %1218 : vector<8x64xf32>
    %cst_439 = arith.constant 5.000000e-01 : f32
    %1220 = vector.broadcast %cst_439 : f32 to vector<8x64xf32>
    %1221 = arith.mulf %1220, %1219 : vector<8x64xf32>
    %cst_440 = arith.constant 5.000000e-01 : f32
    %1222 = vector.broadcast %cst_440 : f32 to vector<8x64xf32>
    %1223 = arith.addf %1221, %1222 : vector<8x64xf32>
    %1224 = vector.extract_strided_slice %1199 {offsets = [0, 128], sizes = [8, 64], strides = [1, 1]} : vector<8x192xf32> to vector<8x64xf32>
    %1225 = vector.extract_strided_slice %1203 {offsets = [0, 128], sizes = [8, 64], strides = [1, 1]} : vector<8x192xf32> to vector<8x64xf32>
    %1226 = arith.mulf %1213, %1225 : vector<8x64xf32>
    %1227 = arith.addf %1224, %1226 : vector<8x64xf32>
    %1228 = math.tanh %1227 : vector<8x64xf32>
    %cst_441 = arith.constant 1.000000e+00 : f32
    %1229 = vector.broadcast %cst_441 : f32 to vector<8x64xf32>
    %1230 = arith.subf %1229, %1223 : vector<8x64xf32>
    %1231 = arith.mulf %1230, %1228 : vector<8x64xf32>
    %1232 = arith.mulf %1223, %1194 : vector<8x64xf32>
    %1233 = arith.addf %1231, %1232 : vector<8x64xf32>
    %1234 = vector.extract_strided_slice %1233 {offsets = [0, 0], sizes = [8, 32], strides = [1, 1]} : vector<8x64xf32> to vector<8x32xf32>
    %c104_442 = arith.constant 104 : index
    %c0_443 = arith.constant 0 : index
    %1235 = vector.load %arg6[%c104_442, %c0_443] : memref<128x64xf32, #tpu.memory_space<vmem>>, vector<8x32xf32>
    tpu.vector_store %arg6[%c104_442, %c0_443], %1234 {strides = array<i32>} : memref<128x64xf32, #tpu.memory_space<vmem>>, vector<8x32xf32>,
    %1236 = vector.extract_strided_slice %1233 {offsets = [0, 32], sizes = [8, 32], strides = [1, 1]} : vector<8x64xf32> to vector<8x32xf32>
    %c16_444 = arith.constant 16 : index
    %c32_445 = arith.constant 32 : index
    %1237 = vector.load %arg6[%c16_444, %c32_445] : memref<128x64xf32, #tpu.memory_space<vmem>>, vector<8x32xf32>
    tpu.vector_store %arg6[%c16_444, %c32_445], %1236 {strides = array<i32>} : memref<128x64xf32, #tpu.memory_space<vmem>>, vector<8x32xf32>,
    %c112_446 = arith.constant 112 : index
    %c0_447 = arith.constant 0 : index
    %1238 = vector.load %arg5[%c112_446, %c0_447] : memref<128x192xf32, #tpu.memory_space<vmem>>, vector<8x192xf32>
    %1239 = arith.truncf %1233 : vector<8x64xf32> to vector<8x64xbf16>
    %cst_448 = arith.constant dense<0.000000e+00> : vector<8x192xf32>
    %1240 = tpu.matmul %1239, %689, %cst_448 {dimension_numbers = #tpu.dot_dimension_numbers<[1], [0], [0], [1], [0, 0, 1, 1], [], []>} : vector<8x64xbf16>, vector<64x192xbf16>, vector<8x192xf32> -> vector<8x192xf32>
    %1241 = vector.broadcast %690 : vector<1x192xf32> to vector<8x192xf32>
    %1242 = arith.addf %1240, %1241 : vector<8x192xf32>
    %1243 = vector.extract_strided_slice %1238 {offsets = [0, 0], sizes = [8, 64], strides = [1, 1]} : vector<8x192xf32> to vector<8x64xf32>
    %1244 = vector.extract_strided_slice %1242 {offsets = [0, 0], sizes = [8, 64], strides = [1, 1]} : vector<8x192xf32> to vector<8x64xf32>
    %1245 = arith.addf %1243, %1244 : vector<8x64xf32>
    %cst_449 = arith.constant 5.000000e-01 : f32
    %1246 = vector.broadcast %cst_449 : f32 to vector<8x64xf32>
    %1247 = arith.mulf %1246, %1245 : vector<8x64xf32>
    %1248 = math.tanh %1247 : vector<8x64xf32>
    %cst_450 = arith.constant 5.000000e-01 : f32
    %1249 = vector.broadcast %cst_450 : f32 to vector<8x64xf32>
    %1250 = arith.mulf %1249, %1248 : vector<8x64xf32>
    %cst_451 = arith.constant 5.000000e-01 : f32
    %1251 = vector.broadcast %cst_451 : f32 to vector<8x64xf32>
    %1252 = arith.addf %1250, %1251 : vector<8x64xf32>
    %1253 = vector.extract_strided_slice %1238 {offsets = [0, 64], sizes = [8, 64], strides = [1, 1]} : vector<8x192xf32> to vector<8x64xf32>
    %1254 = vector.extract_strided_slice %1242 {offsets = [0, 64], sizes = [8, 64], strides = [1, 1]} : vector<8x192xf32> to vector<8x64xf32>
    %1255 = arith.addf %1253, %1254 : vector<8x64xf32>
    %cst_452 = arith.constant 5.000000e-01 : f32
    %1256 = vector.broadcast %cst_452 : f32 to vector<8x64xf32>
    %1257 = arith.mulf %1256, %1255 : vector<8x64xf32>
    %1258 = math.tanh %1257 : vector<8x64xf32>
    %cst_453 = arith.constant 5.000000e-01 : f32
    %1259 = vector.broadcast %cst_453 : f32 to vector<8x64xf32>
    %1260 = arith.mulf %1259, %1258 : vector<8x64xf32>
    %cst_454 = arith.constant 5.000000e-01 : f32
    %1261 = vector.broadcast %cst_454 : f32 to vector<8x64xf32>
    %1262 = arith.addf %1260, %1261 : vector<8x64xf32>
    %1263 = vector.extract_strided_slice %1238 {offsets = [0, 128], sizes = [8, 64], strides = [1, 1]} : vector<8x192xf32> to vector<8x64xf32>
    %1264 = vector.extract_strided_slice %1242 {offsets = [0, 128], sizes = [8, 64], strides = [1, 1]} : vector<8x192xf32> to vector<8x64xf32>
    %1265 = arith.mulf %1252, %1264 : vector<8x64xf32>
    %1266 = arith.addf %1263, %1265 : vector<8x64xf32>
    %1267 = math.tanh %1266 : vector<8x64xf32>
    %cst_455 = arith.constant 1.000000e+00 : f32
    %1268 = vector.broadcast %cst_455 : f32 to vector<8x64xf32>
    %1269 = arith.subf %1268, %1262 : vector<8x64xf32>
    %1270 = arith.mulf %1269, %1267 : vector<8x64xf32>
    %1271 = arith.mulf %1262, %1233 : vector<8x64xf32>
    %1272 = arith.addf %1270, %1271 : vector<8x64xf32>
    %1273 = vector.extract_strided_slice %1272 {offsets = [0, 0], sizes = [8, 32], strides = [1, 1]} : vector<8x64xf32> to vector<8x32xf32>
    %c112_456 = arith.constant 112 : index
    %c0_457 = arith.constant 0 : index
    %1274 = vector.load %arg6[%c112_456, %c0_457] : memref<128x64xf32, #tpu.memory_space<vmem>>, vector<8x32xf32>
    tpu.vector_store %arg6[%c112_456, %c0_457], %1273 {strides = array<i32>} : memref<128x64xf32, #tpu.memory_space<vmem>>, vector<8x32xf32>,
    %1275 = vector.extract_strided_slice %1272 {offsets = [0, 32], sizes = [8, 32], strides = [1, 1]} : vector<8x64xf32> to vector<8x32xf32>
    %c8_458 = arith.constant 8 : index
    %c32_459 = arith.constant 32 : index
    %1276 = vector.load %arg6[%c8_458, %c32_459] : memref<128x64xf32, #tpu.memory_space<vmem>>, vector<8x32xf32>
    tpu.vector_store %arg6[%c8_458, %c32_459], %1275 {strides = array<i32>} : memref<128x64xf32, #tpu.memory_space<vmem>>, vector<8x32xf32>,
    %c120_460 = arith.constant 120 : index
    %c0_461 = arith.constant 0 : index
    %1277 = vector.load %arg5[%c120_460, %c0_461] : memref<128x192xf32, #tpu.memory_space<vmem>>, vector<8x192xf32>
    %1278 = arith.truncf %1272 : vector<8x64xf32> to vector<8x64xbf16>
    %cst_462 = arith.constant dense<0.000000e+00> : vector<8x192xf32>
    %1279 = tpu.matmul %1278, %689, %cst_462 {dimension_numbers = #tpu.dot_dimension_numbers<[1], [0], [0], [1], [0, 0, 1, 1], [], []>} : vector<8x64xbf16>, vector<64x192xbf16>, vector<8x192xf32> -> vector<8x192xf32>
    %1280 = vector.broadcast %690 : vector<1x192xf32> to vector<8x192xf32>
    %1281 = arith.addf %1279, %1280 : vector<8x192xf32>
    %1282 = vector.extract_strided_slice %1277 {offsets = [0, 0], sizes = [8, 64], strides = [1, 1]} : vector<8x192xf32> to vector<8x64xf32>
    %1283 = vector.extract_strided_slice %1281 {offsets = [0, 0], sizes = [8, 64], strides = [1, 1]} : vector<8x192xf32> to vector<8x64xf32>
    %1284 = arith.addf %1282, %1283 : vector<8x64xf32>
    %cst_463 = arith.constant 5.000000e-01 : f32
    %1285 = vector.broadcast %cst_463 : f32 to vector<8x64xf32>
    %1286 = arith.mulf %1285, %1284 : vector<8x64xf32>
    %1287 = math.tanh %1286 : vector<8x64xf32>
    %cst_464 = arith.constant 5.000000e-01 : f32
    %1288 = vector.broadcast %cst_464 : f32 to vector<8x64xf32>
    %1289 = arith.mulf %1288, %1287 : vector<8x64xf32>
    %cst_465 = arith.constant 5.000000e-01 : f32
    %1290 = vector.broadcast %cst_465 : f32 to vector<8x64xf32>
    %1291 = arith.addf %1289, %1290 : vector<8x64xf32>
    %1292 = vector.extract_strided_slice %1277 {offsets = [0, 64], sizes = [8, 64], strides = [1, 1]} : vector<8x192xf32> to vector<8x64xf32>
    %1293 = vector.extract_strided_slice %1281 {offsets = [0, 64], sizes = [8, 64], strides = [1, 1]} : vector<8x192xf32> to vector<8x64xf32>
    %1294 = arith.addf %1292, %1293 : vector<8x64xf32>
    %cst_466 = arith.constant 5.000000e-01 : f32
    %1295 = vector.broadcast %cst_466 : f32 to vector<8x64xf32>
    %1296 = arith.mulf %1295, %1294 : vector<8x64xf32>
    %1297 = math.tanh %1296 : vector<8x64xf32>
    %cst_467 = arith.constant 5.000000e-01 : f32
    %1298 = vector.broadcast %cst_467 : f32 to vector<8x64xf32>
    %1299 = arith.mulf %1298, %1297 : vector<8x64xf32>
    %cst_468 = arith.constant 5.000000e-01 : f32
    %1300 = vector.broadcast %cst_468 : f32 to vector<8x64xf32>
    %1301 = arith.addf %1299, %1300 : vector<8x64xf32>
    %1302 = vector.extract_strided_slice %1277 {offsets = [0, 128], sizes = [8, 64], strides = [1, 1]} : vector<8x192xf32> to vector<8x64xf32>
    %1303 = vector.extract_strided_slice %1281 {offsets = [0, 128], sizes = [8, 64], strides = [1, 1]} : vector<8x192xf32> to vector<8x64xf32>
    %1304 = arith.mulf %1291, %1303 : vector<8x64xf32>
    %1305 = arith.addf %1302, %1304 : vector<8x64xf32>
    %1306 = math.tanh %1305 : vector<8x64xf32>
    %cst_469 = arith.constant 1.000000e+00 : f32
    %1307 = vector.broadcast %cst_469 : f32 to vector<8x64xf32>
    %1308 = arith.subf %1307, %1301 : vector<8x64xf32>
    %1309 = arith.mulf %1308, %1306 : vector<8x64xf32>
    %1310 = arith.mulf %1301, %1272 : vector<8x64xf32>
    %1311 = arith.addf %1309, %1310 : vector<8x64xf32>
    %1312 = vector.extract_strided_slice %1311 {offsets = [0, 0], sizes = [8, 32], strides = [1, 1]} : vector<8x64xf32> to vector<8x32xf32>
    %c120_470 = arith.constant 120 : index
    %c0_471 = arith.constant 0 : index
    %1313 = vector.load %arg6[%c120_470, %c0_471] : memref<128x64xf32, #tpu.memory_space<vmem>>, vector<8x32xf32>
    tpu.vector_store %arg6[%c120_470, %c0_471], %1312 {strides = array<i32>} : memref<128x64xf32, #tpu.memory_space<vmem>>, vector<8x32xf32>,
    %1314 = vector.extract_strided_slice %1311 {offsets = [0, 32], sizes = [8, 32], strides = [1, 1]} : vector<8x64xf32> to vector<8x32xf32>
    %c0_472 = arith.constant 0 : index
    %c32_473 = arith.constant 32 : index
    %1315 = vector.load %arg6[%c0_472, %c32_473] : memref<128x64xf32, #tpu.memory_space<vmem>>, vector<8x32xf32>
    tpu.vector_store %arg6[%c0_472, %c32_473], %1314 {strides = array<i32>} : memref<128x64xf32, #tpu.memory_space<vmem>>, vector<8x32xf32>,
    %c0_474 = arith.constant 0 : index
    %c0_475 = arith.constant 0 : index
    %1316 = vector.load %arg6[%c0_474, %c0_475] : memref<128x64xf32, #tpu.memory_space<vmem>>, vector<128x64xf32>
    %cst_476 = arith.constant 0.000000e+00 : f32
    %1317 = vector.broadcast %cst_476 : f32 to vector<128x64xf32>
    %1318 = arith.maximumf %1316, %1317 : vector<128x64xf32>
    %1319 = arith.truncf %1318 : vector<128x64xf32> to vector<128x64xbf16>
    %c48_477 = arith.constant 48 : index
    %c0_478 = arith.constant 0 : index
    %1320 = vector.load %arg2[%c48_477, %c0_478] : memref<120x128xf32, #tpu.memory_space<vmem>>, vector<64x128xf32>
    %1321 = arith.truncf %1320 : vector<64x128xf32> to vector<64x128xbf16>
    %c114 = arith.constant 114 : index
    %c0_479 = arith.constant 0 : index
    %1322 = vector.load %arg2[%c114, %c0_479] : memref<120x128xf32, #tpu.memory_space<vmem>>, vector<1x128xf32>
    %cst_480 = arith.constant dense<0.000000e+00> : vector<128x128xf32>
    %1323 = tpu.matmul %1319, %1321, %cst_480 {dimension_numbers = #tpu.dot_dimension_numbers<[1], [0], [0], [1], [0, 0, 1, 1], [], []>} : vector<128x64xbf16>, vector<64x128xbf16>, vector<128x128xf32> -> vector<128x128xf32>
    %1324 = vector.broadcast %1322 : vector<1x128xf32> to vector<128x128xf32>
    %1325 = arith.addf %1323, %1324 : vector<128x128xf32>
    %cst_481 = arith.constant 5.000000e-01 : f32
    %1326 = vector.broadcast %cst_481 : f32 to vector<128x128xf32>
    %1327 = arith.mulf %1326, %1325 : vector<128x128xf32>
    %1328 = math.tanh %1327 : vector<128x128xf32>
    %cst_482 = arith.constant 5.000000e-01 : f32
    %1329 = vector.broadcast %cst_482 : f32 to vector<128x128xf32>
    %1330 = arith.mulf %1329, %1328 : vector<128x128xf32>
    %cst_483 = arith.constant 5.000000e-01 : f32
    %1331 = vector.broadcast %cst_483 : f32 to vector<128x128xf32>
    %1332 = arith.addf %1330, %1331 : vector<128x128xf32>
    %c0_484 = arith.constant 0 : index
    %c0_485 = arith.constant 0 : index
    %1333 = vector.load %arg3[%c0_484, %c0_485] : memref<128x128xf32, #tpu.memory_space<vmem>>, vector<128x128xf32>
    tpu.vector_store %arg3[%c0_484, %c0_485], %1332 {strides = array<i32>} : memref<128x128xf32, #tpu.memory_space<vmem>>, vector<128x128xf32>,
    return
  }
}

</mosaic_0001>

<bundles_post_ra>
// kernel: timbre_vae_forward.1
= control target key start
LH: loop header
LB: loop body
LE: loop exit
PB: predicated region body
PF: predicated region fallthrough
CT: control target
= control target key end

     0   :  { %v4047_v3 = vmov 0   ;;  %vm66_vm0 = vcmask 261120   ;;  %v56_v61 = vlaneseq  ;;  %vm205_vm1 = vcmask 523264   ;;  %s4048_s20 = smov 64   ;;  %s5638_s1 = inlined_call_operand.vmem [shape: f32[168,192], index: 1, kind: input, shape index: {}]   ;;  %s5639_s0 = inlined_call_operand.vmem [shape: f32[128,32], index: 0, kind: input, shape index: {}]   ;;  %s5640_s2 = inlined_call_operand.vmem [shape: f32[120,128], index: 2, kind: input, shape index: {}]   ;;  %s5641_s4 = inlined_call_operand.vmem [shape: f32[16,8], index: 4, kind: output, shape index: {1}]   ;;  %s5642_s3 = inlined_call_operand.vmem [shape: f32[128,128], index: 3, kind: output, shape index: {0}]  }
   0x1   :  { %v46_v0 = vld [vmem:[%s5638_s1 + $0x28] sm:$0xff]  ;;  %v48_v1 = vld [vmem:[%s5638_s1 + $0x38] sm:$0xff]  ;;  %v45_v2 = vld [vmem:[%s5638_s1 + $0x20] sm:$0xff]  ;;  %123 = vmatprep.mubr.bf16.mxu0 %v4047_v3  ;;  %384 = vmatprep.mubr.bf16.mxu1 %v4047_v3  ;;  %vm341_vm2 = vcmask 523520   ;;  %vm1678_vm3 = vcmask 130048   ;;  %vm1655_vm4 = vcmask 1041409  }
   0x2   :  { %v52_v4 = vpack.c.bf16 %v48_v1, %v46_v0  ;;  %v47_v5 = vld [vmem:[%s5638_s1 + $0x30] sm:$0xff]  ;;  %v42_v6 = vld [vmem:[%s5638_s1 + $0x8] sm:$0xff]  ;;  %v44_v7 = vld [vmem:[%s5638_s1 + $0x18] sm:$0xff]  ;;  %v4259_v62 = vshrl.u32 %v56_v61, 7  ;;  %vm1657_vm5 = vcmask 1042434   ;;  %vm1659_vm6 = vcmask 1043459  }
   0x3   :  { %v51_v8 = vpack.c.bf16 %v47_v5, %v45_v2  ;;  %v50_v9 = vpack.c.bf16 %v44_v7, %v42_v6  ;;  %v41_v10 = vld [vmem:[%s5638_s1] sm:$0xff]  ;;  %v43_v11 = vld [vmem:[%s5638_s1 + $0x10] sm:$0xff]  ;;  %v250_v13 = vld [vmem:[%s5638_s1 + $0xa8] sm:$0xff]  ;;  %vm1661_vm7 = vcmask 1044484   ;;  %vm1663_vm8 = vcmask 1045509  }
   0x4   :  { %103 = vmatprep.subr.bf16.mxu0 %v52_v4  ;;  %v17_v12 = vld [vmem:[%s5639_s0] sm:$0xff]  ;;  %v252_v14 = vld [vmem:[%s5638_s1 + $0xb8] sm:$0xff]  ;;  %v49_v15 = vpack.c.bf16 %v43_v11, %v41_v10  ;;  %v18_v16 = vld [vmem:[%s5639_s0 + $0x8] sm:$0xff]  ;;  %v4262_v63 = vsub.s32 1, %v4259_v62  ;;  %v4268_v1 = vsub.s32 0, %v4259_v62  ;;  %vm1665_vm9 = vcmask 1046534  }
   0x5   :  { %104 = vmatpush1.bf16.msra.mxu0 %v51_v8  ;;  %v4114_v17 = vpack.c.bf16 %v252_v14, %v250_v13  ;;  %v249_v18 = vld [vmem:[%s5638_s1 + $0xa0] sm:$0xff]  ;;  %v251_v19 = vld [vmem:[%s5638_s1 + $0xb0] sm:$0xff]  ;;  %v246_v21 = vld [vmem:[%s5638_s1 + $0x88] sm:$0xff]  ;;  %v33_v24 = vpack.c.bf16 %v18_v16, %v17_v12  ;;  %vm1667_vm10 = vcmask 1047559   ;;  %vm1760_vm11 = vcmask 64512  }
   0x6   :  { %105 = vmatprep.subr.bf16.mxu0 %v50_v9  ;;  %v4122_v20 = vpack.c.bf16 %v251_v19, %v249_v18  ;;  %v248_v22 = vld [vmem:[%s5638_s1 + $0x98] sm:$0xff]  ;;  %v245_v23 = vld [vmem:[%s5638_s1 + $0x80] sm:$0xff]  ;;  %v247_v26 = vld [vmem:[%s5638_s1 + $0x90] sm:$0xff] }
   0x7   :  { %360 = vmatprep.subr.bf16.mxu1 %v4114_v17  ;;  %v4134_v25 = vpack.c.bf16 %v248_v22, %v246_v21  ;;  %v242_v27 = vld [vmem:[%s5638_s1 + $0x68] sm:$0xff]  ;;  %v4144_v28 = vpack.c.bf16 %v247_v26, %v245_v23  ;;  %v244_v29 = vld [vmem:[%s5638_s1 + $0x78] sm:$0xff]  ;;  %v241_v30 = vld [vmem:[%s5638_s1 + $0x60] sm:$0xff] }
   0x8   :  { %361 = vmatpush1.bf16.msra.mxu1 %v4122_v20  ;;  %v243_v31 = vld [vmem:[%s5638_s1 + $0x70] sm:$0xff]  ;;  %v4157_v32 = vpack.c.bf16 %v244_v29, %v242_v27  ;;  %v238_v33 = vld [vmem:[%s5638_s1 + $0x48] sm:$0xff]  ;;  %v240_v34 = vld [vmem:[%s5638_s1 + $0x58] sm:$0xff] }
   0x9   :  { %106 = vmatpush1.bf16.msra.mxu0 %v49_v15  ;;  %362 = vmatprep.subr.bf16.mxu1 %v4134_v25  ;;  %v19_v35 = vld [vmem:[%s5639_s0 + $0x10] sm:$0xff]  ;;  %v20_v36 = vld [vmem:[%s5639_s0 + $0x18] sm:$0xff]  ;;  %v4175_v37 = vpack.c.bf16 %v243_v31, %v241_v30  ;;  %v4178_v38 = vpack.c.bf16 %v240_v34, %v238_v33  ;;  %v237_v39 = vld [vmem:[%s5638_s1 + $0x40] sm:$0xff] }
   0xa   :  { %287 = vmatprep.subr.bf16.mxu0 %v4114_v17  ;;  %v239_v40 = vld [vmem:[%s5638_s1 + $0x50] sm:$0xff]  ;;  %v34_v41 = vpack.c.bf16 %v20_v36, %v19_v35  ;;  %v21_v43 = vld [vmem:[%s5639_s0 + $0x20] sm:$0xff]  ;;  %v22_v44 = vld [vmem:[%s5639_s0 + $0x28] sm:$0xff] }
   0xb   :  { %v4190_v42 = vpack.c.bf16 %v239_v40, %v237_v39  ;;  %v35_v45 = vpack.c.bf16 %v22_v44, %v21_v43  ;;  %v23_v46 = vld [vmem:[%s5639_s0 + $0x30] sm:$0xff]  ;;  %v24_v47 = vld [vmem:[%s5639_s0 + $0x38] sm:$0xff]  ;;  %v25_v49 = vld [vmem:[%s5639_s0 + $0x40] sm:$0xff] }
   0xc   :  { %3756 = vmatmul.mubr.msk.bf16.vlgmr.msra.gmra.mxu0 %vm66_vm0, %v33_v24  ;;  %363 = vmatpush1.bf16.msra.mxu1 %v4144_v28  ;;  %v36_v48 = vpack.c.bf16 %v24_v47, %v23_v46  ;;  %v26_v50 = vld [vmem:[%s5639_s0 + $0x48] sm:$0xff]  ;;  %v27_v52 = vld [vmem:[%s5639_s0 + $0x50] sm:$0xff]  ;;  %v28_v53 = vld [vmem:[%s5639_s0 + $0x58] sm:$0xff] }
   0xd   :  { %288 = vmatpush1.bf16.msra.mxu0 %v4122_v20  ;;  %133 = vmatprep.mubr.bf16.mxu0 %v4047_v3  ;;  %v37_v51 = vpack.c.bf16 %v26_v50, %v25_v49  ;;  %v38_v54 = vpack.c.bf16 %v28_v53, %v27_v52  ;;  %v29_v55 = vld [vmem:[%s5639_s0 + $0x60] sm:$0xff]  ;;  %v30_v56 = vld [vmem:[%s5639_s0 + $0x68] sm:$0xff]  ;;  %v31_v58 = vld [vmem:[%s5639_s0 + $0x70] sm:$0xff] }
   0xe   :  { %289 = vmatprep.subr.bf16.mxu0 %v4134_v25  ;;  %364 = vmatprep.subr.bf16.mxu1 %v4157_v32  ;;  %v39_v57 = vpack.c.bf16 %v30_v56, %v29_v55  ;;  %v32_v59 = vld [vmem:[%s5639_s0 + $0x78] sm:$0xff]  ;;  %v3755_v0 = vld [vmem:[%s5638_s1 + $0x140] ss:$8 sm:$0x3] }
   0xf   :  { %v40_v60 = vpack.c.bf16 %v32_v59, %v31_v58  ;;  %v4271_v2 = vrot.slane %v3755_v0, %v4262_v63  ;;  %v4276_v6 = vrot.slane %v3755_v0, %v4268_v1 }
  0x10   :  { %365 = vmatpush1.bf16.msra.mxu1 %v4175_v37 }
  0x11   :  { %290 = vmatpush1.bf16.msra.mxu0 %v4144_v28  ;;  %366 = vmatprep.subr.bf16.mxu1 %v4178_v38 }
  0x12   :  { %291 = vmatprep.subr.bf16.mxu0 %v4157_v32 }
  0x14   :  { %3757 = vmatmul.mubr.msk.bf16.gmra.mxu0 %vm66_vm0, %v34_v41  ;;  %367 = vmatpush1.bf16.msra.mxu1 %v4190_v42 }
  0x15   :  { %143 = vmatprep.mubr.bf16.mxu0 %v4047_v3  ;;  %292 = vmatpush1.bf16.msra.mxu0 %v4175_v37 }
  0x16   :  { %293 = vmatprep.subr.bf16.mxu0 %v4178_v38  ;;  %432 = vmatprep.subr.bf16.mxu1 %v4114_v17 }
  0x19   :  { %294 = vmatpush1.bf16.msra.mxu0 %v4190_v42 }
  0x1a   :  { %576 = vmatprep.subr.bf16.mxu0 %v4114_v17 }
  0x1c   :  { %3758 = vmatmul.mubr.msk.bf16.gmra.mxu0 %vm66_vm0, %v35_v45 }
  0x1d   :  { %153 = vmatprep.mubr.bf16.mxu0 %v4047_v3 }
  0x24   :  { %3759 = vmatmul.mubr.msk.bf16.gmra.mxu0 %vm66_vm0, %v36_v48 }
  0x25   :  { %163 = vmatprep.mubr.bf16.mxu0 %v4047_v3 }
  0x2c   :  { %3760 = vmatmul.mubr.msk.bf16.gmra.mxu0 %vm66_vm0, %v37_v51 }
  0x2d   :  { %173 = vmatprep.mubr.bf16.mxu0 %v4047_v3 }
  0x34   :  { %3761 = vmatmul.mubr.msk.bf16.gmra.mxu0 %vm66_vm0, %v38_v54 }
  0x35   :  { %183 = vmatprep.mubr.bf16.mxu0 %v4047_v3 }
  0x3c   :  { %3762 = vmatmul.mubr.msk.bf16.gmra.mxu0 %vm66_vm0, %v39_v57 }
  0x3d   :  { %193 = vmatprep.mubr.bf16.mxu0 %v4047_v3 }
  0x44   :  { %3763 = vmatmul.mubr.msk.bf16.gmra.mxu0 %vm66_vm0, %v40_v60 }
  0x45   :  { %311 = vmatprep.mubr.bf16.mxu0 %v4047_v3 }
  0x4c   :  { %312 = vmatmul.mubr.bf16.vlgmr.msra.gmra.mxu0 %v4047_v3 }
  0x4d   :  { %577 = vmatpush1.bf16.msra.mxu0 %v4122_v20  ;;  %600 = vmatprep.mubr.bf16.mxu0 %v4047_v3 }
  0x4e   :  { %578 = vmatprep.subr.bf16.mxu0 %v4134_v25 }
  0x51   :  { %579 = vmatpush1.bf16.msra.mxu0 %v4144_v28 }
  0x52   :  { %580 = vmatprep.subr.bf16.mxu0 %v4157_v32 }
  0x55   :  { %581 = vmatpush1.bf16.msra.mxu0 %v4175_v37 }
  0x56   :  { %582 = vmatprep.subr.bf16.mxu0 %v4178_v38 }
  0x59   :  { %583 = vmatpush1.bf16.msra.mxu0 %v4190_v42 }
  0x5a   :  { %720 = vmatprep.subr.bf16.mxu0 %v4114_v17 }
  0xcc   :  { %v4273_v4 = vpop.f32.mrf.mxu0 }
  0xce   :  { %v127_v5 = vpop.f32.mrf.mxu0 }
  0xcf   :  { %v128_v7 = vadd.f32 %v127_v5, %v4271_v2 }
  0xd0   :  { %v129_v8 = vpop.f32.mrf.mxu0 }
  0xd1   :  { %206 = vst.msk [vmem:[#allocation2 + $0x8] sm:$0xff] %vm205_vm1, %v128_v7  ;;  %v4281_v9 = vadd.f32 %v129_v8, %v4276_v6 }
  0xd2   :  { %v131_v10 = vpop.f32.mrf.mxu0 }
  0xd3   :  { %v132_v11 = vadd.f32 %v131_v10, %v4271_v2 }
  0xd4   :  { %v135_v12 = vpop.f32.mrf.mxu0 }
  0xd5   :  { %208 = vst.msk [vmem:[#allocation2 + $0x18] sm:$0xff] %vm205_vm1, %v132_v11  ;;  %v4286_v13 = vadd.f32 %v135_v12, %v4276_v6 }
  0xd6   :  { %v137_v14 = vpop.f32.mrf.mxu0 }
  0xd7   :  { %v138_v15 = vadd.f32 %v137_v14, %v4271_v2 }
  0xd8   :  { %v139_v16 = vpop.f32.mrf.mxu0 }
  0xd9   :  { %210 = vst.msk [vmem:[#allocation2 + $0x28] sm:$0xff] %vm205_vm1, %v138_v15  ;;  %v4291_v18 = vadd.f32 %v139_v16, %v4276_v6 }
  0xda   :  { %v141_v19 = vpop.f32.mrf.mxu0 }
  0xdb   :  { %v142_v21 = vadd.f32 %v141_v19, %v4271_v2  ;;  %v3764_v19 = vld [vmem:[%s5638_s1 + $0x141] ss:$8 sm:$0x3] }
  0xdc   :  { %v145_v22 = vpop.f32.mrf.mxu0 }
  0xdd   :  { %212 = vst.msk [vmem:[#allocation2 + $0x38] sm:$0xff] %vm205_vm1, %v142_v21  ;;  %v4296_v23 = vadd.f32 %v145_v22, %v4276_v6 }
  0xde   :  { %v147_v24 = vpop.f32.mrf.mxu0 }
  0xdf   :  { %v148_v26 = vadd.f32 %v147_v24, %v4271_v2 }
  0xe0   :  { %v149_v27 = vpop.f32.mrf.mxu0 }
  0xe1   :  { %214 = vst.msk [vmem:[#allocation2 + $0x48] sm:$0xff] %vm205_vm1, %v148_v26  ;;  %v4301_v29 = vadd.f32 %v149_v27, %v4276_v6  ;;  %v4355_v26 = vrot.slane %v3764_v19, %v4268_v1 }
  0xe2   :  { %v151_v30 = vpop.f32.mrf.mxu0 }
  0xe3   :  { %v152_v31 = vadd.f32 %v151_v30, %v4271_v2 }
  0xe4   :  { %v155_v33 = vpop.f32.mrf.mxu0 }
  0xe5   :  { %216 = vst.msk [vmem:[#allocation2 + $0x58] sm:$0xff] %vm205_vm1, %v152_v31  ;;  %v4306_v34 = vadd.f32 %v155_v33, %v4276_v6  ;;  %v126_v33 = vadd.f32 %v4273_v4, %v4276_v6  ;;  %v264_v4 = vld [vmem:[#allocation2 + $0x8] sm:$0xff] }
  0xe6   :  { %v157_v35 = vpop.f32.mrf.mxu0 }
  0xe7   :  { %v158_v36 = vadd.f32 %v157_v35, %v4271_v2 }
  0xe8   :  { %v159_v39 = vpop.f32.mrf.mxu0 }
  0xe9   :  { %218 = vst.msk [vmem:[#allocation2 + $0x68] sm:$0xff] %vm205_vm1, %v158_v36  ;;  %v4311_v40 = vadd.f32 %v159_v39, %v4276_v6 }
  0xea   :  { %v161_v41 = vpop.f32.mrf.mxu0 }
  0xeb   :  { %v162_v43 = vadd.f32 %v161_v41, %v4271_v2 }
  0xec   :  { %v165_v44 = vpop.f32.mrf.mxu0 }
  0xed   :  { %220 = vst.msk [vmem:[#allocation2 + $0x78] sm:$0xff] %vm205_vm1, %v162_v43  ;;  %v4316_v45 = vadd.f32 %v165_v44, %v4276_v6 }
  0xee   :  { %v167_v46 = vpop.f32.mrf.mxu0 }
  0xef   :  { %v168_v47 = vadd.f32 %v167_v46, %v4271_v2  ;;  %v4363_v46 = vrot.slane %v3764_v19, %v4262_v63 }
  0xf0   :  { %v169_v48 = vpop.f32.mrf.mxu0 }
  0xf1   :  { %222 = vst.msk [vmem:[#allocation2 + $0x88] sm:$0xff] %vm205_vm1, %v168_v47  ;;  %v4321_v49 = vadd.f32 %v169_v48, %v4276_v6 }
  0xf2   :  { %v171_v50 = vpop.f32.mrf.mxu0 }
  0xf3   :  { %v172_v51 = vadd.f32 %v171_v50, %v4271_v2 }
  0xf4   :  { %v175_v52 = vpop.f32.mrf.mxu0 }
  0xf5   :  { %224 = vst.msk [vmem:[#allocation2 + $0x98] sm:$0xff] %vm205_vm1, %v172_v51  ;;  %v4326_v53 = vadd.f32 %v175_v52, %v4276_v6 }
  0xf6   :  { %v177_v54 = vpop.f32.mrf.mxu0 }
  0xf7   :  { %v178_v55 = vadd.f32 %v177_v54, %v4271_v2 }
  0xf8   :  { %v179_v56 = vpop.f32.mrf.mxu0 }
  0xf9   :  { %226 = vst.msk [vmem:[#allocation2 + $0xa8] sm:$0xff] %vm205_vm1, %v178_v55  ;;  %v4331_v57 = vadd.f32 %v179_v56, %v4276_v6 }
  0xfa   :  { %v181_v58 = vpop.f32.mrf.mxu0 }
  0xfb   :  { %v182_v59 = vadd.f32 %v181_v58, %v4271_v2 }
  0xfc   :  { %v185_v60 = vpop.f32.mrf.mxu0 }
  0xfd   :  { %228 = vst.msk [vmem:[#allocation2 + $0xb8] sm:$0xff] %vm205_vm1, %v182_v59  ;;  %v4336_v0 = vadd.f32 %v185_v60, %v4276_v6 }
  0xfe   :  { %v187_v5 = vpop.f32.mrf.mxu0 }
  0xff   :  { %v188_v7 = vadd.f32 %v187_v5, %v4271_v2 }
 0x100   :  { %v189_v8 = vpop.f32.mrf.mxu0 }
 0x101   :  { %230 = vst.msk [vmem:[#allocation2 + $0xc8] sm:$0xff] %vm205_vm1, %v188_v7  ;;  %v4341_v10 = vadd.f32 %v189_v8, %v4276_v6 }
 0x102   :  { %v191_v11 = vpop.f32.mrf.mxu0 }
 0x103   :  { %v192_v12 = vadd.f32 %v191_v11, %v4271_v2 }
 0x104   :  { %v195_v14 = vpop.f32.mrf.mxu0 }
 0x105   :  { %232 = vst.msk [vmem:[#allocation2 + $0xd8] sm:$0xff] %vm205_vm1, %v192_v12  ;;  %v4346_v15 = vadd.f32 %v195_v14, %v4276_v6 }
 0x106   :  { %v197_v16 = vpop.f32.mrf.mxu0 }
 0x107   :  { %v198_v21 = vadd.f32 %v197_v16, %v4271_v2 }
 0x108   :  { %v199_v22 = vpop.f32.mrf.mxu0 }
 0x109   :  { %234 = vst.msk [vmem:[#allocation2 + $0xe8] sm:$0xff] %vm205_vm1, %v198_v21  ;;  %v200_v24 = vadd.f32 %v199_v22, %v4276_v6 }
 0x10a   :  { %v201_v27 = vpop.f32.mrf.mxu0 }
 0x10b   :  { %235 = vst [vmem:[#allocation2 + $0xf0] sm:$0xff] %v200_v24  ;;  %v202_v30 = vadd.f32 %v201_v27, %v4271_v2 }
 0x10c   :  { %v313_v31 = vpop.f32.mrf.mxu0 }
 0x10d   :  { %236 = vst.msk [vmem:[#allocation2 + $0xf8] sm:$0xff] %vm205_vm1, %v202_v30  ;;  %v314_v35 = vadd.f32 %v313_v31, %v4355_v26  ;;  %v344_v31 = vld [vmem:[#allocation2 + $0x18] sm:$0xff] }
 0x10e   :  { %v315_v36 = vpop.f32.mrf.mxu0 }
 0x10f   :  { %v320_v39 = vadd.f32 %v314_v35, %v126_v33  ;;  %v316_v2 = vadd.f32 %v315_v36, %v4363_v46 }
 0x110   :  { %v317_v41 = vpop.f32.mrf.mxu0 }
 0x111   :  { %v321_v43 = vmul.f32 0.5, %v320_v39 }
 0x112   :  { %v318_v44 = vpop.f32.mrf.mxu0 }
 0x113   :  { %3886 = vtanh.f32 %v321_v43 }
 0x120   :  { %v3887_v47 = vpop.eup %3886 }
 0x121   :  { %v323_v48 = vmul.f32 0.5, %v3887_v47 }
 0x123   :  { %v324_v50 = vadd.f32 0.5, %v323_v48 }
 0x125   :  { %v325_v51 = vmul.f32 %v324_v50, %v316_v2  ;;  %v328_v54 = vsub.f32 1.0, %v324_v50  ;;  %v334_v56 = vmul.f32 0.0, %v324_v50 }
 0x127   :  { %v326_v6 = vadd.f32 %v325_v51, %v264_v4 }
 0x129   :  { %3888 = vtanh.f32 %v326_v6 }
 0x136   :  { %v3889_v52 = vpop.eup %3888 }
 0x137   :  { %330 = vrot.lane.b32.xlu0 %v3889_v52, %s4048_s20 }
 0x1a9   :  { %v331_v55 = vpop.permute.xlu0 %330 }
 0x1aa   :  { %v333_v58 = vmul.f32 %v331_v55, %v328_v54 }
 0x1ac   :  { %v4367_v59 = vadd.f32 %v334_v56, %v333_v58 }
 0x1ae   :  { %v345_v60 = vpack.c.bf16 %v4367_v59, %v4367_v59 }
 0x1b0   :  { %347 = vrot.lane.b32.xlu0 %v345_v60, %s4048_s20 }
 0x222   :  { %v348_v5 = vpop.permute.xlu0 %347 }
 0x223   :  { %3765 = vmatmul.mubr.msk.bf16.vlgmr.msra.gmra.mxu1 %vm205_vm1, %v348_v5  ;;  %v416_v5 = vld [vmem:[#allocation2 + $0x28] sm:$0xff] }
 0x224   :  { %433 = vmatpush1.bf16.msra.mxu1 %v4122_v20  ;;  %456 = vmatprep.mubr.bf16.mxu1 %v4047_v3 }
 0x225   :  { %434 = vmatprep.subr.bf16.mxu1 %v4134_v25 }
 0x228   :  { %435 = vmatpush1.bf16.msra.mxu1 %v4144_v28 }
 0x229   :  { %436 = vmatprep.subr.bf16.mxu1 %v4157_v32 }
 0x22c   :  { %437 = vmatpush1.bf16.msra.mxu1 %v4175_v37 }
 0x22d   :  { %438 = vmatprep.subr.bf16.mxu1 %v4178_v38 }
 0x230   :  { %439 = vmatpush1.bf16.msra.mxu1 %v4190_v42 }
 0x231   :  { %504 = vmatprep.subr.bf16.mxu1 %v4114_v17 }
 0x2e3   :  { %v386_v7 = vpop.f32.mrf.mxu1 }
 0x2e4   :  { %v387_v8 = vadd.f32 %v386_v7, %v4355_v26 }
 0x2e5   :  { %v388_v11 = vpop.f32.mrf.mxu1 }
 0x2e6   :  { %v393_v12 = vadd.f32 %v387_v8, %v4281_v9  ;;  %v389_v24 = vadd.f32 %v388_v11, %v4363_v46 }
 0x2e7   :  { %v390_v14 = vpop.f32.mrf.mxu1 }
 0x2e8   :  { %v394_v16 = vmul.f32 0.5, %v393_v12 }
 0x2e9   :  { %v391_v19 = vpop.f32.mrf.mxu1 }
 0x2ea   :  { %3890 = vtanh.f32 %v394_v16 }
 0x2f7   :  { %v3891_v21 = vpop.eup %3890 }
 0x2f8   :  { %v396_v22 = vmul.f32 0.5, %v3891_v21 }
 0x2fa   :  { %v397_v27 = vadd.f32 0.5, %v396_v22 }
 0x2fc   :  { %v398_v30 = vmul.f32 %v397_v27, %v389_v24  ;;  %v401_v36 = vsub.f32 1.0, %v397_v27  ;;  %v407_v9 = vmul.f32 %v397_v27, %v4367_v59 }
 0x2fe   :  { %v399_v33 = vadd.f32 %v398_v30, %v344_v31 }
 0x300   :  { %3892 = vtanh.f32 %v399_v33 }
 0x30d   :  { %v3893_v35 = vpop.eup %3892 }
 0x30e   :  { %403 = vrot.lane.b32.xlu1 %v3893_v35, %s4048_s20 }
 0x380   :  { %v404_v39 = vpop.permute.xlu1 %403 }
 0x381   :  { %v406_v41 = vmul.f32 %v404_v39, %v401_v36 }
 0x383   :  { %v4387_v43 = vadd.f32 %v407_v9, %v406_v41 }
 0x385   :  { %v417_v44 = vpack.c.bf16 %v4387_v43, %v4387_v43 }
 0x387   :  { %419 = vrot.lane.b32.xlu1 %v417_v44, %s4048_s20 }
 0x3f9   :  { %v420_v47 = vpop.permute.xlu1 %419 }
 0x3fa   :  { %3766 = vmatmul.mubr.msk.bf16.vlgmr.msra.gmra.mxu1 %vm205_vm1, %v420_v47  ;;  %v488_v47 = vld [vmem:[#allocation2 + $0x38] sm:$0xff] }
 0x3fb   :  { %505 = vmatpush1.bf16.msra.mxu1 %v4122_v20  ;;  %528 = vmatprep.mubr.bf16.mxu1 %v4047_v3 }
 0x3fc   :  { %506 = vmatprep.subr.bf16.mxu1 %v4134_v25 }
 0x3ff   :  { %507 = vmatpush1.bf16.msra.mxu1 %v4144_v28 }
 0x400   :  { %508 = vmatprep.subr.bf16.mxu1 %v4157_v32 }
 0x403   :  { %509 = vmatpush1.bf16.msra.mxu1 %v4175_v37 }
 0x404   :  { %510 = vmatprep.subr.bf16.mxu1 %v4178_v38 }
 0x407   :  { %511 = vmatpush1.bf16.msra.mxu1 %v4190_v42 }
 0x408   :  { %648 = vmatprep.subr.bf16.mxu1 %v4114_v17 }
 0x4ba   :  { %v458_v48 = vpop.f32.mrf.mxu1 }
 0x4bb   :  { %v459_v2 = vadd.f32 %v458_v48, %v4355_v26 }
 0x4bc   :  { %v460_v50 = vpop.f32.mrf.mxu1 }
 0x4bd   :  { %v465_v51 = vadd.f32 %v459_v2, %v4286_v13  ;;  %v461_v56 = vadd.f32 %v460_v50, %v4363_v46 }
 0x4be   :  { %v462_v4 = vpop.f32.mrf.mxu1 }
 0x4bf   :  { %v466_v6 = vmul.f32 0.5, %v465_v51 }
 0x4c0   :  { %v463_v52 = vpop.f32.mrf.mxu1 }
 0x4c1   :  { %3894 = vtanh.f32 %v466_v6 }
 0x4ce   :  { %v3895_v54 = vpop.eup %3894 }
 0x4cf   :  { %v468_v55 = vmul.f32 0.5, %v3895_v54 }
 0x4d1   :  { %v469_v58 = vadd.f32 0.5, %v468_v55 }
 0x4d3   :  { %v470_v60 = vmul.f32 %v469_v58, %v461_v56  ;;  %v473_v11 = vsub.f32 1.0, %v469_v58  ;;  %v479_v13 = vmul.f32 %v469_v58, %v4387_v43 }
 0x4d5   :  { %v471_v7 = vadd.f32 %v470_v60, %v416_v5 }
 0x4d7   :  { %3896 = vtanh.f32 %v471_v7 }
 0x4e4   :  { %v3897_v8 = vpop.eup %3896 }
 0x4e5   :  { %475 = vrot.lane.b32.xlu0 %v3897_v8, %s4048_s20 }
 0x557   :  { %v476_v12 = vpop.permute.xlu0 %475 }
 0x558   :  { %v478_v14 = vmul.f32 %v476_v12, %v473_v11 }
 0x55a   :  { %v4407_v16 = vadd.f32 %v479_v13, %v478_v14 }
 0x55c   :  { %v489_v19 = vpack.c.bf16 %v4407_v16, %v4407_v16 }
 0x55e   :  { %491 = vrot.lane.b32.xlu1 %v489_v19, %s4048_s20 }
 0x5d0   :  { %v492_v21 = vpop.permute.xlu1 %491 }
 0x5d1   :  { %3767 = vmatmul.mubr.msk.bf16.vlgmr.msra.gmra.mxu1 %vm205_vm1, %v492_v21  ;;  %v560_v21 = vld [vmem:[#allocation2 + $0x48] sm:$0xff] }
 0x5d2   :  { %649 = vmatpush1.bf16.msra.mxu1 %v4122_v20  ;;  %672 = vmatprep.mubr.bf16.mxu1 %v4047_v3 }
 0x5d3   :  { %650 = vmatprep.subr.bf16.mxu1 %v4134_v25 }
 0x5d6   :  { %651 = vmatpush1.bf16.msra.mxu1 %v4144_v28 }
 0x5d7   :  { %652 = vmatprep.subr.bf16.mxu1 %v4157_v32 }
 0x5da   :  { %653 = vmatpush1.bf16.msra.mxu1 %v4175_v37 }
 0x5db   :  { %654 = vmatprep.subr.bf16.mxu1 %v4178_v38 }
 0x5de   :  { %655 = vmatpush1.bf16.msra.mxu1 %v4190_v42 }
 0x5df   :  { %792 = vmatprep.subr.bf16.mxu1 %v4114_v17 }
 0x691   :  { %v530_v22 = vpop.f32.mrf.mxu1 }
 0x692   :  { %v531_v24 = vadd.f32 %v530_v22, %v4355_v26 }
 0x693   :  { %v532_v27 = vpop.f32.mrf.mxu1 }
 0x694   :  { %v537_v30 = vadd.f32 %v531_v24, %v4291_v18  ;;  %v533_v9 = vadd.f32 %v532_v27, %v4363_v46 }
 0x695   :  { %v534_v31 = vpop.f32.mrf.mxu1 }
 0x696   :  { %v538_v33 = vmul.f32 0.5, %v537_v30 }
 0x697   :  { %v535_v35 = vpop.f32.mrf.mxu1 }
 0x698   :  { %3898 = vtanh.f32 %v538_v33 }
 0x6a5   :  { %v3899_v36 = vpop.eup %3898 }
 0x6a6   :  { %v540_v39 = vmul.f32 0.5, %v3899_v36 }
 0x6a8   :  { %v541_v41 = vadd.f32 0.5, %v540_v39 }
 0x6aa   :  { %v542_v44 = vmul.f32 %v541_v41, %v533_v9  ;;  %v545_v50 = vsub.f32 1.0, %v541_v41  ;;  %v551_v18 = vmul.f32 %v541_v41, %v4407_v16 }
 0x6ac   :  { %v543_v48 = vadd.f32 %v542_v44, %v488_v47 }
 0x6ae   :  { %3900 = vtanh.f32 %v543_v48 }
 0x6bb   :  { %v3901_v2 = vpop.eup %3900 }
 0x6bc   :  { %547 = vrot.lane.b32.xlu0 %v3901_v2, %s4048_s20 }
 0x72e   :  { %v548_v51 = vpop.permute.xlu0 %547 }
 0x72f   :  { %v550_v4 = vmul.f32 %v548_v51, %v545_v50 }
 0x731   :  { %v4427_v6 = vadd.f32 %v551_v18, %v550_v4 }
 0x733   :  { %v561_v52 = vpack.c.bf16 %v4427_v6, %v4427_v6 }
 0x735   :  { %563 = vrot.lane.b32.xlu1 %v561_v52, %s4048_s20 }
 0x7a7   :  { %v564_v54 = vpop.permute.xlu1 %563 }
 0x7a8   :  { %3768 = vmatmul.mubr.msk.bf16.vlgmr.msra.gmra.mxu0 %vm205_vm1, %v564_v54  ;;  %v632_v54 = vld [vmem:[#allocation2 + $0x58] sm:$0xff] }
 0x7a9   :  { %721 = vmatpush1.bf16.msra.mxu0 %v4122_v20  ;;  %744 = vmatprep.mubr.bf16.mxu0 %v4047_v3 }
 0x7aa   :  { %722 = vmatprep.subr.bf16.mxu0 %v4134_v25 }
 0x7ad   :  { %723 = vmatpush1.bf16.msra.mxu0 %v4144_v28 }
 0x7ae   :  { %724 = vmatprep.subr.bf16.mxu0 %v4157_v32 }
 0x7b1   :  { %725 = vmatpush1.bf16.msra.mxu0 %v4175_v37 }
 0x7b2   :  { %726 = vmatprep.subr.bf16.mxu0 %v4178_v38 }
 0x7b5   :  { %727 = vmatpush1.bf16.msra.mxu0 %v4190_v42 }
 0x7b6   :  { %864 = vmatprep.subr.bf16.mxu0 %v4114_v17 }
 0x868   :  { %v602_v55 = vpop.f32.mrf.mxu0 }
 0x869   :  { %v603_v56 = vadd.f32 %v602_v55, %v4355_v26 }
 0x86a   :  { %v604_v58 = vpop.f32.mrf.mxu0 }
 0x86b   :  { %v609_v60 = vadd.f32 %v603_v56, %v4296_v23  ;;  %v605_v13 = vadd.f32 %v604_v58, %v4363_v46 }
 0x86c   :  { %v606_v5 = vpop.f32.mrf.mxu0 }
 0x86d   :  { %v610_v7 = vmul.f32 0.5, %v609_v60 }
 0x86e   :  { %v607_v8 = vpop.f32.mrf.mxu0 }
 0x86f   :  { %3902 = vtanh.f32 %v610_v7 }
 0x87c   :  { %v3903_v11 = vpop.eup %3902 }
 0x87d   :  { %v612_v12 = vmul.f32 0.5, %v3903_v11 }
 0x87f   :  { %v613_v14 = vadd.f32 0.5, %v612_v12 }
 0x881   :  { %v614_v19 = vmul.f32 %v613_v14, %v605_v13  ;;  %v617_v27 = vsub.f32 1.0, %v613_v14  ;;  %v623_v23 = vmul.f32 %v613_v14, %v4427_v6 }
 0x883   :  { %v615_v22 = vadd.f32 %v614_v19, %v560_v21 }
 0x885   :  { %3904 = vtanh.f32 %v615_v22 }
 0x892   :  { %v3905_v24 = vpop.eup %3904 }
 0x893   :  { %619 = vrot.lane.b32.xlu0 %v3905_v24, %s4048_s20 }
 0x905   :  { %v620_v30 = vpop.permute.xlu0 %619 }
 0x906   :  { %v622_v31 = vmul.f32 %v620_v30, %v617_v27 }
 0x908   :  { %v4447_v33 = vadd.f32 %v623_v23, %v622_v31 }
 0x90a   :  { %v633_v35 = vpack.c.bf16 %v4447_v33, %v4447_v33 }
 0x90c   :  { %635 = vrot.lane.b32.xlu1 %v633_v35, %s4048_s20 }
 0x97e   :  { %v636_v36 = vpop.permute.xlu1 %635 }
 0x97f   :  { %3769 = vmatmul.mubr.msk.bf16.vlgmr.msra.gmra.mxu1 %vm205_vm1, %v636_v36  ;;  %v704_v36 = vld [vmem:[#allocation2 + $0x68] sm:$0xff] }
 0x980   :  { %793 = vmatpush1.bf16.msra.mxu1 %v4122_v20  ;;  %816 = vmatprep.mubr.bf16.mxu1 %v4047_v3 }
 0x981   :  { %794 = vmatprep.subr.bf16.mxu1 %v4134_v25 }
 0x984   :  { %795 = vmatpush1.bf16.msra.mxu1 %v4144_v28 }
 0x985   :  { %796 = vmatprep.subr.bf16.mxu1 %v4157_v32 }
 0x988   :  { %797 = vmatpush1.bf16.msra.mxu1 %v4175_v37 }
 0x989   :  { %798 = vmatprep.subr.bf16.mxu1 %v4178_v38 }
 0x98c   :  { %799 = vmatpush1.bf16.msra.mxu1 %v4190_v42 }
 0x98d   :  { %936 = vmatprep.subr.bf16.mxu1 %v4114_v17 }
 0xa3f   :  { %v674_v39 = vpop.f32.mrf.mxu1 }
 0xa40   :  { %v675_v9 = vadd.f32 %v674_v39, %v4355_v26 }
 0xa41   :  { %v676_v41 = vpop.f32.mrf.mxu1 }
 0xa42   :  { %v681_v44 = vadd.f32 %v675_v9, %v4301_v29  ;;  %v677_v18 = vadd.f32 %v676_v41, %v4363_v46 }
 0xa43   :  { %v678_v47 = vpop.f32.mrf.mxu1 }
 0xa44   :  { %v682_v48 = vmul.f32 0.5, %v681_v44 }
 0xa45   :  { %v679_v2 = vpop.f32.mrf.mxu1 }
 0xa46   :  { %3906 = vtanh.f32 %v682_v48 }
 0xa53   :  { %v3907_v50 = vpop.eup %3906 }
 0xa54   :  { %v684_v51 = vmul.f32 0.5, %v3907_v50 }
 0xa56   :  { %v685_v4 = vadd.f32 0.5, %v684_v51 }
 0xa58   :  { %v686_v52 = vmul.f32 %v685_v4, %v677_v18  ;;  %v689_v58 = vsub.f32 1.0, %v685_v4  ;;  %v695_v29 = vmul.f32 %v685_v4, %v4447_v33 }
 0xa5a   :  { %v687_v55 = vadd.f32 %v686_v52, %v632_v54 }
 0xa5c   :  { %3908 = vtanh.f32 %v687_v55 }
 0xa69   :  { %v3909_v56 = vpop.eup %3908 }
 0xa6a   :  { %691 = vrot.lane.b32.xlu0 %v3909_v56, %s4048_s20 }
 0xadc   :  { %v692_v60 = vpop.permute.xlu0 %691 }
 0xadd   :  { %v694_v5 = vmul.f32 %v692_v60, %v689_v58 }
 0xadf   :  { %v4467_v7 = vadd.f32 %v695_v29, %v694_v5 }
 0xae1   :  { %v705_v8 = vpack.c.bf16 %v4467_v7, %v4467_v7 }
 0xae3   :  { %707 = vrot.lane.b32.xlu1 %v705_v8, %s4048_s20 }
 0xb55   :  { %v708_v11 = vpop.permute.xlu1 %707 }
 0xb56   :  { %3770 = vmatmul.mubr.msk.bf16.vlgmr.msra.gmra.mxu0 %vm205_vm1, %v708_v11  ;;  %v776_v11 = vld [vmem:[#allocation2 + $0x78] sm:$0xff] }
 0xb57   :  { %865 = vmatpush1.bf16.msra.mxu0 %v4122_v20  ;;  %888 = vmatprep.mubr.bf16.mxu0 %v4047_v3 }
 0xb58   :  { %866 = vmatprep.subr.bf16.mxu0 %v4134_v25 }
 0xb5b   :  { %867 = vmatpush1.bf16.msra.mxu0 %v4144_v28 }
 0xb5c   :  { %868 = vmatprep.subr.bf16.mxu0 %v4157_v32 }
 0xb5f   :  { %869 = vmatpush1.bf16.msra.mxu0 %v4175_v37 }
 0xb60   :  { %870 = vmatprep.subr.bf16.mxu0 %v4178_v38 }
 0xb63   :  { %871 = vmatpush1.bf16.msra.mxu0 %v4190_v42 }
 0xb64   :  { %1008 = vmatprep.subr.bf16.mxu0 %v4114_v17 }
 0xc16   :  { %v746_v12 = vpop.f32.mrf.mxu0 }
 0xc17   :  { %v747_v13 = vadd.f32 %v746_v12, %v4355_v26 }
 0xc18   :  { %v748_v14 = vpop.f32.mrf.mxu0 }
 0xc19   :  { %v753_v19 = vadd.f32 %v747_v13, %v4306_v34  ;;  %v749_v23 = vadd.f32 %v748_v14, %v4363_v46 }
 0xc1a   :  { %v750_v21 = vpop.f32.mrf.mxu0 }
 0xc1b   :  { %v754_v22 = vmul.f32 0.5, %v753_v19 }
 0xc1c   :  { %v751_v24 = vpop.f32.mrf.mxu0 }
 0xc1d   :  { %3910 = vtanh.f32 %v754_v22 }
 0xc2a   :  { %v3911_v27 = vpop.eup %3910 }
 0xc2b   :  { %v756_v30 = vmul.f32 0.5, %v3911_v27 }
 0xc2d   :  { %v757_v31 = vadd.f32 0.5, %v756_v30 }
 0xc2f   :  { %v758_v35 = vmul.f32 %v757_v31, %v749_v23  ;;  %v761_v41 = vsub.f32 1.0, %v757_v31  ;;  %v767_v34 = vmul.f32 %v757_v31, %v4467_v7 }
 0xc31   :  { %v759_v39 = vadd.f32 %v758_v35, %v704_v36 }
 0xc33   :  { %3912 = vtanh.f32 %v759_v39 }
 0xc40   :  { %v3913_v9 = vpop.eup %3912 }
 0xc41   :  { %763 = vrot.lane.b32.xlu0 %v3913_v9, %s4048_s20 }
 0xcb3   :  { %v764_v44 = vpop.permute.xlu0 %763 }
 0xcb4   :  { %v766_v47 = vmul.f32 %v764_v44, %v761_v41 }
 0xcb6   :  { %v4487_v48 = vadd.f32 %v767_v34, %v766_v47 }
 0xcb8   :  { %v777_v2 = vpack.c.bf16 %v4487_v48, %v4487_v48 }
 0xcba   :  { %779 = vrot.lane.b32.xlu1 %v777_v2, %s4048_s20 }
 0xd2c   :  { %v780_v50 = vpop.permute.xlu1 %779 }
 0xd2d   :  { %3771 = vmatmul.mubr.msk.bf16.vlgmr.msra.gmra.mxu1 %vm205_vm1, %v780_v50  ;;  %v848_v50 = vld [vmem:[#allocation2 + $0x88] sm:$0xff] }
 0xd2e   :  { %937 = vmatpush1.bf16.msra.mxu1 %v4122_v20  ;;  %960 = vmatprep.mubr.bf16.mxu1 %v4047_v3 }
 0xd2f   :  { %938 = vmatprep.subr.bf16.mxu1 %v4134_v25 }
 0xd32   :  { %939 = vmatpush1.bf16.msra.mxu1 %v4144_v28 }
 0xd33   :  { %940 = vmatprep.subr.bf16.mxu1 %v4157_v32 }
 0xd36   :  { %941 = vmatpush1.bf16.msra.mxu1 %v4175_v37 }
 0xd37   :  { %942 = vmatprep.subr.bf16.mxu1 %v4178_v38 }
 0xd3a   :  { %943 = vmatpush1.bf16.msra.mxu1 %v4190_v42 }
 0xd3b   :  { %1080 = vmatprep.subr.bf16.mxu1 %v4114_v17 }
 0xded   :  { %v818_v51 = vpop.f32.mrf.mxu1 }
 0xdee   :  { %v819_v18 = vadd.f32 %v818_v51, %v4355_v26 }
 0xdef   :  { %v820_v4 = vpop.f32.mrf.mxu1 }
 0xdf0   :  { %v825_v52 = vadd.f32 %v819_v18, %v4311_v40  ;;  %v821_v29 = vadd.f32 %v820_v4, %v4363_v46 }
 0xdf1   :  { %v822_v54 = vpop.f32.mrf.mxu1 }
 0xdf2   :  { %v826_v55 = vmul.f32 0.5, %v825_v52 }
 0xdf3   :  { %v823_v56 = vpop.f32.mrf.mxu1 }
 0xdf4   :  { %3914 = vtanh.f32 %v826_v55 }
 0xe01   :  { %v3915_v58 = vpop.eup %3914 }
 0xe02   :  { %v828_v60 = vmul.f32 0.5, %v3915_v58 }
 0xe04   :  { %v829_v5 = vadd.f32 0.5, %v828_v60 }
 0xe06   :  { %v830_v8 = vmul.f32 %v829_v5, %v821_v29  ;;  %v833_v14 = vsub.f32 1.0, %v829_v5  ;;  %v839_v40 = vmul.f32 %v829_v5, %v4487_v48 }
 0xe08   :  { %v831_v12 = vadd.f32 %v830_v8, %v776_v11 }
 0xe0a   :  { %3916 = vtanh.f32 %v831_v12 }
 0xe17   :  { %v3917_v13 = vpop.eup %3916 }
 0xe18   :  { %835 = vrot.lane.b32.xlu0 %v3917_v13, %s4048_s20 }
 0xe8a   :  { %v836_v19 = vpop.permute.xlu0 %835 }
 0xe8b   :  { %v838_v21 = vmul.f32 %v836_v19, %v833_v14 }
 0xe8d   :  { %v4507_v22 = vadd.f32 %v839_v40, %v838_v21 }
 0xe8f   :  { %v849_v24 = vpack.c.bf16 %v4507_v22, %v4507_v22 }
 0xe91   :  { %851 = vrot.lane.b32.xlu1 %v849_v24, %s4048_s20 }
 0xf03   :  { %v852_v27 = vpop.permute.xlu1 %851 }
 0xf04   :  { %3772 = vmatmul.mubr.msk.bf16.vlgmr.msra.gmra.mxu0 %vm205_vm1, %v852_v27  ;;  %v920_v27 = vld [vmem:[#allocation2 + $0x98] sm:$0xff] }
 0xf05   :  { %1009 = vmatpush1.bf16.msra.mxu0 %v4122_v20  ;;  %1032 = vmatprep.mubr.bf16.mxu0 %v4047_v3 }
 0xf06   :  { %1010 = vmatprep.subr.bf16.mxu0 %v4134_v25 }
 0xf09   :  { %1011 = vmatpush1.bf16.msra.mxu0 %v4144_v28 }
 0xf0a   :  { %1012 = vmatprep.subr.bf16.mxu0 %v4157_v32 }
 0xf0d   :  { %1013 = vmatpush1.bf16.msra.mxu0 %v4175_v37 }
 0xf0e   :  { %1014 = vmatprep.subr.bf16.mxu0 %v4178_v38 }
 0xf11   :  { %1015 = vmatpush1.bf16.msra.mxu0 %v4190_v42 }
 0xf12   :  { %1152 = vmatprep.subr.bf16.mxu0 %v4114_v17 }
 0xfc4   :  { %v890_v30 = vpop.f32.mrf.mxu0 }
 0xfc5   :  { %v891_v23 = vadd.f32 %v890_v30, %v4355_v26 }
 0xfc6   :  { %v892_v31 = vpop.f32.mrf.mxu0 }
 0xfc7   :  { %v897_v35 = vadd.f32 %v891_v23, %v4316_v45  ;;  %v893_v34 = vadd.f32 %v892_v31, %v4363_v46 }
 0xfc8   :  { %v894_v36 = vpop.f32.mrf.mxu0 }
 0xfc9   :  { %v898_v39 = vmul.f32 0.5, %v897_v35 }
 0xfca   :  { %v895_v9 = vpop.f32.mrf.mxu0 }
 0xfcb   :  { %3918 = vtanh.f32 %v898_v39 }
 0xfd8   :  { %v3919_v41 = vpop.eup %3918 }
 0xfd9   :  { %v900_v44 = vmul.f32 0.5, %v3919_v41 }
 0xfdb   :  { %v901_v47 = vadd.f32 0.5, %v900_v44 }
 0xfdd   :  { %v902_v2 = vmul.f32 %v901_v47, %v893_v34  ;;  %v905_v4 = vsub.f32 1.0, %v901_v47  ;;  %v911_v45 = vmul.f32 %v901_v47, %v4507_v22 }
 0xfdf   :  { %v903_v51 = vadd.f32 %v902_v2, %v848_v50 }
 0xfe1   :  { %3920 = vtanh.f32 %v903_v51 }
 0xfee   :  { %v3921_v18 = vpop.eup %3920 }
 0xfef   :  { %907 = vrot.lane.b32.xlu0 %v3921_v18, %s4048_s20 }
0x1061   :  { %v908_v52 = vpop.permute.xlu0 %907 }
0x1062   :  { %v910_v54 = vmul.f32 %v908_v52, %v905_v4 }
0x1064   :  { %v4527_v55 = vadd.f32 %v911_v45, %v910_v54 }
0x1066   :  { %v921_v56 = vpack.c.bf16 %v4527_v55, %v4527_v55 }
0x1068   :  { %923 = vrot.lane.b32.xlu1 %v921_v56, %s4048_s20 }
0x10da   :  { %v924_v58 = vpop.permute.xlu1 %923 }
0x10db   :  { %3773 = vmatmul.mubr.msk.bf16.vlgmr.msra.gmra.mxu1 %vm205_vm1, %v924_v58  ;;  %v992_v58 = vld [vmem:[#allocation2 + $0xa8] sm:$0xff] }
0x10dc   :  { %1081 = vmatpush1.bf16.msra.mxu1 %v4122_v20  ;;  %1104 = vmatprep.mubr.bf16.mxu1 %v4047_v3 }
0x10dd   :  { %1082 = vmatprep.subr.bf16.mxu1 %v4134_v25 }
0x10e0   :  { %1083 = vmatpush1.bf16.msra.mxu1 %v4144_v28 }
0x10e1   :  { %1084 = vmatprep.subr.bf16.mxu1 %v4157_v32 }
0x10e4   :  { %1085 = vmatpush1.bf16.msra.mxu1 %v4175_v37 }
0x10e5   :  { %1086 = vmatprep.subr.bf16.mxu1 %v4178_v38 }
0x10e8   :  { %1087 = vmatpush1.bf16.msra.mxu1 %v4190_v42 }
0x10e9   :  { %1224 = vmatprep.subr.bf16.mxu1 %v4114_v17 }
0x119b   :  { %v962_v60 = vpop.f32.mrf.mxu1 }
0x119c   :  { %v963_v29 = vadd.f32 %v962_v60, %v4355_v26 }
0x119d   :  { %v964_v5 = vpop.f32.mrf.mxu1 }
0x119e   :  { %v969_v8 = vadd.f32 %v963_v29, %v4321_v49  ;;  %v965_v40 = vadd.f32 %v964_v5, %v4363_v46 }
0x119f   :  { %v966_v11 = vpop.f32.mrf.mxu1 }
0x11a0   :  { %v970_v12 = vmul.f32 0.5, %v969_v8 }
0x11a1   :  { %v967_v13 = vpop.f32.mrf.mxu1 }
0x11a2   :  { %3922 = vtanh.f32 %v970_v12 }
0x11af   :  { %v3923_v14 = vpop.eup %3922 }
0x11b0   :  { %v972_v19 = vmul.f32 0.5, %v3923_v14 }
0x11b2   :  { %v973_v21 = vadd.f32 0.5, %v972_v19 }
0x11b4   :  { %v974_v24 = vmul.f32 %v973_v21, %v965_v40  ;;  %v977_v31 = vsub.f32 1.0, %v973_v21  ;;  %v983_v49 = vmul.f32 %v973_v21, %v4527_v55 }
0x11b6   :  { %v975_v30 = vadd.f32 %v974_v24, %v920_v27 }
0x11b8   :  { %3924 = vtanh.f32 %v975_v30 }
0x11c5   :  { %v3925_v23 = vpop.eup %3924 }
0x11c6   :  { %979 = vrot.lane.b32.xlu0 %v3925_v23, %s4048_s20 }
0x1238   :  { %v980_v35 = vpop.permute.xlu0 %979 }
0x1239   :  { %v982_v36 = vmul.f32 %v980_v35, %v977_v31 }
0x123b   :  { %v4547_v39 = vadd.f32 %v983_v49, %v982_v36 }
0x123d   :  { %v993_v9 = vpack.c.bf16 %v4547_v39, %v4547_v39 }
0x123f   :  { %995 = vrot.lane.b32.xlu1 %v993_v9, %s4048_s20 }
0x12b1   :  { %v996_v41 = vpop.permute.xlu1 %995 }
0x12b2   :  { %3774 = vmatmul.mubr.msk.bf16.vlgmr.msra.gmra.mxu0 %vm205_vm1, %v996_v41  ;;  %v1064_v41 = vld [vmem:[#allocation2 + $0xb8] sm:$0xff] }
0x12b3   :  { %1153 = vmatpush1.bf16.msra.mxu0 %v4122_v20  ;;  %1176 = vmatprep.mubr.bf16.mxu0 %v4047_v3 }
0x12b4   :  { %1154 = vmatprep.subr.bf16.mxu0 %v4134_v25 }
0x12b7   :  { %1155 = vmatpush1.bf16.msra.mxu0 %v4144_v28 }
0x12b8   :  { %1156 = vmatprep.subr.bf16.mxu0 %v4157_v32 }
0x12bb   :  { %1157 = vmatpush1.bf16.msra.mxu0 %v4175_v37 }
0x12bc   :  { %1158 = vmatprep.subr.bf16.mxu0 %v4178_v38 }
0x12bf   :  { %1159 = vmatpush1.bf16.msra.mxu0 %v4190_v42 }
0x12c0   :  { %1296 = vmatprep.subr.bf16.mxu0 %v4114_v17 }
0x1372   :  { %v1034_v44 = vpop.f32.mrf.mxu0 }
0x1373   :  { %v1035_v34 = vadd.f32 %v1034_v44, %v4355_v26 }
0x1374   :  { %v1036_v47 = vpop.f32.mrf.mxu0 }
0x1375   :  { %v1041_v2 = vadd.f32 %v1035_v34, %v4326_v53  ;;  %v1037_v45 = vadd.f32 %v1036_v47, %v4363_v46 }
0x1376   :  { %v1038_v50 = vpop.f32.mrf.mxu0 }
0x1377   :  { %v1042_v51 = vmul.f32 0.5, %v1041_v2 }
0x1378   :  { %v1039_v18 = vpop.f32.mrf.mxu0 }
0x1379   :  { %3926 = vtanh.f32 %v1042_v51 }
0x1386   :  { %v3927_v4 = vpop.eup %3926 }
0x1387   :  { %v1044_v52 = vmul.f32 0.5, %v3927_v4 }
0x1389   :  { %v1045_v54 = vadd.f32 0.5, %v1044_v52 }
0x138b   :  { %v1046_v56 = vmul.f32 %v1045_v54, %v1037_v45  ;;  %v1049_v5 = vsub.f32 1.0, %v1045_v54  ;;  %v1055_v53 = vmul.f32 %v1045_v54, %v4547_v39 }
0x138d   :  { %v1047_v60 = vadd.f32 %v1046_v56, %v992_v58 }
0x138f   :  { %3928 = vtanh.f32 %v1047_v60 }
0x139c   :  { %v3929_v29 = vpop.eup %3928 }
0x139d   :  { %1051 = vrot.lane.b32.xlu0 %v3929_v29, %s4048_s20 }
0x140f   :  { %v1052_v8 = vpop.permute.xlu0 %1051 }
0x1410   :  { %v1054_v11 = vmul.f32 %v1052_v8, %v1049_v5 }
0x1412   :  { %v4567_v12 = vadd.f32 %v1055_v53, %v1054_v11 }
0x1414   :  { %v1065_v13 = vpack.c.bf16 %v4567_v12, %v4567_v12 }
0x1416   :  { %1067 = vrot.lane.b32.xlu1 %v1065_v13, %s4048_s20  ;;  %v1136_v13 = vld [vmem:[#allocation2 + $0xc8] sm:$0xff] }
0x1488   :  { %v1068_v14 = vpop.permute.xlu1 %1067 }
0x1489   :  { %3775 = vmatmul.mubr.msk.bf16.vlgmr.msra.gmra.mxu1 %vm205_vm1, %v1068_v14 }
0x148a   :  { %1225 = vmatpush1.bf16.msra.mxu1 %v4122_v20  ;;  %1248 = vmatprep.mubr.bf16.mxu1 %v4047_v3 }
0x148b   :  { %1226 = vmatprep.subr.bf16.mxu1 %v4134_v25 }
0x148e   :  { %1227 = vmatpush1.bf16.msra.mxu1 %v4144_v28 }
0x148f   :  { %1228 = vmatprep.subr.bf16.mxu1 %v4157_v32 }
0x1492   :  { %1229 = vmatpush1.bf16.msra.mxu1 %v4175_v37 }
0x1493   :  { %1230 = vmatprep.subr.bf16.mxu1 %v4178_v38 }
0x1496   :  { %1231 = vmatpush1.bf16.msra.mxu1 %v4190_v42 }
0x1497   :  { %1368 = vmatprep.subr.bf16.mxu1 %v4114_v17 }
0x1549   :  { %v1106_v19 = vpop.f32.mrf.mxu1 }
0x154a   :  { %v1107_v40 = vadd.f32 %v1106_v19, %v4355_v26 }
0x154b   :  { %v1108_v21 = vpop.f32.mrf.mxu1 }
0x154c   :  { %v1113_v24 = vadd.f32 %v1107_v40, %v4331_v57  ;;  %v1109_v49 = vadd.f32 %v1108_v21, %v4363_v46 }
0x154d   :  { %v1110_v27 = vpop.f32.mrf.mxu1 }
0x154e   :  { %v1114_v30 = vmul.f32 0.5, %v1113_v24 }
0x154f   :  { %v1111_v23 = vpop.f32.mrf.mxu1 }
0x1550   :  { %3930 = vtanh.f32 %v1114_v30 }
0x155d   :  { %v3931_v31 = vpop.eup %3930 }
0x155e   :  { %v1116_v35 = vmul.f32 0.5, %v3931_v31 }
0x1560   :  { %v1117_v36 = vadd.f32 0.5, %v1116_v35 }
0x1562   :  { %v1118_v9 = vmul.f32 %v1117_v36, %v1109_v49  ;;  %v1121_v34 = vsub.f32 1.0, %v1117_v36  ;;  %v1127_v57 = vmul.f32 %v1117_v36, %v4567_v12 }
0x1564   :  { %v1119_v44 = vadd.f32 %v1118_v9, %v1064_v41 }
0x1566   :  { %3932 = vtanh.f32 %v1119_v44 }
0x1573   :  { %v3933_v17 = vpop.eup %3932 }
0x1574   :  { %1123 = vrot.lane.b32.xlu0 %v3933_v17, %s4048_s20  ;;  %v1208_v17 = vld [vmem:[#allocation2 + $0xd8] sm:$0xff] }
0x15e6   :  { %v1124_v47 = vpop.permute.xlu0 %1123 }
0x15e7   :  { %v1126_v2 = vmul.f32 %v1124_v47, %v1121_v34 }
0x15e9   :  { %v4587_v50 = vadd.f32 %v1127_v57, %v1126_v2 }
0x15eb   :  { %v1137_v51 = vpack.c.bf16 %v4587_v50, %v4587_v50 }
0x15ed   :  { %1139 = vrot.lane.b32.xlu1 %v1137_v51, %s4048_s20 }
0x165f   :  { %v1140_v18 = vpop.permute.xlu1 %1139 }
0x1660   :  { %3776 = vmatmul.mubr.msk.bf16.vlgmr.msra.gmra.mxu0 %vm205_vm1, %v1140_v18 }
0x1661   :  { %1297 = vmatpush1.bf16.msra.mxu0 %v4122_v20  ;;  %1320 = vmatprep.mubr.bf16.mxu0 %v4047_v3 }
0x1662   :  { %1298 = vmatprep.subr.bf16.mxu0 %v4134_v25 }
0x1665   :  { %1299 = vmatpush1.bf16.msra.mxu0 %v4144_v28 }
0x1666   :  { %1300 = vmatprep.subr.bf16.mxu0 %v4157_v32 }
0x1669   :  { %1301 = vmatpush1.bf16.msra.mxu0 %v4175_v37 }
0x166a   :  { %1302 = vmatprep.subr.bf16.mxu0 %v4178_v38 }
0x166d   :  { %1303 = vmatpush1.bf16.msra.mxu0 %v4190_v42 }
0x1720   :  { %v1178_v4 = vpop.f32.mrf.mxu0 }
0x1721   :  { %v1179_v52 = vadd.f32 %v1178_v4, %v4355_v26 }
0x1722   :  { %v1180_v45 = vpop.f32.mrf.mxu0 }
0x1723   :  { %v1185_v54 = vadd.f32 %v1179_v52, %v4336_v0  ;;  %v1181_v8 = vadd.f32 %v1180_v45, %v4363_v46 }
0x1724   :  { %v1182_v56 = vpop.f32.mrf.mxu0 }
0x1725   :  { %v1186_v58 = vmul.f32 0.5, %v1185_v54 }
0x1726   :  { %v1183_v60 = vpop.f32.mrf.mxu0 }
0x1727   :  { %3934 = vtanh.f32 %v1186_v58 }
0x1734   :  { %v3935_v29 = vpop.eup %3934 }
0x1735   :  { %v1188_v5 = vmul.f32 0.5, %v3935_v29 }
0x1737   :  { %v1189_v53 = vadd.f32 0.5, %v1188_v5 }
0x1739   :  { %v1190_v11 = vmul.f32 %v1189_v53, %v1181_v8  ;;  %v1193_v40 = vsub.f32 1.0, %v1189_v53  ;;  %v1199_v0 = vmul.f32 %v1189_v53, %v4587_v50 }
0x173b   :  { %v1191_v14 = vadd.f32 %v1190_v11, %v1136_v13  ;;  %v1280_v13 = vld [vmem:[#allocation2 + $0xe8] sm:$0xff] }
0x173d   :  { %3936 = vtanh.f32 %v1191_v14 }
0x174a   :  { %v3937_v19 = vpop.eup %3936 }
0x174b   :  { %1195 = vrot.lane.b32.xlu0 %v3937_v19, %s4048_s20 }
0x17bd   :  { %v1196_v21 = vpop.permute.xlu0 %1195 }
0x17be   :  { %v1198_v24 = vmul.f32 %v1196_v21, %v1193_v40 }
0x17c0   :  { %v4606_v27 = vadd.f32 %v1199_v0, %v1198_v24 }
0x17c2   :  { %v1209_v30 = vpack.c.bf16 %v4606_v27, %v4606_v27 }
0x17c4   :  { %1211 = vrot.lane.b32.xlu1 %v1209_v30, %s4048_s20 }
0x1836   :  { %v1212_v23 = vpop.permute.xlu1 %1211 }
0x1837   :  { %3777 = vmatmul.mubr.msk.bf16.vlgmr.msra.gmra.mxu1 %vm205_vm1, %v1212_v23 }
0x1838   :  { %1369 = vmatpush1.bf16.msra.mxu1 %v4122_v20  ;;  %1392 = vmatprep.mubr.bf16.mxu1 %v4047_v3 }
0x1839   :  { %1370 = vmatprep.subr.bf16.mxu1 %v4134_v25 }
0x183c   :  { %1371 = vmatpush1.bf16.msra.mxu1 %v4144_v28 }
0x183d   :  { %1372 = vmatprep.subr.bf16.mxu1 %v4157_v32 }
0x1840   :  { %1373 = vmatpush1.bf16.msra.mxu1 %v4175_v37 }
0x1841   :  { %1374 = vmatprep.subr.bf16.mxu1 %v4178_v38 }
0x1844   :  { %1375 = vmatpush1.bf16.msra.mxu1 %v4190_v42 }
0x18f7   :  { %v1250_v31 = vpop.f32.mrf.mxu1 }
0x18f8   :  { %v1251_v35 = vadd.f32 %v1250_v31, %v4355_v26 }
0x18f9   :  { %v1252_v49 = vpop.f32.mrf.mxu1 }
0x18fa   :  { %v1257_v20 = vadd.f32 %v1251_v35, %v4341_v10  ;;  %v1253_v32 = vadd.f32 %v1252_v49, %v4363_v46 }
0x18fb   :  { %v1254_v36 = vpop.f32.mrf.mxu1 }
0x18fc   :  { %v1258_v9 = vmul.f32 0.5, %v1257_v20  ;;  %v1351_v20 = vld [vmem:[#allocation2 + $0xf0] sm:$0xff] }
0x18fd   :  { %v1255_v41 = vpop.f32.mrf.mxu1 }
0x18fe   :  { %3938 = vtanh.f32 %v1258_v9 }
0x190b   :  { %v3939_v25 = vpop.eup %3938 }
0x190c   :  { %v1260_v28 = vmul.f32 0.5, %v3939_v25 }
0x190e   :  { %v1261_v44 = vadd.f32 0.5, %v1260_v28 }
0x1910   :  { %v1262_v37 = vmul.f32 %v1261_v44, %v1253_v32  ;;  %v1265_v34 = vsub.f32 1.0, %v1261_v44  ;;  %v1271_v10 = vmul.f32 %v1261_v44, %v4606_v27 }
0x1912   :  { %v1263_v38 = vadd.f32 %v1262_v37, %v1208_v17 }
0x1914   :  { %3940 = vtanh.f32 %v1263_v38 }
0x1921   :  { %v3941_v42 = vpop.eup %3940 }
0x1922   :  { %1267 = vrot.lane.b32.xlu0 %v3941_v42, %s4048_s20  ;;  %v1352_v42 = vld [vmem:[#allocation2 + $0xf8] sm:$0xff] }
0x1994   :  { %v1268_v47 = vpop.permute.xlu0 %1267 }
0x1995   :  { %v1270_v57 = vmul.f32 %v1268_v47, %v1265_v34 }
0x1997   :  { %v4625_v2 = vadd.f32 %v1271_v10, %v1270_v57 }
0x1999   :  { %v1281_v51 = vpack.c.bf16 %v4625_v2, %v4625_v2 }
0x199b   :  { %1283 = vrot.lane.b32.xlu1 %v1281_v51, %s4048_s20 }
0x1a0d   :  { %v1284_v18 = vpop.permute.xlu1 %1283 }
0x1a0e   :  { %3778 = vmatmul.mubr.msk.bf16.vlgmr.msra.gmra.mxu0 %vm205_vm1, %v1284_v18 }
0x1ace   :  { %v1322_v4 = vpop.f32.mrf.mxu0 }
0x1acf   :  { %v1323_v52 = vadd.f32 %v1322_v4, %v4355_v26  ;;  %v4708_v4 = vld [vmem:[%s5640_s2 + $0x70] ss:$0 sm:$0xff] }
0x1ad0   :  { %v1324_v45 = vpop.f32.mrf.mxu0 }
0x1ad1   :  { %v1329_v54 = vadd.f32 %v1323_v52, %v4346_v15  ;;  %v1325_v8 = vadd.f32 %v1324_v45, %v4363_v46 }
0x1ad2   :  { %v1326_v56 = vpop.f32.mrf.mxu0 }
0x1ad3   :  { %v1330_v58 = vmul.f32 0.5, %v1329_v54 }
0x1ad4   :  { %v1327_v60 = vpop.f32.mrf.mxu0 }
0x1ad5   :  { %3942 = vtanh.f32 %v1330_v58 }
0x1ae2   :  { %v3943_v29 = vpop.eup %3942 }
0x1ae3   :  { %v1332_v5 = vmul.f32 0.5, %v3943_v29 }
0x1ae5   :  { %v1333_v53 = vadd.f32 0.5, %v1332_v5 }
0x1ae7   :  { %v1334_v11 = vmul.f32 %v1333_v53, %v1325_v8  ;;  %v1337_v40 = vsub.f32 1.0, %v1333_v53  ;;  %v1343_v15 = vmul.f32 %v1333_v53, %v4625_v2 }
0x1ae9   :  { %v1335_v14 = vadd.f32 %v1334_v11, %v1280_v13 }
0x1aeb   :  { %3944 = vtanh.f32 %v1335_v14 }
0x1af8   :  { %v3945_v19 = vpop.eup %3944 }
0x1af9   :  { %1339 = vrot.lane.b32.xlu0 %v3945_v19, %s4048_s20 }
0x1b6b   :  { %v1340_v21 = vpop.permute.xlu0 %1339 }
0x1b6c   :  { %v1342_v0 = vmul.f32 %v1340_v21, %v1337_v40 }
0x1b6e   :  { %v4636_v24 = vadd.f32 %v1343_v15, %v1342_v0 }
0x1b70   :  { %v1353_v30 = vpack.c.bf16 %v4636_v24, %v4636_v24 }
0x1b72   :  { %1355 = vrot.lane.b32.xlu1 %v1353_v30, %s4048_s20 }
0x1b76   :  { %770 = vrot.lane.b32.xlu1 %v4487_v48, %s4048_s20 }
0x1b7a   :  { %698 = vrot.lane.b32.xlu1 %v4467_v7, %s4048_s20 }
0x1b7e   :  { %986 = vrot.lane.b32.xlu1 %v4547_v39, %s4048_s20 }
0x1b82   :  { %410 = vrot.lane.b32.xlu1 %v4387_v43, %s4048_s20 }
0x1b86   :  { %1058 = vrot.lane.b32.xlu1 %v4567_v12, %s4048_s20 }
0x1b8a   :  { %554 = vrot.lane.b32.xlu1 %v4427_v6, %s4048_s20 }
0x1b8e   :  { %1346 = vrot.lane.b32.xlu1 %v4636_v24, %s4048_s20 }
0x1b92   :  { %1202 = vrot.lane.b32.xlu1 %v4606_v27, %s4048_s20 }
0x1be4   :  { %v1356_v48 = vpop.permute.xlu1 %1355 }
0x1be5   :  { %3779 = vmatmul.mubr.msk.bf16.vlgmr.msra.gmra.mxu1 %vm205_vm1, %v1356_v48 }
0x1be6   :  { %2378 = vmatprep.mubr.bf16.mxu1 %v4047_v3 }
0x1be8   :  { %v771_v7 = vpop.permute.xlu1 %770 }
0x1be9   :  { %773 = vst.msk [vmem:[#allocation3 + $0x30] sm:$0xff] %vm66_vm0, %v771_v7 }
0x1bea   :  { %774 = vst.msk [vmem:[#allocation3 + $0x48] sm:$0xff] %vm341_vm2, %v771_v7 }
0x1bec   :  { %v699_v43 = vpop.permute.xlu1 %698 }
0x1bed   :  { %701 = vst.msk [vmem:[#allocation3 + $0x28] sm:$0xff] %vm66_vm0, %v699_v43 }
0x1bee   :  { %702 = vst.msk [vmem:[#allocation3 + $0x50] sm:$0xff] %vm341_vm2, %v699_v43 }
0x1bf0   :  { %v987_v6 = vpop.permute.xlu1 %986 }
0x1bf1   :  { %989 = vst.msk [vmem:[#allocation3 + $0x48] sm:$0xff] %vm66_vm0, %v987_v6 }
0x1bf2   :  { %990 = vst.msk [vmem:[#allocation3 + $0x30] sm:$0xff] %vm341_vm2, %v987_v6 }
0x1bf4   :  { %v411_v39 = vpop.permute.xlu1 %410 }
0x1bf5   :  { %413 = vst.msk [vmem:[#allocation3 + $0x8] sm:$0xff] %vm66_vm0, %v411_v39 }
0x1bf6   :  { %414 = vst.msk [vmem:[#allocation3 + $0x70] sm:$0xff] %vm341_vm2, %v411_v39 }
0x1bf8   :  { %v1059_v12 = vpop.permute.xlu1 %1058  ;;  %v1432_v56 = vld [vmem:[#allocation3 + $0x48] sm:$0xff] }
0x1bf9   :  { %1061 = vst.msk [vmem:[#allocation3 + $0x50] sm:$0xff] %vm66_vm0, %v1059_v12  ;;  %v1448_v60 = vmax.f32 %v1432_v56, 0.0 }
0x1bfa   :  { %1062 = vst.msk [vmem:[#allocation3 + $0x28] sm:$0xff] %vm341_vm2, %v1059_v12 }
0x1bfb   :  { %v1470_v13 = vmul.f32 %v4708_v4, %v1448_v60 }
0x1bfc   :  { %v555_v27 = vpop.permute.xlu1 %554 }
0x1bfd   :  { %557 = vst.msk [vmem:[#allocation3 + $0x18] sm:$0xff] %vm66_vm0, %v555_v27  ;;  %v1504_v15 = vsel %vm205_vm1, %v1470_v13, 0.0 }
0x1bfe   :  { %558 = vst.msk [vmem:[#allocation3 + $0x60] sm:$0xff] %vm341_vm2, %v555_v27 }
0x1c00   :  { %v1347_v23 = vpop.permute.xlu1 %1346  ;;  %v1433_v5 = vld [vmem:[#allocation3 + $0x50] sm:$0xff] }
0x1c01   :  { %1349 = vst.msk [vmem:[#allocation3 + $0x70] sm:$0xff] %vm66_vm0, %v1347_v23  ;;  %v1449_v14 = vmax.f32 %v1433_v5, 0.0  ;;  %v1561_v5 = vld [vmem:[%s5640_s2] sm:$0xff] }
0x1c02   :  { %1350 = vst.msk [vmem:[#allocation3 + $0x8] sm:$0xff] %vm341_vm2, %v1347_v23  ;;  %3840 = vmatprep.mubr.msk.f32.mxu0 %vm1678_vm3, %v1561_v5 }
0x1c03   :  { %v1471_v0 = vmul.f32 %v4708_v4, %v1449_v14 }
0x1c04   :  { %v1203_v31 = vpop.permute.xlu1 %1202 }
0x1c05   :  { %1205 = vst.msk [vmem:[#allocation3 + $0x60] sm:$0xff] %vm66_vm0, %v1203_v31  ;;  %v1507_v48 = vsel %vm205_vm1, %v1471_v0, 0.0  ;;  %v1590_v0 = vand.u32 127, %v56_v61 }
0x1c06   :  { %1206 = vst.msk [vmem:[#allocation3 + $0x18] sm:$0xff] %vm341_vm2, %v1203_v31 }
0x1c08   :  { %v1437_v27 = vld [vmem:[#allocation3 + $0x70] sm:$0xff] }
0x1c09   :  { %v1424_v19 = vld [vmem:[#allocation3 + $0x8] sm:$0xff] }
0x1c0c   :  { %v1435_v58 = vld [vmem:[#allocation3 + $0x60] sm:$0xff] }
0x1c0d   :  { %v1451_v53 = vmax.f32 %v1435_v58, 0.0  ;;  %v1426_v12 = vld [vmem:[#allocation3 + $0x18] sm:$0xff] }
0x1c0f   :  { %v1473_v21 = vmul.f32 %v4708_v4, %v1451_v53 }
0x1c11   :  { %v1513_v30 = vsel %vm205_vm1, %v1473_v21, 0.0 }
0x1ca5   :  { %v1394_v35 = vpop.f32.mrf.mxu1 }
0x1ca6   :  { %v1395_v49 = vadd.f32 %v1394_v35, %v4355_v26  ;;  %v1456_v26 = vld [vmem:[%s5640_s2 + $0x71] sm:$0x1]  ;;  %v1442_v35 = vmax.f32 %v1426_v12, 0.0 }
0x1ca7   :  { %v1396_v36 = vpop.f32.mrf.mxu1  ;;  %3875 = vpush %v1456_v26 }
0x1ca8   :  { %v1401_v9 = vadd.f32 %v1395_v49, %v1351_v20  ;;  %v1397_v37 = vadd.f32 %v1396_v36, %v4363_v46  ;;  %v1453_v49 = vmax.f32 %v1437_v27, 0.0 }
0x1ca9   :  { %v1398_v41 = vpop.f32.mrf.mxu1 }
0x1caa   :  { %v1402_v25 = vmul.f32 0.5, %v1401_v9 }
0x1cab   :  { %v1399_v28 = vpop.f32.mrf.mxu1 }
0x1cac   :  { %3946 = vtanh.f32 %v1402_v25 }
0x1cb9   :  { %v3947_v32 = vpop.eup %3946 }
0x1cba   :  { %v1404_v44 = vmul.f32 0.5, %v3947_v32  ;;  %v1464_v32 = vmul.f32 %v4708_v4, %v1442_v35 }
0x1cbc   :  { %v1405_v17 = vadd.f32 0.5, %v1404_v44  ;;  %v1475_v44 = vmul.f32 %v4708_v4, %v1453_v49 }
0x1cbe   :  { %v1406_v38 = vmul.f32 %v1405_v17, %v1397_v37  ;;  %v1409_v46 = vsub.f32 1.0, %v1405_v17  ;;  %v1519_v26 = vsel %vm205_vm1, %v1475_v44, 0.0 }
0x1cc0   :  { %v1407_v34 = vadd.f32 %v1406_v38, %v1352_v42 }
0x1cc2   :  { %3948 = vtanh.f32 %v1407_v34  ;;  %v1428_v34 = vld [vmem:[#allocation3 + $0x28] sm:$0xff] }
0x1ccf   :  { %v3949_v47 = vpop.eup %3948 }
0x1cd0   :  { %1411 = vrot.lane.b32.xlu0 %v3949_v47, %s4048_s20 }
0x1cd4   :  { %842 = vrot.lane.b32.xlu0 %v4507_v22, %s4048_s20 }
0x1cd8   :  { %914 = vrot.lane.b32.xlu0 %v4527_v55, %s4048_s20  ;;  %v1415_v55 = vmul.f32 %v1405_v17, %v4636_v24  ;;  %v1440_v24 = vmax.f32 %v1424_v19, 0.0  ;;  %s3876_s27 = spop %3875 }
0x1cd9   :  { %v4755_v14 = vstv %s3876_s27 }
0x1cda   :  { %v1462_v7 = vmul.f32 %v4708_v4, %v1440_v24 }
0x1cdc   :  { %337 = vrot.lane.b32.xlu0 %v4367_v59, %s4048_s20  ;;  %v1480_v43 = vsel %vm205_vm1, %v1462_v7, 0.0 }
0x1ce0   :  { %626 = vrot.lane.b32.xlu0 %v4447_v33, %s4048_s20 }
0x1ce4   :  { %482 = vrot.lane.b32.xlu0 %v4407_v16, %s4048_s20 }
0x1ce8   :  { %1130 = vrot.lane.b32.xlu0 %v4587_v50, %s4048_s20 }
0x1d42   :  { %v1412_v22 = vpop.permute.xlu0 %1411 }
0x1d43   :  { %v1414_v10 = vmul.f32 %v1412_v22, %v1409_v46  ;;  %v1444_v46 = vmax.f32 %v1428_v34, 0.0  ;;  %v1486_v22 = vsel %vm205_vm1, %v1464_v32, 0.0 }
0x1d45   :  { %v1416_v59 = vadd.f32 %v1415_v55, %v1414_v10 }
0x1d46   :  { %v843_v57 = vpop.permute.xlu0 %842 }
0x1d47   :  { %845 = vst.msk [vmem:[#allocation3 + $0x38] sm:$0xff] %vm66_vm0, %v843_v57  ;;  %1418 = vrot.lane.b32.xlu0 %v1416_v59, %s4048_s20 }
0x1d48   :  { %846 = vst.msk [vmem:[#allocation3 + $0x40] sm:$0xff] %vm341_vm2, %v843_v57  ;;  %v1429_v57 = vld [vmem:[#allocation3 + $0x30] sm:$0xff] }
0x1d4a   :  { %v915_v16 = vpop.permute.xlu0 %914 }
0x1d4b   :  { %917 = vst.msk [vmem:[#allocation3 + $0x40] sm:$0xff] %vm66_vm0, %v915_v16  ;;  %1274 = vrot.lane.b32.xlu0 %v4625_v2, %s4048_s20 }
0x1d4c   :  { %918 = vst.msk [vmem:[#allocation3 + $0x38] sm:$0xff] %vm341_vm2, %v915_v16 }
0x1d4e   :  { %v338_v33 = vpop.permute.xlu0 %337 }
0x1d4f   :  { %340 = vst.msk [vmem:[#allocation3] sm:$0xff] %vm66_vm0, %v338_v33 }
0x1d50   :  { %342 = vst.msk [vmem:[#allocation3 + $0x78] sm:$0xff] %vm341_vm2, %v338_v33  ;;  %v1466_v33 = vmul.f32 %v4708_v4, %v1444_v46 }
0x1d52   :  { %v627_v50 = vpop.permute.xlu0 %626  ;;  %v1431_v51 = vld [vmem:[#allocation3 + $0x40] sm:$0xff] }
0x1d53   :  { %629 = vst.msk [vmem:[#allocation3 + $0x20] sm:$0xff] %vm66_vm0, %v627_v50  ;;  %v1447_v18 = vmax.f32 %v1431_v51, 0.0  ;;  %v1430_v16 = vld [vmem:[#allocation3 + $0x38] sm:$0xff] }
0x1d54   :  { %630 = vst.msk [vmem:[#allocation3 + $0x58] sm:$0xff] %vm341_vm2, %v627_v50  ;;  %v1445_v50 = vmax.f32 %v1429_v57, 0.0 }
0x1d55   :  { %v1469_v52 = vmul.f32 %v4708_v4, %v1447_v18 }
0x1d56   :  { %v483_v2 = vpop.permute.xlu0 %482  ;;  %v1467_v56 = vmul.f32 %v4708_v4, %v1445_v50 }
0x1d57   :  { %485 = vst.msk [vmem:[#allocation3 + $0x10] sm:$0xff] %vm66_vm0, %v483_v2  ;;  %v1501_v45 = vsel %vm205_vm1, %v1469_v52, 0.0 }
0x1d58   :  { %486 = vst.msk [vmem:[#allocation3 + $0x68] sm:$0xff] %vm341_vm2, %v483_v2  ;;  %1502 = vadd.xlane.f32.xlu1 %v1501_v45  ;;  %v1446_v2 = vmax.f32 %v1430_v16, 0.0  ;;  %v1492_v45 = vsel %vm205_vm1, %v1466_v33, 0.0  ;;  %v1495_v60 = vsel %vm205_vm1, %v1467_v56, 0.0 }
0x1d5a   :  { %v1131_v54 = vpop.permute.xlu0 %1130  ;;  %v1468_v58 = vmul.f32 %v4708_v4, %v1446_v2 }
0x1d5b   :  { %1133 = vst.msk [vmem:[#allocation3 + $0x58] sm:$0xff] %vm66_vm0, %v1131_v54 }
0x1d5c   :  { %1134 = vst.msk [vmem:[#allocation3 + $0x20] sm:$0xff] %vm341_vm2, %v1131_v54 }
0x1d62   :  { %v1434_v29 = vld [vmem:[#allocation3 + $0x58] sm:$0xff] }
0x1d63   :  { %v1450_v8 = vmax.f32 %v1434_v29, 0.0  ;;  %v1427_v9 = vld [vmem:[#allocation3 + $0x20] sm:$0xff]  ;;  %v1498_v29 = vsel %vm205_vm1, %v1468_v58, 0.0 }
0x1d64   :  { %v1443_v38 = vmax.f32 %v1427_v9, 0.0 }
0x1d65   :  { %v1472_v11 = vmul.f32 %v4708_v4, %v1450_v8  ;;  %v4049_v8 = vmov 16  }
0x1d66   :  { %v1465_v55 = vmul.f32 %v4708_v4, %v1443_v38  ;;  %3881 = vset.pattern.permute.xlu0 %v4049_v8 }
0x1d67   :  { %v1510_v40 = vsel %vm205_vm1, %v1472_v11, 0.0 }
0x1d68   :  { %1511 = vadd.xlane.f32.xlu1 %v1510_v40  ;;  %v1489_v51 = vsel %vm205_vm1, %v1465_v55, 0.0 }
0x1d6a   :  { %1505 = vadd.xlane.f32.xlu0 %v1504_v15 }
0x1d6c   :  { %1514 = vadd.xlane.f32.xlu1 %v1513_v30 }
0x1d6e   :  { %1508 = vadd.xlane.f32.xlu0 %v1507_v48 }
0x1d72   :  { %1481 = vadd.xlane.f32.xlu0 %v1480_v43 }
0x1db9   :  { %v1419_v6 = vpop.permute.xlu0 %1418 }
0x1dba   :  { %1421 = vst.msk [vmem:[#allocation3 + $0x78] sm:$0xff] %vm66_vm0, %v1419_v6 }
0x1dbb   :  { %1422 = vst.msk [vmem:[#allocation3] sm:$0xff] %vm341_vm2, %v1419_v6  ;;  %v4762_v6 = vsub.s32 %v1590_v0, %v4259_v62 }
0x1dbd   :  { %v1275_v39 = vpop.permute.xlu0 %1274 }
0x1dbe   :  { %1277 = vst.msk [vmem:[#allocation3 + $0x68] sm:$0xff] %vm66_vm0, %v1275_v39 }
0x1dbf   :  { %1278 = vst.msk [vmem:[#allocation3 + $0x10] sm:$0xff] %vm341_vm2, %v1275_v39 }
0x1dc1   :  { %v1438_v47 = vld [vmem:[#allocation3 + $0x78] sm:$0xff] }
0x1dc2   :  { %v1423_v41 = vld [vmem:[#allocation3] sm:$0xff]  ;;  %v1454_v59 = vmax.f32 %v1438_v47, 0.0 }
0x1dc3   :  { %v1439_v42 = vmax.f32 %v1423_v41, 0.0 }
0x1dc4   :  { %v1476_v52 = vmul.f32 %v4708_v4, %v1454_v59 }
0x1dc5   :  { %v1436_v31 = vld [vmem:[#allocation3 + $0x68] sm:$0xff]  ;;  %v1461_v10 = vmul.f32 %v4708_v4, %v1439_v42 }
0x1dc6   :  { %v1425_v23 = vld [vmem:[#allocation3 + $0x10] sm:$0xff]  ;;  %v1452_v36 = vmax.f32 %v1436_v31, 0.0  ;;  %v1522_v54 = vsel %vm205_vm1, %v1476_v52, 0.0 }
0x1dc7   :  { %v1441_v20 = vmax.f32 %v1425_v23, 0.0  ;;  %v1477_v18 = vsel %vm205_vm1, %v1461_v10, 0.0 }
0x1dc8   :  { %v1474_v28 = vmul.f32 %v4708_v4, %v1452_v36 }
0x1dc9   :  { %v1463_v25 = vmul.f32 %v4708_v4, %v1441_v20 }
0x1dca   :  { %v1516_v17 = vsel %vm205_vm1, %v1474_v28, 0.0 }
0x1dcb   :  { %v1483_v37 = vsel %vm205_vm1, %v1463_v25, 0.0  ;;  %1517 = vadd.xlane.f32.xlu1 %v1516_v17 }
0x1dcc   :  { %1484 = vadd.xlane.f32.xlu0 %v1483_v37 }
0x1dcf   :  { %1520 = vadd.xlane.f32.xlu1 %v1519_v26 }
0x1dd0   :  { %1487 = vadd.xlane.f32.xlu0 %v1486_v22 }
0x1dd3   :  { %1478 = vadd.xlane.f32.xlu1 %v1477_v18 }
0x1dd4   :  { %1490 = vadd.xlane.f32.xlu0 %v1489_v51 }
0x1dd7   :  { %1523 = vadd.xlane.f32.xlu1 %v1522_v54 }
0x1dd8   :  { %1493 = vadd.xlane.f32.xlu0 %v1492_v45 }
0x1ddb   :  { %1499 = vadd.xlane.f32.xlu1 %v1498_v29 }
0x1ddc   :  { %1496 = vadd.xlane.f32.xlu0 %v1495_v60 }
0x1de1   :  { %v1503_v53 = vpop.xlane.xlu1 %1502 }
0x1de2   :  { %v1537_v24 = vadd.f32 %v4755_v14, %v1503_v53 }
0x1de4   :  { %v1553_v39 = vmax.f32 %v1537_v24, 0.0 }
0x1de6   :  { %v1626_v36 = vrot.slane %v1553_v39, %v4762_v6 }
0x1df1   :  { %v1512_v11 = vpop.xlane.xlu1 %1511 }
0x1df2   :  { %1565 = vperm.xlu0 %3881, %v1561_v5   ;;  %v1540_v12 = vadd.f32 %v4755_v14, %v1512_v11 }
0x1df3   :  { %v1506_v4 = vpop.xlane.xlu0 %1505 }
0x1df4   :  { %v1538_v19 = vadd.f32 %v4755_v14, %v1506_v4  ;;  %v1556_v9 = vmax.f32 %v1540_v12, 0.0 }
0x1df5   :  { %v1515_v40 = vpop.xlane.xlu1 %1514 }
0x1df6   :  { %v1554_v30 = vmax.f32 %v1538_v19, 0.0  ;;  %v1541_v27 = vadd.f32 %v4755_v14, %v1515_v40  ;;  %v1638_v46 = vrot.slane %v1556_v9, %v4762_v6  ;;  %v2319_v9 = vld [vmem:[%s5638_s1 + $0x120] sm:$0xff] }
0x1df7   :  { %v1509_v13 = vpop.xlane.xlu0 %1508 }
0x1df8   :  { %v1539_v15 = vadd.f32 %v4755_v14, %v1509_v13  ;;  %v1630_v23 = vrot.slane %v1554_v30, %v4762_v6  ;;  %v1557_v28 = vmax.f32 %v1541_v27, 0.0 }
0x1dfa   :  { %v1555_v43 = vmax.f32 %v1539_v15, 0.0  ;;  %v1669_v32 = vsel %vm1655_vm4, %v1630_v23, %v1626_v36  ;;  %v1642_v10 = vrot.slane %v1557_v28, %v4762_v6  ;;  %v2322_v36 = vld [vmem:[%s5638_s1 + $0x138] sm:$0xff]  ;;  %v2321_v28 = vld [vmem:[%s5638_s1 + $0x130] sm:$0xff] }
0x1dfb   :  { %v1482_v21 = vpop.xlane.xlu0 %1481 }
0x1dfc   :  { %v1530_v31 = vadd.f32 %v4755_v14, %v1482_v21  ;;  %v1634_v20 = vrot.slane %v1555_v43, %v4762_v6 }
0x1dfe   :  { %v1546_v44 = vmax.f32 %v1530_v31, 0.0  ;;  %v1670_v34 = vsel %vm1657_vm5, %v1634_v20, %v1669_v32  ;;  %v2320_v20 = vld [vmem:[%s5638_s1 + $0x128] sm:$0xff] }
0x1dff   :  { %v1671_v57 = vsel %vm1659_vm6, %v1638_v46, %v1670_v34  ;;  %v2316_v32 = vld [vmem:[%s5638_s1 + $0x108] sm:$0xff]  ;;  %v1765_v46 = vld [vmem:[%s5640_s2 + $0x20] sm:$0xff] }
0x1e00   :  { %v1598_v16 = vrot.slane %v1546_v44, %v4762_v6  ;;  %v1672_v4 = vsel %vm1661_vm7, %v1642_v10, %v1671_v57  ;;  %v2318_v44 = vld [vmem:[%s5638_s1 + $0x118] sm:$0xff]  ;;  %v2312_v34 = vld [vmem:[%s5638_s1 + $0xe8] sm:$0xff]  ;;  %v2313_v10 = vld [vmem:[%s5638_s1 + $0xf0] sm:$0xff] }
0x1e01   :  { %v2310_v57 = vld [vmem:[%s5638_s1 + $0xd8] sm:$0xff] }
0x1e54   :  { %v1518_v7 = vpop.xlane.xlu1 %1517 }
0x1e55   :  { %v1485_v48 = vpop.xlane.xlu0 %1484  ;;  %v1542_v61 = vadd.f32 %v4755_v14, %v1518_v7 }
0x1e56   :  { %v1531_v41 = vadd.f32 %v4755_v14, %v1485_v48 }
0x1e57   :  { %v1558_v37 = vmax.f32 %v1542_v61, 0.0 }
0x1e58   :  { %v1521_v49 = vpop.xlane.xlu1 %1520  ;;  %v1547_v22 = vmax.f32 %v1531_v41, 0.0  ;;  %v4050_v41 = vmov 8  }
0x1e59   :  { %v1488_v35 = vpop.xlane.xlu0 %1487  ;;  %v1543_v25 = vadd.f32 %v4755_v14, %v1521_v49  ;;  %v1646_v33 = vrot.slane %v1558_v37, %v4762_v6  ;;  %v1562_v49 = vld [vmem:[%s5640_s2 + $0x8] sm:$0xff]  ;;  %3882 = vset.pattern.permute.xlu1 %v4050_v41  ;;  %3883 = vset.pattern.permute.xlu0 %v4050_v41  ;;  %v4837_v37 = vpack.c.bf16 %v2321_v28, %v2319_v9 }
0x1e5a   :  { %v1532_v17 = vadd.f32 %v4755_v14, %v1488_v35  ;;  %v1602_v56 = vrot.slane %v1547_v22, %v4762_v6 }
0x1e5b   :  { %v1559_v55 = vmax.f32 %v1543_v25, 0.0  ;;  %v1673_v40 = vsel %vm1663_vm8, %v1646_v33, %v1672_v4  ;;  %v4825_v25 = vpack.c.bf16 %v2322_v36, %v2320_v20 }
0x1e5c   :  { %v1479_v42 = vpop.xlane.xlu1 %1478  ;;  %v1548_v50 = vmax.f32 %v1532_v17, 0.0  ;;  %v4839_v17 = vpack.c.bf16 %v2318_v44, %v2316_v32 }
0x1e5d   :  { %v1491_v38 = vpop.xlane.xlu0 %1490  ;;  %v1529_v26 = vadd.f32 %v4755_v14, %v1479_v42  ;;  %v1650_v58 = vrot.slane %v1559_v55, %v4762_v6  ;;  %v2317_v42 = vld [vmem:[%s5638_s1 + $0x110] sm:$0xff]  ;;  %2354 = vmatprep.subr.bf16.mxu1 %v4825_v25  ;;  %v2311_v55 = vld [vmem:[%s5638_s1 + $0xe0] sm:$0xff] }
0x1e5e   :  { %v1533_v47 = vadd.f32 %v4755_v14, %v1491_v38  ;;  %v1606_v53 = vrot.slane %v1548_v50, %v4762_v6  ;;  %v2315_v38 = vld [vmem:[%s5638_s1 + $0x100] sm:$0xff]  ;;  %2355 = vmatpush1.bf16.msra.mxu1 %v4837_v37 }
0x1e5f   :  { %v1545_v59 = vmax.f32 %v1529_v26, 0.0  ;;  %v1674_v48 = vsel %vm1665_vm9, %v1650_v58, %v1673_v40  ;;  %v4855_v26 = vpack.c.bf16 %v2317_v42, %v2315_v38  ;;  %2356 = vmatprep.subr.bf16.mxu1 %v4839_v17  ;;  %v2307_v50 = vld [vmem:[%s5638_s1 + $0xc0] sm:$0xff]  ;;  %v4908_v58 = vld [vmem:[%s5640_s2 + $0x18] sm:$0xff] }
0x1e60   :  { %v1524_v18 = vpop.xlane.xlu1 %1523  ;;  %v1549_v52 = vmax.f32 %v1533_v47, 0.0  ;;  %v2314_v47 = vld [vmem:[%s5638_s1 + $0xf8] sm:$0xff] }
0x1e61   :  { %v1494_v51 = vpop.xlane.xlu0 %1493  ;;  %v1594_v2 = vrot.slane %v1545_v59, %v4762_v6  ;;  %v1544_v54 = vadd.f32 %v4755_v14, %v1524_v18  ;;  %v4861_v22 = vpack.c.bf16 %v2314_v47, %v2312_v34  ;;  %v2308_v59 = vld [vmem:[%s5638_s1 + $0xc8] sm:$0xff] }
0x1e62   :  { %v1534_v45 = vadd.f32 %v4755_v14, %v1494_v51  ;;  %v1610_v21 = vrot.slane %v1549_v52, %v4762_v6  ;;  %2357 = vmatpush1.bf16.msra.mxu1 %v4855_v26  ;;  %v4879_v33 = vpack.c.bf16 %v2310_v57, %v2308_v59  ;;  %v2309_v51 = vld [vmem:[%s5638_s1 + $0xd0] sm:$0xff] }
0x1e63   :  { %v1656_v60 = vsel %vm1655_vm4, %v1598_v16, %v1594_v2  ;;  %v1560_v5 = vmax.f32 %v1544_v54, 0.0  ;;  %v4876_v16 = vpack.c.bf16 %v2313_v10, %v2311_v55  ;;  %2358 = vmatprep.subr.bf16.mxu1 %v4861_v22  ;;  %v4888_v18 = vpack.c.bf16 %v2309_v51, %v2307_v50 }
0x1e64   :  { %v1550_v29 = vmax.f32 %v1534_v45, 0.0  ;;  %v1658_v11 = vsel %vm1657_vm5, %v1602_v56, %v1656_v60  ;;  %v1500_v19 = vpop.xlane.xlu1 %1499  ;;  %v4921_v60 = vld [vmem:[%s5640_s2 + $0x28] sm:$0xff] }
0x1e65   :  { %v1497_v13 = vpop.xlane.xlu0 %1496  ;;  %v1654_v15 = vrot.slane %v1560_v5, %v4762_v6  ;;  %v1536_v24 = vadd.f32 %v4755_v14, %v1500_v19  ;;  %v1660_v7 = vsel %vm1659_vm6, %v1606_v53, %v1658_v11 }
0x1e66   :  { %v1535_v0 = vadd.f32 %v4755_v14, %v1497_v13  ;;  %v1614_v30 = vrot.slane %v1550_v29, %v4762_v6  ;;  %v1662_v27 = vsel %vm1661_vm7, %v1610_v21, %v1660_v7  ;;  %2359 = vmatpush1.bf16.msra.mxu1 %v4876_v16 }
0x1e67   :  { %v1552_v39 = vmax.f32 %v1536_v24, 0.0  ;;  %v1675_v12 = vsel %vm1667_vm10, %v1654_v15, %v1674_v48  ;;  %2360 = vmatprep.subr.bf16.mxu1 %v4879_v33 }
0x1e68   :  { %v1551_v43 = vmax.f32 %v1535_v0, 0.0  ;;  %3836 = vmatprep.subr.mxu0 %v1675_v12  ;;  %v1664_v14 = vsel %vm1663_vm8, %v1614_v30, %v1662_v27 }
0x1e69   :  { %v1622_v31 = vrot.slane %v1552_v39, %v4762_v6  ;;  %3837 = vmatpush3.msra.mxu0 %v1675_v12  ;;  %v3787_v39 = vld [vmem:[%s5638_s1 + $0x144] ss:$8 sm:$0x3]  ;;  %v3788_v12 = vld [vmem:[%s5638_s1 + $0x145] ss:$8 sm:$0x3] }
0x1e6a   :  { %v1618_v23 = vrot.slane %v1551_v43, %v4762_v6  ;;  %v1763_v6 = vld [vmem:[%s5640_s2 + $0x10] sm:$0xff]  ;;  %2361 = vmatpush1.bf16.msra.mxu1 %v4888_v18 }
0x1e6b   :  { %1769 = vperm.xlu1 %3882, %v1763_v6   ;;  %2498 = vmatprep.subr.bf16.mxu1 %v4825_v25 }
0x1e6c   :  { %v1666_v61 = vsel %vm1665_vm9, %v1618_v23, %v1664_v14  ;;  %v3790_v23 = vld [vmem:[%s5638_s1 + $0x143] ss:$8 sm:$0x3]  ;;  %v4959_v14 = vrot.slane %v3787_v39, %v4262_v63 }
0x1e6d   :  { %v1668_v35 = vsel %vm1667_vm10, %v1622_v31, %v1666_v61  ;;  %2379 = vmatmul.mubr.bf16.vlgmr.msra.gmra.mxu1 %v4047_v3  ;;  %v1566_v2 = vpop.permute.xlu0 %1565  ;;  %v4956_v31 = vrot.slane %v3787_v39, %v4268_v1  ;;  %v3789_v61 = vld [vmem:[%s5638_s1 + $0x142] ss:$8 sm:$0x3]  ;;  %v4988_v57 = vrot.slane %v3790_v23, %v4262_v63 }
0x1e6e   :  { %3838 = vmatprep.subr.mxu0 %v1668_v35  ;;  %2499 = vmatpush1.bf16.msra.mxu1 %v4837_v37  ;;  %v4974_v20 = vrot.slane %v3789_v61, %v4268_v1  ;;  %v4977_v36 = vrot.slane %v3789_v61, %v4262_v63 }
0x1e6f   :  { %3839 = vmatpush3.msra.mxu0 %v1668_v35  ;;  %1779 = vperm.xlu1 %3882, %v1765_v46   ;;  %v4965_v35 = vrot.slane %v3788_v12, %v4268_v1 }
0x1e70   :  { %3841 = vmatmul.mubr.msk.f32.vlgmr.msra.gmra.mxu0 %vm1678_vm3, %v1562_v49  ;;  %2522 = vmatprep.mubr.bf16.mxu1 %v4047_v3  ;;  %v4968_v49 = vrot.slane %v3788_v12, %v4262_v63 }
0x1e71   :  { %3845 = vmatprep.mubr.msk.f32.mxu0 %vm1760_vm11, %v1763_v6  ;;  %2500 = vmatprep.subr.bf16.mxu1 %v4839_v17  ;;  %v4971_v6 = vrot.slane %v3790_v23, %v4268_v1 }
0x1e72   :  { %2501 = vmatpush1.bf16.msra.mxu1 %v4855_v26 }
0x1e73   :  { %2502 = vmatprep.subr.bf16.mxu1 %v4861_v22 }
0x1e76   :  { %2503 = vmatpush1.bf16.msra.mxu1 %v4876_v16 }
0x1e77   :  { %2504 = vmatprep.subr.bf16.mxu1 %v4879_v33 }
0x1e7a   :  { %2505 = vmatpush1.bf16.msra.mxu1 %v4888_v18 }
0x1e7b   :  { %2642 = vmatprep.subr.bf16.mxu1 %v4825_v25 }
0x1ee6   :  { %v1770_v5 = vpop.permute.xlu1 %1769 }
0x1eea   :  { %v1780_v0 = vpop.permute.xlu1 %1779 }
0x1f2d   :  { %v2380_v29 = vpop.f32.mrf.mxu1 }
0x1f2e   :  { %v2381_v47 = vadd.f32 %v2380_v29, %v4971_v6 }
0x1f2f   :  { %v2382_v53 = vpop.f32.mrf.mxu1 }
0x1f30   :  { %v4903_v52 = vpop.f32.mrf.mxu0 }
0x1f31   :  { %v2384_v13 = vpop.f32.mrf.mxu1 }
0x1f32   :  { %v1749_v45 = vpop.f32.mrf.mxu0 }
0x1f33   :  { %v1750_v54 = vadd.f32 %v1749_v45, %v1566_v2  ;;  %v2385_v21 = vpop.f32.mrf.mxu1  ;;  %v2383_v2 = vadd.f32 %v2382_v53, %v4988_v57 }
0x1f35   :  { %v1758_v56 = vmax.f32 %v1750_v54, 0.0 }
0x1f37   :  { %1761 = vst.msk [vmem:[%s5641_s4] sm:$0xff] %vm1760_vm11, %v1758_v56  ;;  %3843 = vmatprep.subr.mxu0 %v1758_v56 }
0x1f38   :  { %3844 = vmatpush3.msra.mxu0 %v1758_v56 }
0x1f39   :  { %3846 = vmatmul.mubr.msk.f32.vlgmr.msra.gmra.mxu0 %vm1760_vm11, %v4908_v58  ;;  %2426 = vmatprep.subr.bf16.mxu0 %v4825_v25 }
0x1f3a   :  { %3848 = vmatprep.mubr.msk.f32.mxu0 %vm1760_vm11, %v1765_v46  ;;  %2427 = vmatpush1.bf16.msra.mxu0 %v4837_v37 }
0x1f3b   :  { %2428 = vmatprep.subr.bf16.mxu0 %v4839_v17 }
0x1f3d   :  { %3849 = vmatmul.mubr.msk.f32.gmra.mxu0 %vm1760_vm11, %v4921_v60 }
0x1f3e   :  { %2429 = vmatpush1.bf16.msra.mxu0 %v4855_v26  ;;  %2450 = vmatprep.mubr.bf16.mxu0 %v4047_v3 }
0x1f3f   :  { %2430 = vmatprep.subr.bf16.mxu0 %v4861_v22 }
0x1f42   :  { %2431 = vmatpush1.bf16.msra.mxu0 %v4876_v16 }
0x1f43   :  { %2432 = vmatprep.subr.bf16.mxu0 %v4879_v33 }
0x1f46   :  { %2433 = vmatpush1.bf16.msra.mxu0 %v4888_v18 }
0x1f47   :  { %2570 = vmatprep.subr.bf16.mxu0 %v4825_v25 }
0x1ff9   :  { %v4934_v4 = vpop.f32.mrf.mxu0 }
0x1ffb   :  { %v1861_v11 = vpop.f32.mrf.mxu0 }
0x1ffc   :  { %v1862_v19 = vadd.f32 %v1861_v11, %v1770_v5 }
0x1ffd   :  { %v4936_v40 = vpop.f32.mrf.mxu0 }
0x1ffe   :  { %v4938_v15 = vmax.f32 %v1862_v19, 0.0 }
0x1fff   :  { %v1871_v24 = vpop.f32.mrf.mxu0 }
0x2000   :  { %v1872_v30 = vadd.f32 %v1871_v24, %v1780_v0  ;;  %v1893_v48 = vrot.slane %v4938_v15, %v4268_v1  ;;  %v1900_v53 = vrot.slane %v4938_v15, %v4262_v63 }
0x2002   :  { %v4942_v7 = vmax.f32 %v1872_v30, 0.0  ;;  %1895 = vbcast.lane.b32.xlu1 %v1893_v48, 256 }
0x2004   :  { %v2048_v43 = vrot.slane %v4942_v7, %v4268_v1  ;;  %v2055_v30 = vrot.slane %v4942_v7, %v4262_v63 }
0x2006   :  { %2050 = vbcast.lane.b32.xlu1 %v2048_v43, 256 }
0x2074   :  { %v1896_v27 = vpop.permute.xlu1 %1895 }
0x2075   :  { %v2013_v28 = vmul.f32 %v4956_v31, %v1896_v27  ;;  %v2014_v32 = vmul.f32 %v4959_v14, %v1896_v27 }
0x2078   :  { %v2051_v9 = vpop.permute.xlu1 %2050 }
0x2079   :  { %v2168_v44 = vmul.f32 %v4965_v35, %v2051_v9  ;;  %v2169_v38 = vmul.f32 %v4968_v49, %v2051_v9 }
0x207b   :  { %v2200_v42 = vadd.f32 %v2168_v44, %v2013_v28  ;;  %v2201_v34 = vadd.f32 %v2169_v38, %v2014_v32 }
0x207d   :  { %v2243_v46 = vadd.f32 %v4974_v20, %v2200_v42  ;;  %v2244_v55 = vadd.f32 %v4977_v36, %v2201_v34 }
0x207f   :  { %2276 = vst.msk [vmem:[#allocation2 + $0x8] sm:$0xff] %vm205_vm1, %v2244_v55  ;;  %v2387_v10 = vadd.f32 %v2381_v47, %v2243_v46 }
0x2081   :  { %v2388_v59 = vmul.f32 0.5, %v2387_v10 }
0x2083   :  { %3950 = vtanh.f32 %v2388_v59 }
0x2086   :  { %v2334_v56 = vld [vmem:[#allocation2 + $0x8] sm:$0xff] }
0x2090   :  { %v3951_v50 = vpop.eup %3950 }
0x2091   :  { %v2390_v51 = vmul.f32 0.5, %v3951_v50 }
0x2093   :  { %v2391_v45 = vadd.f32 0.5, %v2390_v51 }
0x2095   :  { %v2392_v54 = vmul.f32 %v2391_v45, %v2383_v2  ;;  %v2395_v11 = vsub.f32 1.0, %v2391_v45  ;;  %v2401_v19 = vmul.f32 0.0, %v2391_v45 }
0x2097   :  { %v2393_v29 = vadd.f32 %v2392_v54, %v2334_v56 }
0x2099   :  { %3952 = vtanh.f32 %v2393_v29  ;;  %v5021_v29 = vsub.s32 2, %v4259_v62 }
0x20a6   :  { %v3953_v5 = vpop.eup %3952 }
0x20a7   :  { %2397 = vrot.lane.b32.xlu1 %v3953_v5, %s4048_s20 }
0x2119   :  { %v2398_v13 = vpop.permute.xlu1 %2397 }
0x211a   :  { %v2400_v21 = vmul.f32 %v2398_v13, %v2395_v11  ;;  %v1907_v11 = vrot.slane %v4938_v15, %v5021_v29 }
0x211c   :  { %v4992_v0 = vadd.f32 %v2401_v19, %v2400_v21 }
0x211e   :  { %v2411_v24 = vpack.c.bf16 %v4992_v0, %v4992_v0 }
0x2120   :  { %2413 = vrot.lane.b32.xlu1 %v2411_v24, %s4048_s20 }
0x2124   :  { %1902 = vbcast.lane.b32.xlu1 %v1900_v53, 256 }
0x2128   :  { %2057 = vbcast.lane.b32.xlu1 %v2055_v30, 256 }
0x2192   :  { %v2414_v48 = vpop.permute.xlu1 %2413 }
0x2193   :  { %3791 = vmatmul.mubr.msk.bf16.vlgmr.msra.gmra.mxu0 %vm205_vm1, %v2414_v48  ;;  %v2062_v48 = vrot.slane %v4942_v7, %v5021_v29 }
0x2194   :  { %2571 = vmatpush1.bf16.msra.mxu0 %v4837_v37  ;;  %2594 = vmatprep.mubr.bf16.mxu0 %v4047_v3 }
0x2195   :  { %2572 = vmatprep.subr.bf16.mxu0 %v4839_v17 }
0x2196   :  { %v1903_v43 = vpop.permute.xlu1 %1902 }
0x2197   :  { %v2015_v12 = vmul.f32 %v4956_v31, %v1903_v43  ;;  %v2016_v27 = vmul.f32 %v4959_v14, %v1903_v43 }
0x2198   :  { %2573 = vmatpush1.bf16.msra.mxu0 %v4855_v26 }
0x2199   :  { %2574 = vmatprep.subr.bf16.mxu0 %v4861_v22 }
0x219a   :  { %v2058_v39 = vpop.permute.xlu1 %2057 }
0x219b   :  { %v2170_v23 = vmul.f32 %v4965_v35, %v2058_v39  ;;  %v2171_v61 = vmul.f32 %v4968_v49, %v2058_v39 }
0x219c   :  { %2575 = vmatpush1.bf16.msra.mxu0 %v4876_v16 }
0x219d   :  { %v2202_v9 = vadd.f32 %v2170_v23, %v2015_v12  ;;  %v2203_v28 = vadd.f32 %v2171_v61, %v2016_v27  ;;  %2576 = vmatprep.subr.bf16.mxu0 %v4879_v33 }
0x219f   :  { %v2245_v32 = vadd.f32 %v4974_v20, %v2202_v9  ;;  %v2246_v44 = vadd.f32 %v4977_v36, %v2203_v28 }
0x21a0   :  { %2577 = vmatpush1.bf16.msra.mxu0 %v4888_v18 }
0x21a1   :  { %2278 = vst.msk [vmem:[#allocation2 + $0x18] sm:$0xff] %vm205_vm1, %v2246_v44  ;;  %2714 = vmatprep.subr.bf16.mxu0 %v4825_v25 }
0x21a8   :  { %v2410_v54 = vld [vmem:[#allocation2 + $0x18] sm:$0xff] }
0x2253   :  { %v2452_v38 = vpop.f32.mrf.mxu0 }
0x2254   :  { %v2453_v42 = vadd.f32 %v2452_v38, %v4971_v6 }
0x2255   :  { %v2454_v34 = vpop.f32.mrf.mxu0 }
0x2256   :  { %v2459_v47 = vadd.f32 %v2453_v42, %v2245_v32  ;;  %v2455_v51 = vadd.f32 %v2454_v34, %v4988_v57 }
0x2257   :  { %v2456_v46 = vpop.f32.mrf.mxu0 }
0x2258   :  { %v2460_v55 = vmul.f32 0.5, %v2459_v47 }
0x2259   :  { %v2457_v10 = vpop.f32.mrf.mxu0 }
0x225a   :  { %3954 = vtanh.f32 %v2460_v55 }
0x2267   :  { %v3955_v59 = vpop.eup %3954 }
0x2268   :  { %v2462_v50 = vmul.f32 0.5, %v3955_v59 }
0x226a   :  { %v2463_v2 = vadd.f32 0.5, %v2462_v50 }
0x226c   :  { %v2464_v45 = vmul.f32 %v2463_v2, %v2455_v51  ;;  %v2467_v13 = vsub.f32 1.0, %v2463_v2  ;;  %v2473_v21 = vmul.f32 %v2463_v2, %v4992_v0 }
0x226e   :  { %v2465_v56 = vadd.f32 %v2464_v45, %v2410_v54 }
0x2270   :  { %3956 = vtanh.f32 %v2465_v56 }
0x227d   :  { %v3957_v5 = vpop.eup %3956 }
0x227e   :  { %2469 = vrot.lane.b32.xlu0 %v3957_v5, %s4048_s20 }
0x2282   :  { %1909 = vbcast.lane.b32.xlu0 %v1907_v11, 256  ;;  %v5054_v11 = vsub.s32 3, %v4259_v62 }
0x22f0   :  { %v2470_v19 = vpop.permute.xlu0 %2469 }
0x22f1   :  { %v2472_v24 = vmul.f32 %v2470_v19, %v2467_v13  ;;  %v1914_v19 = vrot.slane %v4938_v15, %v5054_v11 }
0x22f3   :  { %v5027_v53 = vadd.f32 %v2473_v21, %v2472_v24 }
0x22f4   :  { %v1910_v39 = vpop.permute.xlu0 %1909 }
0x22f5   :  { %v2483_v30 = vpack.c.bf16 %v5027_v53, %v5027_v53  ;;  %v2017_v27 = vmul.f32 %v4956_v31, %v1910_v39  ;;  %v2018_v23 = vmul.f32 %v4959_v14, %v1910_v39 }
0x22f7   :  { %2485 = vrot.lane.b32.xlu1 %v2483_v30, %s4048_s20 }
0x22fb   :  { %2064 = vbcast.lane.b32.xlu1 %v2062_v48, 256 }
0x2369   :  { %v2486_v43 = vpop.permute.xlu1 %2485 }
0x236a   :  { %3792 = vmatmul.mubr.msk.bf16.vlgmr.msra.gmra.mxu1 %vm205_vm1, %v2486_v43 }
0x236b   :  { %2643 = vmatpush1.bf16.msra.mxu1 %v4837_v37  ;;  %2666 = vmatprep.mubr.bf16.mxu1 %v4047_v3 }
0x236c   :  { %2644 = vmatprep.subr.bf16.mxu1 %v4839_v17 }
0x236d   :  { %v2065_v12 = vpop.permute.xlu1 %2064 }
0x236e   :  { %v2172_v61 = vmul.f32 %v4965_v35, %v2065_v12  ;;  %v2173_v9 = vmul.f32 %v4968_v49, %v2065_v12  ;;  %v2069_v12 = vrot.slane %v4942_v7, %v5054_v11 }
0x236f   :  { %2645 = vmatpush1.bf16.msra.mxu1 %v4855_v26 }
0x2370   :  { %v2204_v28 = vadd.f32 %v2172_v61, %v2017_v27  ;;  %v2205_v32 = vadd.f32 %v2173_v9, %v2018_v23  ;;  %2646 = vmatprep.subr.bf16.mxu1 %v4861_v22 }
0x2372   :  { %v2247_v44 = vadd.f32 %v4974_v20, %v2204_v28  ;;  %v2248_v38 = vadd.f32 %v4977_v36, %v2205_v32 }
0x2373   :  { %2647 = vmatpush1.bf16.msra.mxu1 %v4876_v16 }
0x2374   :  { %2280 = vst.msk [vmem:[#allocation2 + $0x28] sm:$0xff] %vm205_vm1, %v2248_v38  ;;  %2648 = vmatprep.subr.bf16.mxu1 %v4879_v33 }
0x2377   :  { %2649 = vmatpush1.bf16.msra.mxu1 %v4888_v18 }
0x2378   :  { %2786 = vmatprep.subr.bf16.mxu1 %v4825_v25 }
0x237b   :  { %v2482_v56 = vld [vmem:[#allocation2 + $0x28] sm:$0xff] }
0x242a   :  { %v2524_v42 = vpop.f32.mrf.mxu1 }
0x242b   :  { %v2525_v34 = vadd.f32 %v2524_v42, %v4971_v6 }
0x242c   :  { %v2526_v47 = vpop.f32.mrf.mxu1 }
0x242d   :  { %v2531_v46 = vadd.f32 %v2525_v34, %v2247_v44  ;;  %v2527_v2 = vadd.f32 %v2526_v47, %v4988_v57 }
0x242e   :  { %v2528_v55 = vpop.f32.mrf.mxu1 }
0x242f   :  { %v2532_v10 = vmul.f32 0.5, %v2531_v46 }
0x2430   :  { %v2529_v59 = vpop.f32.mrf.mxu1 }
0x2431   :  { %3958 = vtanh.f32 %v2532_v10 }
0x243e   :  { %v3959_v50 = vpop.eup %3958 }
0x243f   :  { %v2534_v51 = vmul.f32 0.5, %v3959_v50 }
0x2441   :  { %v2535_v45 = vadd.f32 0.5, %v2534_v51 }
0x2443   :  { %v2536_v54 = vmul.f32 %v2535_v45, %v2527_v2  ;;  %v2539_v21 = vsub.f32 1.0, %v2535_v45  ;;  %v2545_v30 = vmul.f32 %v2535_v45, %v5027_v53 }
0x2445   :  { %v2537_v5 = vadd.f32 %v2536_v54, %v2482_v56 }
0x2447   :  { %3960 = vtanh.f32 %v2537_v5 }
0x2454   :  { %v3961_v13 = vpop.eup %3960 }
0x2455   :  { %2541 = vrot.lane.b32.xlu0 %v3961_v13, %s4048_s20 }
0x2459   :  { %1916 = vbcast.lane.b32.xlu0 %v1914_v19, 256 }
0x24c7   :  { %v2542_v24 = vpop.permute.xlu0 %2541 }
0x24c8   :  { %v2544_v48 = vmul.f32 %v2542_v24, %v2539_v21  ;;  %v5087_v24 = vsub.s32 4, %v4259_v62 }
0x24ca   :  { %v5060_v43 = vadd.f32 %v2545_v30, %v2544_v48  ;;  %v1921_v48 = vrot.slane %v4938_v15, %v5087_v24 }
0x24cb   :  { %v1917_v23 = vpop.permute.xlu0 %1916 }
0x24cc   :  { %v2555_v39 = vpack.c.bf16 %v5060_v43, %v5060_v43  ;;  %v2019_v9 = vmul.f32 %v4956_v31, %v1917_v23  ;;  %v2020_v28 = vmul.f32 %v4959_v14, %v1917_v23 }
0x24ce   :  { %2557 = vrot.lane.b32.xlu1 %v2555_v39, %s4048_s20 }
0x24d2   :  { %2071 = vbcast.lane.b32.xlu1 %v2069_v12, 256 }
0x2540   :  { %v2558_v27 = vpop.permute.xlu1 %2557 }
0x2541   :  { %3793 = vmatmul.mubr.msk.bf16.vlgmr.msra.gmra.mxu0 %vm205_vm1, %v2558_v27 }
0x2542   :  { %2715 = vmatpush1.bf16.msra.mxu0 %v4837_v37  ;;  %2738 = vmatprep.mubr.bf16.mxu0 %v4047_v3 }
0x2543   :  { %2716 = vmatprep.subr.bf16.mxu0 %v4839_v17 }
0x2544   :  { %v2072_v61 = vpop.permute.xlu1 %2071 }
0x2545   :  { %v2174_v32 = vmul.f32 %v4965_v35, %v2072_v61  ;;  %v2175_v44 = vmul.f32 %v4968_v49, %v2072_v61 }
0x2546   :  { %2717 = vmatpush1.bf16.msra.mxu0 %v4855_v26 }
0x2547   :  { %v2206_v38 = vadd.f32 %v2174_v32, %v2019_v9  ;;  %v2207_v42 = vadd.f32 %v2175_v44, %v2020_v28  ;;  %2718 = vmatprep.subr.bf16.mxu0 %v4861_v22  ;;  %v2076_v28 = vrot.slane %v4942_v7, %v5087_v24 }
0x2549   :  { %v2249_v34 = vadd.f32 %v4974_v20, %v2206_v38  ;;  %v2250_v47 = vadd.f32 %v4977_v36, %v2207_v42 }
0x254a   :  { %2719 = vmatpush1.bf16.msra.mxu0 %v4876_v16 }
0x254b   :  { %2282 = vst.msk [vmem:[#allocation2 + $0x38] sm:$0xff] %vm205_vm1, %v2250_v47  ;;  %2720 = vmatprep.subr.bf16.mxu0 %v4879_v33 }
0x254e   :  { %2721 = vmatpush1.bf16.msra.mxu0 %v4888_v18 }
0x254f   :  { %2858 = vmatprep.subr.bf16.mxu0 %v4825_v25 }
0x2552   :  { %v2554_v19 = vld [vmem:[#allocation2 + $0x38] sm:$0xff] }
0x2601   :  { %v2596_v46 = vpop.f32.mrf.mxu0 }
0x2602   :  { %v2597_v55 = vadd.f32 %v2596_v46, %v4971_v6 }
0x2603   :  { %v2598_v10 = vpop.f32.mrf.mxu0 }
0x2604   :  { %v2603_v59 = vadd.f32 %v2597_v55, %v2249_v34  ;;  %v2599_v56 = vadd.f32 %v2598_v10, %v4988_v57 }
0x2605   :  { %v2600_v50 = vpop.f32.mrf.mxu0 }
0x2606   :  { %v2604_v51 = vmul.f32 0.5, %v2603_v59 }
0x2607   :  { %v2601_v2 = vpop.f32.mrf.mxu0 }
0x2608   :  { %3962 = vtanh.f32 %v2604_v51 }
0x2615   :  { %v3963_v45 = vpop.eup %3962 }
0x2616   :  { %v2606_v54 = vmul.f32 0.5, %v3963_v45 }
0x2618   :  { %v2607_v5 = vadd.f32 0.5, %v2606_v54 }
0x261a   :  { %v2608_v13 = vmul.f32 %v2607_v5, %v2599_v56  ;;  %v2611_v39 = vsub.f32 1.0, %v2607_v5  ;;  %v2617_v27 = vmul.f32 %v2607_v5, %v5060_v43 }
0x261c   :  { %v2609_v21 = vadd.f32 %v2608_v13, %v2554_v19 }
0x261e   :  { %3964 = vtanh.f32 %v2609_v21 }
0x262b   :  { %v3965_v30 = vpop.eup %3964 }
0x262c   :  { %2613 = vrot.lane.b32.xlu0 %v3965_v30, %s4048_s20 }
0x2630   :  { %1923 = vbcast.lane.b32.xlu0 %v1921_v48, 256 }
0x269e   :  { %v2614_v12 = vpop.permute.xlu0 %2613 }
0x269f   :  { %v2616_v23 = vmul.f32 %v2614_v12, %v2611_v39 }
0x26a1   :  { %v5093_v61 = vadd.f32 %v2617_v27, %v2616_v23  ;;  %v5120_v23 = vsub.s32 5, %v4259_v62 }
0x26a2   :  { %v1924_v44 = vpop.permute.xlu0 %1923 }
0x26a3   :  { %v2627_v9 = vpack.c.bf16 %v5093_v61, %v5093_v61  ;;  %v2021_v42 = vmul.f32 %v4956_v31, %v1924_v44  ;;  %v2022_v34 = vmul.f32 %v4959_v14, %v1924_v44 }
0x26a5   :  { %2629 = vrot.lane.b32.xlu1 %v2627_v9, %s4048_s20 }
0x26a9   :  { %2078 = vbcast.lane.b32.xlu1 %v2076_v28, 256  ;;  %v1928_v28 = vrot.slane %v4938_v15, %v5120_v23 }
0x2717   :  { %v2630_v32 = vpop.permute.xlu1 %2629 }
0x2718   :  { %3794 = vmatmul.mubr.msk.bf16.vlgmr.msra.gmra.mxu1 %vm205_vm1, %v2630_v32 }
0x2719   :  { %2787 = vmatpush1.bf16.msra.mxu1 %v4837_v37  ;;  %2810 = vmatprep.mubr.bf16.mxu1 %v4047_v3 }
0x271a   :  { %2788 = vmatprep.subr.bf16.mxu1 %v4839_v17 }
0x271b   :  { %v2079_v38 = vpop.permute.xlu1 %2078 }
0x271c   :  { %v2176_v47 = vmul.f32 %v4965_v35, %v2079_v38  ;;  %v2177_v46 = vmul.f32 %v4968_v49, %v2079_v38 }
0x271d   :  { %2789 = vmatpush1.bf16.msra.mxu1 %v4855_v26 }
0x271e   :  { %v2208_v55 = vadd.f32 %v2176_v47, %v2021_v42  ;;  %v2209_v10 = vadd.f32 %v2177_v46, %v2022_v34  ;;  %2790 = vmatprep.subr.bf16.mxu1 %v4861_v22  ;;  %v2083_v46 = vrot.slane %v4942_v7, %v5120_v23 }
0x2720   :  { %v2251_v59 = vadd.f32 %v4974_v20, %v2208_v55  ;;  %v2252_v50 = vadd.f32 %v4977_v36, %v2209_v10 }
0x2721   :  { %2791 = vmatpush1.bf16.msra.mxu1 %v4876_v16 }
0x2722   :  { %2284 = vst.msk [vmem:[#allocation2 + $0x48] sm:$0xff] %vm205_vm1, %v2252_v50  ;;  %2792 = vmatprep.subr.bf16.mxu1 %v4879_v33 }
0x2725   :  { %2793 = vmatpush1.bf16.msra.mxu1 %v4888_v18 }
0x2726   :  { %2930 = vmatprep.subr.bf16.mxu1 %v4825_v25 }
0x2729   :  { %v2626_v12 = vld [vmem:[#allocation2 + $0x48] sm:$0xff] }
0x27d8   :  { %v2668_v51 = vpop.f32.mrf.mxu1 }
0x27d9   :  { %v2669_v2 = vadd.f32 %v2668_v51, %v4971_v6 }
0x27da   :  { %v2670_v45 = vpop.f32.mrf.mxu1 }
0x27db   :  { %v2675_v54 = vadd.f32 %v2669_v2, %v2251_v59  ;;  %v2671_v30 = vadd.f32 %v2670_v45, %v4988_v57 }
0x27dc   :  { %v2672_v56 = vpop.f32.mrf.mxu1 }
0x27dd   :  { %v2676_v5 = vmul.f32 0.5, %v2675_v54 }
0x27de   :  { %v2673_v13 = vpop.f32.mrf.mxu1 }
0x27df   :  { %3966 = vtanh.f32 %v2676_v5 }
0x27ec   :  { %v3967_v19 = vpop.eup %3966 }
0x27ed   :  { %v2678_v21 = vmul.f32 0.5, %v3967_v19 }
0x27ef   :  { %v2679_v48 = vadd.f32 0.5, %v2678_v21 }
0x27f1   :  { %v2680_v39 = vmul.f32 %v2679_v48, %v2671_v30  ;;  %v2683_v32 = vsub.f32 1.0, %v2679_v48  ;;  %v2689_v38 = vmul.f32 %v2679_v48, %v5093_v61 }
0x27f3   :  { %v2681_v27 = vadd.f32 %v2680_v39, %v2626_v12 }
0x27f5   :  { %3968 = vtanh.f32 %v2681_v27 }
0x2802   :  { %v3969_v9 = vpop.eup %3968 }
0x2803   :  { %2685 = vrot.lane.b32.xlu0 %v3969_v9, %s4048_s20 }
0x2807   :  { %1930 = vbcast.lane.b32.xlu0 %v1928_v28, 256 }
0x2875   :  { %v2686_v44 = vpop.permute.xlu0 %2685 }
0x2876   :  { %v2688_v42 = vmul.f32 %v2686_v44, %v2683_v32 }
0x2878   :  { %v5126_v34 = vadd.f32 %v2689_v38, %v2688_v42 }
0x2879   :  { %v1931_v10 = vpop.permute.xlu0 %1930 }
0x287a   :  { %v2699_v47 = vpack.c.bf16 %v5126_v34, %v5126_v34  ;;  %v2023_v50 = vmul.f32 %v4956_v31, %v1931_v10  ;;  %v2024_v51 = vmul.f32 %v4959_v14, %v1931_v10 }
0x287c   :  { %2701 = vrot.lane.b32.xlu1 %v2699_v47, %s4048_s20 }
0x2880   :  { %2085 = vbcast.lane.b32.xlu1 %v2083_v46, 256  ;;  %v5153_v46 = vsub.s32 6, %v4259_v62 }
0x2882   :  { %v1935_v10 = vrot.slane %v4938_v15, %v5153_v46 }
0x28ee   :  { %v2702_v55 = vpop.permute.xlu1 %2701 }
0x28ef   :  { %3795 = vmatmul.mubr.msk.bf16.vlgmr.msra.gmra.mxu0 %vm205_vm1, %v2702_v55 }
0x28f0   :  { %2859 = vmatpush1.bf16.msra.mxu0 %v4837_v37  ;;  %2882 = vmatprep.mubr.bf16.mxu0 %v4047_v3 }
0x28f1   :  { %2860 = vmatprep.subr.bf16.mxu0 %v4839_v17 }
0x28f2   :  { %v2086_v59 = vpop.permute.xlu1 %2085 }
0x28f3   :  { %v2178_v2 = vmul.f32 %v4965_v35, %v2086_v59  ;;  %v2179_v45 = vmul.f32 %v4968_v49, %v2086_v59 }
0x28f4   :  { %2861 = vmatpush1.bf16.msra.mxu0 %v4855_v26 }
0x28f5   :  { %v2210_v54 = vadd.f32 %v2178_v2, %v2023_v50  ;;  %v2211_v56 = vadd.f32 %v2179_v45, %v2024_v51  ;;  %2862 = vmatprep.subr.bf16.mxu0 %v4861_v22 }
0x28f7   :  { %v2253_v5 = vadd.f32 %v4974_v20, %v2210_v54  ;;  %v2254_v13 = vadd.f32 %v4977_v36, %v2211_v56  ;;  %v2090_v56 = vrot.slane %v4942_v7, %v5153_v46 }
0x28f8   :  { %2863 = vmatpush1.bf16.msra.mxu0 %v4876_v16 }
0x28f9   :  { %2286 = vst.msk [vmem:[#allocation2 + $0x58] sm:$0xff] %vm205_vm1, %v2254_v13  ;;  %2864 = vmatprep.subr.bf16.mxu0 %v4879_v33 }
0x28fc   :  { %2865 = vmatpush1.bf16.msra.mxu0 %v4888_v18 }
0x28fd   :  { %3002 = vmatprep.subr.bf16.mxu0 %v4825_v25 }
0x2900   :  { %v2698_v42 = vld [vmem:[#allocation2 + $0x58] sm:$0xff] }
0x29af   :  { %v2740_v19 = vpop.f32.mrf.mxu0 }
0x29b0   :  { %v2741_v21 = vadd.f32 %v2740_v19, %v4971_v6 }
0x29b1   :  { %v2742_v30 = vpop.f32.mrf.mxu0 }
0x29b2   :  { %v2747_v48 = vadd.f32 %v2741_v21, %v2253_v5  ;;  %v2743_v32 = vadd.f32 %v2742_v30, %v4988_v57 }
0x29b3   :  { %v2744_v39 = vpop.f32.mrf.mxu0 }
0x29b4   :  { %v2748_v12 = vmul.f32 0.5, %v2747_v48 }
0x29b5   :  { %v2745_v27 = vpop.f32.mrf.mxu0 }
0x29b6   :  { %3970 = vtanh.f32 %v2748_v12 }
0x29c3   :  { %v3971_v9 = vpop.eup %3970 }
0x29c4   :  { %v2750_v28 = vmul.f32 0.5, %v3971_v9 }
0x29c6   :  { %v2751_v44 = vadd.f32 0.5, %v2750_v28 }
0x29c8   :  { %v2752_v38 = vmul.f32 %v2751_v44, %v2743_v32  ;;  %v2755_v59 = vsub.f32 1.0, %v2751_v44  ;;  %v2761_v51 = vmul.f32 %v2751_v44, %v5126_v34 }
0x29ca   :  { %v2753_v47 = vadd.f32 %v2752_v38, %v2698_v42 }
0x29cc   :  { %3972 = vtanh.f32 %v2753_v47 }
0x29d9   :  { %v3973_v55 = vpop.eup %3972 }
0x29da   :  { %2757 = vrot.lane.b32.xlu0 %v3973_v55, %s4048_s20 }
0x29de   :  { %1937 = vbcast.lane.b32.xlu0 %v1935_v10, 256 }
0x2a4c   :  { %v2758_v50 = vpop.permute.xlu0 %2757 }
0x2a4d   :  { %v2760_v2 = vmul.f32 %v2758_v50, %v2755_v59 }
0x2a4f   :  { %v5159_v45 = vadd.f32 %v2761_v51, %v2760_v2 }
0x2a50   :  { %v1938_v13 = vpop.permute.xlu0 %1937 }
0x2a51   :  { %v2771_v54 = vpack.c.bf16 %v5159_v45, %v5159_v45  ;;  %v2025_v21 = vmul.f32 %v4956_v31, %v1938_v13  ;;  %v2026_v30 = vmul.f32 %v4959_v14, %v1938_v13  ;;  %v5186_v13 = vsub.s32 7, %v4259_v62 }
0x2a53   :  { %2773 = vrot.lane.b32.xlu1 %v2771_v54, %s4048_s20  ;;  %v2097_v62 = vrot.slane %v4942_v7, %v5186_v13 }
0x2a57   :  { %2092 = vbcast.lane.b32.xlu1 %v2090_v56, 256 }
0x2ac5   :  { %v2774_v5 = vpop.permute.xlu1 %2773 }
0x2ac6   :  { %3796 = vmatmul.mubr.msk.bf16.vlgmr.msra.gmra.mxu1 %vm205_vm1, %v2774_v5 }
0x2ac7   :  { %2931 = vmatpush1.bf16.msra.mxu1 %v4837_v37  ;;  %2954 = vmatprep.mubr.bf16.mxu1 %v4047_v3 }
0x2ac8   :  { %2932 = vmatprep.subr.bf16.mxu1 %v4839_v17 }
0x2ac9   :  { %v2093_v19 = vpop.permute.xlu1 %2092 }
0x2aca   :  { %v2180_v48 = vmul.f32 %v4965_v35, %v2093_v19  ;;  %v2181_v39 = vmul.f32 %v4968_v49, %v2093_v19 }
0x2acb   :  { %2933 = vmatpush1.bf16.msra.mxu1 %v4855_v26 }
0x2acc   :  { %v2212_v12 = vadd.f32 %v2180_v48, %v2025_v21  ;;  %v2213_v27 = vadd.f32 %v2181_v39, %v2026_v30  ;;  %2934 = vmatprep.subr.bf16.mxu1 %v4861_v22  ;;  %v1942_v21 = vrot.slane %v4938_v15, %v5186_v13 }
0x2ace   :  { %v2255_v9 = vadd.f32 %v4974_v20, %v2212_v12  ;;  %v2256_v28 = vadd.f32 %v4977_v36, %v2213_v27 }
0x2acf   :  { %2935 = vmatpush1.bf16.msra.mxu1 %v4876_v16 }
0x2ad0   :  { %2288 = vst.msk [vmem:[#allocation2 + $0x68] sm:$0xff] %vm205_vm1, %v2256_v28  ;;  %2936 = vmatprep.subr.bf16.mxu1 %v4879_v33 }
0x2ad3   :  { %2937 = vmatpush1.bf16.msra.mxu1 %v4888_v18 }
0x2ad4   :  { %3074 = vmatprep.subr.bf16.mxu1 %v4825_v25 }
0x2ad7   :  { %v2770_v56 = vld [vmem:[#allocation2 + $0x68] sm:$0xff] }
0x2b86   :  { %v2812_v32 = vpop.f32.mrf.mxu1 }
0x2b87   :  { %v2813_v44 = vadd.f32 %v2812_v32, %v4971_v6 }
0x2b88   :  { %v2814_v38 = vpop.f32.mrf.mxu1 }
0x2b89   :  { %v2819_v42 = vadd.f32 %v2813_v44, %v2255_v9  ;;  %v2815_v51 = vadd.f32 %v2814_v38, %v4988_v57 }
0x2b8a   :  { %v2816_v47 = vpop.f32.mrf.mxu1 }
0x2b8b   :  { %v2820_v55 = vmul.f32 0.5, %v2819_v42 }
0x2b8c   :  { %v2817_v10 = vpop.f32.mrf.mxu1 }
0x2b8d   :  { %3974 = vtanh.f32 %v2820_v55 }
0x2b9a   :  { %v3975_v59 = vpop.eup %3974 }
0x2b9b   :  { %v2822_v50 = vmul.f32 0.5, %v3975_v59 }
0x2b9d   :  { %v2823_v2 = vadd.f32 0.5, %v2822_v50 }
0x2b9f   :  { %v2824_v54 = vmul.f32 %v2823_v2, %v2815_v51  ;;  %v2827_v30 = vsub.f32 1.0, %v2823_v2  ;;  %v2833_v39 = vmul.f32 %v2823_v2, %v5159_v45 }
0x2ba1   :  { %v2825_v5 = vadd.f32 %v2824_v54, %v2770_v56 }
0x2ba3   :  { %3976 = vtanh.f32 %v2825_v5 }
0x2bb0   :  { %v3977_v19 = vpop.eup %3976 }
0x2bb1   :  { %2829 = vrot.lane.b32.xlu0 %v3977_v19, %s4048_s20 }
0x2bb5   :  { %1944 = vbcast.lane.b32.xlu0 %v1942_v21, 256 }
0x2c23   :  { %v2830_v48 = vpop.permute.xlu0 %2829 }
0x2c24   :  { %v2832_v12 = vmul.f32 %v2830_v48, %v2827_v30 }
0x2c26   :  { %v5192_v27 = vadd.f32 %v2833_v39, %v2832_v12 }
0x2c27   :  { %v1945_v15 = vpop.permute.xlu0 %1944 }
0x2c28   :  { %v2843_v9 = vpack.c.bf16 %v5192_v27, %v5192_v27  ;;  %v2027_v44 = vmul.f32 %v4956_v31, %v1945_v15  ;;  %v2028_v38 = vmul.f32 %v4959_v14, %v1945_v15 }
0x2c2a   :  { %2845 = vrot.lane.b32.xlu1 %v2843_v9, %s4048_s20 }
0x2c2e   :  { %2099 = vbcast.lane.b32.xlu1 %v2097_v62, 256 }
0x2c9c   :  { %v2846_v28 = vpop.permute.xlu1 %2845 }
0x2c9d   :  { %3797 = vmatmul.mubr.msk.bf16.vlgmr.msra.gmra.mxu0 %vm205_vm1, %v2846_v28 }
0x2c9e   :  { %3003 = vmatpush1.bf16.msra.mxu0 %v4837_v37  ;;  %3026 = vmatprep.mubr.bf16.mxu0 %v4047_v3 }
0x2c9f   :  { %3004 = vmatprep.subr.bf16.mxu0 %v4839_v17 }
0x2ca0   :  { %v2100_v32 = vpop.permute.xlu1 %2099 }
0x2ca1   :  { %v2182_v42 = vmul.f32 %v4965_v35, %v2100_v32  ;;  %v2183_v7 = vmul.f32 %v4968_v49, %v2100_v32 }
0x2ca2   :  { %3005 = vmatpush1.bf16.msra.mxu0 %v4855_v26 }
0x2ca3   :  { %v2214_v47 = vadd.f32 %v2182_v42, %v2027_v44  ;;  %v2215_v55 = vadd.f32 %v2183_v7, %v2028_v38  ;;  %3006 = vmatprep.subr.bf16.mxu0 %v4861_v22 }
0x2ca5   :  { %v2257_v10 = vadd.f32 %v4974_v20, %v2214_v47  ;;  %v2258_v59 = vadd.f32 %v4977_v36, %v2215_v55 }
0x2ca6   :  { %3007 = vmatpush1.bf16.msra.mxu0 %v4876_v16 }
0x2ca7   :  { %2290 = vst.msk [vmem:[#allocation2 + $0x78] sm:$0xff] %vm205_vm1, %v2258_v59  ;;  %3008 = vmatprep.subr.bf16.mxu0 %v4879_v33 }
0x2caa   :  { %3009 = vmatpush1.bf16.msra.mxu0 %v4888_v18 }
0x2cab   :  { %3146 = vmatprep.subr.bf16.mxu0 %v4825_v25 }
0x2cae   :  { %v2842_v9 = vld [vmem:[#allocation2 + $0x78] sm:$0xff] }
0x2d5d   :  { %v2884_v50 = vpop.f32.mrf.mxu0 }
0x2d5e   :  { %v2885_v51 = vadd.f32 %v2884_v50, %v4971_v6 }
0x2d5f   :  { %v2886_v2 = vpop.f32.mrf.mxu0 }
0x2d60   :  { %v2891_v54 = vadd.f32 %v2885_v51, %v2257_v10  ;;  %v2887_v48 = vadd.f32 %v2886_v2, %v4988_v57 }
0x2d61   :  { %v2888_v56 = vpop.f32.mrf.mxu0 }
0x2d62   :  { %v2892_v5 = vmul.f32 0.5, %v2891_v54 }
0x2d63   :  { %v2889_v19 = vpop.f32.mrf.mxu0 }
0x2d64   :  { %3978 = vtanh.f32 %v2892_v5 }
0x2d71   :  { %v3979_v21 = vpop.eup %3978 }
0x2d72   :  { %v2894_v30 = vmul.f32 0.5, %v3979_v21 }
0x2d74   :  { %v2895_v39 = vadd.f32 0.5, %v2894_v30 }
0x2d76   :  { %v2896_v12 = vmul.f32 %v2895_v39, %v2887_v48  ;;  %v2899_v15 = vsub.f32 1.0, %v2895_v39  ;;  %v2905_v44 = vmul.f32 %v2895_v39, %v5192_v27 }
0x2d78   :  { %v2897_v62 = vadd.f32 %v2896_v12, %v2842_v9 }
0x2d7a   :  { %3980 = vtanh.f32 %v2897_v62 }
0x2d87   :  { %v3981_v28 = vpop.eup %3980 }
0x2d88   :  { %2901 = vrot.lane.b32.xlu0 %v3981_v28, %s4048_s20 }
0x2d8c   :  { %1774 = vperm.xlu0 %3883, %v4908_v58  }
0x2d90   :  { %3884 = vset.pattern.permute.xlu0 %v4049_v8 }
0x2dfa   :  { %v2902_v32 = vpop.permute.xlu0 %2901 }
0x2dfb   :  { %v2904_v38 = vmul.f32 %v2902_v32, %v2899_v15 }
0x2dfd   :  { %v5222_v42 = vadd.f32 %v2905_v44, %v2904_v38 }
0x2dff   :  { %v2915_v7 = vpack.c.bf16 %v5222_v42, %v5222_v42 }
0x2e01   :  { %2917 = vrot.lane.b32.xlu1 %v2915_v7, %s4048_s20 }
0x2e05   :  { %1784 = vperm.xlu1 %3882, %v4921_v60  }
0x2e07   :  { %v1775_v47 = vpop.permute.xlu0 %1774 }
0x2e08   :  { %v1867_v55 = vadd.f32 %v4934_v4, %v1775_v47 }
0x2e0a   :  { %v5229_v58 = vmax.f32 %v1867_v55, 0.0 }
0x2e0c   :  { %v1949_v8 = vrot.slane %v5229_v58, %v4268_v1 }
0x2e0e   :  { %1951 = vbcast.lane.b32.xlu1 %v1949_v8, 256 }
0x2e73   :  { %v2918_v10 = vpop.permute.xlu1 %2917 }
0x2e74   :  { %3798 = vmatmul.mubr.msk.bf16.vlgmr.msra.gmra.mxu1 %vm205_vm1, %v2918_v10 }
0x2e75   :  { %3075 = vmatpush1.bf16.msra.mxu1 %v4837_v37  ;;  %3098 = vmatprep.mubr.bf16.mxu1 %v4047_v3 }
0x2e76   :  { %3076 = vmatprep.subr.bf16.mxu1 %v4839_v17 }
0x2e79   :  { %3077 = vmatpush1.bf16.msra.mxu1 %v4855_v26 }
0x2e7a   :  { %3078 = vmatprep.subr.bf16.mxu1 %v4861_v22 }
0x2e7d   :  { %3079 = vmatpush1.bf16.msra.mxu1 %v4876_v16 }
0x2e7e   :  { %3080 = vmatprep.subr.bf16.mxu1 %v4879_v33 }
0x2e80   :  { %v1785_v60 = vpop.permute.xlu1 %1784 }
0x2e81   :  { %v1877_v4 = vadd.f32 %v4936_v40, %v1785_v60  ;;  %3081 = vmatpush1.bf16.msra.mxu1 %v4888_v18  ;;  %v1956_v60 = vrot.slane %v5229_v58, %v4262_v63 }
0x2e82   :  { %3218 = vmatprep.subr.bf16.mxu1 %v4825_v25 }
0x2e83   :  { %v5244_v59 = vmax.f32 %v1877_v4, 0.0 }
0x2e84   :  { %v1952_v51 = vpop.permute.xlu1 %1951 }
0x2e85   :  { %v2104_v50 = vrot.slane %v5244_v59, %v4268_v1  ;;  %v2029_v54 = vmul.f32 %v4956_v31, %v1952_v51  ;;  %v2030_v56 = vmul.f32 %v4959_v14, %v1952_v51 }
0x2e87   :  { %2106 = vbcast.lane.b32.xlu0 %v2104_v50, 256 }
0x2ef9   :  { %v2107_v2 = vpop.permute.xlu0 %2106 }
0x2efa   :  { %v2184_v5 = vmul.f32 %v4965_v35, %v2107_v2  ;;  %v2185_v40 = vmul.f32 %v4968_v49, %v2107_v2 }
0x2efc   :  { %v2216_v19 = vadd.f32 %v2184_v5, %v2029_v54  ;;  %v2217_v21 = vadd.f32 %v2185_v40, %v2030_v56  ;;  %v2111_v5 = vrot.slane %v5244_v59, %v4262_v63 }
0x2efe   :  { %v2259_v30 = vadd.f32 %v4974_v20, %v2216_v19  ;;  %v2260_v48 = vadd.f32 %v4977_v36, %v2217_v21 }
0x2f00   :  { %2292 = vst.msk [vmem:[#allocation2 + $0x88] sm:$0xff] %vm205_vm1, %v2260_v48 }
0x2f07   :  { %v2914_v55 = vld [vmem:[#allocation2 + $0x88] sm:$0xff] }
0x2f34   :  { %v2956_v1 = vpop.f32.mrf.mxu1 }
0x2f35   :  { %v2957_v39 = vadd.f32 %v2956_v1, %v4971_v6 }
0x2f36   :  { %v2958_v12 = vpop.f32.mrf.mxu1 }
0x2f37   :  { %v2963_v9 = vadd.f32 %v2957_v39, %v2259_v30  ;;  %v2959_v38 = vadd.f32 %v2958_v12, %v4988_v57 }
0x2f38   :  { %v2960_v62 = vpop.f32.mrf.mxu1 }
0x2f39   :  { %v2964_v28 = vmul.f32 0.5, %v2963_v9 }
0x2f3a   :  { %v2961_v15 = vpop.f32.mrf.mxu1 }
0x2f3b   :  { %3982 = vtanh.f32 %v2964_v28 }
0x2f48   :  { %v3983_v32 = vpop.eup %3982 }
0x2f49   :  { %v2966_v44 = vmul.f32 0.5, %v3983_v32 }
0x2f4b   :  { %v2967_v7 = vadd.f32 0.5, %v2966_v44 }
0x2f4d   :  { %v2968_v47 = vmul.f32 %v2967_v7, %v2959_v38  ;;  %v2971_v4 = vsub.f32 1.0, %v2967_v7  ;;  %v2977_v51 = vmul.f32 %v2967_v7, %v5222_v42 }
0x2f4f   :  { %v2969_v8 = vadd.f32 %v2968_v47, %v2914_v55 }
0x2f51   :  { %3984 = vtanh.f32 %v2969_v8 }
0x2f5e   :  { %v3985_v10 = vpop.eup %3984 }
0x2f5f   :  { %2973 = vrot.lane.b32.xlu1 %v3985_v10, %s4048_s20 }
0x2f63   :  { %1958 = vbcast.lane.b32.xlu1 %v1956_v60, 256 }
0x2fd1   :  { %v2974_v50 = vpop.permute.xlu1 %2973 }
0x2fd2   :  { %v2976_v2 = vmul.f32 %v2974_v50, %v2971_v4 }
0x2fd4   :  { %v5261_v54 = vadd.f32 %v2977_v51, %v2976_v2 }
0x2fd5   :  { %v1959_v19 = vpop.permute.xlu1 %1958 }
0x2fd6   :  { %v2987_v56 = vpack.c.bf16 %v5261_v54, %v5261_v54  ;;  %v2031_v30 = vmul.f32 %v4956_v31, %v1959_v19  ;;  %v2032_v48 = vmul.f32 %v4959_v14, %v1959_v19 }
0x2fd8   :  { %2989 = vrot.lane.b32.xlu0 %v2987_v56, %s4048_s20  ;;  %v1963_v56 = vrot.slane %v5229_v58, %v5021_v29 }
0x2fdc   :  { %2113 = vbcast.lane.b32.xlu0 %v2111_v5, 256 }
0x304a   :  { %v2990_v40 = vpop.permute.xlu0 %2989 }
0x304b   :  { %3799 = vmatmul.mubr.msk.bf16.vlgmr.msra.gmra.mxu0 %vm205_vm1, %v2990_v40 }
0x304c   :  { %3147 = vmatpush1.bf16.msra.mxu0 %v4837_v37  ;;  %3170 = vmatprep.mubr.bf16.mxu0 %v4047_v3 }
0x304d   :  { %3148 = vmatprep.subr.bf16.mxu0 %v4839_v17 }
0x304e   :  { %v2114_v21 = vpop.permute.xlu0 %2113 }
0x304f   :  { %v2186_v1 = vmul.f32 %v4965_v35, %v2114_v21  ;;  %v2187_v63 = vmul.f32 %v4968_v49, %v2114_v21 }
0x3050   :  { %3149 = vmatpush1.bf16.msra.mxu0 %v4855_v26 }
0x3051   :  { %v2218_v39 = vadd.f32 %v2186_v1, %v2031_v30  ;;  %v2219_v12 = vadd.f32 %v2187_v63, %v2032_v48  ;;  %3150 = vmatprep.subr.bf16.mxu0 %v4861_v22  ;;  %v2118_v1 = vrot.slane %v5244_v59, %v5021_v29 }
0x3053   :  { %v2261_v9 = vadd.f32 %v4974_v20, %v2218_v39  ;;  %v2262_v62 = vadd.f32 %v4977_v36, %v2219_v12 }
0x3054   :  { %3151 = vmatpush1.bf16.msra.mxu0 %v4876_v16 }
0x3055   :  { %2294 = vst.msk [vmem:[#allocation2 + $0x98] sm:$0xff] %vm205_vm1, %v2262_v62  ;;  %3152 = vmatprep.subr.bf16.mxu0 %v4879_v33 }
0x3058   :  { %3153 = vmatpush1.bf16.msra.mxu0 %v4888_v18 }
0x3059   :  { %3290 = vmatprep.subr.bf16.mxu0 %v4825_v25 }
0x305c   :  { %v2986_v50 = vld [vmem:[#allocation2 + $0x98] sm:$0xff] }
0x310b   :  { %v3028_v28 = vpop.f32.mrf.mxu0 }
0x310c   :  { %v3029_v15 = vadd.f32 %v3028_v28, %v4971_v6 }
0x310d   :  { %v3030_v32 = vpop.f32.mrf.mxu0 }
0x310e   :  { %v3035_v44 = vadd.f32 %v3029_v15, %v2261_v9  ;;  %v3031_v10 = vadd.f32 %v3030_v32, %v4988_v57 }
0x310f   :  { %v3032_v38 = vpop.f32.mrf.mxu0 }
0x3110   :  { %v3036_v7 = vmul.f32 0.5, %v3035_v44 }
0x3111   :  { %v3033_v47 = vpop.f32.mrf.mxu0 }
0x3112   :  { %3986 = vtanh.f32 %v3036_v7 }
0x311f   :  { %v3987_v55 = vpop.eup %3986 }
0x3120   :  { %v3038_v8 = vmul.f32 0.5, %v3987_v55 }
0x3122   :  { %v3039_v60 = vadd.f32 0.5, %v3038_v8 }
0x3124   :  { %v3040_v4 = vmul.f32 %v3039_v60, %v3031_v10  ;;  %v3043_v5 = vsub.f32 1.0, %v3039_v60  ;;  %v3049_v19 = vmul.f32 %v3039_v60, %v5261_v54 }
0x3126   :  { %v3041_v51 = vadd.f32 %v3040_v4, %v2986_v50 }
0x3128   :  { %3988 = vtanh.f32 %v3041_v51 }
0x3135   :  { %v3989_v2 = vpop.eup %3988 }
0x3136   :  { %3045 = vrot.lane.b32.xlu1 %v3989_v2, %s4048_s20 }
0x313a   :  { %1965 = vbcast.lane.b32.xlu1 %v1963_v56, 256 }
0x31a8   :  { %v3046_v40 = vpop.permute.xlu1 %3045 }
0x31a9   :  { %v3048_v21 = vmul.f32 %v3046_v40, %v3043_v5 }
0x31ab   :  { %v5291_v30 = vadd.f32 %v3049_v19, %v3048_v21 }
0x31ac   :  { %v1966_v39 = vpop.permute.xlu1 %1965 }
0x31ad   :  { %v3059_v48 = vpack.c.bf16 %v5291_v30, %v5291_v30  ;;  %v2033_v9 = vmul.f32 %v4956_v31, %v1966_v39  ;;  %v2034_v62 = vmul.f32 %v4959_v14, %v1966_v39 }
0x31af   :  { %3061 = vrot.lane.b32.xlu0 %v3059_v48, %s4048_s20  ;;  %v1970_v48 = vrot.slane %v5229_v58, %v5054_v11 }
0x31b3   :  { %2120 = vbcast.lane.b32.xlu0 %v2118_v1, 256 }
0x3221   :  { %v3062_v63 = vpop.permute.xlu0 %3061 }
0x3222   :  { %3800 = vmatmul.mubr.msk.bf16.vlgmr.msra.gmra.mxu1 %vm205_vm1, %v3062_v63 }
0x3223   :  { %3219 = vmatpush1.bf16.msra.mxu1 %v4837_v37  ;;  %3242 = vmatprep.mubr.bf16.mxu1 %v4047_v3 }
0x3224   :  { %3220 = vmatprep.subr.bf16.mxu1 %v4839_v17 }
0x3225   :  { %v2121_v12 = vpop.permute.xlu0 %2120 }
0x3226   :  { %v2188_v28 = vmul.f32 %v4965_v35, %v2121_v12  ;;  %v2189_v29 = vmul.f32 %v4968_v49, %v2121_v12 }
0x3227   :  { %3221 = vmatpush1.bf16.msra.mxu1 %v4855_v26 }
0x3228   :  { %v2220_v15 = vadd.f32 %v2188_v28, %v2033_v9  ;;  %v2221_v32 = vadd.f32 %v2189_v29, %v2034_v62  ;;  %3222 = vmatprep.subr.bf16.mxu1 %v4861_v22  ;;  %v2125_v28 = vrot.slane %v5244_v59, %v5054_v11 }
0x322a   :  { %v2263_v44 = vadd.f32 %v4974_v20, %v2220_v15  ;;  %v2264_v38 = vadd.f32 %v4977_v36, %v2221_v32 }
0x322b   :  { %3223 = vmatpush1.bf16.msra.mxu1 %v4876_v16 }
0x322c   :  { %2296 = vst.msk [vmem:[#allocation2 + $0xa8] sm:$0xff] %vm205_vm1, %v2264_v38  ;;  %3224 = vmatprep.subr.bf16.mxu1 %v4879_v33 }
0x322f   :  { %3225 = vmatpush1.bf16.msra.mxu1 %v4888_v18 }
0x3230   :  { %3362 = vmatprep.subr.bf16.mxu1 %v4825_v25 }
0x3233   :  { %v3058_v40 = vld [vmem:[#allocation2 + $0xa8] sm:$0xff] }
0x32e2   :  { %v3100_v7 = vpop.f32.mrf.mxu1 }
0x32e3   :  { %v3101_v47 = vadd.f32 %v3100_v7, %v4971_v6 }
0x32e4   :  { %v3102_v55 = vpop.f32.mrf.mxu1 }
0x32e5   :  { %v3107_v8 = vadd.f32 %v3101_v47, %v2263_v44  ;;  %v3103_v2 = vadd.f32 %v3102_v55, %v4988_v57 }
0x32e6   :  { %v3104_v10 = vpop.f32.mrf.mxu1 }
0x32e7   :  { %v3108_v60 = vmul.f32 0.5, %v3107_v8 }
0x32e8   :  { %v3105_v4 = vpop.f32.mrf.mxu1 }
0x32e9   :  { %3990 = vtanh.f32 %v3108_v60 }
0x32f6   :  { %v3991_v50 = vpop.eup %3990 }
0x32f7   :  { %v3110_v51 = vmul.f32 0.5, %v3991_v50 }
0x32f9   :  { %v3111_v56 = vadd.f32 0.5, %v3110_v51 }
0x32fb   :  { %v3112_v5 = vmul.f32 %v3111_v56, %v3103_v2  ;;  %v3115_v1 = vsub.f32 1.0, %v3111_v56  ;;  %v3121_v39 = vmul.f32 %v3111_v56, %v5291_v30 }
0x32fd   :  { %v3113_v19 = vadd.f32 %v3112_v5, %v3058_v40 }
0x32ff   :  { %3992 = vtanh.f32 %v3113_v19 }
0x330c   :  { %v3993_v21 = vpop.eup %3992 }
0x330d   :  { %3117 = vrot.lane.b32.xlu1 %v3993_v21, %s4048_s20 }
0x3311   :  { %1972 = vbcast.lane.b32.xlu1 %v1970_v48, 256 }
0x337f   :  { %v3118_v63 = vpop.permute.xlu1 %3117 }
0x3380   :  { %v3120_v12 = vmul.f32 %v3118_v63, %v3115_v1 }
0x3382   :  { %v5321_v9 = vadd.f32 %v3121_v39, %v3120_v12 }
0x3383   :  { %v1973_v15 = vpop.permute.xlu1 %1972 }
0x3384   :  { %v3131_v62 = vpack.c.bf16 %v5321_v9, %v5321_v9  ;;  %v2035_v44 = vmul.f32 %v4956_v31, %v1973_v15  ;;  %v2036_v38 = vmul.f32 %v4959_v14, %v1973_v15 }
0x3386   :  { %3133 = vrot.lane.b32.xlu0 %v3131_v62, %s4048_s20 }
0x338a   :  { %2127 = vbcast.lane.b32.xlu0 %v2125_v28, 256 }
0x33f8   :  { %v3134_v29 = vpop.permute.xlu0 %3133 }
0x33f9   :  { %3801 = vmatmul.mubr.msk.bf16.vlgmr.msra.gmra.mxu0 %vm205_vm1, %v3134_v29 }
0x33fa   :  { %3291 = vmatpush1.bf16.msra.mxu0 %v4837_v37  ;;  %3314 = vmatprep.mubr.bf16.mxu0 %v4047_v3 }
0x33fb   :  { %3292 = vmatprep.subr.bf16.mxu0 %v4839_v17 }
0x33fc   :  { %v2128_v32 = vpop.permute.xlu0 %2127 }
0x33fd   :  { %v2190_v7 = vmul.f32 %v4965_v35, %v2128_v32  ;;  %v2191_v11 = vmul.f32 %v4968_v49, %v2128_v32 }
0x33fe   :  { %3293 = vmatpush1.bf16.msra.mxu0 %v4855_v26 }
0x33ff   :  { %v2222_v47 = vadd.f32 %v2190_v7, %v2035_v44  ;;  %v2223_v55 = vadd.f32 %v2191_v11, %v2036_v38  ;;  %3294 = vmatprep.subr.bf16.mxu0 %v4861_v22  ;;  %v2132_v38 = vrot.slane %v5244_v59, %v5087_v24 }
0x3401   :  { %v2265_v8 = vadd.f32 %v4974_v20, %v2222_v47  ;;  %v2266_v10 = vadd.f32 %v4977_v36, %v2223_v55 }
0x3402   :  { %3295 = vmatpush1.bf16.msra.mxu0 %v4876_v16 }
0x3403   :  { %2298 = vst.msk [vmem:[#allocation2 + $0xb8] sm:$0xff] %vm205_vm1, %v2266_v10  ;;  %3296 = vmatprep.subr.bf16.mxu0 %v4879_v33 }
0x3406   :  { %3297 = vmatpush1.bf16.msra.mxu0 %v4888_v18 }
0x3407   :  { %3434 = vmatprep.subr.bf16.mxu0 %v4825_v25  ;;  %v1977_v25 = vrot.slane %v5229_v58, %v5087_v24 }
0x340a   :  { %v3130_v63 = vld [vmem:[#allocation2 + $0xb8] sm:$0xff] }
0x34b9   :  { %v3172_v60 = vpop.f32.mrf.mxu0 }
0x34ba   :  { %v3173_v4 = vadd.f32 %v3172_v60, %v4971_v6 }
0x34bb   :  { %v3174_v50 = vpop.f32.mrf.mxu0 }
0x34bc   :  { %v3179_v51 = vadd.f32 %v3173_v4, %v2265_v8  ;;  %v3175_v21 = vadd.f32 %v3174_v50, %v4988_v57 }
0x34bd   :  { %v3176_v2 = vpop.f32.mrf.mxu0 }
0x34be   :  { %v3180_v56 = vmul.f32 0.5, %v3179_v51 }
0x34bf   :  { %v3177_v5 = vpop.f32.mrf.mxu0 }
0x34c0   :  { %3994 = vtanh.f32 %v3180_v56 }
0x34cd   :  { %v3995_v40 = vpop.eup %3994 }
0x34ce   :  { %v3182_v19 = vmul.f32 0.5, %v3995_v40 }
0x34d0   :  { %v3183_v48 = vadd.f32 0.5, %v3182_v19 }
0x34d2   :  { %v3184_v1 = vmul.f32 %v3183_v48, %v3175_v21  ;;  %v3187_v62 = vsub.f32 1.0, %v3183_v48  ;;  %v3193_v29 = vmul.f32 %v3183_v48, %v5321_v9 }
0x34d4   :  { %v3185_v39 = vadd.f32 %v3184_v1, %v3130_v63 }
0x34d6   :  { %3996 = vtanh.f32 %v3185_v39 }
0x34e3   :  { %v3997_v12 = vpop.eup %3996 }
0x34e4   :  { %3189 = vrot.lane.b32.xlu1 %v3997_v12, %s4048_s20 }
0x34e8   :  { %1979 = vbcast.lane.b32.xlu1 %v1977_v25, 256 }
0x3556   :  { %v3190_v28 = vpop.permute.xlu1 %3189 }
0x3557   :  { %v3192_v15 = vmul.f32 %v3190_v28, %v3187_v62 }
0x3559   :  { %v5351_v32 = vadd.f32 %v3193_v29, %v3192_v15  ;;  %v1984_v15 = vrot.slane %v5229_v58, %v5120_v23 }
0x355a   :  { %v1980_v11 = vpop.permute.xlu1 %1979 }
0x355b   :  { %v3203_v44 = vpack.c.bf16 %v5351_v32, %v5351_v32  ;;  %v2037_v55 = vmul.f32 %v4956_v31, %v1980_v11  ;;  %v2038_v8 = vmul.f32 %v4959_v14, %v1980_v11 }
0x355d   :  { %3205 = vrot.lane.b32.xlu0 %v3203_v44, %s4048_s20 }
0x3561   :  { %2134 = vbcast.lane.b32.xlu0 %v2132_v38, 256 }
0x35cf   :  { %v3206_v7 = vpop.permute.xlu0 %3205 }
0x35d0   :  { %3802 = vmatmul.mubr.msk.bf16.vlgmr.msra.gmra.mxu1 %vm205_vm1, %v3206_v7 }
0x35d1   :  { %3363 = vmatpush1.bf16.msra.mxu1 %v4837_v37  ;;  %3386 = vmatprep.mubr.bf16.mxu1 %v4047_v3 }
0x35d2   :  { %3364 = vmatprep.subr.bf16.mxu1 %v4839_v17 }
0x35d3   :  { %v2135_v47 = vpop.permute.xlu0 %2134 }
0x35d4   :  { %v2192_v10 = vmul.f32 %v4965_v35, %v2135_v47  ;;  %v2193_v24 = vmul.f32 %v4968_v49, %v2135_v47 }
0x35d5   :  { %3365 = vmatpush1.bf16.msra.mxu1 %v4855_v26 }
0x35d6   :  { %v2224_v60 = vadd.f32 %v2192_v10, %v2037_v55  ;;  %v2225_v4 = vadd.f32 %v2193_v24, %v2038_v8  ;;  %3366 = vmatprep.subr.bf16.mxu1 %v4861_v22  ;;  %v2139_v8 = vrot.slane %v5244_v59, %v5120_v23 }
0x35d8   :  { %v2267_v50 = vadd.f32 %v4974_v20, %v2224_v60  ;;  %v2268_v51 = vadd.f32 %v4977_v36, %v2225_v4 }
0x35d9   :  { %3367 = vmatpush1.bf16.msra.mxu1 %v4876_v16 }
0x35da   :  { %2300 = vst.msk [vmem:[#allocation2 + $0xc8] sm:$0xff] %vm205_vm1, %v2268_v51  ;;  %3368 = vmatprep.subr.bf16.mxu1 %v4879_v33 }
0x35dd   :  { %3369 = vmatpush1.bf16.msra.mxu1 %v4888_v18 }
0x35e1   :  { %v3202_v62 = vld [vmem:[#allocation2 + $0xc8] sm:$0xff] }
0x3690   :  { %v3244_v2 = vpop.f32.mrf.mxu1 }
0x3691   :  { %v3245_v56 = vadd.f32 %v3244_v2, %v4971_v6 }
0x3692   :  { %v3246_v5 = vpop.f32.mrf.mxu1 }
0x3693   :  { %v3251_v40 = vadd.f32 %v3245_v56, %v2267_v50  ;;  %v3247_v39 = vadd.f32 %v3246_v5, %v4988_v57 }
0x3694   :  { %v3248_v19 = vpop.f32.mrf.mxu1 }
0x3695   :  { %v3252_v21 = vmul.f32 0.5, %v3251_v40 }
0x3696   :  { %v3249_v48 = vpop.f32.mrf.mxu1 }
0x3697   :  { %3998 = vtanh.f32 %v3252_v21 }
0x36a4   :  { %v3999_v1 = vpop.eup %3998 }
0x36a5   :  { %v3254_v63 = vmul.f32 0.5, %v3999_v1 }
0x36a7   :  { %v3255_v12 = vadd.f32 0.5, %v3254_v63 }
0x36a9   :  { %v3256_v25 = vmul.f32 %v3255_v12, %v3247_v39  ;;  %v3259_v44 = vsub.f32 1.0, %v3255_v12  ;;  %v3265_v7 = vmul.f32 %v3255_v12, %v5351_v32 }
0x36ab   :  { %v3257_v28 = vadd.f32 %v3256_v25, %v3202_v62 }
0x36ad   :  { %4000 = vtanh.f32 %v3257_v28 }
0x36ba   :  { %v4001_v29 = vpop.eup %4000 }
0x36bb   :  { %3261 = vrot.lane.b32.xlu1 %v4001_v29, %s4048_s20 }
0x36bf   :  { %1986 = vbcast.lane.b32.xlu1 %v1984_v15, 256 }
0x372d   :  { %v3262_v38 = vpop.permute.xlu1 %3261 }
0x372e   :  { %v3264_v11 = vmul.f32 %v3262_v38, %v3259_v44 }
0x3730   :  { %v5380_v47 = vadd.f32 %v3265_v7, %v3264_v11  ;;  %v2146_v7 = vrot.slane %v5244_v59, %v5153_v46 }
0x3731   :  { %v1987_v24 = vpop.permute.xlu1 %1986 }
0x3732   :  { %v3275_v55 = vpack.c.bf16 %v5380_v47, %v5380_v47  ;;  %v2039_v4 = vmul.f32 %v4956_v31, %v1987_v24  ;;  %v2040_v50 = vmul.f32 %v4959_v14, %v1987_v24 }
0x3734   :  { %3277 = vrot.lane.b32.xlu0 %v3275_v55, %s4048_s20 }
0x3738   :  { %2141 = vbcast.lane.b32.xlu0 %v2139_v8, 256 }
0x37a6   :  { %v3278_v10 = vpop.permute.xlu0 %3277 }
0x37a7   :  { %3803 = vmatmul.mubr.msk.bf16.vlgmr.msra.gmra.mxu0 %vm205_vm1, %v3278_v10 }
0x37a8   :  { %3435 = vmatpush1.bf16.msra.mxu0 %v4837_v37  ;;  %3458 = vmatprep.mubr.bf16.mxu0 %v4047_v3 }
0x37a9   :  { %3436 = vmatprep.subr.bf16.mxu0 %v4839_v17 }
0x37aa   :  { %v2142_v60 = vpop.permute.xlu0 %2141 }
0x37ab   :  { %v2194_v51 = vmul.f32 %v4965_v35, %v2142_v60  ;;  %v2195_v23 = vmul.f32 %v4968_v49, %v2142_v60 }
0x37ac   :  { %3437 = vmatpush1.bf16.msra.mxu0 %v4855_v26 }
0x37ad   :  { %v2226_v2 = vadd.f32 %v2194_v51, %v2039_v4  ;;  %v2227_v56 = vadd.f32 %v2195_v23, %v2040_v50  ;;  %3438 = vmatprep.subr.bf16.mxu0 %v4861_v22 }
0x37af   :  { %v2269_v37 = vadd.f32 %v4974_v20, %v2226_v2  ;;  %v2270_v3 = vadd.f32 %v4977_v36, %v2227_v56 }
0x37b0   :  { %3439 = vmatpush1.bf16.msra.mxu0 %v4876_v16 }
0x37b1   :  { %2302 = vst.msk [vmem:[#allocation2 + $0xd8] sm:$0xff] %vm205_vm1, %v2270_v3  ;;  %3440 = vmatprep.subr.bf16.mxu0 %v4879_v33 }
0x37b4   :  { %3441 = vmatpush1.bf16.msra.mxu0 %v4888_v18  ;;  %v1991_v18 = vrot.slane %v5229_v58, %v5153_v46 }
0x37b8   :  { %v3274_v12 = vld [vmem:[#allocation2 + $0xd8] sm:$0xff] }
0x3867   :  { %v3316_v17 = vpop.f32.mrf.mxu0 }
0x3868   :  { %v3317_v5 = vadd.f32 %v3316_v17, %v4971_v6 }
0x3869   :  { %v3318_v26 = vpop.f32.mrf.mxu0 }
0x386a   :  { %v3323_v40 = vadd.f32 %v3317_v5, %v2269_v37  ;;  %v3319_v63 = vadd.f32 %v3318_v26, %v4988_v57 }
0x386b   :  { %v3320_v19 = vpop.f32.mrf.mxu0 }
0x386c   :  { %v3324_v21 = vmul.f32 0.5, %v3323_v40 }
0x386d   :  { %v3321_v22 = vpop.f32.mrf.mxu0 }
0x386e   :  { %4002 = vtanh.f32 %v3324_v21 }
0x387b   :  { %v4003_v48 = vpop.eup %4002 }
0x387c   :  { %v3326_v1 = vmul.f32 0.5, %v4003_v48 }
0x387e   :  { %v3327_v16 = vadd.f32 0.5, %v3326_v1 }
0x3880   :  { %v3328_v39 = vmul.f32 %v3327_v16, %v3319_v63  ;;  %v3331_v62 = vsub.f32 1.0, %v3327_v16  ;;  %v3337_v29 = vmul.f32 %v3327_v16, %v5380_v47 }
0x3882   :  { %v3329_v25 = vadd.f32 %v3328_v39, %v3274_v12  ;;  %v1998_v39 = vrot.slane %v5229_v58, %v5186_v13 }
0x3884   :  { %4004 = vtanh.f32 %v3329_v25 }
0x3891   :  { %v4005_v33 = vpop.eup %4004 }
0x3892   :  { %3333 = vrot.lane.b32.xlu1 %v4005_v33, %s4048_s20 }
0x3896   :  { %1993 = vbcast.lane.b32.xlu1 %v1991_v18, 256 }
0x3904   :  { %v3334_v28 = vpop.permute.xlu1 %3333 }
0x3905   :  { %v3336_v15 = vmul.f32 %v3334_v28, %v3331_v62 }
0x3907   :  { %v5409_v44 = vadd.f32 %v3337_v29, %v3336_v15  ;;  %v2153_v29 = vrot.slane %v5244_v59, %v5186_v13 }
0x3908   :  { %v1994_v55 = vpop.permute.xlu1 %1993 }
0x3909   :  { %v3347_v38 = vpack.c.bf16 %v5409_v44, %v5409_v44  ;;  %v2041_v10 = vmul.f32 %v4956_v31, %v1994_v55  ;;  %v2042_v24 = vmul.f32 %v4959_v14, %v1994_v55 }
0x390b   :  { %3349 = vrot.lane.b32.xlu0 %v3347_v38, %s4048_s20 }
0x390f   :  { %2148 = vbcast.lane.b32.xlu0 %v2146_v7, 256 }
0x397d   :  { %v3350_v11 = vpop.permute.xlu0 %3349 }
0x397e   :  { %3804 = vmatmul.mubr.msk.bf16.vlgmr.msra.gmra.mxu1 %vm205_vm1, %v3350_v11 }
0x3981   :  { %v2149_v8 = vpop.permute.xlu0 %2148 }
0x3982   :  { %v2196_v60 = vmul.f32 %v4965_v35, %v2149_v8  ;;  %v2197_v4 = vmul.f32 %v4968_v49, %v2149_v8 }
0x3984   :  { %v2228_v50 = vadd.f32 %v2196_v60, %v2041_v10  ;;  %v2229_v51 = vadd.f32 %v2197_v4, %v2042_v24 }
0x3986   :  { %v2271_v23 = vadd.f32 %v4974_v20, %v2228_v50  ;;  %v2272_v46 = vadd.f32 %v4977_v36, %v2229_v51 }
0x3988   :  { %2304 = vst.msk [vmem:[#allocation2 + $0xe8] sm:$0xff] %vm205_vm1, %v2272_v46 }
0x398f   :  { %v3346_v1 = vld [vmem:[#allocation2 + $0xe8] sm:$0xff] }
0x3a3e   :  { %v3388_v2 = vpop.f32.mrf.mxu1 }
0x3a3f   :  { %v3389_v56 = vadd.f32 %v3388_v2, %v4971_v6 }
0x3a40   :  { %v3390_v37 = vpop.f32.mrf.mxu1 }
0x3a41   :  { %v3395_v3 = vadd.f32 %v3389_v56, %v2271_v23  ;;  %v3391_v21 = vadd.f32 %v3390_v37, %v4988_v57 }
0x3a42   :  { %v3392_v17 = vpop.f32.mrf.mxu1 }
0x3a43   :  { %v3396_v5 = vmul.f32 0.5, %v3395_v3 }
0x3a44   :  { %v3393_v26 = vpop.f32.mrf.mxu1 }
0x3a45   :  { %4006 = vtanh.f32 %v3396_v5  ;;  %v3536_v26 = vld [vmem:[%s5640_s2 + $0x68] sm:$0xff] }
0x3a52   :  { %v4007_v40 = vpop.eup %4006 }
0x3a53   :  { %v3398_v19 = vmul.f32 0.5, %v4007_v40  ;;  %v3534_v40 = vld [vmem:[%s5640_s2 + $0x58] sm:$0xff] }
0x3a55   :  { %v3399_v22 = vadd.f32 0.5, %v3398_v19 }
0x3a57   :  { %v3400_v48 = vmul.f32 %v3399_v22, %v3391_v21  ;;  %v3403_v12 = vsub.f32 1.0, %v3399_v22  ;;  %v3409_v33 = vmul.f32 %v3399_v22, %v5409_v44 }
0x3a59   :  { %v3401_v63 = vadd.f32 %v3400_v48, %v3346_v1  ;;  %v3529_v48 = vld [vmem:[%s5640_s2 + $0x30] sm:$0xff]  ;;  %v3530_v1 = vld [vmem:[%s5640_s2 + $0x38] sm:$0xff] }
0x3a5b   :  { %4008 = vtanh.f32 %v3401_v63 }
0x3a68   :  { %v4009_v16 = vpop.eup %4008 }
0x3a69   :  { %3405 = vrot.lane.b32.xlu1 %v4009_v16, %s4048_s20 }
0x3a6d   :  { %2000 = vbcast.lane.b32.xlu1 %v1998_v39, 256  ;;  %v3537_v39 = vpack.c.bf16 %v3530_v1, %v3529_v48 }
0x3adb   :  { %v3406_v25 = vpop.permute.xlu1 %3405 }
0x3adc   :  { %v3408_v18 = vmul.f32 %v3406_v25, %v3403_v12 }
0x3ade   :  { %v5430_v62 = vadd.f32 %v3409_v33, %v3408_v18 }
0x3ae0   :  { %v3419_v28 = vpack.c.bf16 %v5430_v62, %v5430_v62 }
0x3ae2   :  { %3421 = vrot.lane.b32.xlu0 %v3419_v28, %s4048_s20 }
0x3ae6   :  { %2155 = vbcast.lane.b32.xlu0 %v2153_v29, 256 }
0x3aea   :  { %2404 = vrot.lane.b32.xlu0 %v4992_v0, %s4048_s20  ;;  %v4046_v0 = vld [vmem:[%s5640_s2 + $0x8] sm:$0xff] }
0x3aee   :  { %2548 = vrot.lane.b32.xlu0 %v5060_v43, %s4048_s20 }
0x3af2   :  { %3412 = vrot.lane.b32.xlu0 %v5430_v62, %s4048_s20 }
0x3af6   :  { %3268 = vrot.lane.b32.xlu0 %v5380_v47, %s4048_s20 }
0x3afa   :  { %2692 = vrot.lane.b32.xlu0 %v5126_v34, %s4048_s20  ;;  %v2001_v34 = vpop.permute.xlu1 %2000 }
0x3afb   :  { %v2044_v58 = vmul.f32 %v4959_v14, %v2001_v34 }
0x3afe   :  { %2836 = vrot.lane.b32.xlu0 %v5192_v27, %s4048_s20  ;;  %v2043_v27 = vmul.f32 %v4956_v31, %v2001_v34 }
0x3b02   :  { %3124 = vrot.lane.b32.xlu0 %v5321_v9, %s4048_s20 }
0x3b06   :  { %2980 = vrot.lane.b32.xlu0 %v5261_v54, %s4048_s20 }
0x3b0a   :  { %1570 = vperm.xlu0 %3884, %v4046_v0  }
0x3b0e   :  { %3885 = vset.pattern.permute.xlu0 %v4050_v41 }
0x3b54   :  { %v3422_v43 = vpop.permute.xlu0 %3421 }
0x3b55   :  { %3805 = vmatmul.mubr.msk.bf16.vlgmr.msra.gmra.mxu0 %vm205_vm1, %v3422_v43 }
0x3b58   :  { %v2156_v13 = vpop.permute.xlu0 %2155 }
0x3b59   :  { %v2198_v59 = vmul.f32 %v4965_v35, %v2156_v13  ;;  %v2199_v54 = vmul.f32 %v4968_v49, %v2156_v13 }
0x3b5b   :  { %v2230_v9 = vadd.f32 %v2198_v59, %v2043_v27  ;;  %v2231_v47 = vadd.f32 %v2199_v54, %v2044_v58 }
0x3b5c   :  { %v2405_v15 = vpop.permute.xlu0 %2404 }
0x3b5d   :  { %v2273_v38 = vadd.f32 %v4974_v20, %v2230_v9  ;;  %v2274_v41 = vadd.f32 %v4977_v36, %v2231_v47  ;;  %2407 = vst.msk [vmem:[#allocation3] sm:$0xff] %vm66_vm0, %v2405_v15 }
0x3b5e   :  { %2408 = vst.msk [vmem:[#allocation3 + $0x78] sm:$0xff] %vm341_vm2, %v2405_v15 }
0x3b5f   :  { %2305 = vst [vmem:[#allocation2 + $0xf0] sm:$0xff] %v2273_v38  ;;  %2306 = vst.msk [vmem:[#allocation2 + $0xf8] sm:$0xff] %vm205_vm1, %v2274_v41 }
0x3b60   :  { %v2549_v31 = vpop.permute.xlu0 %2548 }
0x3b61   :  { %2551 = vst.msk [vmem:[#allocation3 + $0x10] sm:$0xff] %vm66_vm0, %v2549_v31 }
0x3b62   :  { %2552 = vst.msk [vmem:[#allocation3 + $0x68] sm:$0xff] %vm341_vm2, %v2549_v31 }
0x3b64   :  { %v5469_v14 = vpop.permute.xlu0 %3412 }
0x3b66   :  { %v3418_v3 = vld [vmem:[#allocation2 + $0xf8] sm:$0xff] }
0x3b68   :  { %v5471_v35 = vpop.permute.xlu0 %3268 }
0x3b6c   :  { %v2693_v49 = vpop.permute.xlu0 %2692 }
0x3b6d   :  { %2695 = vst.msk [vmem:[#allocation3 + $0x20] sm:$0xff] %vm66_vm0, %v2693_v49 }
0x3b6e   :  { %2696 = vst.msk [vmem:[#allocation3 + $0x58] sm:$0xff] %vm341_vm2, %v2693_v49 }
0x3b70   :  { %v2837_v20 = vpop.permute.xlu0 %2836 }
0x3b71   :  { %2839 = vst.msk [vmem:[#allocation3 + $0x30] sm:$0xff] %vm66_vm0, %v2837_v20 }
0x3b72   :  { %2840 = vst.msk [vmem:[#allocation3 + $0x48] sm:$0xff] %vm341_vm2, %v2837_v20 }
0x3b74   :  { %v5477_v36 = vpop.permute.xlu0 %3124 }
0x3b78   :  { %v5479_v7 = vpop.permute.xlu0 %2980 }
0x3b85   :  { %v1571_v11 = vpop.permute.xlu0 %1570 }
0x3b86   :  { %v1755_v55 = vadd.f32 %v4903_v52, %v1571_v11 }
0x3b88   :  { %v1759_v8 = vmax.f32 %v1755_v55, 0.0 }
0x3b8a   :  { %1762 = vst.msk [vmem:[%s5641_s4 + $0x8] sm:$0xff] %vm1760_vm11, %v1759_v8 }
0x3c15   :  { %v3460_v10 = vpop.f32.mrf.mxu0 }
0x3c16   :  { %v3461_v24 = vadd.f32 %v3460_v10, %v4971_v6  ;;  %v3535_v6 = vld [vmem:[%s5640_s2 + $0x60] sm:$0xff] }
0x3c17   :  { %v3462_v60 = vpop.f32.mrf.mxu0 }
0x3c18   :  { %v3467_v4 = vadd.f32 %v3461_v24, %v2273_v38  ;;  %v3463_v56 = vadd.f32 %v3462_v60, %v4988_v57  ;;  %v3540_v57 = vpack.c.bf16 %v3536_v26, %v3535_v6  ;;  %v5572_v26 = vld [vmem:[%s5640_s2 + $0x72] ss:$0 sm:$0xff] }
0x3c19   :  { %v3464_v50 = vpop.f32.mrf.mxu0 }
0x3c1a   :  { %v3468_v51 = vmul.f32 0.5, %v3467_v4  ;;  %3851 = vmatprep.subr.bf16.mxu1 %v3540_v57 }
0x3c1b   :  { %v3465_v23 = vpop.f32.mrf.mxu0  ;;  %3852 = vmatpush3.bf16.msra.mxu1 %v3540_v57 }
0x3c1c   :  { %4010 = vtanh.f32 %v3468_v51 }
0x3c29   :  { %v4011_v46 = vpop.eup %4010 }
0x3c2a   :  { %v3470_v2 = vmul.f32 0.5, %v4011_v46 }
0x3c2c   :  { %v3471_v52 = vadd.f32 0.5, %v3470_v2 }
0x3c2e   :  { %v3472_v37 = vmul.f32 %v3471_v52, %v3463_v56  ;;  %v3475_v21 = vsub.f32 1.0, %v3471_v52  ;;  %v3481_v63 = vmul.f32 %v3471_v52, %v5430_v62 }
0x3c30   :  { %v3473_v17 = vadd.f32 %v3472_v37, %v3418_v3 }
0x3c32   :  { %4012 = vtanh.f32 %v3473_v17 }
0x3c3f   :  { %v4013_v5 = vpop.eup %4012 }
0x3c40   :  { %3477 = vrot.lane.b32.xlu1 %v4013_v5, %s4048_s20 }
0x3c44   :  { %2476 = vrot.lane.b32.xlu1 %v5027_v53, %s4048_s20  ;;  %v3533_v53 = vld [vmem:[%s5640_s2 + $0x50] sm:$0xff] }
0x3c45   :  { %v3539_v19 = vpack.c.bf16 %v3534_v40, %v3533_v53 }
0x3c47   :  { %3853 = vmatprep.subr.bf16.mxu1 %v3539_v19 }
0x3c48   :  { %2620 = vrot.lane.b32.xlu1 %v5093_v61, %s4048_s20  ;;  %3854 = vmatpush3.bf16.msra.mxu1 %v3539_v19  ;;  %v3531_v61 = vld [vmem:[%s5640_s2 + $0x40] sm:$0xff] }
0x3c4c   :  { %3340 = vrot.lane.b32.xlu1 %v5409_v44, %s4048_s20  ;;  %v3532_v44 = vld [vmem:[%s5640_s2 + $0x48] sm:$0xff] }
0x3c50   :  { %2764 = vrot.lane.b32.xlu1 %v5159_v45, %s4048_s20  ;;  %v3538_v45 = vpack.c.bf16 %v3532_v44, %v3531_v61 }
0x3c52   :  { %3855 = vmatprep.subr.bf16.mxu1 %v3538_v45 }
0x3c53   :  { %3856 = vmatpush3.bf16.msra.mxu1 %v3538_v45 }
0x3c54   :  { %3857 = vmatprep.subr.bf16.mxu1 %v3537_v39 }
0x3c57   :  { %3858 = vmatpush3.bf16.msra.mxu1 %v3537_v39 }
0x3cb2   :  { %v3478_v22 = vpop.permute.xlu1 %3477 }
0x3cb3   :  { %v3480_v16 = vmul.f32 %v3478_v22, %v3475_v21 }
0x3cb5   :  { %v3482_v12 = vadd.f32 %v3481_v63, %v3480_v16 }
0x3cb6   :  { %v2477_v25 = vpop.permute.xlu1 %2476 }
0x3cb7   :  { %2479 = vst.msk [vmem:[#allocation3 + $0x8] sm:$0xff] %vm66_vm0, %v2477_v25  ;;  %3484 = vrot.lane.b32.xlu1 %v3482_v12, %s4048_s20 }
0x3cb8   :  { %2480 = vst.msk [vmem:[#allocation3 + $0x70] sm:$0xff] %vm341_vm2, %v2477_v25  ;;  %3416 = vst.msk [vmem:[#allocation3 + $0x8] sm:$0xff] %vm341_vm2, %v5469_v14 }
0x3cb9   :  { %3415 = vst.msk [vmem:[#allocation3 + $0x70] sm:$0xff] %vm66_vm0, %v5469_v14 }
0x3cba   :  { %v2621_v33 = vpop.permute.xlu1 %2620 }
0x3cbb   :  { %2623 = vst.msk [vmem:[#allocation3 + $0x18] sm:$0xff] %vm66_vm0, %v2621_v33  ;;  %2908 = vrot.lane.b32.xlu1 %v5222_v42, %s4048_s20 }
0x3cbc   :  { %2624 = vst.msk [vmem:[#allocation3 + $0x60] sm:$0xff] %vm341_vm2, %v2621_v33  ;;  %3272 = vst.msk [vmem:[#allocation3 + $0x18] sm:$0xff] %vm341_vm2, %v5471_v35 }
0x3cbd   :  { %3271 = vst.msk [vmem:[#allocation3 + $0x60] sm:$0xff] %vm66_vm0, %v5471_v35 }
0x3cbe   :  { %v3341_v18 = vpop.permute.xlu1 %3340 }
0x3cbf   :  { %3343 = vst.msk [vmem:[#allocation3 + $0x68] sm:$0xff] %vm66_vm0, %v3341_v18  ;;  %3196 = vrot.lane.b32.xlu1 %v5351_v32, %s4048_s20 }
0x3cc0   :  { %3344 = vst.msk [vmem:[#allocation3 + $0x10] sm:$0xff] %vm341_vm2, %v3341_v18  ;;  %v3503_v3 = vld [vmem:[#allocation3 + $0x70] sm:$0xff] }
0x3cc1   :  { %v3519_v5 = vmax.f32 %v3503_v3, 0.0 }
0x3cc2   :  { %v2765_v62 = vpop.permute.xlu1 %2764 }
0x3cc3   :  { %2767 = vst.msk [vmem:[#allocation3 + $0x28] sm:$0xff] %vm66_vm0, %v2765_v62  ;;  %3052 = vrot.lane.b32.xlu1 %v5291_v30, %s4048_s20  ;;  %v3490_v30 = vld [vmem:[#allocation3 + $0x8] sm:$0xff]  ;;  %v3492_v29 = vld [vmem:[#allocation3 + $0x18] sm:$0xff] }
0x3cc4   :  { %2768 = vst.msk [vmem:[#allocation3 + $0x50] sm:$0xff] %vm341_vm2, %v2765_v62  ;;  %3128 = vst.msk [vmem:[#allocation3 + $0x28] sm:$0xff] %vm341_vm2, %v5477_v36  ;;  %v3506_v27 = vmax.f32 %v3490_v30, 0.0  ;;  %v3508_v58 = vmax.f32 %v3492_v29, 0.0  ;;  %v3501_v51 = vld [vmem:[#allocation3 + $0x60] sm:$0xff] }
0x3cc5   :  { %3127 = vst.msk [vmem:[#allocation3 + $0x50] sm:$0xff] %vm66_vm0, %v5477_v36  ;;  %v3517_v2 = vmax.f32 %v3501_v51, 0.0 }
0x3cc6   :  { %v3502_v60 = vld [vmem:[#allocation3 + $0x68] sm:$0xff] }
0x3cc7   :  { %v3491_v28 = vld [vmem:[#allocation3 + $0x10] sm:$0xff]  ;;  %v3518_v23 = vmax.f32 %v3502_v60, 0.0 }
0x3cc8   :  { %v3507_v34 = vmax.f32 %v3491_v28, 0.0 }
0x3cc9   :  { %v3527_v52 = vpack.c.bf16 %v3518_v23, %v3517_v2 }
0x3cca   :  { %v3522_v9 = vpack.c.bf16 %v3508_v58, %v3507_v34 }
0x3ccb   :  { %v3494_v47 = vld [vmem:[#allocation3 + $0x28] sm:$0xff] }
0x3ccc   :  { %v3510_v41 = vmax.f32 %v3494_v47, 0.0  ;;  %v3499_v4 = vld [vmem:[#allocation3 + $0x50] sm:$0xff] }
0x3ccd   :  { %v3515_v46 = vmax.f32 %v3499_v4, 0.0 }
0x3d29   :  { %v3485_v42 = vpop.permute.xlu1 %3484 }
0x3d2a   :  { %3487 = vst.msk [vmem:[#allocation3 + $0x78] sm:$0xff] %vm66_vm0, %v3485_v42 }
0x3d2b   :  { %3488 = vst.msk [vmem:[#allocation3] sm:$0xff] %vm341_vm2, %v3485_v42 }
0x3d2d   :  { %v2909_v32 = vpop.permute.xlu1 %2908 }
0x3d2e   :  { %2911 = vst.msk [vmem:[#allocation3 + $0x38] sm:$0xff] %vm66_vm0, %v2909_v32 }
0x3d2f   :  { %2912 = vst.msk [vmem:[#allocation3 + $0x40] sm:$0xff] %vm341_vm2, %v2909_v32  ;;  %2984 = vst.msk [vmem:[#allocation3 + $0x38] sm:$0xff] %vm341_vm2, %v5479_v7 }
0x3d30   :  { %2983 = vst.msk [vmem:[#allocation3 + $0x40] sm:$0xff] %vm66_vm0, %v5479_v7 }
0x3d31   :  { %v3197_v0 = vpop.permute.xlu1 %3196  ;;  %v3504_v37 = vld [vmem:[#allocation3 + $0x78] sm:$0xff] }
0x3d32   :  { %v3489_v43 = vld [vmem:[#allocation3] sm:$0xff]  ;;  %3199 = vst.msk [vmem:[#allocation3 + $0x58] sm:$0xff] %vm66_vm0, %v3197_v0  ;;  %v3520_v17 = vmax.f32 %v3504_v37, 0.0 }
0x3d33   :  { %3200 = vst.msk [vmem:[#allocation3 + $0x20] sm:$0xff] %vm341_vm2, %v3197_v0  ;;  %v3505_v13 = vmax.f32 %v3489_v43, 0.0 }
0x3d34   :  { %v3528_v6 = vpack.c.bf16 %v3520_v17, %v3519_v5 }
0x3d35   :  { %v3521_v59 = vpack.c.bf16 %v3506_v27, %v3505_v13  ;;  %v3053_v54 = vpop.permute.xlu1 %3052 }
0x3d36   :  { %3055 = vst.msk [vmem:[#allocation3 + $0x48] sm:$0xff] %vm66_vm0, %v3053_v54  ;;  %v3496_v31 = vld [vmem:[#allocation3 + $0x38] sm:$0xff] }
0x3d37   :  { %3056 = vst.msk [vmem:[#allocation3 + $0x30] sm:$0xff] %vm341_vm2, %v3053_v54  ;;  %3859 = vmatprep.mubr.msk.bf16.mxu1 %vm205_vm1, %v3521_v59  ;;  %v3497_v14 = vld [vmem:[#allocation3 + $0x40] sm:$0xff]  ;;  %v3512_v7 = vmax.f32 %v3496_v31, 0.0 }
0x3d38   :  { %3860 = vmatmul.mubr.msk.bf16.vlgmr.msra.gmra.mxu1 %vm205_vm1, %v3522_v9  ;;  %v3513_v11 = vmax.f32 %v3497_v14, 0.0 }
0x3d39   :  { %v3500_v24 = vld [vmem:[#allocation3 + $0x58] sm:$0xff] }
0x3d3a   :  { %v3493_v15 = vld [vmem:[#allocation3 + $0x20] sm:$0xff]  ;;  %v3516_v50 = vmax.f32 %v3500_v24, 0.0 }
0x3d3b   :  { %v3509_v38 = vmax.f32 %v3493_v15, 0.0 }
0x3d3c   :  { %v3526_v56 = vpack.c.bf16 %v3516_v50, %v3515_v46 }
0x3d3d   :  { %v3523_v35 = vpack.c.bf16 %v3510_v41, %v3509_v38  ;;  %v3498_v20 = vld [vmem:[#allocation3 + $0x48] sm:$0xff] }
0x3d3e   :  { %v3495_v49 = vld [vmem:[#allocation3 + $0x30] sm:$0xff]  ;;  %v3514_v55 = vmax.f32 %v3498_v20, 0.0 }
0x3d3f   :  { %3863 = vmatprep.mubr.msk.bf16.mxu1 %vm205_vm1, %v3523_v35  ;;  %v3511_v36 = vmax.f32 %v3495_v49, 0.0 }
0x3d40   :  { %v3525_v10 = vpack.c.bf16 %v3514_v55, %v3513_v11 }
0x3d41   :  { %v3524_v8 = vpack.c.bf16 %v3512_v7, %v3511_v36 }
0x3d43   :  { %3864 = vmatmul.mubr.msk.bf16.gmra.mxu1 %vm205_vm1, %v3524_v8 }
0x3d44   :  { %3867 = vmatprep.mubr.msk.bf16.mxu1 %vm205_vm1, %v3525_v10 }
0x3d4b   :  { %3868 = vmatmul.mubr.msk.bf16.gmra.mxu1 %vm205_vm1, %v3526_v56 }
0x3d4c   :  { %3871 = vmatprep.mubr.msk.bf16.mxu1 %vm205_vm1, %v3527_v52 }
0x3d53   :  { %3872 = vmatmul.mubr.msk.bf16.gmra.mxu1 %vm205_vm1, %v3528_v6 }
0x3df8   :  { %v3861_v57 = vpop.f32.mrf.mxu1 }
0x3df9   :  { %v3613_v53 = vadd.f32 %v3861_v57, %v5572_v26 }
0x3dfa   :  { %v3604_v40 = vpop.f32.mrf.mxu1 }
0x3dfb   :  { %v3669_v19 = vmul.f32 0.5, %v3613_v53  ;;  %v3605_v61 = vadd.f32 %v5572_v26, %v3604_v40 }
0x3dfc   :  { %v3862_v44 = vpop.f32.mrf.mxu1 }
0x3dfd   :  { %4014 = vtanh.f32 %v3669_v19  ;;  %v3667_v45 = vmul.f32 0.5, %v3605_v61  ;;  %v3616_v21 = vadd.f32 %v3862_v44, %v5572_v26 }
0x3dfe   :  { %v3607_v22 = vpop.f32.mrf.mxu1 }
0x3dff   :  { %4016 = vtanh.f32 %v3667_v45  ;;  %v3670_v48 = vmul.f32 0.5, %v3616_v21  ;;  %v3608_v1 = vadd.f32 %v5572_v26, %v3607_v22 }
0x3e01   :  { %4018 = vtanh.f32 %v3670_v48  ;;  %v3668_v63 = vmul.f32 0.5, %v3608_v1 }
0x3e03   :  { %4020 = vtanh.f32 %v3668_v63  ;;  %v3865_v16 = vpop.f32.mrf.mxu1 }
0x3e04   :  { %v3629_v39 = vadd.f32 %v3865_v16, %v5572_v26 }
0x3e05   :  { %v3620_v12 = vpop.f32.mrf.mxu1 }
0x3e06   :  { %v3673_v25 = vmul.f32 0.5, %v3629_v39  ;;  %v3621_v33 = vadd.f32 %v5572_v26, %v3620_v12 }
0x3e07   :  { %v3866_v18 = vpop.f32.mrf.mxu1 }
0x3e08   :  { %4022 = vtanh.f32 %v3673_v25  ;;  %v3671_v62 = vmul.f32 0.5, %v3621_v33  ;;  %v3632_v42 = vadd.f32 %v3866_v18, %v5572_v26 }
0x3e09   :  { %v3623_v32 = vpop.f32.mrf.mxu1 }
0x3e0a   :  { %v4015_v28 = vpop.eup %4014  ;;  %4024 = vtanh.f32 %v3671_v62  ;;  %v3674_v30 = vmul.f32 0.5, %v3632_v42  ;;  %v3624_v29 = vadd.f32 %v5572_v26, %v3623_v32 }
0x3e0b   :  { %v3701_v0 = vmul.f32 0.5, %v4015_v28  ;;  %v3869_v43 = vpop.f32.mrf.mxu1 }
0x3e0c   :  { %v4017_v34 = vpop.eup %4016  ;;  %4026 = vtanh.f32 %v3674_v30  ;;  %v3672_v13 = vmul.f32 0.5, %v3624_v29  ;;  %v3645_v27 = vadd.f32 %v3869_v43, %v5572_v26 }
0x3e0d   :  { %v3717_v58 = vadd.f32 0.5, %v3701_v0  ;;  %v3699_v59 = vmul.f32 0.5, %v4017_v34  ;;  %v3636_v54 = vpop.f32.mrf.mxu1 }
0x3e0e   :  { %v4019_v9 = vpop.eup %4018  ;;  %4028 = vtanh.f32 %v3672_v13  ;;  %v3677_v47 = vmul.f32 0.5, %v3645_v27  ;;  %v3637_v15 = vadd.f32 %v5572_v26, %v3636_v54 }
0x3e0f   :  { %3733 = vst [vmem:[%s5642_s3 + $0x10] sm:$0xff] %v3717_v58  ;;  %v3715_v38 = vadd.f32 0.5, %v3699_v59  ;;  %v3702_v41 = vmul.f32 0.5, %v4019_v9  ;;  %v3870_v31 = vpop.f32.mrf.mxu1 }
0x3e10   :  { %v4021_v14 = vpop.eup %4020  ;;  %4030 = vtanh.f32 %v3677_v47  ;;  %v3675_v35 = vmul.f32 0.5, %v3637_v15  ;;  %v3648_v49 = vadd.f32 %v3870_v31, %v5572_v26 }
0x3e11   :  { %3731 = vst [vmem:[%s5642_s3] sm:$0xff] %v3715_v38  ;;  %v3718_v20 = vadd.f32 0.5, %v3702_v41  ;;  %v3700_v36 = vmul.f32 0.5, %v4021_v14  ;;  %v3639_v7 = vpop.f32.mrf.mxu1 }
0x3e12   :  { %4032 = vtanh.f32 %v3675_v35  ;;  %v3678_v11 = vmul.f32 0.5, %v3648_v49  ;;  %v3640_v55 = vadd.f32 %v5572_v26, %v3639_v7 }
0x3e13   :  { %3734 = vst [vmem:[%s5642_s3 + $0x18] sm:$0xff] %v3718_v20  ;;  %v3716_v8 = vadd.f32 0.5, %v3700_v36  ;;  %v3873_v10 = vpop.f32.mrf.mxu1 }
0x3e14   :  { %4034 = vtanh.f32 %v3678_v11  ;;  %v3676_v24 = vmul.f32 0.5, %v3640_v55  ;;  %v3661_v60 = vadd.f32 %v3873_v10, %v5572_v26 }
0x3e15   :  { %v4023_v4 = vpop.eup %4022  ;;  %3732 = vst [vmem:[%s5642_s3 + $0x8] sm:$0xff] %v3716_v8  ;;  %v3652_v50 = vpop.f32.mrf.mxu1 }
0x3e16   :  { %v3705_v51 = vmul.f32 0.5, %v4023_v4  ;;  %4036 = vtanh.f32 %v3676_v24  ;;  %v3681_v23 = vmul.f32 0.5, %v3661_v60  ;;  %v3653_v46 = vadd.f32 %v5572_v26, %v3652_v50 }
0x3e17   :  { %v4025_v2 = vpop.eup %4024  ;;  %v3874_v56 = vpop.f32.mrf.mxu1 }
0x3e18   :  { %v3721_v52 = vadd.f32 0.5, %v3705_v51  ;;  %v3703_v37 = vmul.f32 0.5, %v4025_v2  ;;  %4038 = vtanh.f32 %v3681_v23  ;;  %v3679_v3 = vmul.f32 0.5, %v3653_v46 }
0x3e19   :  { %v4027_v17 = vpop.eup %4026  ;;  %v3664_v5 = vadd.f32 %v3874_v56, %v5572_v26  ;;  %v3655_v6 = vpop.f32.mrf.mxu1 }
0x3e1a   :  { %3737 = vst [vmem:[%s5642_s3 + $0x30] sm:$0xff] %v3721_v52  ;;  %v3719_v57 = vadd.f32 0.5, %v3703_v37  ;;  %v3706_v53 = vmul.f32 0.5, %v4027_v17  ;;  %4040 = vtanh.f32 %v3679_v3  ;;  %v3656_v40 = vadd.f32 %v5572_v26, %v3655_v6 }
0x3e1b   :  { %v4029_v19 = vpop.eup %4028  ;;  %v3682_v61 = vmul.f32 0.5, %v3664_v5 }
0x3e1c   :  { %3735 = vst [vmem:[%s5642_s3 + $0x20] sm:$0xff] %v3719_v57  ;;  %v3722_v44 = vadd.f32 0.5, %v3706_v53  ;;  %v3704_v45 = vmul.f32 0.5, %v4029_v19  ;;  %v3680_v21 = vmul.f32 0.5, %v3656_v40 }
0x3e1d   :  { %v4031_v22 = vpop.eup %4030  ;;  %4042 = vtanh.f32 %v3682_v61 }
0x3e1e   :  { %3738 = vst [vmem:[%s5642_s3 + $0x38] sm:$0xff] %v3722_v44  ;;  %v3720_v48 = vadd.f32 0.5, %v3704_v45  ;;  %v3709_v1 = vmul.f32 0.5, %v4031_v22  ;;  %4044 = vtanh.f32 %v3680_v21 }
0x3e1f   :  { %v4033_v63 = vpop.eup %4032 }
0x3e20   :  { %3736 = vst [vmem:[%s5642_s3 + $0x28] sm:$0xff] %v3720_v48  ;;  %v3725_v26 = vadd.f32 0.5, %v3709_v1  ;;  %v3707_v16 = vmul.f32 0.5, %v4033_v63 }
0x3e21   :  { %v4035_v39 = vpop.eup %4034 }
0x3e22   :  { %3741 = vst [vmem:[%s5642_s3 + $0x50] sm:$0xff] %v3725_v26  ;;  %v3723_v12 = vadd.f32 0.5, %v3707_v16  ;;  %v3710_v25 = vmul.f32 0.5, %v4035_v39 }
0x3e23   :  { %v4037_v33 = vpop.eup %4036 }
0x3e24   :  { %3739 = vst [vmem:[%s5642_s3 + $0x40] sm:$0xff] %v3723_v12  ;;  %v3726_v18 = vadd.f32 0.5, %v3710_v25  ;;  %v3708_v62 = vmul.f32 0.5, %v4037_v33 }
0x3e25   :  { %v4039_v42 = vpop.eup %4038 }
0x3e26   :  { %3742 = vst [vmem:[%s5642_s3 + $0x58] sm:$0xff] %v3726_v18  ;;  %v3724_v32 = vadd.f32 0.5, %v3708_v62  ;;  %v3713_v28 = vmul.f32 0.5, %v4039_v42 }
0x3e27   :  { %v4041_v30 = vpop.eup %4040 }
0x3e28   :  { %3740 = vst [vmem:[%s5642_s3 + $0x48] sm:$0xff] %v3724_v32  ;;  %v3729_v29 = vadd.f32 0.5, %v3713_v28  ;;  %v3711_v0 = vmul.f32 0.5, %v4041_v30 }
0x3e2a   :  { %v4043_v43 = vpop.eup %4042  ;;  %3745 = vst [vmem:[%s5642_s3 + $0x70] sm:$0xff] %v3729_v29  ;;  %v3727_v34 = vadd.f32 0.5, %v3711_v0 }
0x3e2b   :  { %v4045_v13 = vpop.eup %4044  ;;  %v3714_v27 = vmul.f32 0.5, %v4043_v43 }
0x3e2c   :  { %3743 = vst [vmem:[%s5642_s3 + $0x60] sm:$0xff] %v3727_v34  ;;  %v3712_v58 = vmul.f32 0.5, %v4045_v13 }
0x3e2d   :  { %v3730_v59 = vadd.f32 0.5, %v3714_v27 }
0x3e2e   :  { %v3728_v54 = vadd.f32 0.5, %v3712_v58 }
0x3e2f   :  { %3746 = vst [vmem:[%s5642_s3 + $0x78] sm:$0xff] %v3730_v59 }
0x3e30   :  { %3744 = vst [vmem:[%s5642_s3 + $0x68] sm:$0xff] %v3728_v54 }

</bundles_post_ra>
